<compile_context>
chip_gen: v7x
topology: tpu7x:2x2x1
jax: 0.10.0
libtpu: 0.0.40
codegen_flags: <defaults>
</compile_context>

<pallas_src>
import math
from functools import partial

import jax
import jax.numpy as jnp
from jax.experimental import pallas as pl
from jax.experimental.pallas import tpu as pltpu


def _cross_attn_block_kernel(q_ref, x_ref,
                             ln1_g_ref, ln1_b_ref,
                             wq_t_ref, wkv_t_ref, wproj_t_ref, bproj_ref,
                             ln2_g_ref, ln2_b_ref,
                             w1_t_ref, b1_ref, w2_t_ref, b2_ref,
                             out_ref,
                             kv_ref, attn_ref,
                             *, num_heads, head_dim):
    f32 = jnp.float32
    eps = 1e-5                       # PyTorch nn.LayerNorm default
    C = num_heads * head_dim
    dt = q_ref.dtype                 # MXU operand dtype = input dtype (f32 or bf16)
    approx_recip = dt != jnp.float32  # EUP approx reciprocal is plenty for bf16 precision

    def layernorm(z, g, b):
        mu = jnp.mean(z, axis=-1, keepdims=True)
        var = jnp.mean((z - mu) ** 2, axis=-1, keepdims=True)
        return (z - mu) * jax.lax.rsqrt(var + eps) * g + b

    # norm1(x) + KV projection: computed once per batch element, cached across query tiles.
    @pl.when(pl.program_id(1) == 0)
    def _():
        xn = layernorm(x_ref[...].astype(f32), ln1_g_ref[...], ln1_b_ref[...])
        kv_ref[...] = jnp.dot(xn.astype(dt), wkv_t_ref[...],
                              preferred_element_type=f32).astype(kv_ref.dtype)

    q_in = q_ref[...]                     # (tq, C) in compute dtype
    q_f32 = q_in.astype(f32)

    # Q projection; 1/sqrt(head_dim) is already folded into wq_t by the wrapper.
    qp = jnp.dot(q_in, wq_t_ref[...], preferred_element_type=f32)   # (tq, C) f32

    kv = kv_ref[...]                      # (N, 2C): [K | V] halves
    for h in range(num_heads):
        lo = h * head_dim
        hi = lo + head_dim
        qh = qp[:, lo:hi].astype(dt)      # (tq, hd)
        kh = kv[:, lo:hi]                 # (N, hd)
        vh = kv[:, C + lo:C + hi]         # (N, hd)
        # scores = qh @ kh^T without materializing a transpose (contract last dims).
        s = jax.lax.dot_general(qh, kh, (((1,), (1,)), ((), ())),
                                preferred_element_type=f32)          # (tq, N)
        p = jnp.exp(s - jnp.max(s, axis=-1, keepdims=True))
        l = jnp.sum(p, axis=-1, keepdims=True)
        o = jnp.dot(p.astype(dt), vh, preferred_element_type=f32)    # (tq, hd)
        # Normalize the (tq, hd) output instead of the (tq, N) probabilities.
        attn_ref[:, lo:hi] = o * pl.reciprocal(l, approx=approx_recip)

    # Output projection (bias=True) + first residual.
    y = jnp.dot(attn_ref[...].astype(dt), wproj_t_ref[...],
                preferred_element_type=f32) + bproj_ref[...]
    q1 = q_f32 + y

    # norm2 + MLP (Linear -> exact erf GELU -> Linear) + second residual.
    qn = layernorm(q1, ln2_g_ref[...], ln2_b_ref[...])
    h1 = jnp.dot(qn.astype(dt), w1_t_ref[...], preferred_element_type=f32) + b1_ref[...]
    h1 = 0.5 * h1 * (1.0 + jax.lax.erf(h1 * jnp.float32(1.0 / math.sqrt(2.0))))
    m = jnp.dot(h1.astype(dt), w2_t_ref[...], preferred_element_type=f32) + b2_ref[...]

    out_ref[...] = (q1 + m).astype(out_ref.dtype)


def _pick_q_tile(n):
    for t in (256, 128):
        if n % t == 0:
            return t
    return n


def cross_attention_block(q, x, params, num_heads):
    B, n, C = q.shape
    _, N, _ = x.shape
    head_dim = C // num_heads
    hidden = params["w1"].shape[0]
    cdt = q.dtype                      # compute (MXU operand) dtype follows the input
    f32 = jnp.float32
    scale = head_dim ** (-0.5)

    # Glue: pre-transpose Linear weights (PyTorch stores (out, in)), fold the attention scale
    # into Wq, cast matmul weights to the compute dtype, keep LN params / biases in f32.
    args = [
        q, x,
        params["ln1_g"].reshape(1, C).astype(f32), params["ln1_b"].reshape(1, C).astype(f32),
        (params["wq"].T * scale).astype(cdt),
        params["wkv"].T.astype(cdt),
        params["wproj"].T.astype(cdt), params["bproj"].reshape(1, C).astype(f32),
        params["ln2_g"].reshape(1, C).astype(f32), params["ln2_b"].reshape(1, C).astype(f32),
        params["w1"].T.astype(cdt), params["b1"].reshape(1, hidden).astype(f32),
        params["w2"].T.astype(cdt), params["b2"].reshape(1, C).astype(f32),
    ]

    tq = _pick_q_tile(n)
    n_tiles = n // tq
    kernel = partial(_cross_attn_block_kernel, num_heads=num_heads, head_dim=head_dim)

    def build(weight_mode):
        def wspec(a):
            if weight_mode is None:
                return pl.BlockSpec(a.shape, lambda b, i: (0, 0))
            return pl.BlockSpec(a.shape, lambda b, i: (0, 0), pipeline_mode=weight_mode)

        in_specs = [
            pl.BlockSpec((None, tq, C), lambda b, i: (b, i, 0)),   # q: one (batch, q-tile)
            pl.BlockSpec((None, N, C), lambda b, i: (b, 0, 0)),    # x: one batch, full context
        ] + [wspec(a) for a in args[2:]]                           # weights: full, constant

        return pl.pallas_call(
            kernel,
            out_shape=jax.ShapeDtypeStruct((B, n, C), q.dtype),
            grid_spec=pltpu.PrefetchScalarGridSpec(
                num_scalar_prefetch=0,
                grid=(B, n_tiles),
                in_specs=in_specs,
                out_specs=pl.BlockSpec((None, tq, C), lambda b, i: (b, i, 0)),
                scratch_shapes=[
                    pltpu.VMEM((N, 2 * C), cdt),        # cached [K|V] per batch element
                    pltpu.VMEM((tq, C), jnp.float32),   # per-tile attention output assembly
                ],
            ),
            compiler_params=pltpu.CompilerParams(
                dimension_semantics=("parallel", "arbitrary"),
                vmem_limit_bytes=48 * 1024 * 1024,      # explicit budget; headroom on v7x 64MiB
            ),
        )

    try:
        # Weights have a constant index_map -> single-buffer them to halve their VMEM footprint.
        return build(pl.Buffered(1))(*args)
    except Exception:
        # Fallback for JAX versions without pipeline_mode / Buffered(1) support.
        return build(None)(*args)


def reference(q, x, params, num_heads):
    """Pure-JAX reference mirroring the PyTorch forward."""
    B, n, C = q.shape
    _, N, _ = x.shape
    hd = C // num_heads
    eps = 1e-5

    def ln(z, g, b):
        mu = z.mean(-1, keepdims=True)
        var = ((z - mu) ** 2).mean(-1, keepdims=True)
        return (z - mu) / jnp.sqrt(var + eps) * g + b

    xn = ln(x, params["ln1_g"], params["ln1_b"])
    qp = q @ params["wq"].T                                   # (B, n, C)
    kvp = xn @ params["wkv"].T                                # (B, N, 2C)
    qh = qp.reshape(B, n, num_heads, hd).transpose(0, 2, 1, 3)
    kv = kvp.reshape(B, N, 2, num_heads, hd).transpose(2, 0, 3, 1, 4)
    k, v = kv[0], kv[1]
    s = jnp.einsum("bhnd,bhmd->bhnm", qh, k) / math.sqrt(hd)
    p = jax.nn.softmax(s, axis=-1)
    o = jnp.einsum("bhnm,bhmd->bhnd", p, v)
    o = o.transpose(0, 2, 1, 3).reshape(B, n, C)
    y = o @ params["wproj"].T + params["bproj"]
    q1 = q + y
    qn = ln(q1, params["ln2_g"], params["ln2_b"])
    h1 = qn @ params["w1"].T + params["b1"]
    h1 = jax.nn.gelu(h1, approximate=False)                   # PyTorch nn.GELU default (erf)
    m = h1 @ params["w2"].T + params["b2"]
    return q1 + m


if __name__ == "__main__":
    # Lane-dense small config: C multiple of 128, head_dim = 64.
    B, n, N, C = 2, 128, 128, 128
    num_heads = 2
    mlp_ratio = 4.0
    hidden = int(C * mlp_ratio)

    key = jax.random.PRNGKey(0)
    ks = jax.random.split(key, 16)

    params = {
        "ln1_g": 1.0 + 0.1 * jax.random.normal(ks[0], (C,), jnp.float32),
        "ln1_b": 0.02 * jax.random.normal(ks[1], (C,), jnp.float32),
        "wq": 0.05 * jax.random.normal(ks[2], (C, C), jnp.float32),       # qkv_bias=False
        "wkv": 0.05 * jax.random.normal(ks[3], (2 * C, C), jnp.float32),  # qkv_bias=False
        "wproj": 0.05 * jax.random.normal(ks[4], (C, C), jnp.float32),
        "bproj": 0.02 * jax.random.normal(ks[5], (C,), jnp.float32),
        "ln2_g": 1.0 + 0.1 * jax.random.normal(ks[6], (C,), jnp.float32),
        "ln2_b": 0.02 * jax.random.normal(ks[7], (C,), jnp.float32),
        "w1": 0.05 * jax.random.normal(ks[8], (hidden, C), jnp.float32),
        "b1": 0.02 * jax.random.normal(ks[9], (hidden,), jnp.float32),
        "w2": 0.05 * jax.random.normal(ks[10], (C, hidden), jnp.float32),
        "b2": 0.02 * jax.random.normal(ks[11], (C,), jnp.float32),
    }

    q = jax.random.normal(ks[12], (B, n, C), jnp.float32)
    x = jax.random.normal(ks[13], (B, N, C), jnp.float32)

    ref = jax.block_until_ready(reference(q, x, params, num_heads))

    # f32 path: matmuls in f32 (input dtype), must match the reference tightly.
    out = jax.block_until_ready(cross_attention_block(q, x, params, num_heads))
    assert out.shape == (B, n, C)
    assert jnp.allclose(out, ref, atol=1e-4, rtol=1e-4), float(jnp.max(jnp.abs(out - ref)))

    # bf16 path: MXU operands in bf16 (full-rate on v6e/v7x), f32 accumulate & f32
    # LayerNorm/softmax/GELU — looser tolerance vs. the f32 reference.
    out_bf16 = jax.block_until_ready(
        cross_attention_block(q.astype(jnp.bfloat16), x.astype(jnp.bfloat16), params, num_heads))
    assert out_bf16.dtype == jnp.bfloat16
    assert jnp.allclose(out_bf16.astype(jnp.float32), ref, atol=1e-1, rtol=1e-1), \
        float(jnp.max(jnp.abs(out_bf16.astype(jnp.float32) - ref)))

    print("KERNEL_OK")
</pallas_src>

<mosaic_0001>
module attributes {stable_mosaic.version = 11 : i64} {
  func.func @_cross_attn_block_kernel(%arg0: i32, %arg1: i32, %arg2: memref<1x128x128xf32, #tpu.memory_space<vmem>>, %arg3: memref<1x128x128xf32, #tpu.memory_space<vmem>>, %arg4: memref<1x128xf32, #tpu.memory_space<vmem>>, %arg5: memref<1x128xf32, #tpu.memory_space<vmem>>, %arg6: memref<128x128xf32, #tpu.memory_space<vmem>>, %arg7: memref<128x256xf32, #tpu.memory_space<vmem>>, %arg8: memref<128x128xf32, #tpu.memory_space<vmem>>, %arg9: memref<1x128xf32, #tpu.memory_space<vmem>>, %arg10: memref<1x128xf32, #tpu.memory_space<vmem>>, %arg11: memref<1x128xf32, #tpu.memory_space<vmem>>, %arg12: memref<128x512xf32, #tpu.memory_space<vmem>>, %arg13: memref<1x512xf32, #tpu.memory_space<vmem>>, %arg14: memref<512x128xf32, #tpu.memory_space<vmem>>, %arg15: memref<1x128xf32, #tpu.memory_space<vmem>>, %arg16: memref<1x128x128xf32, #tpu.memory_space<vmem>>, %arg17: memref<128x256xf32, #tpu.memory_space<vmem>>, %arg18: memref<128x128xf32, #tpu.memory_space<vmem>>) attributes {dimension_semantics = [#tpu.dimension_semantics<parallel>, #tpu.dimension_semantics<arbitrary>], iteration_bounds = array<i64: 2, 1>, scalar_prefetch = 0 : i64, scratch_operands = 2 : i64, tpu.core_type = #tpu.core_type<tc>, window_params = [{transform_indices = @transform_0, window_bounds = array<i64: 1, 128, 128>}, {transform_indices = @transform_1, window_bounds = array<i64: 1, 128, 128>}, {pipeline_mode = #tpu.pipeline_mode<synchronous>, transform_indices = @transform_2, window_bounds = array<i64: 1, 128>}, {pipeline_mode = #tpu.pipeline_mode<synchronous>, transform_indices = @transform_3, window_bounds = array<i64: 1, 128>}, {pipeline_mode = #tpu.pipeline_mode<synchronous>, transform_indices = @transform_4, window_bounds = array<i64: 128, 128>}, {pipeline_mode = #tpu.pipeline_mode<synchronous>, transform_indices = @transform_5, window_bounds = array<i64: 128, 256>}, {pipeline_mode = #tpu.pipeline_mode<synchronous>, transform_indices = @transform_6, window_bounds = array<i64: 128, 128>}, {pipeline_mode = #tpu.pipeline_mode<synchronous>, transform_indices = @transform_7, window_bounds = array<i64: 1, 128>}, {pipeline_mode = #tpu.pipeline_mode<synchronous>, transform_indices = @transform_8, window_bounds = array<i64: 1, 128>}, {pipeline_mode = #tpu.pipeline_mode<synchronous>, transform_indices = @transform_9, window_bounds = array<i64: 1, 128>}, {pipeline_mode = #tpu.pipeline_mode<synchronous>, transform_indices = @transform_10, window_bounds = array<i64: 128, 512>}, {pipeline_mode = #tpu.pipeline_mode<synchronous>, transform_indices = @transform_11, window_bounds = array<i64: 1, 512>}, {pipeline_mode = #tpu.pipeline_mode<synchronous>, transform_indices = @transform_12, window_bounds = array<i64: 512, 128>}, {pipeline_mode = #tpu.pipeline_mode<synchronous>, transform_indices = @transform_13, window_bounds = array<i64: 1, 128>}, {transform_indices = @transform_14, window_bounds = array<i64: 1, 128, 128>}]} {
    %c0_i32 = arith.constant 0 : i32
    %0 = arith.cmpi eq, %arg1, %c0_i32 : i32
    %1 = arith.extui %0 : i1 to i32
    %c0_i32_0 = arith.constant 0 : i32
    %2 = arith.cmpi ne, %1, %c0_i32_0 : i32
    scf.if %2 {
      %c0_50 = arith.constant 0 : index
      %c0_51 = arith.constant 0 : index
      %c0_52 = arith.constant 0 : index
      %93 = vector.load %arg3[%c0_50, %c0_51, %c0_52] : memref<1x128x128xf32, #tpu.memory_space<vmem>>, vector<1x128x128xf32>
      %94 = vector.shape_cast %93 : vector<1x128x128xf32> to vector<128x128xf32>
      %c0_53 = arith.constant 0 : index
      %c0_54 = arith.constant 0 : index
      %95 = vector.load %arg4[%c0_53, %c0_54] : memref<1x128xf32, #tpu.memory_space<vmem>>, vector<1x128xf32>
      %c0_55 = arith.constant 0 : index
      %c0_56 = arith.constant 0 : index
      %96 = vector.load %arg5[%c0_55, %c0_56] : memref<1x128xf32, #tpu.memory_space<vmem>>, vector<1x128xf32>
      %cst_57 = arith.constant dense<0.000000e+00> : vector<128xf32>
      %97 = vector.multi_reduction <add>, %94, %cst_57 [1] : vector<128x128xf32> to vector<128xf32>
      %98 = vector.shape_cast %97 : vector<128xf32> to vector<128x1xf32>
      %cst_58 = arith.constant 1.280000e+02 : f32
      %99 = vector.broadcast %cst_58 : f32 to vector<128x1xf32>
      %100 = arith.divf %98, %99 : vector<128x1xf32>
      %101 = vector.broadcast %100 : vector<128x1xf32> to vector<128x128xf32>
      %102 = arith.subf %94, %101 : vector<128x128xf32>
      %103 = arith.mulf %102, %102 : vector<128x128xf32>
      %cst_59 = arith.constant dense<0.000000e+00> : vector<128xf32>
      %104 = vector.multi_reduction <add>, %103, %cst_59 [1] : vector<128x128xf32> to vector<128xf32>
      %105 = vector.shape_cast %104 : vector<128xf32> to vector<128x1xf32>
      %cst_60 = arith.constant 1.280000e+02 : f32
      %106 = vector.broadcast %cst_60 : f32 to vector<128x1xf32>
      %107 = arith.divf %105, %106 : vector<128x1xf32>
      %108 = vector.broadcast %100 : vector<128x1xf32> to vector<128x128xf32>
      %109 = arith.subf %94, %108 : vector<128x128xf32>
      %cst_61 = arith.constant 9.99999974E-6 : f32
      %110 = vector.broadcast %cst_61 : f32 to vector<128x1xf32>
      %111 = arith.addf %107, %110 : vector<128x1xf32>
      %112 = math.rsqrt %111 : vector<128x1xf32>
      %113 = vector.broadcast %112 : vector<128x1xf32> to vector<128x128xf32>
      %114 = arith.mulf %109, %113 : vector<128x128xf32>
      %115 = vector.broadcast %95 : vector<1x128xf32> to vector<128x128xf32>
      %116 = arith.mulf %114, %115 : vector<128x128xf32>
      %117 = vector.broadcast %96 : vector<1x128xf32> to vector<128x128xf32>
      %118 = arith.addf %116, %117 : vector<128x128xf32>
      %c0_62 = arith.constant 0 : index
      %c0_63 = arith.constant 0 : index
      %119 = vector.load %arg7[%c0_62, %c0_63] : memref<128x256xf32, #tpu.memory_space<vmem>>, vector<128x256xf32>
      %cst_64 = arith.constant dense<0.000000e+00> : vector<128x256xf32>
      %120 = tpu.matmul %118, %119, %cst_64 {dimension_numbers = #tpu.dot_dimension_numbers<[1], [0], [0], [1], [0, 0, 1, 1], [], []>} : vector<128x128xf32>, vector<128x256xf32>, vector<128x256xf32> -> vector<128x256xf32>
      %c0_65 = arith.constant 0 : index
      %c0_66 = arith.constant 0 : index
      %121 = vector.load %arg17[%c0_65, %c0_66] : memref<128x256xf32, #tpu.memory_space<vmem>>, vector<128x256xf32>
      tpu.vector_store %arg17[%c0_65, %c0_66], %120 {strides = array<i32>} : memref<128x256xf32, #tpu.memory_space<vmem>>, vector<128x256xf32>,
    } else {
    }
    %c0 = arith.constant 0 : index
    %c0_1 = arith.constant 0 : index
    %c0_2 = arith.constant 0 : index
    %3 = vector.load %arg2[%c0, %c0_1, %c0_2] : memref<1x128x128xf32, #tpu.memory_space<vmem>>, vector<1x128x128xf32>
    %4 = vector.shape_cast %3 : vector<1x128x128xf32> to vector<128x128xf32>
    %c0_3 = arith.constant 0 : index
    %c0_4 = arith.constant 0 : index
    %5 = vector.load %arg6[%c0_3, %c0_4] : memref<128x128xf32, #tpu.memory_space<vmem>>, vector<128x128xf32>
    %cst = arith.constant dense<0.000000e+00> : vector<128x128xf32>
    %6 = tpu.matmul %4, %5, %cst {dimension_numbers = #tpu.dot_dimension_numbers<[1], [0], [0], [1], [0, 0, 1, 1], [], []>} : vector<128x128xf32>, vector<128x128xf32>, vector<128x128xf32> -> vector<128x128xf32>
    %c0_5 = arith.constant 0 : index
    %c0_6 = arith.constant 0 : index
    %7 = vector.load %arg17[%c0_5, %c0_6] : memref<128x256xf32, #tpu.memory_space<vmem>>, vector<128x256xf32>
    %8 = vector.extract_strided_slice %6 {offsets = [0, 0], sizes = [128, 64], strides = [1, 1]} : vector<128x128xf32> to vector<128x64xf32>
    %9 = vector.extract_strided_slice %7 {offsets = [0, 0], sizes = [128, 64], strides = [1, 1]} : vector<128x256xf32> to vector<128x64xf32>
    %10 = vector.extract_strided_slice %7 {offsets = [0, 128], sizes = [128, 64], strides = [1, 1]} : vector<128x256xf32> to vector<128x64xf32>
    %cst_7 = arith.constant dense<0.000000e+00> : vector<128x128xf32>
    %11 = tpu.matmul %8, %9, %cst_7 {dimension_numbers = #tpu.dot_dimension_numbers<[1], [1], [0], [0], [0, 0, 1, 0], [], []>} : vector<128x64xf32>, vector<128x64xf32>, vector<128x128xf32> -> vector<128x128xf32>
    %cst_8 = arith.constant dense<0xFF800000> : vector<128xf32>
    %12 = vector.multi_reduction <maximumf>, %11, %cst_8 [1] : vector<128x128xf32> to vector<128xf32>
    %13 = vector.shape_cast %12 : vector<128xf32> to vector<128x1xf32>
    %14 = vector.broadcast %13 : vector<128x1xf32> to vector<128x128xf32>
    %15 = arith.subf %11, %14 : vector<128x128xf32>
    %16 = math.exp %15 : vector<128x128xf32>
    %cst_9 = arith.constant dense<0.000000e+00> : vector<128xf32>
    %17 = vector.multi_reduction <add>, %16, %cst_9 [1] : vector<128x128xf32> to vector<128xf32>
    %18 = vector.shape_cast %17 : vector<128xf32> to vector<128x1xf32>
    %cst_10 = arith.constant dense<0.000000e+00> : vector<128x64xf32>
    %19 = tpu.matmul %16, %10, %cst_10 {dimension_numbers = #tpu.dot_dimension_numbers<[1], [0], [0], [1], [0, 0, 1, 1], [], []>} : vector<128x128xf32>, vector<128x64xf32>, vector<128x64xf32> -> vector<128x64xf32>
    %20 = tpu.reciprocal %18 : vector<128x1xf32> -> vector<128x1xf32>
    %21 = vector.broadcast %20 : vector<128x1xf32> to vector<128x64xf32>
    %22 = arith.mulf %19, %21 : vector<128x64xf32>
    %c0_11 = arith.constant 0 : index
    %c0_12 = arith.constant 0 : index
    %23 = vector.load %arg18[%c0_11, %c0_12] : memref<128x128xf32, #tpu.memory_space<vmem>>, vector<128x64xf32>
    tpu.vector_store %arg18[%c0_11, %c0_12], %22 {strides = array<i32>} : memref<128x128xf32, #tpu.memory_space<vmem>>, vector<128x64xf32>,
    %24 = vector.extract_strided_slice %6 {offsets = [0, 64], sizes = [128, 64], strides = [1, 1]} : vector<128x128xf32> to vector<128x64xf32>
    %25 = vector.extract_strided_slice %7 {offsets = [0, 64], sizes = [128, 64], strides = [1, 1]} : vector<128x256xf32> to vector<128x64xf32>
    %26 = vector.extract_strided_slice %7 {offsets = [0, 192], sizes = [128, 64], strides = [1, 1]} : vector<128x256xf32> to vector<128x64xf32>
    %cst_13 = arith.constant dense<0.000000e+00> : vector<128x128xf32>
    %27 = tpu.matmul %24, %25, %cst_13 {dimension_numbers = #tpu.dot_dimension_numbers<[1], [1], [0], [0], [0, 0, 1, 0], [], []>} : vector<128x64xf32>, vector<128x64xf32>, vector<128x128xf32> -> vector<128x128xf32>
    %cst_14 = arith.constant dense<0xFF800000> : vector<128xf32>
    %28 = vector.multi_reduction <maximumf>, %27, %cst_14 [1] : vector<128x128xf32> to vector<128xf32>
    %29 = vector.shape_cast %28 : vector<128xf32> to vector<128x1xf32>
    %30 = vector.broadcast %29 : vector<128x1xf32> to vector<128x128xf32>
    %31 = arith.subf %27, %30 : vector<128x128xf32>
    %32 = math.exp %31 : vector<128x128xf32>
    %cst_15 = arith.constant dense<0.000000e+00> : vector<128xf32>
    %33 = vector.multi_reduction <add>, %32, %cst_15 [1] : vector<128x128xf32> to vector<128xf32>
    %34 = vector.shape_cast %33 : vector<128xf32> to vector<128x1xf32>
    %cst_16 = arith.constant dense<0.000000e+00> : vector<128x64xf32>
    %35 = tpu.matmul %32, %26, %cst_16 {dimension_numbers = #tpu.dot_dimension_numbers<[1], [0], [0], [1], [0, 0, 1, 1], [], []>} : vector<128x128xf32>, vector<128x64xf32>, vector<128x64xf32> -> vector<128x64xf32>
    %36 = tpu.reciprocal %34 : vector<128x1xf32> -> vector<128x1xf32>
    %37 = vector.broadcast %36 : vector<128x1xf32> to vector<128x64xf32>
    %38 = arith.mulf %35, %37 : vector<128x64xf32>
    %c0_17 = arith.constant 0 : index
    %c64 = arith.constant 64 : index
    %39 = vector.load %arg18[%c0_17, %c64] : memref<128x128xf32, #tpu.memory_space<vmem>>, vector<128x64xf32>
    tpu.vector_store %arg18[%c0_17, %c64], %38 {strides = array<i32>} : memref<128x128xf32, #tpu.memory_space<vmem>>, vector<128x64xf32>,
    %c0_18 = arith.constant 0 : index
    %c0_19 = arith.constant 0 : index
    %40 = vector.load %arg18[%c0_18, %c0_19] : memref<128x128xf32, #tpu.memory_space<vmem>>, vector<128x128xf32>
    %c0_20 = arith.constant 0 : index
    %c0_21 = arith.constant 0 : index
    %41 = vector.load %arg8[%c0_20, %c0_21] : memref<128x128xf32, #tpu.memory_space<vmem>>, vector<128x128xf32>
    %cst_22 = arith.constant dense<0.000000e+00> : vector<128x128xf32>
    %42 = tpu.matmul %40, %41, %cst_22 {dimension_numbers = #tpu.dot_dimension_numbers<[1], [0], [0], [1], [0, 0, 1, 1], [], []>} : vector<128x128xf32>, vector<128x128xf32>, vector<128x128xf32> -> vector<128x128xf32>
    %c0_23 = arith.constant 0 : index
    %c0_24 = arith.constant 0 : index
    %43 = vector.load %arg9[%c0_23, %c0_24] : memref<1x128xf32, #tpu.memory_space<vmem>>, vector<1x128xf32>
    %44 = vector.broadcast %43 : vector<1x128xf32> to vector<128x128xf32>
    %45 = arith.addf %42, %44 : vector<128x128xf32>
    %46 = arith.addf %4, %45 : vector<128x128xf32>
    %c0_25 = arith.constant 0 : index
    %c0_26 = arith.constant 0 : index
    %47 = vector.load %arg10[%c0_25, %c0_26] : memref<1x128xf32, #tpu.memory_space<vmem>>, vector<1x128xf32>
    %c0_27 = arith.constant 0 : index
    %c0_28 = arith.constant 0 : index
    %48 = vector.load %arg11[%c0_27, %c0_28] : memref<1x128xf32, #tpu.memory_space<vmem>>, vector<1x128xf32>
    %cst_29 = arith.constant dense<0.000000e+00> : vector<128xf32>
    %49 = vector.multi_reduction <add>, %46, %cst_29 [1] : vector<128x128xf32> to vector<128xf32>
    %50 = vector.shape_cast %49 : vector<128xf32> to vector<128x1xf32>
    %cst_30 = arith.constant 1.280000e+02 : f32
    %51 = vector.broadcast %cst_30 : f32 to vector<128x1xf32>
    %52 = arith.divf %50, %51 : vector<128x1xf32>
    %53 = vector.broadcast %52 : vector<128x1xf32> to vector<128x128xf32>
    %54 = arith.subf %46, %53 : vector<128x128xf32>
    %55 = arith.mulf %54, %54 : vector<128x128xf32>
    %cst_31 = arith.constant dense<0.000000e+00> : vector<128xf32>
    %56 = vector.multi_reduction <add>, %55, %cst_31 [1] : vector<128x128xf32> to vector<128xf32>
    %57 = vector.shape_cast %56 : vector<128xf32> to vector<128x1xf32>
    %cst_32 = arith.constant 1.280000e+02 : f32
    %58 = vector.broadcast %cst_32 : f32 to vector<128x1xf32>
    %59 = arith.divf %57, %58 : vector<128x1xf32>
    %60 = vector.broadcast %52 : vector<128x1xf32> to vector<128x128xf32>
    %61 = arith.subf %46, %60 : vector<128x128xf32>
    %cst_33 = arith.constant 9.99999974E-6 : f32
    %62 = vector.broadcast %cst_33 : f32 to vector<128x1xf32>
    %63 = arith.addf %59, %62 : vector<128x1xf32>
    %64 = math.rsqrt %63 : vector<128x1xf32>
    %65 = vector.broadcast %64 : vector<128x1xf32> to vector<128x128xf32>
    %66 = arith.mulf %61, %65 : vector<128x128xf32>
    %67 = vector.broadcast %47 : vector<1x128xf32> to vector<128x128xf32>
    %68 = arith.mulf %66, %67 : vector<128x128xf32>
    %69 = vector.broadcast %48 : vector<1x128xf32> to vector<128x128xf32>
    %70 = arith.addf %68, %69 : vector<128x128xf32>
    %c0_34 = arith.constant 0 : index
    %c0_35 = arith.constant 0 : index
    %71 = vector.load %arg12[%c0_34, %c0_35] : memref<128x512xf32, #tpu.memory_space<vmem>>, vector<128x512xf32>
    %cst_36 = arith.constant dense<0.000000e+00> : vector<128x512xf32>
    %72 = tpu.matmul %70, %71, %cst_36 {dimension_numbers = #tpu.dot_dimension_numbers<[1], [0], [0], [1], [0, 0, 1, 1], [], []>} : vector<128x128xf32>, vector<128x512xf32>, vector<128x512xf32> -> vector<128x512xf32>
    %c0_37 = arith.constant 0 : index
    %c0_38 = arith.constant 0 : index
    %73 = vector.load %arg13[%c0_37, %c0_38] : memref<1x512xf32, #tpu.memory_space<vmem>>, vector<1x512xf32>
    %74 = vector.broadcast %73 : vector<1x512xf32> to vector<128x512xf32>
    %75 = arith.addf %72, %74 : vector<128x512xf32>
    %cst_39 = arith.constant 5.000000e-01 : f32
    %76 = vector.broadcast %cst_39 : f32 to vector<128x512xf32>
    %77 = arith.mulf %76, %75 : vector<128x512xf32>
    %cst_40 = arith.constant 0.707106769 : f32
    %78 = vector.broadcast %cst_40 : f32 to vector<128x512xf32>
    %79 = arith.mulf %75, %78 : vector<128x512xf32>
    %80 = math.erf %79 : vector<128x512xf32>
    %cst_41 = arith.constant 1.000000e+00 : f32
    %81 = vector.broadcast %cst_41 : f32 to vector<128x512xf32>
    %82 = arith.addf %81, %80 : vector<128x512xf32>
    %83 = arith.mulf %77, %82 : vector<128x512xf32>
    %c0_42 = arith.constant 0 : index
    %c0_43 = arith.constant 0 : index
    %84 = vector.load %arg14[%c0_42, %c0_43] : memref<512x128xf32, #tpu.memory_space<vmem>>, vector<512x128xf32>
    %cst_44 = arith.constant dense<0.000000e+00> : vector<128x128xf32>
    %85 = tpu.matmul %83, %84, %cst_44 {dimension_numbers = #tpu.dot_dimension_numbers<[1], [0], [0], [1], [0, 0, 1, 1], [], []>} : vector<128x512xf32>, vector<512x128xf32>, vector<128x128xf32> -> vector<128x128xf32>
    %c0_45 = arith.constant 0 : index
    %c0_46 = arith.constant 0 : index
    %86 = vector.load %arg15[%c0_45, %c0_46] : memref<1x128xf32, #tpu.memory_space<vmem>>, vector<1x128xf32>
    %87 = vector.broadcast %86 : vector<1x128xf32> to vector<128x128xf32>
    %88 = arith.addf %85, %87 : vector<128x128xf32>
    %89 = arith.addf %46, %88 : vector<128x128xf32>
    %c0_47 = arith.constant 0 : index
    %c0_48 = arith.constant 0 : index
    %c0_49 = arith.constant 0 : index
    %90 = vector.load %arg16[%c0_47, %c0_48, %c0_49] : memref<1x128x128xf32, #tpu.memory_space<vmem>>, vector<1x128x128xf32>
    %91 = vector.shape_cast %90 : vector<1x128x128xf32> to vector<128x128xf32>
    %92 = vector.shape_cast %89 : vector<128x128xf32> to vector<1x128x128xf32>
    tpu.vector_store %arg16[%c0_47, %c0_48, %c0_49], %92 {strides = array<i32>} : memref<1x128x128xf32, #tpu.memory_space<vmem>>, vector<1x128x128xf32>,
    return
  }
  func.func @transform_0(%arg0: i32, %arg1: i32) -> (i32, i32, i32) {
    %c0_i32 = arith.constant 0 : i32
    %c0_i32_0 = arith.constant 0 : i32
    return %arg0, %arg1, %c0_i32 : i32, i32, i32
  }
  func.func @transform_1(%arg0: i32, %arg1: i32) -> (i32, i32, i32) {
    %c0_i32 = arith.constant 0 : i32
    %c0_i32_0 = arith.constant 0 : i32
    %c0_i32_1 = arith.constant 0 : i32
    return %arg0, %c0_i32, %c0_i32_0 : i32, i32, i32
  }
  func.func @transform_2(%arg0: i32, %arg1: i32) -> (i32, i32) {
    %c0_i32 = arith.constant 0 : i32
    %c0_i32_0 = arith.constant 0 : i32
    %c0_i32_1 = arith.constant 0 : i32
    return %c0_i32, %c0_i32_0 : i32, i32
  }
  func.func @transform_3(%arg0: i32, %arg1: i32) -> (i32, i32) {
    %c0_i32 = arith.constant 0 : i32
    %c0_i32_0 = arith.constant 0 : i32
    %c0_i32_1 = arith.constant 0 : i32
    return %c0_i32, %c0_i32_0 : i32, i32
  }
  func.func @transform_4(%arg0: i32, %arg1: i32) -> (i32, i32) {
    %c0_i32 = arith.constant 0 : i32
    %c0_i32_0 = arith.constant 0 : i32
    %c0_i32_1 = arith.constant 0 : i32
    return %c0_i32, %c0_i32_0 : i32, i32
  }
  func.func @transform_5(%arg0: i32, %arg1: i32) -> (i32, i32) {
    %c0_i32 = arith.constant 0 : i32
    %c0_i32_0 = arith.constant 0 : i32
    %c0_i32_1 = arith.constant 0 : i32
    return %c0_i32, %c0_i32_0 : i32, i32
  }
  func.func @transform_6(%arg0: i32, %arg1: i32) -> (i32, i32) {
    %c0_i32 = arith.constant 0 : i32
    %c0_i32_0 = arith.constant 0 : i32
    %c0_i32_1 = arith.constant 0 : i32
    return %c0_i32, %c0_i32_0 : i32, i32
  }
  func.func @transform_7(%arg0: i32, %arg1: i32) -> (i32, i32) {
    %c0_i32 = arith.constant 0 : i32
    %c0_i32_0 = arith.constant 0 : i32
    %c0_i32_1 = arith.constant 0 : i32
    return %c0_i32, %c0_i32_0 : i32, i32
  }
  func.func @transform_8(%arg0: i32, %arg1: i32) -> (i32, i32) {
    %c0_i32 = arith.constant 0 : i32
    %c0_i32_0 = arith.constant 0 : i32
    %c0_i32_1 = arith.constant 0 : i32
    return %c0_i32, %c0_i32_0 : i32, i32
  }
  func.func @transform_9(%arg0: i32, %arg1: i32) -> (i32, i32) {
    %c0_i32 = arith.constant 0 : i32
    %c0_i32_0 = arith.constant 0 : i32
    %c0_i32_1 = arith.constant 0 : i32
    return %c0_i32, %c0_i32_0 : i32, i32
  }
  func.func @transform_10(%arg0: i32, %arg1: i32) -> (i32, i32) {
    %c0_i32 = arith.constant 0 : i32
    %c0_i32_0 = arith.constant 0 : i32
    %c0_i32_1 = arith.constant 0 : i32
    return %c0_i32, %c0_i32_0 : i32, i32
  }
  func.func @transform_11(%arg0: i32, %arg1: i32) -> (i32, i32) {
    %c0_i32 = arith.constant 0 : i32
    %c0_i32_0 = arith.constant 0 : i32
    %c0_i32_1 = arith.constant 0 : i32
    return %c0_i32, %c0_i32_0 : i32, i32
  }
  func.func @transform_12(%arg0: i32, %arg1: i32) -> (i32, i32) {
    %c0_i32 = arith.constant 0 : i32
    %c0_i32_0 = arith.constant 0 : i32
    %c0_i32_1 = arith.constant 0 : i32
    return %c0_i32, %c0_i32_0 : i32, i32
  }
  func.func @transform_13(%arg0: i32, %arg1: i32) -> (i32, i32) {
    %c0_i32 = arith.constant 0 : i32
    %c0_i32_0 = arith.constant 0 : i32
    %c0_i32_1 = arith.constant 0 : i32
    return %c0_i32, %c0_i32_0 : i32, i32
  }
  func.func @transform_14(%arg0: i32, %arg1: i32) -> (i32, i32, i32) {
    %c0_i32 = arith.constant 0 : i32
    %c0_i32_0 = arith.constant 0 : i32
    return %arg0, %arg1, %c0_i32 : i32, i32, i32
  }
}

module attributes {stable_mosaic.version = 11 : i64} {
  func.func @_cross_attn_block_kernel(%arg0: i32, %arg1: i32, %arg2: memref<1x128x128xf32, #tpu.memory_space<vmem>>, %arg3: memref<1x128x128xf32, #tpu.memory_space<vmem>>, %arg4: memref<1x128xf32, #tpu.memory_space<vmem>>, %arg5: memref<1x128xf32, #tpu.memory_space<vmem>>, %arg6: memref<128x128xf32, #tpu.memory_space<vmem>>, %arg7: memref<128x256xf32, #tpu.memory_space<vmem>>, %arg8: memref<128x128xf32, #tpu.memory_space<vmem>>, %arg9: memref<1x128xf32, #tpu.memory_space<vmem>>, %arg10: memref<1x128xf32, #tpu.memory_space<vmem>>, %arg11: memref<1x128xf32, #tpu.memory_space<vmem>>, %arg12: memref<128x512xf32, #tpu.memory_space<vmem>>, %arg13: memref<1x512xf32, #tpu.memory_space<vmem>>, %arg14: memref<512x128xf32, #tpu.memory_space<vmem>>, %arg15: memref<1x128xf32, #tpu.memory_space<vmem>>, %arg16: memref<1x128x128xf32, #tpu.memory_space<vmem>>, %arg17: memref<128x256xf32, #tpu.memory_space<vmem>>, %arg18: memref<128x128xf32, #tpu.memory_space<vmem>>) attributes {dimension_semantics = [#tpu.dimension_semantics<parallel>, #tpu.dimension_semantics<arbitrary>], iteration_bounds = array<i64: 2, 1>, scalar_prefetch = 0 : i64, scratch_operands = 2 : i64, tpu.core_type = #tpu.core_type<tc>, window_params = [{transform_indices = @transform_0, window_bounds = array<i64: 1, 128, 128>}, {transform_indices = @transform_1, window_bounds = array<i64: 1, 128, 128>}, {pipeline_mode = #tpu.pipeline_mode<synchronous>, transform_indices = @transform_2, window_bounds = array<i64: 1, 128>}, {pipeline_mode = #tpu.pipeline_mode<synchronous>, transform_indices = @transform_3, window_bounds = array<i64: 1, 128>}, {pipeline_mode = #tpu.pipeline_mode<synchronous>, transform_indices = @transform_4, window_bounds = array<i64: 128, 128>}, {pipeline_mode = #tpu.pipeline_mode<synchronous>, transform_indices = @transform_5, window_bounds = array<i64: 128, 256>}, {pipeline_mode = #tpu.pipeline_mode<synchronous>, transform_indices = @transform_6, window_bounds = array<i64: 128, 128>}, {pipeline_mode = #tpu.pipeline_mode<synchronous>, transform_indices = @transform_7, window_bounds = array<i64: 1, 128>}, {pipeline_mode = #tpu.pipeline_mode<synchronous>, transform_indices = @transform_8, window_bounds = array<i64: 1, 128>}, {pipeline_mode = #tpu.pipeline_mode<synchronous>, transform_indices = @transform_9, window_bounds = array<i64: 1, 128>}, {pipeline_mode = #tpu.pipeline_mode<synchronous>, transform_indices = @transform_10, window_bounds = array<i64: 128, 512>}, {pipeline_mode = #tpu.pipeline_mode<synchronous>, transform_indices = @transform_11, window_bounds = array<i64: 1, 512>}, {pipeline_mode = #tpu.pipeline_mode<synchronous>, transform_indices = @transform_12, window_bounds = array<i64: 512, 128>}, {pipeline_mode = #tpu.pipeline_mode<synchronous>, transform_indices = @transform_13, window_bounds = array<i64: 1, 128>}, {transform_indices = @transform_14, window_bounds = array<i64: 1, 128, 128>}]} {
    %c0_i32 = arith.constant 0 : i32
    %0 = arith.cmpi eq, %arg1, %c0_i32 : i32
    %1 = arith.extui %0 : i1 to i32
    %c0_i32_0 = arith.constant 0 : i32
    %2 = arith.cmpi ne, %1, %c0_i32_0 : i32
    scf.if %2 {
      %c0_50 = arith.constant 0 : index
      %c0_51 = arith.constant 0 : index
      %c0_52 = arith.constant 0 : index
      %93 = vector.load %arg3[%c0_50, %c0_51, %c0_52] : memref<1x128x128xf32, #tpu.memory_space<vmem>>, vector<1x128x128xf32>
      %94 = vector.shape_cast %93 : vector<1x128x128xf32> to vector<128x128xf32>
      %c0_53 = arith.constant 0 : index
      %c0_54 = arith.constant 0 : index
      %95 = vector.load %arg4[%c0_53, %c0_54] : memref<1x128xf32, #tpu.memory_space<vmem>>, vector<1x128xf32>
      %c0_55 = arith.constant 0 : index
      %c0_56 = arith.constant 0 : index
      %96 = vector.load %arg5[%c0_55, %c0_56] : memref<1x128xf32, #tpu.memory_space<vmem>>, vector<1x128xf32>
      %cst_57 = arith.constant dense<0.000000e+00> : vector<128xf32>
      %97 = vector.multi_reduction <add>, %94, %cst_57 [1] : vector<128x128xf32> to vector<128xf32>
      %98 = vector.shape_cast %97 : vector<128xf32> to vector<128x1xf32>
      %cst_58 = arith.constant 1.280000e+02 : f32
      %99 = vector.broadcast %cst_58 : f32 to vector<128x1xf32>
      %100 = arith.divf %98, %99 : vector<128x1xf32>
      %101 = vector.broadcast %100 : vector<128x1xf32> to vector<128x128xf32>
      %102 = arith.subf %94, %101 : vector<128x128xf32>
      %103 = arith.mulf %102, %102 : vector<128x128xf32>
      %cst_59 = arith.constant dense<0.000000e+00> : vector<128xf32>
      %104 = vector.multi_reduction <add>, %103, %cst_59 [1] : vector<128x128xf32> to vector<128xf32>
      %105 = vector.shape_cast %104 : vector<128xf32> to vector<128x1xf32>
      %cst_60 = arith.constant 1.280000e+02 : f32
      %106 = vector.broadcast %cst_60 : f32 to vector<128x1xf32>
      %107 = arith.divf %105, %106 : vector<128x1xf32>
      %108 = vector.broadcast %100 : vector<128x1xf32> to vector<128x128xf32>
      %109 = arith.subf %94, %108 : vector<128x128xf32>
      %cst_61 = arith.constant 9.99999974E-6 : f32
      %110 = vector.broadcast %cst_61 : f32 to vector<128x1xf32>
      %111 = arith.addf %107, %110 : vector<128x1xf32>
      %112 = math.rsqrt %111 : vector<128x1xf32>
      %113 = vector.broadcast %112 : vector<128x1xf32> to vector<128x128xf32>
      %114 = arith.mulf %109, %113 : vector<128x128xf32>
      %115 = vector.broadcast %95 : vector<1x128xf32> to vector<128x128xf32>
      %116 = arith.mulf %114, %115 : vector<128x128xf32>
      %117 = vector.broadcast %96 : vector<1x128xf32> to vector<128x128xf32>
      %118 = arith.addf %116, %117 : vector<128x128xf32>
      %c0_62 = arith.constant 0 : index
      %c0_63 = arith.constant 0 : index
      %119 = vector.load %arg7[%c0_62, %c0_63] : memref<128x256xf32, #tpu.memory_space<vmem>>, vector<128x256xf32>
      %cst_64 = arith.constant dense<0.000000e+00> : vector<128x256xf32>
      %120 = tpu.matmul %118, %119, %cst_64 {dimension_numbers = #tpu.dot_dimension_numbers<[1], [0], [0], [1], [0, 0, 1, 1], [], []>} : vector<128x128xf32>, vector<128x256xf32>, vector<128x256xf32> -> vector<128x256xf32>
      %c0_65 = arith.constant 0 : index
      %c0_66 = arith.constant 0 : index
      %121 = vector.load %arg17[%c0_65, %c0_66] : memref<128x256xf32, #tpu.memory_space<vmem>>, vector<128x256xf32>
      tpu.vector_store %arg17[%c0_65, %c0_66], %120 {strides = array<i32>} : memref<128x256xf32, #tpu.memory_space<vmem>>, vector<128x256xf32>,
    } else {
    }
    %c0 = arith.constant 0 : index
    %c0_1 = arith.constant 0 : index
    %c0_2 = arith.constant 0 : index
    %3 = vector.load %arg2[%c0, %c0_1, %c0_2] : memref<1x128x128xf32, #tpu.memory_space<vmem>>, vector<1x128x128xf32>
    %4 = vector.shape_cast %3 : vector<1x128x128xf32> to vector<128x128xf32>
    %c0_3 = arith.constant 0 : index
    %c0_4 = arith.constant 0 : index
    %5 = vector.load %arg6[%c0_3, %c0_4] : memref<128x128xf32, #tpu.memory_space<vmem>>, vector<128x128xf32>
    %cst = arith.constant dense<0.000000e+00> : vector<128x128xf32>
    %6 = tpu.matmul %4, %5, %cst {dimension_numbers = #tpu.dot_dimension_numbers<[1], [0], [0], [1], [0, 0, 1, 1], [], []>} : vector<128x128xf32>, vector<128x128xf32>, vector<128x128xf32> -> vector<128x128xf32>
    %c0_5 = arith.constant 0 : index
    %c0_6 = arith.constant 0 : index
    %7 = vector.load %arg17[%c0_5, %c0_6] : memref<128x256xf32, #tpu.memory_space<vmem>>, vector<128x256xf32>
    %8 = vector.extract_strided_slice %6 {offsets = [0, 0], sizes = [128, 64], strides = [1, 1]} : vector<128x128xf32> to vector<128x64xf32>
    %9 = vector.extract_strided_slice %7 {offsets = [0, 0], sizes = [128, 64], strides = [1, 1]} : vector<128x256xf32> to vector<128x64xf32>
    %10 = vector.extract_strided_slice %7 {offsets = [0, 128], sizes = [128, 64], strides = [1, 1]} : vector<128x256xf32> to vector<128x64xf32>
    %cst_7 = arith.constant dense<0.000000e+00> : vector<128x128xf32>
    %11 = tpu.matmul %8, %9, %cst_7 {dimension_numbers = #tpu.dot_dimension_numbers<[1], [1], [0], [0], [0, 0, 1, 0], [], []>} : vector<128x64xf32>, vector<128x64xf32>, vector<128x128xf32> -> vector<128x128xf32>
    %cst_8 = arith.constant dense<0xFF800000> : vector<128xf32>
    %12 = vector.multi_reduction <maximumf>, %11, %cst_8 [1] : vector<128x128xf32> to vector<128xf32>
    %13 = vector.shape_cast %12 : vector<128xf32> to vector<128x1xf32>
    %14 = vector.broadcast %13 : vector<128x1xf32> to vector<128x128xf32>
    %15 = arith.subf %11, %14 : vector<128x128xf32>
    %16 = math.exp %15 : vector<128x128xf32>
    %cst_9 = arith.constant dense<0.000000e+00> : vector<128xf32>
    %17 = vector.multi_reduction <add>, %16, %cst_9 [1] : vector<128x128xf32> to vector<128xf32>
    %18 = vector.shape_cast %17 : vector<128xf32> to vector<128x1xf32>
    %cst_10 = arith.constant dense<0.000000e+00> : vector<128x64xf32>
    %19 = tpu.matmul %16, %10, %cst_10 {dimension_numbers = #tpu.dot_dimension_numbers<[1], [0], [0], [1], [0, 0, 1, 1], [], []>} : vector<128x128xf32>, vector<128x64xf32>, vector<128x64xf32> -> vector<128x64xf32>
    %20 = tpu.reciprocal %18 : vector<128x1xf32> -> vector<128x1xf32>
    %21 = vector.broadcast %20 : vector<128x1xf32> to vector<128x64xf32>
    %22 = arith.mulf %19, %21 : vector<128x64xf32>
    %c0_11 = arith.constant 0 : index
    %c0_12 = arith.constant 0 : index
    %23 = vector.load %arg18[%c0_11, %c0_12] : memref<128x128xf32, #tpu.memory_space<vmem>>, vector<128x64xf32>
    tpu.vector_store %arg18[%c0_11, %c0_12], %22 {strides = array<i32>} : memref<128x128xf32, #tpu.memory_space<vmem>>, vector<128x64xf32>,
    %24 = vector.extract_strided_slice %6 {offsets = [0, 64], sizes = [128, 64], strides = [1, 1]} : vector<128x128xf32> to vector<128x64xf32>
    %25 = vector.extract_strided_slice %7 {offsets = [0, 64], sizes = [128, 64], strides = [1, 1]} : vector<128x256xf32> to vector<128x64xf32>
    %26 = vector.extract_strided_slice %7 {offsets = [0, 192], sizes = [128, 64], strides = [1, 1]} : vector<128x256xf32> to vector<128x64xf32>
    %cst_13 = arith.constant dense<0.000000e+00> : vector<128x128xf32>
    %27 = tpu.matmul %24, %25, %cst_13 {dimension_numbers = #tpu.dot_dimension_numbers<[1], [1], [0], [0], [0, 0, 1, 0], [], []>} : vector<128x64xf32>, vector<128x64xf32>, vector<128x128xf32> -> vector<128x128xf32>
    %cst_14 = arith.constant dense<0xFF800000> : vector<128xf32>
    %28 = vector.multi_reduction <maximumf>, %27, %cst_14 [1] : vector<128x128xf32> to vector<128xf32>
    %29 = vector.shape_cast %28 : vector<128xf32> to vector<128x1xf32>
    %30 = vector.broadcast %29 : vector<128x1xf32> to vector<128x128xf32>
    %31 = arith.subf %27, %30 : vector<128x128xf32>
    %32 = math.exp %31 : vector<128x128xf32>
    %cst_15 = arith.constant dense<0.000000e+00> : vector<128xf32>
    %33 = vector.multi_reduction <add>, %32, %cst_15 [1] : vector<128x128xf32> to vector<128xf32>
    %34 = vector.shape_cast %33 : vector<128xf32> to vector<128x1xf32>
    %cst_16 = arith.constant dense<0.000000e+00> : vector<128x64xf32>
    %35 = tpu.matmul %32, %26, %cst_16 {dimension_numbers = #tpu.dot_dimension_numbers<[1], [0], [0], [1], [0, 0, 1, 1], [], []>} : vector<128x128xf32>, vector<128x64xf32>, vector<128x64xf32> -> vector<128x64xf32>
    %36 = tpu.reciprocal %34 : vector<128x1xf32> -> vector<128x1xf32>
    %37 = vector.broadcast %36 : vector<128x1xf32> to vector<128x64xf32>
    %38 = arith.mulf %35, %37 : vector<128x64xf32>
    %c0_17 = arith.constant 0 : index
    %c64 = arith.constant 64 : index
    %39 = vector.load %arg18[%c0_17, %c64] : memref<128x128xf32, #tpu.memory_space<vmem>>, vector<128x64xf32>
    tpu.vector_store %arg18[%c0_17, %c64], %38 {strides = array<i32>} : memref<128x128xf32, #tpu.memory_space<vmem>>, vector<128x64xf32>,
    %c0_18 = arith.constant 0 : index
    %c0_19 = arith.constant 0 : index
    %40 = vector.load %arg18[%c0_18, %c0_19] : memref<128x128xf32, #tpu.memory_space<vmem>>, vector<128x128xf32>
    %c0_20 = arith.constant 0 : index
    %c0_21 = arith.constant 0 : index
    %41 = vector.load %arg8[%c0_20, %c0_21] : memref<128x128xf32, #tpu.memory_space<vmem>>, vector<128x128xf32>
    %cst_22 = arith.constant dense<0.000000e+00> : vector<128x128xf32>
    %42 = tpu.matmul %40, %41, %cst_22 {dimension_numbers = #tpu.dot_dimension_numbers<[1], [0], [0], [1], [0, 0, 1, 1], [], []>} : vector<128x128xf32>, vector<128x128xf32>, vector<128x128xf32> -> vector<128x128xf32>
    %c0_23 = arith.constant 0 : index
    %c0_24 = arith.constant 0 : index
    %43 = vector.load %arg9[%c0_23, %c0_24] : memref<1x128xf32, #tpu.memory_space<vmem>>, vector<1x128xf32>
    %44 = vector.broadcast %43 : vector<1x128xf32> to vector<128x128xf32>
    %45 = arith.addf %42, %44 : vector<128x128xf32>
    %46 = arith.addf %4, %45 : vector<128x128xf32>
    %c0_25 = arith.constant 0 : index
    %c0_26 = arith.constant 0 : index
    %47 = vector.load %arg10[%c0_25, %c0_26] : memref<1x128xf32, #tpu.memory_space<vmem>>, vector<1x128xf32>
    %c0_27 = arith.constant 0 : index
    %c0_28 = arith.constant 0 : index
    %48 = vector.load %arg11[%c0_27, %c0_28] : memref<1x128xf32, #tpu.memory_space<vmem>>, vector<1x128xf32>
    %cst_29 = arith.constant dense<0.000000e+00> : vector<128xf32>
    %49 = vector.multi_reduction <add>, %46, %cst_29 [1] : vector<128x128xf32> to vector<128xf32>
    %50 = vector.shape_cast %49 : vector<128xf32> to vector<128x1xf32>
    %cst_30 = arith.constant 1.280000e+02 : f32
    %51 = vector.broadcast %cst_30 : f32 to vector<128x1xf32>
    %52 = arith.divf %50, %51 : vector<128x1xf32>
    %53 = vector.broadcast %52 : vector<128x1xf32> to vector<128x128xf32>
    %54 = arith.subf %46, %53 : vector<128x128xf32>
    %55 = arith.mulf %54, %54 : vector<128x128xf32>
    %cst_31 = arith.constant dense<0.000000e+00> : vector<128xf32>
    %56 = vector.multi_reduction <add>, %55, %cst_31 [1] : vector<128x128xf32> to vector<128xf32>
    %57 = vector.shape_cast %56 : vector<128xf32> to vector<128x1xf32>
    %cst_32 = arith.constant 1.280000e+02 : f32
    %58 = vector.broadcast %cst_32 : f32 to vector<128x1xf32>
    %59 = arith.divf %57, %58 : vector<128x1xf32>
    %60 = vector.broadcast %52 : vector<128x1xf32> to vector<128x128xf32>
    %61 = arith.subf %46, %60 : vector<128x128xf32>
    %cst_33 = arith.constant 9.99999974E-6 : f32
    %62 = vector.broadcast %cst_33 : f32 to vector<128x1xf32>
    %63 = arith.addf %59, %62 : vector<128x1xf32>
    %64 = math.rsqrt %63 : vector<128x1xf32>
    %65 = vector.broadcast %64 : vector<128x1xf32> to vector<128x128xf32>
    %66 = arith.mulf %61, %65 : vector<128x128xf32>
    %67 = vector.broadcast %47 : vector<1x128xf32> to vector<128x128xf32>
    %68 = arith.mulf %66, %67 : vector<128x128xf32>
    %69 = vector.broadcast %48 : vector<1x128xf32> to vector<128x128xf32>
    %70 = arith.addf %68, %69 : vector<128x128xf32>
    %c0_34 = arith.constant 0 : index
    %c0_35 = arith.constant 0 : index
    %71 = vector.load %arg12[%c0_34, %c0_35] : memref<128x512xf32, #tpu.memory_space<vmem>>, vector<128x512xf32>
    %cst_36 = arith.constant dense<0.000000e+00> : vector<128x512xf32>
    %72 = tpu.matmul %70, %71, %cst_36 {dimension_numbers = #tpu.dot_dimension_numbers<[1], [0], [0], [1], [0, 0, 1, 1], [], []>} : vector<128x128xf32>, vector<128x512xf32>, vector<128x512xf32> -> vector<128x512xf32>
    %c0_37 = arith.constant 0 : index
    %c0_38 = arith.constant 0 : index
    %73 = vector.load %arg13[%c0_37, %c0_38] : memref<1x512xf32, #tpu.memory_space<vmem>>, vector<1x512xf32>
    %74 = vector.broadcast %73 : vector<1x512xf32> to vector<128x512xf32>
    %75 = arith.addf %72, %74 : vector<128x512xf32>
    %cst_39 = arith.constant 5.000000e-01 : f32
    %76 = vector.broadcast %cst_39 : f32 to vector<128x512xf32>
    %77 = arith.mulf %76, %75 : vector<128x512xf32>
    %cst_40 = arith.constant 0.707106769 : f32
    %78 = vector.broadcast %cst_40 : f32 to vector<128x512xf32>
    %79 = arith.mulf %75, %78 : vector<128x512xf32>
    %80 = math.erf %79 : vector<128x512xf32>
    %cst_41 = arith.constant 1.000000e+00 : f32
    %81 = vector.broadcast %cst_41 : f32 to vector<128x512xf32>
    %82 = arith.addf %81, %80 : vector<128x512xf32>
    %83 = arith.mulf %77, %82 : vector<128x512xf32>
    %c0_42 = arith.constant 0 : index
    %c0_43 = arith.constant 0 : index
    %84 = vector.load %arg14[%c0_42, %c0_43] : memref<512x128xf32, #tpu.memory_space<vmem>>, vector<512x128xf32>
    %cst_44 = arith.constant dense<0.000000e+00> : vector<128x128xf32>
    %85 = tpu.matmul %83, %84, %cst_44 {dimension_numbers = #tpu.dot_dimension_numbers<[1], [0], [0], [1], [0, 0, 1, 1], [], []>} : vector<128x512xf32>, vector<512x128xf32>, vector<128x128xf32> -> vector<128x128xf32>
    %c0_45 = arith.constant 0 : index
    %c0_46 = arith.constant 0 : index
    %86 = vector.load %arg15[%c0_45, %c0_46] : memref<1x128xf32, #tpu.memory_space<vmem>>, vector<1x128xf32>
    %87 = vector.broadcast %86 : vector<1x128xf32> to vector<128x128xf32>
    %88 = arith.addf %85, %87 : vector<128x128xf32>
    %89 = arith.addf %46, %88 : vector<128x128xf32>
    %c0_47 = arith.constant 0 : index
    %c0_48 = arith.constant 0 : index
    %c0_49 = arith.constant 0 : index
    %90 = vector.load %arg16[%c0_47, %c0_48, %c0_49] : memref<1x128x128xf32, #tpu.memory_space<vmem>>, vector<1x128x128xf32>
    %91 = vector.shape_cast %90 : vector<1x128x128xf32> to vector<128x128xf32>
    %92 = vector.shape_cast %89 : vector<128x128xf32> to vector<1x128x128xf32>
    tpu.vector_store %arg16[%c0_47, %c0_48, %c0_49], %92 {strides = array<i32>} : memref<1x128x128xf32, #tpu.memory_space<vmem>>, vector<1x128x128xf32>,
    return
  }
  func.func @transform_0(%arg0: i32, %arg1: i32) -> (i32, i32, i32) {
    %c0_i32 = arith.constant 0 : i32
    %c0_i32_0 = arith.constant 0 : i32
    return %arg0, %arg1, %c0_i32 : i32, i32, i32
  }
  func.func @transform_1(%arg0: i32, %arg1: i32) -> (i32, i32, i32) {
    %c0_i32 = arith.constant 0 : i32
    %c0_i32_0 = arith.constant 0 : i32
    %c0_i32_1 = arith.constant 0 : i32
    return %arg0, %c0_i32, %c0_i32_0 : i32, i32, i32
  }
  func.func @transform_2(%arg0: i32, %arg1: i32) -> (i32, i32) {
    %c0_i32 = arith.constant 0 : i32
    %c0_i32_0 = arith.constant 0 : i32
    %c0_i32_1 = arith.constant 0 : i32
    return %c0_i32, %c0_i32_0 : i32, i32
  }
  func.func @transform_3(%arg0: i32, %arg1: i32) -> (i32, i32) {
    %c0_i32 = arith.constant 0 : i32
    %c0_i32_0 = arith.constant 0 : i32
    %c0_i32_1 = arith.constant 0 : i32
    return %c0_i32, %c0_i32_0 : i32, i32
  }
  func.func @transform_4(%arg0: i32, %arg1: i32) -> (i32, i32) {
    %c0_i32 = arith.constant 0 : i32
    %c0_i32_0 = arith.constant 0 : i32
    %c0_i32_1 = arith.constant 0 : i32
    return %c0_i32, %c0_i32_0 : i32, i32
  }
  func.func @transform_5(%arg0: i32, %arg1: i32) -> (i32, i32) {
    %c0_i32 = arith.constant 0 : i32
    %c0_i32_0 = arith.constant 0 : i32
    %c0_i32_1 = arith.constant 0 : i32
    return %c0_i32, %c0_i32_0 : i32, i32
  }
  func.func @transform_6(%arg0: i32, %arg1: i32) -> (i32, i32) {
    %c0_i32 = arith.constant 0 : i32
    %c0_i32_0 = arith.constant 0 : i32
    %c0_i32_1 = arith.constant 0 : i32
    return %c0_i32, %c0_i32_0 : i32, i32
  }
  func.func @transform_7(%arg0: i32, %arg1: i32) -> (i32, i32) {
    %c0_i32 = arith.constant 0 : i32
    %c0_i32_0 = arith.constant 0 : i32
    %c0_i32_1 = arith.constant 0 : i32
    return %c0_i32, %c0_i32_0 : i32, i32
  }
  func.func @transform_8(%arg0: i32, %arg1: i32) -> (i32, i32) {
    %c0_i32 = arith.constant 0 : i32
    %c0_i32_0 = arith.constant 0 : i32
    %c0_i32_1 = arith.constant 0 : i32
    return %c0_i32, %c0_i32_0 : i32, i32
  }
  func.func @transform_9(%arg0: i32, %arg1: i32) -> (i32, i32) {
    %c0_i32 = arith.constant 0 : i32
    %c0_i32_0 = arith.constant 0 : i32
    %c0_i32_1 = arith.constant 0 : i32
    return %c0_i32, %c0_i32_0 : i32, i32
  }
  func.func @transform_10(%arg0: i32, %arg1: i32) -> (i32, i32) {
    %c0_i32 = arith.constant 0 : i32
    %c0_i32_0 = arith.constant 0 : i32
    %c0_i32_1 = arith.constant 0 : i32
    return %c0_i32, %c0_i32_0 : i32, i32
  }
  func.func @transform_11(%arg0: i32, %arg1: i32) -> (i32, i32) {
    %c0_i32 = arith.constant 0 : i32
    %c0_i32_0 = arith.constant 0 : i32
    %c0_i32_1 = arith.constant 0 : i32
    return %c0_i32, %c0_i32_0 : i32, i32
  }
  func.func @transform_12(%arg0: i32, %arg1: i32) -> (i32, i32) {
    %c0_i32 = arith.constant 0 : i32
    %c0_i32_0 = arith.constant 0 : i32
    %c0_i32_1 = arith.constant 0 : i32
    return %c0_i32, %c0_i32_0 : i32, i32
  }
  func.func @transform_13(%arg0: i32, %arg1: i32) -> (i32, i32) {
    %c0_i32 = arith.constant 0 : i32
    %c0_i32_0 = arith.constant 0 : i32
    %c0_i32_1 = arith.constant 0 : i32
    return %c0_i32, %c0_i32_0 : i32, i32
  }
  func.func @transform_14(%arg0: i32, %arg1: i32) -> (i32, i32, i32) {
    %c0_i32 = arith.constant 0 : i32
    %c0_i32_0 = arith.constant 0 : i32
    return %arg0, %arg1, %c0_i32 : i32, i32, i32
  }
}

</mosaic_0001>

<bundles_post_ra>
// kernel: tpu_custom_call.1
= control target key start
LH: loop header
LB: loop body
LE: loop exit
PB: predicated region body
PF: predicated region fallthrough
CT: control target
= control target key end

     0   :  { %s8295_s0 = inlined_call_operand.hbm [shape: f32[2,128,128], index: 0, kind: input, shape index: {}]   ;;  %s8296_s1 = inlined_call_operand.hbm [shape: f32[2,128,128], index: 1, kind: input, shape index: {}]   ;;  %s8297_s2 = inlined_call_operand.vmem [shape: f32[1,128], index: 2, kind: input, shape index: {}]   ;;  %s8298_s3 = inlined_call_operand.vmem [shape: f32[1,128], index: 3, kind: input, shape index: {}]   ;;  %s8299_s4 = inlined_call_operand.hbm [shape: f32[128,128], index: 4, kind: input, shape index: {}]   ;;  %s8300_s5 = inlined_call_operand.hbm [shape: f32[128,256], index: 5, kind: input, shape index: {}]   ;;  %s8301_s6 = inlined_call_operand.hbm [shape: f32[128,128], index: 6, kind: input, shape index: {}]   ;;  %s8302_s7 = inlined_call_operand.vmem [shape: f32[1,128], index: 7, kind: input, shape index: {}]   ;;  %s8303_s8 = inlined_call_operand.vmem [shape: f32[1,128], index: 8, kind: input, shape index: {}]   ;;  %s8304_s9 = inlined_call_operand.vmem [shape: f32[1,128], index: 9, kind: input, shape index: {}]   ;;  %s8305_s10 = inlined_call_operand.hbm [shape: f32[128,512], index: 10, kind: input, shape index: {}]   ;;  %s8306_s11 = inlined_call_operand.vmem [shape: f32[1,512], index: 11, kind: input, shape index: {}]   ;;  %s8307_s12 = inlined_call_operand.hbm [shape: f32[512,128], index: 12, kind: input, shape index: {}]   ;;  %s8308_s13 = inlined_call_operand.vmem [shape: f32[1,128], index: 13, kind: input, shape index: {}]   ;;  %s8309_s14 = inlined_call_operand.hbm [shape: f32[2,128,128], index: 14, kind: output, shape index: {}]  }
   0x1   :  { %8340 = sst [smem:[#allocation44_spill]] %s8298_s3 }
   0x2   :  { %8341 = sst [smem:[#allocation45_spill]] %s8299_s4 }
   0x3   :  { %8342 = sst [smem:[#allocation46_spill]] %s8300_s5 }
   0x4   :  { %8343 = sst [smem:[#allocation47_spill]] %s8301_s6 }
   0x5   :  { %8344 = sst [smem:[#allocation48_spill]] %s8302_s7 }
   0x6   :  { %8345 = sst [smem:[#allocation49_spill]] %s8303_s8 }
   0x7   :  { %8346 = sst [smem:[#allocation50_spill]] %s8304_s9 }
   0x8   :  { %8347 = sst [smem:[#allocation51_spill]] %s8305_s10 }
   0x9   :  { %8348 = sst [smem:[#allocation52_spill]] %s8306_s11 }
   0xa   :  { %8349 = sst [smem:[#allocation53_spill]] %s8307_s12 }
   0xb   :  { %8350 = sst [smem:[#allocation54_spill]] %s8308_s13 }
   0xc   :  { %8351 = sst [smem:[#allocation55_spill]] %s8309_s14 }
   0xd   :  { %19 = vsyncpa [#allocation5], 0 }
   0xe   :  { %21 = vsyncpa [#allocation5 + $0x1], 0 }
   0xf   :  { %22 = vsyncpa [#allocation8], 0 }
  0x10   :  { %24 = vsyncpa [#allocation8 + $0x1], 0 }
  0x11   :  { %25 = vsyncpa [#allocation11], 0 }
  0x12   :  { %26 = vsyncpa [#allocation14], 0 }
  0x13   :  { %27 = vsyncpa [#allocation6], 0 }
  0x14   :  { %29 = vsyncpa [#allocation6 + $0x1], 0  ;;  %s6393_s29 = smov 0   ;;  %s6395_s30 = smov 0  }
  0x15   :  { %s6397_s15 = smov 0   ;;  %s6399_s16 = smov 0  }
  0x16   :  { %s6401_s17 = smov 0   ;;  %s6403_s18 = smov 0  }
  0x17 LB: > { %8352 = sst [smem:[#allocation23_spill]] %s6290_s16  ;;  %s6424_s19 = sadd.s32 4294967295, %s6298_s18   ;;  %s6298_s18 = sphi %s6403_s18, %s35_s18   ;;  %s6294_s17 = sphi %s6401_s17, %s8441_s17   ;;  %s6290_s16 = sphi %s6399_s16, %s8440_s16   ;;  %s6286_s15 = sphi %s6397_s15, %s8439_s15   ;;  %s6282_s30 = sphi %s6395_s30, %s8438_s30   ;;  %s6278_s29 = sphi %s6393_s29, %s8437_s29  }
  0x18   : > { %p4268_p0 = scmp.ge.s32.totalorder %s6298_s18, 1  ;;  %p8315_p1 = scmp.eq.s32.totalorder %s6424_s19, 0 }
  0x19   : > { %p386_p2 = scmp.lt.s32.totalorder %s6298_s18, 3  ;;  %s6300_s21 = smov [#allocation9]  }
  0x1a   : > { %s404_s22 = sshll.u32 %s6300_s21, 4  ;;  %s6301_s24 = smov [#allocation10]   ;;  %s6433_s22 = int_to_ptr.vmem [resolvable:$true] %s404_s22 }
  0x1b   : > { %p6429_p3 = pnand %p4268_p0, %p386_p2  ;;  %s417_s25 = sshll.u32 %s6301_s24, 4  ;;  %s6444_s25 = int_to_ptr.vmem [resolvable:$true] %s417_s25 }
  0x1c   : > { %s8355_s4 = sld [smem:[#allocation45_spill]] }
  0x1d   : > { %s8353_s20 = scalar_select %p6429_p3, 1, 0 }
  0x1e   : > { %p5482_p4 = pneg %p6429_p3 }
  0x20   : > { %p6440_p6 = pnand %p5482_p4, %p8315_p1 }
  0x22   : > { %s6000_s28 = scalar_lea.hbm %s8355_s4, 2048  ;;  %p6454_p8 = pneg %p6440_p6 }
  0x23   : > { %p6001_p7 = scmp.ne.s32.totalorder %s8355_s4, %s6000_s28  ;;  %p6007_p11 = scmp.lt.u32.totalorder %s6000_s28, %s8355_s4 }
  0x25   : > { %p6003_p9 = pnand %p6454_p8, %p6001_p7 }
  0x27   : > { %p6004_p10 = pneg %p6003_p9 }
  0x29   : > { %p6009_p12 = pnand %p6007_p11, %p6004_p10 }
  0x2b   : > { %6012 = shalt.err (!%p6009_p12)
}
  0x2c   : > { %s6013_s14 = scalar_lea.vmem %s6433_s22, 2048  ;;  %p6021_p4 = scmp.lt.s32.totalorder %s6433_s22, %s6433_s22 }
  0x2d   : > { %p6014_p13 = scmp.ne.s32.totalorder %s6433_s22, %s6013_s14  ;;  %p6022_p5 = scmp.lt.s32.totalorder %s6013_s14, %s6013_s14 }
  0x2f   : > { %p6016_p0 = pnand %p6014_p13, %p6454_p8  ;;  %p6023_p7 = por %p6022_p5, %p6021_p4 }
  0x31   : > { %p6017_p2 = pneg %p6016_p0 }
  0x33   : > { %p6024_p9 = pnand %p6023_p7, %p6017_p2 }
  0x35   : > { %6027 = shalt.err (!%p6024_p9)
}
  0x36   : > { %s8311_s26 = smov 128   ;;  %s8313_s13 = smov 8  }
  0x37   : > { %5485 = dma.hbm_to_vmem [thread:$0]  (!%p6440_p6), %s8355_s4, 2048, %s6433_s22, [#allocation8], %s8311_s26, %s8311_s26, %s8313_s13  }
  0x38   : > { %s8357_s5 = sld [smem:[#allocation46_spill]] }
  0x3e   : > { %s6028_s14 = scalar_lea.hbm %s8357_s5, 4096 }
  0x3f   : > { %p6029_p5 = scmp.ne.s32.totalorder %s8357_s5, %s6028_s14  ;;  %p6035_p12 = scmp.lt.u32.totalorder %s6028_s14, %s8357_s5 }
  0x41   : > { %p6031_p10 = pnand %p6029_p5, %p6454_p8 }
  0x43   : > { %p6032_p11 = pneg %p6031_p10 }
  0x45   : > { %p6037_p13 = pnand %p6035_p12, %p6032_p11 }
  0x47   : > { %6040 = shalt.err (!%p6037_p13)
}
  0x48   : > { %s6041_s22 = scalar_lea.vmem %s6444_s25, 4096  ;;  %p6049_p7 = scmp.lt.s32.totalorder %s6444_s25, %s6444_s25 }
  0x49   : > { %p6042_p0 = scmp.ne.s32.totalorder %s6444_s25, %s6041_s22  ;;  %p6050_p9 = scmp.lt.s32.totalorder %s6041_s22, %s6041_s22 }
  0x4b   : > { %p6044_p2 = pnand %p6042_p0, %p6454_p8  ;;  %p6051_p5 = por %p6050_p9, %p6049_p7 }
  0x4d   : > { %p6045_p4 = pneg %p6044_p2 }
  0x4f   : > { %p6052_p10 = pnand %p6051_p5, %p6045_p4 }
  0x51   : > { %6055 = shalt.err (!%p6052_p10)
}
  0x52   : > { %s6304_s9 = smov 256   ;;  %s6305_s7 = smov 16  }
  0x53   : > { %5488 = dma.hbm_to_vmem [thread:$0]  (!%p6440_p6), %s8357_s5, 4096, %s6444_s25, [#allocation11], %s6304_s9, %s6304_s9, %s6305_s7  }
  0x54   : > { %s6306_s27 = smov [#allocation13]   ;;  %s8358_s10 = sld [smem:[#allocation51_spill]] }
  0x55   : > { %s452_s28 = sshll.u32 %s6306_s27, 4  ;;  %s453_s28 = int_to_ptr.vmem [resolvable:$true] %s452_s28 }
  0x5a   : > { %s6056_s14 = scalar_lea.hbm %s8358_s10, 8192 }
  0x5b   : > { %p6057_p11 = scmp.ne.s32.totalorder %s8358_s10, %s6056_s14  ;;  %p6063_p0 = scmp.lt.u32.totalorder %s6056_s14, %s8358_s10 }
  0x5d   : > { %p6059_p12 = pnand %p6057_p11, %p6454_p8 }
  0x5f   : > { %p6060_p13 = pneg %p6059_p12 }
  0x61   : > { %p6065_p2 = pnand %p6063_p0, %p6060_p13 }
  0x63   : > { %6068 = shalt.err (!%p6065_p2)
}
  0x64   : > { %s6069_s25 = scalar_lea.vmem %s453_s28, 8192  ;;  %p6077_p5 = scmp.lt.s32.totalorder %s453_s28, %s453_s28 }
  0x65   : > { %p6070_p4 = scmp.ne.s32.totalorder %s453_s28, %s6069_s25  ;;  %p6078_p10 = scmp.lt.s32.totalorder %s6069_s25, %s6069_s25 }
  0x67   : > { %p6072_p7 = pnand %p6070_p4, %p6454_p8  ;;  %p6079_p1 = por %p6078_p10, %p6077_p5 }
  0x69   : > { %p6073_p9 = pneg %p6072_p7 }
  0x6b   : > { %p6080_p3 = pnand %p6079_p1, %p6073_p9 }
  0x6d   : > { %6083 = shalt.err (!%p6080_p3)
}
  0x6e   : > { %s6307_s26 = smov 512   ;;  %s6308_s9 = smov 32  }
  0x6f   : > { %5494 = dma.hbm_to_vmem [thread:$0]  (!%p6440_p6), %s8358_s10, 8192, %s453_s28, [#allocation14], %s6307_s26, %s6307_s26, %s6308_s9  }
  0x70   : > { %s6309_s7 = smov [#allocation12]   ;;  %s6310_s11 = smov [#allocation15]  }
  0x71   : > { %s430_s8 = sshll.u32 %s6309_s7, 4  ;;  %s468_s27 = sshll.u32 %s6310_s11, 4  ;;  %s431_s8 = int_to_ptr.vmem [resolvable:$true] %s430_s8  ;;  %s469_s27 = int_to_ptr.vmem [resolvable:$true] %s468_s27 }
  0x72   : > { %s8359_s6 = sld [smem:[#allocation47_spill]] }
  0x78   : > { %s6084_s14 = scalar_lea.hbm %s8359_s6, 2048 }
  0x79   : > { %p6085_p1 = scmp.ne.s32.totalorder %s8359_s6, %s6084_s14  ;;  %p6091_p12 = scmp.lt.u32.totalorder %s6084_s14, %s8359_s6 }
  0x7b   : > { %p6087_p3 = pnand %p6085_p1, %p6454_p8 }
  0x7d   : > { %p6088_p11 = pneg %p6087_p3 }
  0x7f   : > { %p6093_p13 = pnand %p6091_p12, %p6088_p11 }
  0x81   : > { %6096 = shalt.err (!%p6093_p13)
}
  0x82   : > { %s6097_s28 = scalar_lea.vmem %s431_s8, 2048  ;;  %p6105_p7 = scmp.lt.s32.totalorder %s431_s8, %s431_s8 }
  0x83   : > { %p6098_p0 = scmp.ne.s32.totalorder %s431_s8, %s6097_s28  ;;  %p6106_p9 = scmp.lt.s32.totalorder %s6097_s28, %s6097_s28 }
  0x85   : > { %p6100_p2 = pnand %p6098_p0, %p6454_p8  ;;  %p6107_p5 = por %p6106_p9, %p6105_p7 }
  0x87   : > { %p6101_p4 = pneg %p6100_p2 }
  0x89   : > { %p6108_p10 = pnand %p6107_p5, %p6101_p4 }
  0x8b   : > { %6111 = shalt.err (!%p6108_p10)
}
  0x8c   : > { %s8360_s26 = smov 8   ;;  %s8361_s9 = smov 128  }
  0x8d   : > { %5491 = dma.hbm_to_vmem [thread:$0]  (!%p6440_p6), %s8359_s6, 2048, %s431_s8, [#allocation11], %s8361_s9, %s8361_s9, %s8360_s26  }
  0x8e   : > { %s8362_s12 = sld [smem:[#allocation53_spill]] }
  0x94   : > { %s6112_s7 = scalar_lea.hbm %s8362_s12, 8192 }
  0x95   : > { %p6113_p1 = scmp.ne.s32.totalorder %s8362_s12, %s6112_s7  ;;  %p6119_p12 = scmp.lt.u32.totalorder %s6112_s7, %s8362_s12 }
  0x97   : > { %p6115_p3 = pnand %p6113_p1, %p6454_p8 }
  0x99   : > { %p6116_p11 = pneg %p6115_p3 }
  0x9b   : > { %p6121_p13 = pnand %p6119_p12, %p6116_p11 }
  0x9d   : > { %6124 = shalt.err (!%p6121_p13)
}
  0x9e   : > { %s6125_s22 = scalar_lea.vmem %s469_s27, 8192  ;;  %p6133_p7 = scmp.lt.s32.totalorder %s469_s27, %s469_s27 }
  0x9f   : > { %p6126_p0 = scmp.ne.s32.totalorder %s469_s27, %s6125_s22  ;;  %p6134_p9 = scmp.lt.s32.totalorder %s6125_s22, %s6125_s22 }
  0xa1   : > { %p6128_p2 = pnand %p6126_p0, %p6454_p8  ;;  %p6135_p5 = por %p6134_p9, %p6133_p7 }
  0xa3   : > { %p6129_p4 = pneg %p6128_p2 }
  0xa5   : > { %p6136_p10 = pnand %p6135_p5, %p6129_p4 }
  0xa7   : > { %6139 = shalt.err (!%p6136_p10)
}
  0xa8   : > { %5497 = dma.hbm_to_vmem [thread:$0]  (!%p6440_p6), %s8362_s12, 8192, %s469_s27, [#allocation14], %s8361_s9, %s8361_s9, %s8360_s26  }
  0xa9   : > { %s4267_s16 = sadd.s32 4294967294, %s6298_s18   ;;  %s47_s23 = sadd.s32 1, %s6294_s17 }
  0xaa   : > { %s56_s28 = sadd.s32 1, %s6286_s15  ;;  %p49_p8 = scmp.ge.s32.totalorder %s47_s23, 2 }
  0xab   : > { %p63_p1 = scmp.ne.s32.totalorder %s6286_s15, %s6282_s30  ;;  %p64_p3 = scmp.eq.s32.totalorder %s6298_s18, 0 }
  0xac   : > { %p69_p11 = scmp.ne.s32.totalorder %s6282_s30, %s6278_s29  ;;  %s8443_s23 = smov (%p49_p8, %s47_s23), 0 }
  0xad   : > { %8363 = sst [smem:[#allocation24_spill]] %s8443_s23  ;;  %p6571_p12 = por %p64_p3, %p63_p1 }
  0xae   : > { %p8365_p13 = scmp.eq.s32.totalorder %s6424_s19, 0  ;;  %s51_s5 = ssub.s32 %s6294_s17, %s8443_s23 }
  0xaf   : > { %p373_p0 = scmp.eq.s32.totalorder %s6424_s19, 1  ;;  %p54_p2 = scmp.eq.s32.totalorder %s51_s5, 0 }
  0xb0   : > { %p6577_p6 = por %p8365_p13, %p69_p11  ;;  %p379_p4 = scmp.eq.s32.totalorder %s4267_s16, 1 }
  0xb1   : > { %p6584_p7 = por %p373_p0, %p63_p1  ;;  %p5514_p9 = scmp.lt.s32.totalorder %s6298_s18, 2 }
  0xb2   : > { %s6590_s13 = scalar_select %p54_p2, %s6286_s15, %s56_s28  }
  0xb3   : > { %s8367_s4 = scalar_select %p6584_p7, 1, 0 }
  0xb4   : > { %p6592_p5 = por %p379_p4, %p69_p11  ;;  %s485_s11 = sand.u32 1, %s6286_s15  }
  0xb5   : > { %s4275_s21 = sshll.u32 %s485_s11, 7  ;;  %s4365_s24 = sshll.u32 %s6294_s17, 11 }
  0xb6   : > { %s8368_s7 = scalar_select %p6592_p5, 1, 0 }
  0xb7   : > { %s6601_s8 = scalar_lea.hbm %s8295_s0, %s4365_s24  ;;  %s489_s25 = scalar_lea.vmem [#allocation4], %s4275_s21 }
  0xb8   : > { %s498_s16 = sshll.u32 %s489_s25, 4  ;;  %p6607_p10 = pnand %p5514_p9, %p6571_p12  ;;  %s6603_s16 = int_to_ptr.vmem [resolvable:$true] %s498_s16 }
  0xb9   : > { %s6614_s14 = scalar_lea.hbm %s8296_s1, %s4365_s24  ;;  %s512_s22 = scalar_lea.vmem [#allocation7], %s4275_s21 }
  0xba   : > { %s6616_s10 = sshll.u32 %s512_s22, 4  ;;  %s6618_s12 = scalar_lea.sflag [#allocation5], %s485_s11  ;;  %s6650_s10 = int_to_ptr.vmem [resolvable:$true] %s6616_s10 }
  0xbb   : > { %s6140_s25 = scalar_lea.hbm %s6601_s8, 2048  ;;  %p6142_p1 = pneg %p6607_p10 }
  0xbc   : > { %p6141_p8 = scmp.ne.s32.totalorder %s6601_s8, %s6140_s25  ;;  %s6145_s6 = scalar_lea.hbm %s8295_s0, 4096 }
  0xbd   : > { %p6146_p12 = scmp.lt.u32.totalorder %s6601_s8, %s8295_s0  ;;  %p6147_p13 = scmp.lt.u32.totalorder %s6145_s6, %s6140_s25 }
  0xbe   : > { %p6143_p3 = pnand %p6142_p1, %p6141_p8  ;;  %p6149_p2 = scmp.lt.u32.totalorder %s6140_s25, %s6601_s8 }
  0xbf   : > { %p6148_p0 = por %p6147_p13, %p6146_p12 }
  0xc0   : > { %p6144_p11 = pneg %p6143_p3 }
  0xc1   : > { %p6150_p4 = por %p6149_p2, %p6148_p0 }
  0xc3   : > { %p6151_p9 = pnand %p6150_p4, %p6144_p11 }
  0xc5   : > { %6154 = shalt.err (!%p6151_p9)
}
  0xc6   : > { %s6155_s11 = scalar_lea.vmem %s6603_s16, 2048  ;;  %s6311_s23 = smov [#allocation4]  }
  0xc7   : > { %p6156_p8 = scmp.ne.s32.totalorder %s6603_s16, %s6155_s11  ;;  %s6160_s21 = sshll.u32 %s6311_s23, 4  ;;  %s6161_s21 = int_to_ptr.vmem [resolvable:$false] %s6160_s21 }
  0xc8   : > { %s6162_s22 = scalar_lea.vmem %s6161_s21, 4096  ;;  %p6163_p7 = scmp.lt.s32.totalorder %s6603_s16, %s6161_s21 }
  0xc9   : > { %p6158_p3 = pnand %p6156_p8, %p6142_p1  ;;  %p6164_p12 = scmp.lt.s32.totalorder %s6162_s22, %s6155_s11 }
  0xcb   : > { %p6159_p5 = pneg %p6158_p3  ;;  %p6165_p13 = por %p6164_p12, %p6163_p7 }
  0xcd   : > { %p6166_p0 = pnand %p6165_p13, %p6159_p5 }
  0xcf   : > { %6169 = shalt.err (!%p6166_p0)
}
  0xd0   : > { %5501 = dma.hbm_to_vmem [thread:$0]  (!%p6607_p10), %s6601_s8, 2048, %s6603_s16, %s6618_s12, %s8361_s9, %s8361_s9, %s8360_s26  }
  0xd1   : > { %s508_s25 = sand.u32 1, %s6298_s18   ;;  %s6170_s6 = scalar_lea.hbm %s6614_s14, 2048 }
  0xd2   : > { %s6653_s3 = scalar_lea.sflag [#allocation8], %s508_s25  ;;  %p6171_p7 = scmp.ne.s32.totalorder %s6614_s14, %s6170_s6 }
  0xd3   : > { %s6175_s11 = scalar_lea.hbm %s8296_s1, 4096  ;;  %p6176_p2 = scmp.lt.u32.totalorder %s6614_s14, %s8296_s1 }
  0xd4   : > { %p6173_p5 = pnand %p6171_p7, %p6142_p1  ;;  %p6177_p4 = scmp.lt.u32.totalorder %s6175_s11, %s6170_s6 }
  0xd5   : > { %p6179_p8 = scmp.lt.u32.totalorder %s6170_s6, %s6614_s14 }
  0xd6   : > { %p6174_p11 = pneg %p6173_p5  ;;  %p6178_p9 = por %p6177_p4, %p6176_p2 }
  0xd8   : > { %p6180_p3 = por %p6179_p8, %p6178_p9 }
  0xda   : > { %p6181_p12 = pnand %p6180_p3, %p6174_p11 }
  0xdc   : > { %6184 = shalt.err (!%p6181_p12)
}
  0xdd   : > { %s6185_s12 = scalar_lea.vmem %s6650_s10, 2048  ;;  %s6312_s8 = smov [#allocation7]  }
  0xde   : > { %p6186_p13 = scmp.ne.s32.totalorder %s6650_s10, %s6185_s12  ;;  %s6190_s16 = sshll.u32 %s6312_s8, 4  ;;  %s6191_s16 = int_to_ptr.vmem [resolvable:$false] %s6190_s16 }
  0xdf   : > { %s6192_s22 = scalar_lea.vmem %s6191_s16, 4096  ;;  %p6193_p5 = scmp.lt.s32.totalorder %s6650_s10, %s6191_s16 }
  0xe0   : > { %p6188_p0 = pnand %p6186_p13, %p6142_p1  ;;  %p6194_p2 = scmp.lt.s32.totalorder %s6192_s22, %s6185_s12 }
  0xe2   : > { %p6189_p7 = pneg %p6188_p0  ;;  %p6195_p4 = por %p6194_p2, %p6193_p5 }
  0xe4   : > { %p6196_p9 = pnand %p6195_p4, %p6189_p7 }
  0xe6   : > { %6199 = shalt.err (!%p6196_p9)
}
  0xe7   : > { %5504 = dma.hbm_to_vmem [thread:$0]  (!%p6607_p10), %s6614_s14, 2048, %s6650_s10, %s6653_s3, %s8361_s9, %s8361_s9, %s8360_s26  }
  0xe8   : > { %p8370_p1 = scmp.ne.s32.totalorder %s8353_s20, 0 }
  0xea   : > { %531 = sbr.rel (%p8370_p1) target bundleno = 3206 (0xc86), region = 76 }
  0xf1   : > { %s6685_s25 = sand.u32 1, %s6282_s30  }
  0xf2   : > { %s6688_s6 = sshll.u32 %s6685_s25, 7  ;;  %s534_s28 = scalar_lea.sflag [#allocation5], %s6685_s25 }
  0xf3   : > { %s6692_s5 = scalar_lea.vmem [#allocation4], %s6688_s6 }
  0xf4   : > { %6253 = dma.done.wait (%p6577_p6), %s534_s28, 2048  }
  0xf5   : > { %6255 = vsyncadd (%p6577_p6), %s534_s28, 4294965248  ;;  %s542_s10 = sand.u32 1, %s6424_s19   ;;  %s6700_s26 = scalar_lea.vmem [#allocation7], %s6688_s6 }
  0xf6   : > { %s543_s20 = scalar_lea.sflag [#allocation8], %s542_s10 }
  0xf7   : > { %6257 = dma.done.wait (%p6577_p6), %s543_s20, 2048  }
  0xf8   : > { %6259 = vsyncadd (%p6577_p6), %s543_s20, 4294965248  ;;  %p8371_p10 = scmp.eq.s32.totalorder %s6424_s19, 0 }
  0xfa   : > { %6261 = dma.done.wait (%p8371_p10), [#allocation8], 2048   ;;  %p8372_p11 = pmov %p8371_p10 }
  0xfb   : > { %p8373_p8 = pmov %p8371_p10 }
  0xfc   : > { %6263 = vsyncadd (%p8372_p11), [#allocation8], 4294965248 }
  0xfd   : > { %6265 = dma.done.wait (%p8373_p8), [#allocation11], 6144   ;;  %p8374_p3 = pmov %p8373_p8 }
  0xff   : > { %6267 = vsyncadd (%p8374_p3), [#allocation11], 4294961152  ;;  %p8375_p12 = pmov %p8374_p3 }
 0x100   : > { %p8376_p13 = pmov %p8374_p3 }
 0x101   : > { %6269 = dma.done.wait (%p8375_p12), [#allocation14], 16384  }
 0x102   : > { %6271 = vsyncadd (%p8376_p13), [#allocation14], 4294950912  ;;  %v622_v0 = vld [vmem:[%s6700_s26] sm:$0xff]  ;;  %v624_v1 = vld [vmem:[%s6700_s26 + $0x10] sm:$0xff]  ;;  %s8377_s3 = sld [smem:[#allocation44_spill]]  ;;  %vm1295_vm0 = vcmask 523264  }
 0x103   : > { %640 = vadd.xlane.f32.xlu0 %v622_v0  ;;  %644 = vadd.xlane.f32.xlu1 %v624_v1  ;;  %v6721_v2 = vld [vmem:[%s6700_s26 + $0x8] sm:$0xff]  ;;  %v6724_v3 = vld [vmem:[%s6700_s26 + $0x18] sm:$0xff]  ;;  %v6729_v4 = vld [vmem:[%s6700_s26 + $0x20] sm:$0xff]  ;;  %s6314_s24 = smov 64   ;;  %vm2532_vm2 = vcmask 1048064   ;;  %s8388_s21 = sld [smem:[#allocation48_spill]] }
 0x104   : > { %v6732_v5 = vld [vmem:[%s6700_s26 + $0x28] sm:$0xff]  ;;  %v6737_v6 = vld [vmem:[%s6700_s26 + $0x30] sm:$0xff]  ;;  %v6740_v7 = vld [vmem:[%s6700_s26 + $0x38] sm:$0xff]  ;;  %s8405_s16 = sld [smem:[#allocation49_spill]]  ;;  %s8414_s27 = sld [smem:[#allocation54_spill]] }
 0x105   : > { %v6745_v8 = vld [vmem:[%s6700_s26 + $0x40] sm:$0xff]  ;;  %v6748_v9 = vld [vmem:[%s6700_s26 + $0x48] sm:$0xff]  ;;  %v6753_v10 = vld [vmem:[%s6700_s26 + $0x50] sm:$0xff]  ;;  %s8192_s14 = scalar_lea.vmem [#allocation16], %s6688_s6  ;;  %s8428_s6 = sld [smem:[#allocation23_spill]] }
 0x106   : > { %v6756_v11 = vld [vmem:[%s6700_s26 + $0x58] sm:$0xff]  ;;  %v6761_v12 = vld [vmem:[%s6700_s26 + $0x60] sm:$0xff]  ;;  %v6764_v13 = vld [vmem:[%s6700_s26 + $0x68] sm:$0xff]  ;;  %s4094_s8 = scalar_lea.sflag [#allocation6], %s6685_s25  ;;  %p8433_p0 = scmp.ne.s32.totalorder %s8367_s4, 0 }
 0x107   : > { %642 = vadd.xlane.f32.xlu0 %v6721_v2  ;;  %646 = vadd.xlane.f32.xlu1 %v6724_v3  ;;  %v6769_v14 = vld [vmem:[%s6700_s26 + $0x70] sm:$0xff]  ;;  %v6772_v15 = vld [vmem:[%s6700_s26 + $0x78] sm:$0xff]  ;;  %v862_v16 = vld [vmem:[#allocation10 + $0x8] sm:$0xff]  ;;  %s8410_s26 = sld [smem:[#allocation52_spill]]  ;;  %s6315_s22 = smov [#allocation16]  }
 0x108   : > { %v864_v17 = vld [vmem:[#allocation10 + $0x18] sm:$0xff]  ;;  %v861_v18 = vld [vmem:[#allocation10] sm:$0xff]  ;;  %v863_v20 = vld [vmem:[#allocation10 + $0x10] sm:$0xff]  ;;  %s6204_s28 = sshll.u32 %s6315_s22, 4  ;;  %s6205_s28 = int_to_ptr.vmem [resolvable:$false] %s6204_s28 }
 0x109   : > { %v5056_v19 = vpack.c.bf16 %v864_v17, %v862_v16  ;;  %v866_v21 = vld [vmem:[#allocation10 + $0x28] sm:$0xff]  ;;  %v868_v22 = vld [vmem:[#allocation10 + $0x38] sm:$0xff]  ;;  %v5058_v23 = vpack.c.bf16 %v863_v20, %v861_v18  ;;  %v865_v25 = vld [vmem:[#allocation10 + $0x20] sm:$0xff] }
 0x10a   : > { %v5060_v24 = vpack.c.bf16 %v868_v22, %v866_v21  ;;  %v867_v26 = vld [vmem:[#allocation10 + $0x30] sm:$0xff]  ;;  %v870_v27 = vld [vmem:[#allocation10 + $0x48] sm:$0xff]  ;;  %v872_v28 = vld [vmem:[#allocation10 + $0x58] sm:$0xff] }
 0x10b   : > { %648 = vadd.xlane.f32.xlu0 %v6729_v4  ;;  %650 = vadd.xlane.f32.xlu1 %v6732_v5  ;;  %v5062_v29 = vpack.c.bf16 %v867_v26, %v865_v25  ;;  %v5064_v30 = vpack.c.bf16 %v872_v28, %v870_v27  ;;  %v869_v31 = vld [vmem:[#allocation10 + $0x40] sm:$0xff]  ;;  %v871_v32 = vld [vmem:[#allocation10 + $0x50] sm:$0xff]  ;;  %v876_v17 = vld [vmem:[#allocation10 + $0x78] sm:$0xff] }
 0x10c   : > { %5057 = vmatprep.subr.bf16.mxu0 %v5056_v19  ;;  %v5066_v33 = vpack.c.bf16 %v871_v32, %v869_v31  ;;  %v873_v21 = vld [vmem:[#allocation10 + $0x60] sm:$0xff]  ;;  %v875_v22 = vld [vmem:[#allocation10 + $0x70] sm:$0xff]  ;;  %v880_v31 = vld [vmem:[#allocation10 + $0x98] sm:$0xff] }
 0x10d   : > { %5059 = vmatpush1.bf16.msra.mxu0 %v5058_v23  ;;  %v5070_v26 = vpack.c.bf16 %v875_v22, %v873_v21  ;;  %v1104_v22 = vld [vmem:[#allocation9 + $0x10] sm:$0xff]  ;;  %vm6978_vm1 = vmpackc.low %vm1295_vm0, %vm1295_vm0 }
 0x10e   : > { %5061 = vmatprep.subr.bf16.mxu0 %v5060_v24 }
 0x10f   : > { %652 = vadd.xlane.f32.xlu0 %v6737_v6  ;;  %654 = vadd.xlane.f32.xlu1 %v6740_v7 }
 0x111   : > { %5063 = vmatpush1.bf16.msra.mxu0 %v5062_v29 }
 0x112   : > { %5065 = vmatprep.subr.bf16.mxu0 %v5064_v30  ;;  %v878_v30 = vld [vmem:[#allocation10 + $0x88] sm:$0xff] }
 0x113   : > { %656 = vadd.xlane.f32.xlu0 %v6745_v8  ;;  %658 = vadd.xlane.f32.xlu1 %v6748_v9 }
 0x115   : > { %5067 = vmatpush1.bf16.msra.mxu0 %v5066_v33 }
 0x117   : > { %660 = vadd.xlane.f32.xlu0 %v6753_v10  ;;  %662 = vadd.xlane.f32.xlu1 %v6756_v11 }
 0x11b   : > { %664 = vadd.xlane.f32.xlu0 %v6761_v12  ;;  %666 = vadd.xlane.f32.xlu1 %v6764_v13 }
 0x11f   : > { %668 = vadd.xlane.f32.xlu0 %v6769_v14  ;;  %670 = vadd.xlane.f32.xlu1 %v6772_v15 }
 0x190   : > { %v641_v34 = vpop.xlane.xlu0 %640  ;;  %v645_v35 = vpop.xlane.xlu1 %644 }
 0x191   : > { %v673_v36 = vmul.f32 0.0078125, %v641_v34  ;;  %v675_v37 = vmul.f32 0.0078125, %v645_v35  ;;  %v877_v35 = vld [vmem:[#allocation10 + $0x80] sm:$0xff] }
 0x193   : > { %v6776_v38 = vsub.f32 %v622_v0, %v673_v36  ;;  %v6778_v39 = vsub.f32 %v624_v1, %v675_v37  ;;  %v879_v36 = vld [vmem:[#allocation10 + $0x90] sm:$0xff]  ;;  %v5072_v37 = vpack.c.bf16 %v880_v31, %v878_v30  ;;  %v1110_v31 = vld [vmem:[#allocation9 + $0x40] sm:$0xff] }
 0x194   : > { %v643_v40 = vpop.xlane.xlu0 %642  ;;  %v647_v41 = vpop.xlane.xlu1 %646 }
 0x195   : > { %v674_v42 = vmul.f32 0.0078125, %v643_v40  ;;  %v705_v43 = vmul.f32 %v6776_v38, %v6776_v38  ;;  %v676_v44 = vmul.f32 0.0078125, %v647_v41  ;;  %v707_v45 = vmul.f32 %v6778_v39, %v6778_v39 }
 0x196   : > { %v5074_v40 = vpack.c.bf16 %v879_v36, %v877_v35  ;;  %v1113_v35 = vld [vmem:[#allocation9 + $0x58] sm:$0xff] }
 0x197   : > { %721 = vadd.xlane.f32.xlu0 %v705_v43  ;;  %v6785_v46 = vsub.f32 %v6721_v2, %v674_v42  ;;  %v6788_v47 = vsub.f32 %v6724_v3, %v676_v44  ;;  %v882_v44 = vld [vmem:[#allocation10 + $0xa8] sm:$0xff] }
 0x198   : > { %v649_v48 = vpop.xlane.xlu0 %648  ;;  %v651_v49 = vpop.xlane.xlu1 %650 }
 0x199   : > { %v677_v50 = vmul.f32 0.0078125, %v649_v48  ;;  %v706_v51 = vmul.f32 %v6785_v46, %v6785_v46  ;;  %v678_v52 = vmul.f32 0.0078125, %v651_v49  ;;  %v708_v53 = vmul.f32 %v6788_v47, %v6788_v47 }
 0x19b   : > { %725 = vadd.xlane.f32.xlu0 %v707_v45  ;;  %723 = vadd.xlane.f32.xlu1 %v706_v51  ;;  %v6795_v54 = vsub.f32 %v6729_v4, %v677_v50  ;;  %v6798_v55 = vsub.f32 %v6732_v5, %v678_v52  ;;  %v884_v45 = vld [vmem:[#allocation10 + $0xb8] sm:$0xff]  ;;  %v881_v51 = vld [vmem:[#allocation10 + $0xa0] sm:$0xff]  ;;  %v883_v52 = vld [vmem:[#allocation10 + $0xb0] sm:$0xff] }
 0x19c   : > { %v653_v56 = vpop.xlane.xlu0 %652  ;;  %v655_v57 = vpop.xlane.xlu1 %654 }
 0x19d   : > { %v679_v58 = vmul.f32 0.0078125, %v653_v56  ;;  %v709_v59 = vmul.f32 %v6795_v54, %v6795_v54  ;;  %v680_v60 = vmul.f32 0.0078125, %v655_v57  ;;  %v710_v61 = vmul.f32 %v6798_v55, %v6798_v55 }
 0x19e   : > { %v5078_v56 = vpack.c.bf16 %v883_v52, %v881_v51  ;;  %v1090_v51 = vld [vmem:[%s6692_s5 + $0x20] sm:$0xff]  ;;  %v1091_v52 = vld [vmem:[%s6692_s5 + $0x28] sm:$0xff] }
 0x19f   : > { %727 = vadd.xlane.f32.xlu1 %v708_v53  ;;  %729 = vadd.xlane.f32.xlu0 %v709_v59  ;;  %v6805_v62 = vsub.f32 %v6737_v6, %v679_v58  ;;  %v6808_v63 = vsub.f32 %v6740_v7, %v680_v60  ;;  %v874_v7 = vld [vmem:[#allocation10 + $0x68] sm:$0xff]  ;;  %v5076_v53 = vpack.c.bf16 %v884_v45, %v882_v44  ;;  %v888_v59 = vld [vmem:[#allocation10 + $0xd8] sm:$0xff]  ;;  %v1086_v44 = vld [vmem:[%s6692_s5] sm:$0xff] }
 0x1a0   : > { %v657_v0 = vpop.xlane.xlu0 %656  ;;  %v659_v1 = vpop.xlane.xlu1 %658  ;;  %v5068_v20 = vpack.c.bf16 %v876_v17, %v874_v7  ;;  %v886_v58 = vld [vmem:[#allocation10 + $0xc8] sm:$0xff]  ;;  %v891_v7 = vld [vmem:[#allocation10 + $0xf0] sm:$0xff]  ;;  %4752 = vmatprep.mubr.f32.mxu1 %v1086_v44 }
 0x1a1   : > { %v681_v2 = vmul.f32 0.0078125, %v657_v0  ;;  %v711_v3 = vmul.f32 %v6805_v62, %v6805_v62  ;;  %v682_v4 = vmul.f32 0.0078125, %v659_v1  ;;  %v712_v5 = vmul.f32 %v6808_v63, %v6808_v63  ;;  %v885_v0 = vld [vmem:[#allocation10 + $0xc0] sm:$0xff]  ;;  %v887_v1 = vld [vmem:[#allocation10 + $0xd0] sm:$0xff] }
 0x1a2   : > { %5069 = vmatprep.subr.bf16.mxu0 %v5068_v20  ;;  %v1103_v20 = vld [vmem:[#allocation9 + $0x8] sm:$0xff] }
 0x1a3   : > { %731 = vadd.xlane.f32.xlu1 %v710_v61  ;;  %733 = vadd.xlane.f32.xlu0 %v711_v3  ;;  %v6815_v16 = vsub.f32 %v6745_v8, %v681_v2  ;;  %v6818_v6 = vsub.f32 %v6748_v9, %v682_v4  ;;  %v5080_v61 = vpack.c.bf16 %v888_v59, %v886_v58  ;;  %v890_v3 = vld [vmem:[#allocation10 + $0xe8] sm:$0xff]  ;;  %v1096_v59 = vld [vmem:[%s6692_s5 + $0x50] sm:$0xff] }
 0x1a4   : > { %v661_v18 = vpop.xlane.xlu0 %660  ;;  %v663_v19 = vpop.xlane.xlu1 %662  ;;  %5071 = vmatpush1.bf16.msra.mxu0 %v5070_v26  ;;  %v5082_v2 = vpack.c.bf16 %v887_v1, %v885_v0  ;;  %v1107_v26 = vld [vmem:[#allocation9 + $0x28] sm:$0xff]  ;;  %v1100_v1 = vld [vmem:[%s6692_s5 + $0x70] sm:$0xff] }
 0x1a5   : > { %v683_v23 = vmul.f32 0.0078125, %v661_v18  ;;  %v713_v24 = vmul.f32 %v6815_v16, %v6815_v16  ;;  %v684_v25 = vmul.f32 0.0078125, %v663_v19  ;;  %v714_v8 = vmul.f32 %v6818_v6, %v6818_v6  ;;  %5073 = vmatprep.subr.bf16.mxu0 %v5072_v37  ;;  %v1102_v19 = vld [vmem:[#allocation9] sm:$0xff]  ;;  %v1095_v58 = vld [vmem:[%s6692_s5 + $0x48] sm:$0xff] }
 0x1a6   : > { %v8319_v18 = vmov 0.0   ;;  %v5088_v21 = vpack.c.bf16 %v1103_v20, %v1102_v19  ;;  %v1114_v37 = vld [vmem:[#allocation9 + $0x60] sm:$0xff]  ;;  %v1099_v0 = vld [vmem:[%s6692_s5 + $0x68] sm:$0xff] }
 0x1a7   : > { %735 = vadd.xlane.f32.xlu1 %v712_v5  ;;  %737 = vadd.xlane.f32.xlu0 %v713_v24  ;;  %v6825_v9 = vsub.f32 %v6753_v10, %v683_v23  ;;  %v6828_v27 = vsub.f32 %v6756_v11, %v684_v25  ;;  %v889_v5 = vld [vmem:[#allocation10 + $0xe0] sm:$0xff]  ;;  %v1105_v23 = vld [vmem:[#allocation9 + $0x18] sm:$0xff] }
 0x1a8   : > { %v665_v28 = vpop.xlane.xlu0 %664  ;;  %v667_v29 = vpop.xlane.xlu1 %666  ;;  %5075 = vmatpush1.bf16.msra.mxu0 %v5074_v40  ;;  %v5086_v17 = vpack.c.bf16 %v891_v7, %v889_v5  ;;  %957 = vmatprep.mubr.f32.mxu0 %v8319_v18  ;;  %v5092_v24 = vpack.c.bf16 %v1105_v23, %v1104_v22  ;;  %v1106_v25 = vld [vmem:[#allocation9 + $0x20] sm:$0xff]  ;;  %v1115_v40 = vld [vmem:[#allocation9 + $0x68] sm:$0xff] }
 0x1a9   : > { %v685_v32 = vmul.f32 0.0078125, %v665_v28  ;;  %v715_v33 = vmul.f32 %v6825_v9, %v6825_v9  ;;  %v686_v34 = vmul.f32 0.0078125, %v667_v29  ;;  %v716_v10 = vmul.f32 %v6828_v27, %v6828_v27  ;;  %5077 = vmatprep.subr.bf16.mxu0 %v5076_v53  ;;  %5089 = vmatprep.subr.bf16.mxu1 %v5088_v21  ;;  %v1108_v28 = vld [vmem:[#allocation9 + $0x30] sm:$0xff]  ;;  %v1109_v29 = vld [vmem:[#allocation9 + $0x38] sm:$0xff] }
 0x1aa   : > { %5091 = vmatpush3.bf16.msra.mxu1 %v5088_v21  ;;  %v5100_v30 = vpack.c.bf16 %v1109_v29, %v1108_v28  ;;  %v1092_v53 = vld [vmem:[%s6692_s5 + $0x30] sm:$0xff] }
 0x1ab   : > { %739 = vadd.xlane.f32.xlu1 %v714_v8  ;;  %741 = vadd.xlane.f32.xlu0 %v715_v33  ;;  %v6835_v11 = vsub.f32 %v6761_v12, %v685_v32  ;;  %v6838_v41 = vsub.f32 %v6764_v13, %v686_v34  ;;  %v5096_v8 = vpack.c.bf16 %v1107_v26, %v1106_v25  ;;  %v1111_v32 = vld [vmem:[#allocation9 + $0x48] sm:$0xff]  ;;  %v1112_v34 = vld [vmem:[#allocation9 + $0x50] sm:$0xff] }
 0x1ac   : > { %v669_v42 = vpop.xlane.xlu0 %668  ;;  %v671_v43 = vpop.xlane.xlu1 %670  ;;  %5079 = vmatpush1.bf16.msra.mxu0 %v5078_v56  ;;  %5093 = vmatprep.subr.bf16.mxu1 %v5092_v24  ;;  %v5104_v33 = vpack.c.bf16 %v1111_v32, %v1110_v31  ;;  %v5108_v36 = vpack.c.bf16 %v1113_v35, %v1112_v34  ;;  %v1093_v56 = vld [vmem:[%s6692_s5 + $0x38] sm:$0xff] }
 0x1ad   : > { %v687_v48 = vmul.f32 0.0078125, %v669_v42  ;;  %v717_v49 = vmul.f32 %v6835_v11, %v6835_v11  ;;  %v688_v50 = vmul.f32 0.0078125, %v671_v43  ;;  %v718_v12 = vmul.f32 %v6838_v41, %v6838_v41  ;;  %5081 = vmatprep.subr.bf16.mxu0 %v5080_v61  ;;  %v1116_v42 = vld [vmem:[#allocation9 + $0x70] sm:$0xff]  ;;  %v1117_v43 = vld [vmem:[#allocation9 + $0x78] sm:$0xff]  ;;  %v1098_v61 = vld [vmem:[%s6692_s5 + $0x60] sm:$0xff] }
 0x1ae   : > { %5095 = vmatpush3.bf16.msra.mxu1 %v5092_v24  ;;  %v5116_v45 = vpack.c.bf16 %v1117_v43, %v1116_v42 }
 0x1af   : > { %743 = vadd.xlane.f32.xlu1 %v716_v10  ;;  %745 = vadd.xlane.f32.xlu0 %v717_v49  ;;  %v6845_v13 = vsub.f32 %v6769_v14, %v687_v48  ;;  %v6848_v57 = vsub.f32 %v6772_v15, %v688_v50  ;;  %v892_v15 = vld [vmem:[#allocation10 + $0xf8] sm:$0xff]  ;;  %v5112_v10 = vpack.c.bf16 %v1115_v40, %v1114_v37  ;;  %v1087_v48 = vld [vmem:[%s6692_s5 + $0x8] sm:$0xff]  ;;  %v1088_v49 = vld [vmem:[%s6692_s5 + $0x10] sm:$0xff] }
 0x1b0   : > { %5083 = vmatpush1.bf16.msra.mxu0 %v5082_v2  ;;  %v5084_v4 = vpack.c.bf16 %v892_v15, %v890_v3  ;;  %5097 = vmatprep.subr.bf16.mxu1 %v5096_v8  ;;  %v1089_v50 = vld [vmem:[%s6692_s5 + $0x18] sm:$0xff] }
 0x1b1   : > { %v719_v60 = vmul.f32 %v6845_v13, %v6845_v13  ;;  %v720_v14 = vmul.f32 %v6848_v57, %v6848_v57  ;;  %v1101_v2 = vld [vmem:[%s6692_s5 + $0x78] sm:$0xff] }
 0x1b2   : > { %5085 = vmatprep.subr.bf16.mxu0 %v5084_v4  ;;  %5099 = vmatpush3.bf16.msra.mxu1 %v5096_v8 }
 0x1b3   : > { %747 = vadd.xlane.f32.xlu1 %v718_v12  ;;  %749 = vadd.xlane.f32.xlu0 %v719_v60  ;;  %v1094_v12 = vld [vmem:[%s6692_s5 + $0x40] sm:$0xff]  ;;  %v1097_v60 = vld [vmem:[%s6692_s5 + $0x58] sm:$0xff] }
 0x1b4   : > { %5087 = vmatpush1.bf16.msra.mxu0 %v5086_v17  ;;  %5101 = vmatprep.subr.bf16.mxu1 %v5100_v30 }
 0x1b6   : > { %5103 = vmatpush3.bf16.msra.mxu1 %v5100_v30 }
 0x1b7   : > { %751 = vadd.xlane.f32.xlu1 %v720_v14  ;;  %5105 = vmatprep.subr.bf16.mxu1 %v5104_v33 }
 0x1ba   : > { %5107 = vmatpush3.bf16.msra.mxu1 %v5104_v33  ;;  %v6874_v33 = vld [vmem:[%s8297_s2] ss:$0 sm:$0xff] }
 0x1bb   : > { %5109 = vmatprep.subr.bf16.mxu1 %v5108_v36 }
 0x1be   : > { %5111 = vmatpush3.bf16.msra.mxu1 %v5108_v36  ;;  %v6880_v36 = vld [vmem:[%s8377_s3] ss:$0 sm:$0xff]  ;;  %s4367_s3 = sshll.u32 %s8428_s6, 11 }
 0x1bf   : > { %5113 = vmatprep.subr.bf16.mxu1 %v5112_v10 }
 0x1c2   : > { %5115 = vmatpush3.bf16.msra.mxu1 %v5112_v10 }
 0x1c3   : > { %5117 = vmatprep.subr.bf16.mxu1 %v5116_v45 }
 0x1c6   : > { %5119 = vmatpush3.bf16.msra.mxu1 %v5116_v45 }
 0x1c9   : > { %4753 = vmatmul.mubr.f32.vlgmr.msra.gmra.mrb[0].mxu1 %v1087_v48 }
 0x1ca   : > { %4755 = vmatprep.mubr.f32.mxu1 %v1088_v49 }
 0x1cd   : > { %4756 = vmatmul.mubr.f32.gmra.mrb[2].mxu1 %v1089_v50 }
 0x1ce   : > { %4758 = vmatprep.mubr.f32.mxu1 %v1090_v51 }
 0x1d1   : > { %4759 = vmatmul.mubr.f32.gmra.mrb[4].mxu1 %v1091_v52 }
 0x1d2   : > { %4761 = vmatprep.mubr.f32.mxu1 %v1092_v53 }
 0x1d5   : > { %4762 = vmatmul.mubr.f32.gmra.mrb[6].mxu1 %v1093_v56 }
 0x1d6   : > { %4764 = vmatprep.mubr.f32.mxu1 %v1094_v12 }
 0x1d9   : > { %4765 = vmatmul.mubr.f32.gmra.mrb[8].mxu1 %v1095_v58 }
 0x1da   : > { %4767 = vmatprep.mubr.f32.mxu1 %v1096_v59 }
 0x1dd   : > { %4768 = vmatmul.mubr.f32.gmra.mrb[10].mxu1 %v1097_v60 }
 0x1de   : > { %4770 = vmatprep.mubr.f32.mxu1 %v1098_v61 }
 0x1e1   : > { %4771 = vmatmul.mubr.f32.gmra.mrb[12].mxu1 %v1099_v0 }
 0x1e2   : > { %4773 = vmatprep.mubr.f32.mxu1 %v1100_v1 }
 0x1e5   : > { %4774 = vmatmul.mubr.f32.gmra.mrb[14].mxu1 %v1101_v2 }
 0x224   : > { %v722_v14 = vpop.xlane.xlu0 %721 }
 0x225   : > { %v753_v3 = vmul.f32 0.0078125, %v722_v14 }
 0x227   : > { %v769_v15 = vadd.f32 1e-05, %v753_v3 }
 0x228   : > { %v724_v4 = vpop.xlane.xlu1 %723  ;;  %v726_v5 = vpop.xlane.xlu0 %725 }
 0x229   : > { %5664 = vrsqrt.f32 %v769_v15  ;;  %v754_v7 = vmul.f32 0.0078125, %v724_v4  ;;  %v755_v17 = vmul.f32 0.0078125, %v726_v5 }
 0x22b   : > { %v770_v19 = vadd.f32 1e-05, %v754_v7  ;;  %v771_v20 = vadd.f32 1e-05, %v755_v17 }
 0x22c   : > { %v728_v21 = vpop.xlane.xlu1 %727  ;;  %v730_v22 = vpop.xlane.xlu0 %729 }
 0x22d   : > { %5666 = vrsqrt.f32 %v770_v19  ;;  %v756_v23 = vmul.f32 0.0078125, %v728_v21  ;;  %v757_v24 = vmul.f32 0.0078125, %v730_v22 }
 0x22e   : > { %5668 = vrsqrt.f32 %v771_v20 }
 0x22f   : > { %v772_v25 = vadd.f32 1e-05, %v756_v23  ;;  %v773_v26 = vadd.f32 1e-05, %v757_v24 }
 0x230   : > { %v732_v8 = vpop.xlane.xlu1 %731  ;;  %v734_v28 = vpop.xlane.xlu0 %733 }
 0x231   : > { %5670 = vrsqrt.f32 %v772_v25  ;;  %v758_v29 = vmul.f32 0.0078125, %v732_v8  ;;  %v759_v32 = vmul.f32 0.0078125, %v734_v28 }
 0x232   : > { %5672 = vrsqrt.f32 %v773_v26 }
 0x233   : > { %v5665_v30 = vpop.eup %5664  ;;  %v774_v31 = vadd.f32 1e-05, %v758_v29  ;;  %v775_v10 = vadd.f32 1e-05, %v759_v32 }
 0x234   : > { %v736_v34 = vpop.xlane.xlu1 %735  ;;  %v801_v35 = vmul.f32 %v5665_v30, %v6776_v38  ;;  %v738_v44 = vpop.xlane.xlu0 %737 }
 0x235   : > { %5674 = vrsqrt.f32 %v774_v31  ;;  %v760_v42 = vmul.f32 0.0078125, %v736_v34  ;;  %v761_v52 = vmul.f32 0.0078125, %v738_v44 }
 0x236   : > { %v823_v37 = vmul.f32 %v6874_v33, %v801_v35  ;;  %5676 = vrsqrt.f32 %v775_v10 }
 0x237   : > { %v5667_v40 = vpop.eup %5666  ;;  %v776_v51 = vadd.f32 1e-05, %v760_v42 }
 0x238   : > { %v5669_v43 = vpop.eup %5668  ;;  %v845_v45 = vadd.f32 %v6880_v36, %v823_v37  ;;  %v802_v48 = vmul.f32 %v5667_v40, %v6785_v46  ;;  %v740_v53 = vpop.xlane.xlu1 %739 }
 0x239   : > { %v803_v49 = vmul.f32 %v5669_v43, %v6778_v39  ;;  %5678 = vrsqrt.f32 %v776_v51  ;;  %v777_v39 = vadd.f32 1e-05, %v761_v52  ;;  %v762_v46 = vmul.f32 0.0078125, %v740_v53  ;;  %v742_v60 = vpop.xlane.xlu0 %741 }
 0x23a   : > { %958 = vmatmul.mubr.f32.vlgmr.msra.gmra.mrb[0].mxu0 %v845_v45  ;;  %v824_v38 = vmul.f32 %v6874_v33, %v802_v48  ;;  %v763_v3 = vmul.f32 0.0078125, %v742_v60 }
 0x23b   : > { %v5671_v50 = vpop.eup %5670  ;;  %963 = vmatprep.mubr.f32.mxu0 %v8319_v18  ;;  %v825_v12 = vmul.f32 %v6874_v33, %v803_v49  ;;  %5680 = vrsqrt.f32 %v777_v39  ;;  %v778_v14 = vadd.f32 1e-05, %v762_v46 }
 0x23c   : > { %v846_v56 = vadd.f32 %v6880_v36, %v824_v38  ;;  %v804_v58 = vmul.f32 %v5671_v50, %v6788_v47  ;;  %v5673_v59 = vpop.eup %5672  ;;  %v744_v47 = vpop.xlane.xlu1 %743  ;;  %v779_v17 = vadd.f32 1e-05, %v763_v3 }
 0x23d   : > { %v847_v61 = vadd.f32 %v6880_v36, %v825_v12  ;;  %v805_v1 = vmul.f32 %v5673_v59, %v6795_v54  ;;  %5682 = vrsqrt.f32 %v778_v14  ;;  %v764_v19 = vmul.f32 0.0078125, %v744_v47  ;;  %v746_v54 = vpop.xlane.xlu0 %745 }
 0x23e   : > { %964 = vmatmul.mubr.f32.gmra.mrb[2].mxu0 %v846_v56  ;;  %v826_v0 = vmul.f32 %v6874_v33, %v804_v58  ;;  %5684 = vrsqrt.f32 %v779_v17  ;;  %v765_v25 = vmul.f32 0.0078125, %v746_v54 }
 0x23f   : > { %969 = vmatprep.mubr.f32.mxu0 %v8319_v18  ;;  %v5675_v2 = vpop.eup %5674  ;;  %v827_v4 = vmul.f32 %v6874_v33, %v805_v1  ;;  %v780_v24 = vadd.f32 1e-05, %v764_v19 }
 0x240   : > { %v848_v15 = vadd.f32 %v6880_v36, %v826_v0  ;;  %v806_v5 = vmul.f32 %v5675_v2, %v6798_v55  ;;  %v5677_v7 = vpop.eup %5676  ;;  %v748_v55 = vpop.xlane.xlu1 %747  ;;  %v781_v30 = vadd.f32 1e-05, %v765_v25 }
 0x241   : > { %v849_v20 = vadd.f32 %v6880_v36, %v827_v4  ;;  %v807_v22 = vmul.f32 %v5677_v7, %v6805_v62  ;;  %5686 = vrsqrt.f32 %v780_v24  ;;  %v766_v31 = vmul.f32 0.0078125, %v748_v55  ;;  %v750_v62 = vpop.xlane.xlu0 %749 }
 0x242   : > { %970 = vmatmul.mubr.f32.gmra.mrb[4].mxu0 %v847_v61  ;;  %v828_v21 = vmul.f32 %v6874_v33, %v806_v5  ;;  %5688 = vrsqrt.f32 %v781_v30  ;;  %v767_v10 = vmul.f32 0.0078125, %v750_v62 }
 0x243   : > { %975 = vmatprep.mubr.f32.mxu0 %v8319_v18  ;;  %v5679_v23 = vpop.eup %5678  ;;  %v829_v8 = vmul.f32 %v6874_v33, %v807_v22  ;;  %v782_v40 = vadd.f32 1e-05, %v766_v31 }
 0x244   : > { %v850_v26 = vadd.f32 %v6880_v36, %v828_v21  ;;  %v808_v28 = vmul.f32 %v5679_v23, %v6808_v63  ;;  %v752_v63 = vpop.xlane.xlu1 %751  ;;  %v783_v48 = vadd.f32 1e-05, %v767_v10 }
 0x245   : > { %v5681_v29 = vpop.eup %5680  ;;  %v851_v32 = vadd.f32 %v6880_v36, %v829_v8  ;;  %5690 = vrsqrt.f32 %v782_v40  ;;  %v768_v49 = vmul.f32 0.0078125, %v752_v63 }
 0x246   : > { %976 = vmatmul.mubr.f32.gmra.mrb[6].mxu0 %v848_v15  ;;  %v830_v34 = vmul.f32 %v6874_v33, %v808_v28  ;;  %v809_v35 = vmul.f32 %v5681_v29, %v6815_v16  ;;  %5692 = vrsqrt.f32 %v783_v48 }
 0x247   : > { %981 = vmatprep.mubr.f32.mxu0 %v8319_v18  ;;  %v5683_v37 = vpop.eup %5682  ;;  %v784_v52 = vadd.f32 1e-05, %v768_v49 }
 0x248   : > { %v852_v42 = vadd.f32 %v6880_v36, %v830_v34  ;;  %v831_v43 = vmul.f32 %v6874_v33, %v809_v35  ;;  %v810_v44 = vmul.f32 %v5683_v37, %v6818_v6  ;;  %v5685_v45 = vpop.eup %5684 }
 0x249   : > { %v811_v50 = vmul.f32 %v5685_v45, %v6825_v9  ;;  %5694 = vrsqrt.f32 %v784_v52 }
 0x24a   : > { %982 = vmatmul.mubr.f32.gmra.mrb[8].mxu0 %v849_v20  ;;  %v853_v16 = vadd.f32 %v6880_v36, %v831_v43  ;;  %v832_v38 = vmul.f32 %v6874_v33, %v810_v44 }
 0x24b   : > { %987 = vmatprep.mubr.f32.mxu0 %v8319_v18  ;;  %v5687_v51 = vpop.eup %5686  ;;  %v833_v53 = vmul.f32 %v6874_v33, %v811_v50 }
 0x24c   : > { %v854_v6 = vadd.f32 %v6880_v36, %v832_v38  ;;  %v812_v56 = vmul.f32 %v5687_v51, %v6828_v27  ;;  %v5689_v12 = vpop.eup %5688 }
 0x24d   : > { %v855_v58 = vadd.f32 %v6880_v36, %v833_v53  ;;  %v813_v59 = vmul.f32 %v5689_v12, %v6835_v11 }
 0x24e   : > { %988 = vmatmul.mubr.f32.gmra.mrb[10].mxu0 %v850_v26  ;;  %v834_v9 = vmul.f32 %v6874_v33, %v812_v56 }
 0x24f   : > { %993 = vmatprep.mubr.f32.mxu0 %v8319_v18  ;;  %v5691_v39 = vpop.eup %5690  ;;  %v835_v60 = vmul.f32 %v6874_v33, %v813_v59 }
 0x250   : > { %v856_v46 = vadd.f32 %v6880_v36, %v834_v9  ;;  %v814_v27 = vmul.f32 %v5691_v39, %v6838_v41  ;;  %v5693_v61 = vpop.eup %5692 }
 0x251   : > { %v857_v0 = vadd.f32 %v6880_v36, %v835_v60  ;;  %v815_v11 = vmul.f32 %v5693_v61, %v6845_v13 }
 0x252   : > { %994 = vmatmul.mubr.f32.gmra.mrb[12].mxu0 %v851_v32  ;;  %v836_v1 = vmul.f32 %v6874_v33, %v814_v27 }
 0x253   : > { %999 = vmatprep.mubr.f32.mxu0 %v8319_v18  ;;  %v5695_v2 = vpop.eup %5694  ;;  %v837_v3 = vmul.f32 %v6874_v33, %v815_v11 }
 0x254   : > { %v858_v14 = vadd.f32 %v6880_v36, %v836_v1  ;;  %v816_v41 = vmul.f32 %v5695_v2, %v6848_v57 }
 0x255   : > { %v859_v47 = vadd.f32 %v6880_v36, %v837_v3 }
 0x256   : > { %1000 = vmatmul.mubr.f32.gmra.mrb[14].mxu0 %v852_v42  ;;  %v838_v15 = vmul.f32 %v6874_v33, %v816_v41 }
 0x257   : > { %1005 = vmatprep.mubr.f32.mxu0 %v8319_v18 }
 0x258   : > { %v860_v13 = vadd.f32 %v6880_v36, %v838_v15 }
 0x25a   : > { %1006 = vmatmul.mubr.f32.gmra.mrb[16].mxu0 %v853_v16 }
 0x25b   : > { %1011 = vmatprep.mubr.f32.mxu0 %v8319_v18 }
 0x25e   : > { %1012 = vmatmul.mubr.f32.gmra.mrb[18].mxu0 %v854_v6 }
 0x25f   : > { %1017 = vmatprep.mubr.f32.mxu0 %v8319_v18 }
 0x262   : > { %1018 = vmatmul.mubr.f32.gmra.mrb[20].mxu0 %v855_v58 }
 0x263   : > { %1023 = vmatprep.mubr.f32.mxu0 %v8319_v18 }
 0x266   : > { %1024 = vmatmul.mubr.f32.gmra.mrb[22].mxu0 %v856_v46 }
 0x267   : > { %1029 = vmatprep.mubr.f32.mxu0 %v8319_v18 }
 0x26a   : > { %1030 = vmatmul.mubr.f32.gmra.mrb[24].mxu0 %v857_v0 }
 0x26b   : > { %1035 = vmatprep.mubr.f32.mxu0 %v8319_v18 }
 0x26e   : > { %1036 = vmatmul.mubr.f32.gmra.mrb[26].mxu0 %v858_v14 }
 0x26f   : > { %1041 = vmatprep.mubr.f32.mxu0 %v8319_v18 }
 0x272   : > { %1042 = vmatmul.mubr.f32.gmra.mrb[28].mxu0 %v859_v47 }
 0x273   : > { %1047 = vmatprep.mubr.f32.mxu0 %v8319_v18 }
 0x276   : > { %1048 = vmatmul.mubr.f32.gmra.mrb[30].mxu0 %v860_v13 }
 0x29c   : > { %v6944_v4 = vpop.f32.mrb[0].mxu1 }
 0x29d   : > { %v6946_v5 = vpop.f32.mrb[1].mxu1 }
 0x29e   : > { %4808 = vmatprep.mubr.msk.f32.mxu0 %vm1295_vm0, %v6946_v5 }
 0x2a0   : > { %v6950_v57 = vpop.f32.mrb[2].mxu1 }
 0x2a1   : > { %v6952_v7 = vpop.f32.mrb[3].mxu1 }
 0x2a4   : > { %v6954_v17 = vpop.f32.mrb[4].mxu1 }
 0x2a5   : > { %v6956_v33 = vpop.f32.mrb[5].mxu1 }
 0x2a8   : > { %v6958_v19 = vpop.f32.mrb[6].mxu1 }
 0x2a9   : > { %v6960_v36 = vpop.f32.mrb[7].mxu1 }
 0x2ac   : > { %v6962_v54 = vpop.f32.mrb[8].mxu1 }
 0x2ad   : > { %v6964_v20 = vpop.f32.mrb[9].mxu1 }
 0x2b0   : > { %v6966_v21 = vpop.f32.mrb[10].mxu1 }
 0x2b1   : > { %v6968_v22 = vpop.f32.mrb[11].mxu1 }
 0x2b4   : > { %v6970_v23 = vpop.f32.mrb[12].mxu1 }
 0x2b5   : > { %v6972_v24 = vpop.f32.mrb[13].mxu1 }
 0x2b8   : > { %v6995_v37 = vpop.f32.mrb[14].mxu1 }
 0x2b9   : > { %v6999_v42 = vpop.f32.mrb[15].mxu1 }
 0x30d   : > { %v959_v25 = vpop.f32.mrb[0].mxu0 }
 0x30e   : > { %v6974_v55 = vpop.f32.mrb[1].mxu0 }
 0x311   : > { %v965_v26 = vpop.f32.mrb[2].mxu0 }
 0x312   : > { %v5584_v28 = vpack.i.bf16 %v965_v26, %v959_v25  ;;  %v5120_v29 = vpack.c.bf16 %v965_v26, %v959_v25  ;;  %v6982_v30 = vpop.f32.mrb[3].mxu0 }
 0x313   : > { %v5168_v62 = vpack.c.bf16 %v6982_v30, %v6974_v55 }
 0x314   : > { %5585 = vrot.lane.b32.xlu0 %v5584_v28, %s6314_s24  ;;  %5122 = vmatprep.subr.msk.bf16.mxu0 %vm6978_vm1, %v5120_v29 }
 0x315   : > { %v971_v32 = vpop.f32.mrb[4].mxu0  ;;  %5125 = vmatpush3.bf16.xpose.msk.msra.mxu0 %vm6978_vm1, %v5120_v29  ;;  %5169 = vmatprep.subr.bf16.mxu1 %v5168_v62 }
 0x316   : > { %v6993_v34 = vpop.f32.mrb[5].mxu0  ;;  %5171 = vmatpush3.bf16.msra.mxu1 %v5168_v62 }
 0x319   : > { %v977_v35 = vpop.f32.mrb[6].mxu0 }
 0x31a   : > { %v5589_v40 = vpack.i.bf16 %v977_v35, %v971_v32  ;;  %v5126_v10 = vpack.c.bf16 %v977_v35, %v971_v32  ;;  %v6997_v63 = vpop.f32.mrb[7].mxu0 }
 0x31b   : > { %v5172_v44 = vpack.c.bf16 %v6997_v63, %v6993_v34 }
 0x31c   : > { %5590 = vrot.lane.b32.xlu1 %v5589_v40, %s6314_s24  ;;  %5128 = vmatprep.subr.msk.bf16.mxu0 %vm6978_vm1, %v5126_v10 }
 0x31d   : > { %v983_v45 = vpop.f32.mrb[8].mxu0  ;;  %5131 = vmatpush3.bf16.xpose.msk.msra.mxu0 %vm6978_vm1, %v5126_v10  ;;  %5173 = vmatprep.subr.bf16.mxu1 %v5172_v44 }
 0x31e   : > { %v7010_v48 = vpop.f32.mrb[9].mxu0  ;;  %5175 = vmatpush3.bf16.msra.mxu1 %v5172_v44 }
 0x321   : > { %v989_v49 = vpop.f32.mrb[10].mxu0 }
 0x322   : > { %v5594_v16 = vpack.i.bf16 %v989_v49, %v983_v45  ;;  %v5132_v38 = vpack.c.bf16 %v989_v49, %v983_v45  ;;  %v7012_v50 = vpop.f32.mrb[11].mxu0 }
 0x323   : > { %v5176_v52 = vpack.c.bf16 %v7012_v50, %v7010_v48 }
 0x324   : > { %5595 = vrot.lane.b32.xlu1 %v5594_v16, %s6314_s24  ;;  %5134 = vmatprep.subr.msk.bf16.mxu0 %vm6978_vm1, %v5132_v38 }
 0x325   : > { %v7021_v6 = vpop.f32.mrb[12].mxu0  ;;  %5137 = vmatpush3.bf16.xpose.msk.msra.mxu0 %vm6978_vm1, %v5132_v38  ;;  %5177 = vmatprep.subr.bf16.mxu1 %v5176_v52 }
 0x326   : > { %v7025_v53 = vpop.f32.mrb[13].mxu0  ;;  %5179 = vmatpush3.bf16.msra.mxu1 %v5176_v52 }
 0x329   : > { %v7027_v56 = vpop.f32.mrb[14].mxu0 }
 0x32a   : > { %v5599_v12 = vpack.i.bf16 %v7027_v56, %v7021_v6  ;;  %v5138_v58 = vpack.c.bf16 %v7027_v56, %v7021_v6  ;;  %v7033_v9 = vpop.f32.mrb[15].mxu0 }
 0x32b   : > { %v5639_v59 = vpack.i.bf16 %v7033_v9, %v7025_v53  ;;  %v5180_v39 = vpack.c.bf16 %v7033_v9, %v7025_v53 }
 0x32c   : > { %5140 = vmatprep.subr.msk.bf16.mxu0 %vm6978_vm1, %v5138_v58 }
 0x32d   : > { %v7041_v46 = vpop.f32.mrb[16].mxu0  ;;  %5143 = vmatpush3.bf16.xpose.msk.msra.mxu0 %vm6978_vm1, %v5138_v58  ;;  %5181 = vmatprep.subr.bf16.mxu1 %v5180_v39 }
 0x32e   : > { %v7045_v60 = vpop.f32.mrb[17].mxu0  ;;  %5183 = vmatpush3.bf16.msra.mxu1 %v5180_v39 }
 0x331   : > { %v7047_v27 = vpop.f32.mrb[18].mxu0 }
 0x332   : > { %v5604_v61 = vpack.i.bf16 %v7047_v27, %v7041_v46  ;;  %v5144_v0 = vpack.c.bf16 %v7047_v27, %v7041_v46  ;;  %v7053_v1 = vpop.f32.mrb[19].mxu0 }
 0x333   : > { %v5184_v2 = vpack.c.bf16 %v7053_v1, %v7045_v60 }
 0x334   : > { %5146 = vmatprep.subr.msk.bf16.mxu0 %vm6978_vm1, %v5144_v0 }
 0x335   : > { %v7061_v14 = vpop.f32.mrb[20].mxu0  ;;  %5149 = vmatpush3.bf16.xpose.msk.msra.mxu0 %vm6978_vm1, %v5144_v0  ;;  %5185 = vmatprep.subr.bf16.mxu1 %v5184_v2 }
 0x336   : > { %v7065_v3 = vpop.f32.mrb[21].mxu0  ;;  %5187 = vmatpush3.bf16.msra.mxu1 %v5184_v2 }
 0x339   : > { %v7067_v41 = vpop.f32.mrb[22].mxu0 }
 0x33a   : > { %v5609_v47 = vpack.i.bf16 %v7067_v41, %v7061_v14  ;;  %v5150_v15 = vpack.c.bf16 %v7067_v41, %v7061_v14  ;;  %v7073_v13 = vpop.f32.mrb[23].mxu0 }
 0x33b   : > { %v5188_v26 = vpack.c.bf16 %v7073_v13, %v7065_v3 }
 0x33c   : > { %5152 = vmatprep.subr.msk.bf16.mxu0 %vm6978_vm1, %v5150_v15 }
 0x33d   : > { %v7081_v28 = vpop.f32.mrb[24].mxu0  ;;  %5155 = vmatpush3.bf16.xpose.msk.msra.mxu0 %vm6978_vm1, %v5150_v15  ;;  %5189 = vmatprep.subr.bf16.mxu1 %v5188_v26 }
 0x33e   : > { %v7085_v29 = vpop.f32.mrb[25].mxu0  ;;  %5191 = vmatpush3.bf16.msra.mxu1 %v5188_v26 }
 0x341   : > { %v7087_v62 = vpop.f32.mrb[26].mxu0 }
 0x342   : > { %v5614_v32 = vpack.i.bf16 %v7087_v62, %v7081_v28  ;;  %v5156_v35 = vpack.c.bf16 %v7087_v62, %v7081_v28  ;;  %v7093_v40 = vpop.f32.mrb[27].mxu0 }
 0x343   : > { %v5192_v44 = vpack.c.bf16 %v7093_v40, %v7085_v29 }
 0x344   : > { %5158 = vmatprep.subr.msk.bf16.mxu0 %vm6978_vm1, %v5156_v35 }
 0x345   : > { %v7101_v45 = vpop.f32.mrb[28].mxu0  ;;  %5161 = vmatpush3.bf16.xpose.msk.msra.mxu0 %vm6978_vm1, %v5156_v35  ;;  %5193 = vmatprep.subr.bf16.mxu1 %v5192_v44 }
 0x346   : > { %v7105_v49 = vpop.f32.mrb[29].mxu0  ;;  %5195 = vmatpush3.bf16.msra.mxu1 %v5192_v44 }
 0x349   : > { %v7107_v16 = vpop.f32.mrb[30].mxu0 }
 0x34a   : > { %v5619_v38 = vpack.i.bf16 %v7107_v16, %v7101_v45  ;;  %v5162_v52 = vpack.c.bf16 %v7107_v16, %v7101_v45  ;;  %v7113_v58 = vpop.f32.mrb[31].mxu0 }
 0x34b   : > { %v5196_v0 = vpack.c.bf16 %v7113_v58, %v7105_v49 }
 0x34c   : > { %5164 = vmatprep.subr.msk.bf16.mxu0 %vm6978_vm1, %v5162_v52 }
 0x34d   : > { %5167 = vmatpush3.bf16.xpose.msk.msra.mxu0 %vm6978_vm1, %v5162_v52  ;;  %5197 = vmatprep.subr.bf16.mxu1 %v5196_v0 }
 0x34e   : > { %5199 = vmatpush3.bf16.msra.mxu1 %v5196_v0 }
 0x354   : > { %4809 = vmatmul.mubr.msk.f32.vlgmr.msra.gmra.mrb[32].mxu0 %vm1295_vm0, %v6944_v4 }
 0x355   : > { %4811 = vmatprep.mubr.msk.f32.mxu0 %vm1295_vm0, %v6952_v7 }
 0x358   : > { %4812 = vmatmul.mubr.msk.f32.gmra.mrb[34].mxu0 %vm1295_vm0, %v6950_v57 }
 0x359   : > { %4814 = vmatprep.mubr.msk.f32.mxu0 %vm1295_vm0, %v6956_v33 }
 0x35c   : > { %4815 = vmatmul.mubr.msk.f32.gmra.mrb[36].mxu0 %vm1295_vm0, %v6954_v17 }
 0x35d   : > { %4817 = vmatprep.mubr.msk.f32.mxu0 %vm1295_vm0, %v6960_v36 }
 0x360   : > { %4818 = vmatmul.mubr.msk.f32.gmra.mrb[38].mxu0 %vm1295_vm0, %v6958_v19 }
 0x361   : > { %4820 = vmatprep.mubr.msk.f32.mxu0 %vm1295_vm0, %v6964_v20 }
 0x364   : > { %4821 = vmatmul.mubr.msk.f32.gmra.mrb[40].mxu0 %vm1295_vm0, %v6962_v54 }
 0x365   : > { %4823 = vmatprep.mubr.msk.f32.mxu0 %vm1295_vm0, %v6968_v22 }
 0x368   : > { %4824 = vmatmul.mubr.msk.f32.gmra.mrb[42].mxu0 %vm1295_vm0, %v6966_v21 }
 0x369   : > { %4826 = vmatprep.mubr.msk.f32.mxu0 %vm1295_vm0, %v6972_v24 }
 0x36c   : > { %4827 = vmatmul.mubr.msk.f32.gmra.mrb[44].mxu0 %vm1295_vm0, %v6970_v23 }
 0x36d   : > { %4829 = vmatprep.mubr.msk.f32.mxu0 %vm1295_vm0, %v6999_v42 }
 0x370   : > { %4830 = vmatmul.mubr.msk.f32.gmra.mrb[46].mxu0 %vm1295_vm0, %v6995_v37 }
 0x386   : > { %v5586_v2 = vpop.permute.xlu0 %5585 }
 0x387   : > { %v5588_v15 = vunpack.i.h.bf16 %v5586_v2  ;;  %v5587_v26 = vunpack.i.l.bf16 %v5586_v2 }
 0x389   : > { %v7153_v35 = vpack.c.bf16 %v5588_v15, %v5587_v26 }
 0x38b   : > { %5202 = vmatprep.subr.msk.bf16.mxu1 %vm6978_vm1, %v7153_v35 }
 0x427   : > { %v4810_v44 = vpop.f32.mrb[32].mxu0 }
 0x428   : > { %1539 = vmax.xlane.f32.xlu1 %v4810_v44  ;;  %v1458_v45 = vpop.f32.mrb[33].mxu0 }
 0x429   : > { %1537 = vmax.xlane.f32.xlu0 %v1458_v45 }
 0x42b   : > { %v7158_v16 = vpop.f32.mrb[34].mxu0 }
 0x42c   : > { %v7160_v52 = vpop.f32.mrb[35].mxu0 }
 0x42f   : > { %v7162_v0 = vpop.f32.mrb[36].mxu0 }
 0x430   : > { %v7164_v39 = vpop.f32.mrb[37].mxu0 }
 0x433   : > { %v7166_v10 = vpop.f32.mrb[38].mxu0 }
 0x434   : > { %v7168_v2 = vpop.f32.mrb[39].mxu0 }
 0x437   : > { %v7170_v15 = vpop.f32.mrb[40].mxu0 }
 0x438   : > { %v7172_v26 = vpop.f32.mrb[41].mxu0 }
 0x439   : > { %5600 = vrot.lane.b32.xlu1 %v5599_v12, %s6314_s24 }
 0x43b   : > { %v7178_v18 = vpop.f32.mrb[42].mxu0 }
 0x43c   : > { %v7180_v25 = vpop.f32.mrb[43].mxu0 }
 0x43f   : > { %5605 = vrot.lane.b32.xlu0 %v5604_v61, %s6314_s24  ;;  %v7186_v11 = vpop.f32.mrb[44].mxu0 }
 0x440   : > { %v7188_v51 = vpop.f32.mrb[45].mxu0 }
 0x443   : > { %v7190_v43 = vpop.f32.mrb[46].mxu0 }
 0x444   : > { %v7192_v31 = vpop.f32.mrb[47].mxu0 }
 0x45d   : > { %1543 = vmax.xlane.f32.xlu1 %v7158_v16 }
 0x45e   : > { %1547 = vmax.xlane.f32.xlu0 %v7162_v0 }
 0x461   : > { %1541 = vmax.xlane.f32.xlu1 %v7160_v52 }
 0x462   : > { %1545 = vmax.xlane.f32.xlu0 %v7164_v39 }
 0x465   : > { %1561 = vmax.xlane.f32.xlu1 %v7188_v51 }
 0x466   : > { %1551 = vmax.xlane.f32.xlu0 %v7166_v10 }
 0x46a   : > { %1549 = vmax.xlane.f32.xlu0 %v7168_v2 }
 0x46e   : > { %1555 = vmax.xlane.f32.xlu0 %v7170_v15 }
 0x472   : > { %1553 = vmax.xlane.f32.xlu0 %v7172_v26 }
 0x476   : > { %1559 = vmax.xlane.f32.xlu0 %v7178_v18  ;;  %5610 = vrot.lane.b32.xlu1 %v5609_v47, %s6314_s24 }
 0x47a   : > { %1557 = vmax.xlane.f32.xlu0 %v7180_v25  ;;  %5615 = vrot.lane.b32.xlu1 %v5614_v32, %s6314_s24 }
 0x47e   : > { %1563 = vmax.xlane.f32.xlu0 %v7186_v11  ;;  %5620 = vrot.lane.b32.xlu1 %v5619_v38, %s6314_s24 }
 0x482   : > { %1842 = vrot.lane.b32.xlu1 %v6946_v5, %s6314_s24  ;;  %1565 = vmax.xlane.f32.xlu0 %v7192_v31  ;;  %v8380_v5 = vpack.i.bf16 %v6982_v30, %v6974_v55 }
 0x486   : > { %1846 = vrot.lane.b32.xlu1 %v6952_v7, %s6314_s24  ;;  %1567 = vmax.xlane.f32.xlu0 %v7190_v43  ;;  %v8381_v7 = vpack.i.bf16 %v6997_v63, %v6993_v34 }
 0x48a   : > { %1848 = vrot.lane.b32.xlu1 %v6950_v57, %s6314_s24 }
 0x48e   : > { %1850 = vrot.lane.b32.xlu1 %v6956_v33, %s6314_s24 }
 0x492   : > { %1852 = vrot.lane.b32.xlu1 %v6954_v17, %s6314_s24 }
 0x496   : > { %1854 = vrot.lane.b32.xlu1 %v6960_v36, %s6314_s24 }
 0x49a   : > { %1856 = vrot.lane.b32.xlu1 %v6958_v19, %s6314_s24 }
 0x49c   : > { %1844 = vrot.lane.b32.xlu0 %v6944_v4, %s6314_s24  ;;  %v5591_v4 = vpop.permute.xlu1 %5590 }
 0x49d   : > { %v5592_v55 = vunpack.i.l.bf16 %v5591_v4 }
 0x49e   : > { %1860 = vrot.lane.b32.xlu1 %v6962_v54, %s6314_s24 }
 0x4a0   : > { %1858 = vrot.lane.b32.xlu0 %v6964_v20, %s6314_s24  ;;  %v5596_v57 = vpop.permute.xlu1 %5595  ;;  %v8382_v20 = vpack.i.bf16 %v7012_v50, %v7010_v48 }
 0x4a1   : > { %v5598_v63 = vunpack.i.h.bf16 %v5596_v57 }
 0x4a2   : > { %1864 = vrot.lane.b32.xlu1 %v6966_v21, %s6314_s24 }
 0x4a4   : > { %1862 = vrot.lane.b32.xlu0 %v6968_v22, %s6314_s24  ;;  %v8383_v22 = vpack.i.bf16 %v7053_v1, %v7045_v60 }
 0x4a6   : > { %1868 = vrot.lane.b32.xlu1 %v6970_v23, %s6314_s24  ;;  %v8384_v23 = vpack.i.bf16 %v7073_v13, %v7065_v3 }
 0x4a8   : > { %1866 = vrot.lane.b32.xlu0 %v6972_v24, %s6314_s24  ;;  %v5593_v24 = vunpack.i.h.bf16 %v5591_v4 }
 0x4aa   : > { %1872 = vrot.lane.b32.xlu1 %v6995_v37, %s6314_s24  ;;  %v5206_v37 = vpack.c.bf16 %v5593_v24, %v5592_v55 }
 0x4ac   : > { %1870 = vrot.lane.b32.xlu0 %v6999_v42, %s6314_s24  ;;  %v5597_v42 = vunpack.i.l.bf16 %v5596_v57 }
 0x4ae   : > { %5640 = vrot.lane.b32.xlu1 %v5639_v59, %s6314_s24  ;;  %v5212_v48 = vpack.c.bf16 %v5598_v63, %v5597_v42 }
 0x4b0   : > { %5625 = vrot.lane.b32.xlu0 %v8380_v5, %s6314_s24 }
 0x4b4   : > { %5630 = vrot.lane.b32.xlu0 %v8381_v7, %s6314_s24 }
 0x4b5   : > { %v1540_v17 = vpop.xlane.xlu1 %1539 }
 0x4b6   : > { %v1570_v33 = vsub.f32 %v4810_v44, %v1540_v17  ;;  %v1538_v19 = vpop.xlane.xlu0 %1537 }
 0x4b7   : > { %v1569_v36 = vsub.f32 %v1458_v45, %v1538_v19 }
 0x4b8   : > { %v1587_v54 = vmul.f32 1.442695, %v1570_v33  ;;  %5635 = vrot.lane.b32.xlu0 %v8382_v20, %s6314_s24 }
 0x4b9   : > { %v1585_v21 = vmul.f32 1.442695, %v1569_v36  ;;  %v5601_v50 = vpop.permute.xlu1 %5600 }
 0x4ba   : > { %v5603_v6 = vunpack.i.h.bf16 %v5601_v50  ;;  %v5602_v53 = vunpack.i.l.bf16 %v5601_v50  ;;  %v5606_v12 = vpop.permute.xlu0 %5605 }
 0x4bb   : > { %5696 = vpow2.f32 %v1585_v21  ;;  %v5608_v9 = vunpack.i.h.bf16 %v5606_v12  ;;  %v5607_v59 = vunpack.i.l.bf16 %v5606_v12 }
 0x4bc   : > { %5698 = vpow2.f32 %v1587_v54  ;;  %5645 = vrot.lane.b32.xlu0 %v8383_v22, %s6314_s24  ;;  %v5218_v56 = vpack.c.bf16 %v5603_v6, %v5602_v53 }
 0x4bd   : > { %v5224_v46 = vpack.c.bf16 %v5608_v9, %v5607_v59 }
 0x4c0   : > { %5650 = vrot.lane.b32.xlu0 %v8384_v23, %s6314_s24 }
 0x4c5   : > { %v7273_v30 = vpop.eup %5696 }
 0x4c6   : > { %v7275_v34 = vpop.eup %5698  ;;  %4864 = vmatprep.mubr.f32.mxu1 %v7273_v30 }
 0x4c7   : > { %4865 = vmatmul.mubr.f32.vlgmr.msra.gmra.mrb[16].mxu1 %v7275_v34 }
 0x4c8   : > { %5205 = vmatpush3.bf16.xpose.msk.msra.mxu1 %vm6978_vm1, %v7153_v35 }
 0x4c9   : > { %5208 = vmatprep.subr.msk.bf16.mxu1 %vm6978_vm1, %v5206_v37 }
 0x4d0   : > { %5211 = vmatpush3.bf16.xpose.msk.msra.mxu1 %vm6978_vm1, %v5206_v37 }
 0x4d1   : > { %5214 = vmatprep.subr.msk.bf16.mxu1 %vm6978_vm1, %v5212_v48 }
 0x4d8   : > { %5217 = vmatpush3.bf16.xpose.msk.msra.mxu1 %vm6978_vm1, %v5212_v48 }
 0x4d9   : > { %5220 = vmatprep.subr.msk.bf16.mxu1 %vm6978_vm1, %v5218_v56 }
 0x4e0   : > { %5223 = vmatpush3.bf16.xpose.msk.msra.mxu1 %vm6978_vm1, %v5218_v56 }
 0x4e1   : > { %5226 = vmatprep.subr.msk.bf16.mxu1 %vm6978_vm1, %v5224_v46 }
 0x4e8   : > { %5229 = vmatpush3.bf16.xpose.msk.msra.mxu1 %vm6978_vm1, %v5224_v46 }
 0x4ea   : > { %v1544_v60 = vpop.xlane.xlu1 %1543 }
 0x4eb   : > { %v1572_v27 = vsub.f32 %v7158_v16, %v1544_v60  ;;  %v1548_v61 = vpop.xlane.xlu0 %1547 }
 0x4ec   : > { %v1574_v47 = vsub.f32 %v7162_v0, %v1548_v61 }
 0x4ed   : > { %v1591_v1 = vmul.f32 1.442695, %v1572_v27 }
 0x4ee   : > { %v1542_v14 = vpop.xlane.xlu1 %1541  ;;  %v1595_v35 = vmul.f32 1.442695, %v1574_v47 }
 0x4ef   : > { %v1571_v3 = vsub.f32 %v7160_v52, %v1542_v14  ;;  %v1546_v41 = vpop.xlane.xlu0 %1545  ;;  %5700 = vpow2.f32 %v1591_v1 }
 0x4f0   : > { %v1573_v13 = vsub.f32 %v7164_v39, %v1546_v41 }
 0x4f1   : > { %v1589_v28 = vmul.f32 1.442695, %v1571_v3 }
 0x4f2   : > { %v1593_v62 = vmul.f32 1.442695, %v1573_v13  ;;  %v1562_v32 = vpop.xlane.xlu1 %1561 }
 0x4f3   : > { %5702 = vpow2.f32 %v1589_v28  ;;  %v1552_v38 = vpop.xlane.xlu0 %1551  ;;  %v1581_v53 = vsub.f32 %v7188_v51, %v1562_v32 }
 0x4f4   : > { %5704 = vpow2.f32 %v1593_v62  ;;  %v1576_v44 = vsub.f32 %v7166_v10, %v1552_v38 }
 0x4f5   : > { %5706 = vpow2.f32 %v1595_v35  ;;  %v1609_v60 = vmul.f32 1.442695, %v1581_v53 }
 0x4f6   : > { %v5611_v45 = vpop.permute.xlu1 %5610  ;;  %v1599_v0 = vmul.f32 1.442695, %v1576_v44 }
 0x4f7   : > { %v5613_v16 = vunpack.i.h.bf16 %v5611_v45  ;;  %v5612_v4 = vunpack.i.l.bf16 %v5611_v45  ;;  %v1550_v5 = vpop.xlane.xlu0 %1549 }
 0x4f8   : > { %v1575_v52 = vsub.f32 %v7168_v2, %v1550_v5 }
 0x4f9   : > { %v5230_v57 = vpack.c.bf16 %v5613_v16, %v5612_v4  ;;  %v7306_v36 = vpop.eup %5700 }
 0x4fa   : > { %v1597_v39 = vmul.f32 1.442695, %v1575_v52  ;;  %v5616_v7 = vpop.permute.xlu1 %5615 }
 0x4fb   : > { %v5618_v17 = vunpack.i.h.bf16 %v5616_v7  ;;  %v5617_v33 = vunpack.i.l.bf16 %v5616_v7  ;;  %v1556_v19 = vpop.xlane.xlu0 %1555  ;;  %5232 = vmatprep.subr.msk.bf16.mxu1 %vm6978_vm1, %v5230_v57 }
 0x4fc   : > { %5708 = vpow2.f32 %v1597_v39  ;;  %5235 = vmatpush3.bf16.xpose.msk.msra.mxu1 %vm6978_vm1, %v5230_v57  ;;  %v1578_v54 = vsub.f32 %v7170_v15, %v1556_v19 }
 0x4fd   : > { %v7310_v10 = vpop.eup %5702  ;;  %5710 = vpow2.f32 %v1599_v0  ;;  %v5236_v2 = vpack.c.bf16 %v5618_v17, %v5617_v33 }
 0x4fe   : > { %v7313_v20 = vpop.eup %5704  ;;  %v5621_v21 = vpop.permute.xlu1 %5620  ;;  %4867 = vmatprep.mubr.f32.mxu1 %v7310_v10  ;;  %v1603_v37 = vmul.f32 1.442695, %v1578_v54 }
 0x4ff   : > { %v5623_v22 = vunpack.i.h.bf16 %v5621_v21  ;;  %v5622_v23 = vunpack.i.l.bf16 %v5621_v21  ;;  %4868 = vmatmul.mubr.f32.gmra.mrb[18].mxu1 %v7306_v36  ;;  %v1554_v24 = vpop.xlane.xlu0 %1553  ;;  %5238 = vmatprep.subr.msk.bf16.mxu1 %vm6978_vm1, %v5236_v2  ;;  %v7321_v63 = vpop.eup %5706 }
 0x500   : > { %v1577_v55 = vsub.f32 %v7172_v26, %v1554_v24  ;;  %4870 = vmatprep.mubr.f32.mxu1 %v7313_v20 }
 0x501   : > { %v5242_v48 = vpack.c.bf16 %v5623_v22, %v5622_v23 }
 0x502   : > { %v1601_v15 = vmul.f32 1.442695, %v1577_v55  ;;  %v7323_v42 = vpop.permute.xlu1 %1842 }
 0x503   : > { %4871 = vmatmul.mubr.f32.gmra.mrb[20].mxu1 %v7321_v63  ;;  %v1560_v50 = vpop.xlane.xlu0 %1559 }
 0x504   : > { %5712 = vpow2.f32 %v1601_v15  ;;  %5241 = vmatpush3.bf16.xpose.msk.msra.mxu1 %vm6978_vm1, %v5236_v2  ;;  %v1580_v6 = vsub.f32 %v7178_v18, %v1560_v50 }
 0x505   : > { %5714 = vpow2.f32 %v1603_v37  ;;  %5244 = vmatprep.subr.msk.bf16.mxu1 %vm6978_vm1, %v5242_v48 }
 0x506   : > { %v7331_v26 = vpop.eup %5708  ;;  %v1847_v56 = vpop.permute.xlu1 %1846  ;;  %v1607_v46 = vmul.f32 1.442695, %v1580_v6 }
 0x507   : > { %v7334_v12 = vpop.eup %5710  ;;  %4873 = vmatprep.mubr.f32.mxu1 %v7331_v26  ;;  %v1558_v9 = vpop.xlane.xlu0 %1557 }
 0x508   : > { %v1579_v59 = vsub.f32 %v7180_v25, %v1558_v9  ;;  %4874 = vmatmul.mubr.f32.gmra.mrb[22].mxu1 %v7334_v12 }
 0x50a   : > { %v1605_v18 = vmul.f32 1.442695, %v1579_v59  ;;  %v1849_v27 = vpop.permute.xlu1 %1848 }
 0x50b   : > { %v1564_v61 = vpop.xlane.xlu0 %1563 }
 0x50c   : > { %5716 = vpow2.f32 %v1605_v18  ;;  %v1582_v1 = vsub.f32 %v7186_v11, %v1564_v61  ;;  %5247 = vmatpush3.bf16.xpose.msk.msra.mxu1 %vm6978_vm1, %v5242_v48 }
 0x50d   : > { %5718 = vpow2.f32 %v1607_v46 }
 0x50e   : > { %v7342_v51 = vpop.eup %5712  ;;  %5720 = vpow2.f32 %v1609_v60  ;;  %v1611_v14 = vmul.f32 1.442695, %v1582_v1  ;;  %v1851_v3 = vpop.permute.xlu1 %1850 }
 0x50f   : > { %v7344_v25 = vpop.eup %5714  ;;  %4876 = vmatprep.mubr.f32.mxu1 %v7342_v51  ;;  %v1566_v41 = vpop.xlane.xlu0 %1565 }
 0x510   : > { %5722 = vpow2.f32 %v1611_v14  ;;  %v1583_v47 = vsub.f32 %v7192_v31, %v1566_v41  ;;  %4877 = vmatmul.mubr.f32.gmra.mrb[24].mxu1 %v7344_v25  ;;  %v8385_v14 = vmov 0.0  }
 0x512   : > { %v1613_v11 = vmul.f32 1.442695, %v1583_v47  ;;  %v1853_v13 = vpop.permute.xlu1 %1852 }
 0x513   : > { %v1568_v8 = vpop.xlane.xlu0 %1567 }
 0x514   : > { %5724 = vpow2.f32 %v1613_v11  ;;  %v1584_v28 = vsub.f32 %v7190_v43, %v1568_v8 }
 0x516   : > { %v7350_v62 = vpop.eup %5716  ;;  %v1615_v32 = vmul.f32 1.442695, %v1584_v28  ;;  %v1855_v38 = vpop.permute.xlu1 %1854 }
 0x517   : > { %v7352_v35 = vpop.eup %5718  ;;  %4879 = vmatprep.mubr.f32.mxu1 %v7350_v62  ;;  %v1845_v44 = vpop.permute.xlu0 %1844 }
 0x518   : > { %v7355_v45 = vpop.eup %5720  ;;  %5726 = vpow2.f32 %v1615_v32  ;;  %4880 = vmatmul.mubr.f32.gmra.mrb[26].mxu1 %v7352_v35 }
 0x519   : > { %4882 = vmatprep.mubr.f32.mxu1 %v7355_v45 }
 0x51a   : > { %v7359_v31 = vpop.eup %5722  ;;  %v1857_v16 = vpop.permute.xlu1 %1856 }
 0x51b   : > { %v1859_v43 = vpop.permute.xlu0 %1858 }
 0x51c   : > { %4883 = vmatmul.mubr.f32.gmra.mrb[28].mxu1 %v7359_v31 }
 0x51e   : > { %v7362_v4 = vpop.eup %5724  ;;  %v1861_v5 = vpop.permute.xlu1 %1860 }
 0x51f   : > { %4885 = vmatprep.mubr.f32.mxu1 %v7362_v4  ;;  %v1863_v52 = vpop.permute.xlu0 %1862 }
 0x522   : > { %v7365_v0 = vpop.eup %5726  ;;  %v1865_v57 = vpop.permute.xlu1 %1864 }
 0x523   : > { %4886 = vmatmul.mubr.f32.gmra.mrb[30].mxu1 %v7365_v0  ;;  %v1867_v39 = vpop.permute.xlu0 %1866 }
 0x524   : > { %4920 = vmatprep.mubr.msk.f32.mxu1 %vm1295_vm0, %v7323_v42 }
 0x526   : > { %v1869_v7 = vpop.permute.xlu1 %1868 }
 0x527   : > { %v1871_v17 = vpop.permute.xlu0 %1870  ;;  %4921 = vmatmul.mubr.msk.f32.vlgmr.msra.gmra.mrb[32].mxu1 %vm1295_vm0, %v1845_v44 }
 0x528   : > { %4923 = vmatprep.mubr.msk.f32.mxu1 %vm1295_vm0, %v1847_v56 }
 0x52a   : > { %v1873_v33 = vpop.permute.xlu1 %1872 }
 0x52b   : > { %v5626_v19 = vpop.permute.xlu0 %5625  ;;  %4924 = vmatmul.mubr.msk.f32.gmra.mrb[34].mxu1 %vm1295_vm0, %v1849_v27 }
 0x52c   : > { %v5628_v2 = vunpack.i.h.bf16 %v5626_v19  ;;  %v5627_v54 = vunpack.i.l.bf16 %v5626_v19  ;;  %4926 = vmatprep.mubr.msk.f32.mxu1 %vm1295_vm0, %v1851_v3 }
 0x52e   : > { %v5248_v21 = vpack.c.bf16 %v5628_v2, %v5627_v54  ;;  %v5641_v55 = vpop.permute.xlu1 %5640 }
 0x52f   : > { %v5631_v22 = vpop.permute.xlu0 %5630  ;;  %4927 = vmatmul.mubr.msk.f32.gmra.mrb[36].mxu1 %vm1295_vm0, %v1853_v13  ;;  %v5643_v42 = vunpack.i.h.bf16 %v5641_v55  ;;  %v5642_v48 = vunpack.i.l.bf16 %v5641_v55 }
 0x530   : > { %v5633_v23 = vunpack.i.h.bf16 %v5631_v22  ;;  %v5632_v24 = vunpack.i.l.bf16 %v5631_v22  ;;  %4929 = vmatprep.mubr.msk.f32.mxu1 %vm1295_vm0, %v1855_v38  ;;  %5249 = vmatprep.subr.bf16.mxu0 %v5248_v21 }
 0x531   : > { %5251 = vmatpush3.bf16.msra.mxu0 %v5248_v21  ;;  %v5260_v46 = vpack.c.bf16 %v5643_v42, %v5642_v48 }
 0x532   : > { %v5252_v37 = vpack.c.bf16 %v5633_v23, %v5632_v24 }
 0x533   : > { %v5636_v15 = vpop.permute.xlu0 %5635  ;;  %4930 = vmatmul.mubr.msk.f32.gmra.mrb[38].mxu1 %vm1295_vm0, %v1857_v16 }
 0x534   : > { %v5638_v50 = vunpack.i.h.bf16 %v5636_v15  ;;  %v5637_v6 = vunpack.i.l.bf16 %v5636_v15  ;;  %4932 = vmatprep.mubr.msk.f32.mxu1 %vm1295_vm0, %v1859_v43  ;;  %5253 = vmatprep.subr.bf16.mxu0 %v5252_v37 }
 0x535   : > { %5255 = vmatpush3.bf16.msra.mxu0 %v5252_v37 }
 0x536   : > { %v5256_v53 = vpack.c.bf16 %v5638_v50, %v5637_v6  ;;  %v8386_v6 = vpack.i.bf16 %v7093_v40, %v7085_v29 }
 0x537   : > { %v5646_v56 = vpop.permute.xlu0 %5645  ;;  %4933 = vmatmul.mubr.msk.f32.gmra.mrb[40].mxu1 %vm1295_vm0, %v1861_v5 }
 0x538   : > { %v5648_v9 = vunpack.i.h.bf16 %v5646_v56  ;;  %v5647_v59 = vunpack.i.l.bf16 %v5646_v56  ;;  %4935 = vmatprep.mubr.msk.f32.mxu1 %vm1295_vm0, %v1863_v52  ;;  %5257 = vmatprep.subr.bf16.mxu0 %v5256_v53 }
 0x539   : > { %5259 = vmatpush3.bf16.msra.mxu0 %v5256_v53  ;;  %v8387_v53 = vpack.i.bf16 %v7113_v58, %v7105_v49 }
 0x53a   : > { %5261 = vmatprep.subr.bf16.mxu0 %v5260_v46  ;;  %v5264_v61 = vpack.c.bf16 %v5648_v9, %v5647_v59 }
 0x53b   : > { %v5651_v60 = vpop.permute.xlu0 %5650  ;;  %4936 = vmatmul.mubr.msk.f32.gmra.mrb[42].mxu1 %vm1295_vm0, %v1865_v57 }
 0x53c   : > { %v5653_v18 = vunpack.i.h.bf16 %v5651_v60  ;;  %v5652_v27 = vunpack.i.l.bf16 %v5651_v60  ;;  %4938 = vmatprep.mubr.msk.f32.mxu1 %vm1295_vm0, %v1867_v39 }
 0x53d   : > { %5263 = vmatpush3.bf16.msra.mxu0 %v5260_v46 }
 0x53e   : > { %5265 = vmatprep.subr.bf16.mxu0 %v5264_v61  ;;  %v5268_v1 = vpack.c.bf16 %v5653_v18, %v5652_v27 }
 0x53f   : > { %4939 = vmatmul.mubr.msk.f32.gmra.mrb[44].mxu1 %vm1295_vm0, %v1869_v7 }
 0x540   : > { %4941 = vmatprep.mubr.msk.f32.mxu1 %vm1295_vm0, %v1871_v17 }
 0x541   : > { %5267 = vmatpush3.bf16.msra.mxu0 %v5264_v61 }
 0x542   : > { %5269 = vmatprep.subr.bf16.mxu0 %v5268_v1 }
 0x543   : > { %4942 = vmatmul.mubr.msk.f32.gmra.mrb[46].mxu1 %vm1295_vm0, %v1873_v33 }
 0x544   : > { %3122 = vmatprep.mubr.f32.mxu1 %v8385_v14 }
 0x545   : > { %5271 = vmatpush3.bf16.msra.mxu0 %v5268_v1 }
 0x59a   : > { %v7386_v3 = vpop.f32.mrb[16].mxu1 }
 0x59b   : > { %v7388_v41 = vpop.f32.mrb[17].mxu1 }
 0x5d2   : > { %v7390_v47 = vpop.f32.mrb[18].mxu1 }
 0x5d3   : > { %v7392_v11 = vpop.f32.mrb[19].mxu1 }
 0x5d6   : > { %v7394_v13 = vpop.f32.mrb[20].mxu1 }
 0x5d7   : > { %v7396_v8 = vpop.f32.mrb[21].mxu1 }
 0x5db   : > { %v7398_v28 = vpop.f32.mrb[22].mxu1 }
 0x5dc   : > { %v7400_v32 = vpop.f32.mrb[23].mxu1 }
 0x5e3   : > { %v7402_v38 = vpop.f32.mrb[24].mxu1 }
 0x5e4   : > { %v7404_v44 = vpop.f32.mrb[25].mxu1 }
 0x5eb   : > { %v7406_v16 = vpop.f32.mrb[26].mxu1 }
 0x5ec   : > { %v7408_v43 = vpop.f32.mrb[27].mxu1 }
 0x5ef   : > { %v7410_v5 = vpop.f32.mrb[28].mxu1 }
 0x5f0   : > { %v7412_v52 = vpop.f32.mrb[29].mxu1 }
 0x5f6   : > { %v7414_v57 = vpop.f32.mrb[30].mxu1 }
 0x5f7   : > { %v7416_v39 = vpop.f32.mrb[31].mxu1 }
 0x5fa   : > { %v4922_v7 = vpop.f32.mrb[32].mxu1 }
 0x5fb   : > { %2117 = vmax.xlane.f32.xlu0 %v4922_v7  ;;  %v2036_v17 = vpop.f32.mrb[33].mxu1 }
 0x5fc   : > { %2115 = vmax.xlane.f32.xlu1 %v2036_v17 }
 0x5fe   : > { %v4925_v33 = vpop.f32.mrb[34].mxu1 }
 0x5ff   : > { %v2046_v19 = vpop.f32.mrb[35].mxu1 }
 0x600   : > { %2121 = vmax.xlane.f32.xlu1 %v4925_v33 }
 0x602   : > { %v7418_v2 = vpop.f32.mrb[36].mxu1 }
 0x603   : > { %v2056_v54 = vpop.f32.mrb[37].mxu1 }
 0x604   : > { %2119 = vmax.xlane.f32.xlu1 %v2046_v19  ;;  %2123 = vmax.xlane.f32.xlu0 %v2056_v54 }
 0x606   : > { %v7420_v21 = vpop.f32.mrb[38].mxu1 }
 0x607   : > { %v7422_v22 = vpop.f32.mrb[39].mxu1 }
 0x608   : > { %2125 = vmax.xlane.f32.xlu1 %v7418_v2 }
 0x60a   : > { %v7425_v23 = vpop.f32.mrb[40].mxu1 }
 0x60b   : > { %v7427_v24 = vpop.f32.mrb[41].mxu1 }
 0x60e   : > { %v7429_v55 = vpop.f32.mrb[42].mxu1 }
 0x60f   : > { %v7431_v37 = vpop.f32.mrb[43].mxu1 }
 0x612   : > { %v7433_v15 = vpop.f32.mrb[44].mxu1 }
 0x613   : > { %v7435_v42 = vpop.f32.mrb[45].mxu1 }
 0x616   : > { %v7437_v48 = vpop.f32.mrb[46].mxu1 }
 0x617   : > { %v7439_v50 = vpop.f32.mrb[47].mxu1 }
 0x619   : > { %5655 = vrot.lane.b32.xlu1 %v8386_v6, %s6314_s24 }
 0x61a   : > { %5660 = vrot.lane.b32.xlu0 %v8387_v53, %s6314_s24 }
 0x639   : > { %2129 = vmax.xlane.f32.xlu0 %v7420_v21 }
 0x63d   : > { %2127 = vmax.xlane.f32.xlu1 %v7422_v22  ;;  %2131 = vmax.xlane.f32.xlu0 %v7427_v24 }
 0x641   : > { %2133 = vmax.xlane.f32.xlu1 %v7425_v23  ;;  %2135 = vmax.xlane.f32.xlu0 %v7431_v37 }
 0x645   : > { %2137 = vmax.xlane.f32.xlu1 %v7429_v55  ;;  %2139 = vmax.xlane.f32.xlu0 %v7435_v42 }
 0x649   : > { %2141 = vmax.xlane.f32.xlu1 %v7433_v15  ;;  %2143 = vmax.xlane.f32.xlu0 %v7439_v50 }
 0x64d   : > { %2145 = vmax.xlane.f32.xlu1 %v7437_v48  ;;  %1621 = vadd.xlane.f32.xlu0 %v7310_v10 }
 0x651   : > { %1617 = vadd.xlane.f32.xlu1 %v7273_v30  ;;  %1625 = vadd.xlane.f32.xlu0 %v7313_v20 }
 0x655   : > { %1619 = vadd.xlane.f32.xlu1 %v7275_v34  ;;  %1629 = vadd.xlane.f32.xlu0 %v7331_v26 }
 0x659   : > { %1623 = vadd.xlane.f32.xlu1 %v7306_v36  ;;  %1635 = vadd.xlane.f32.xlu0 %v7344_v25 }
 0x65d   : > { %1627 = vadd.xlane.f32.xlu1 %v7321_v63  ;;  %1639 = vadd.xlane.f32.xlu0 %v7352_v35 }
 0x661   : > { %1631 = vadd.xlane.f32.xlu1 %v7334_v12  ;;  %1643 = vadd.xlane.f32.xlu0 %v7359_v31 }
 0x665   : > { %1633 = vadd.xlane.f32.xlu1 %v7342_v51 }
 0x669   : > { %1637 = vadd.xlane.f32.xlu1 %v7350_v62 }
 0x66d   : > { %1641 = vadd.xlane.f32.xlu1 %v7355_v45 }
 0x688   : > { %v2118_v29 = vpop.xlane.xlu0 %2117 }
 0x689   : > { %v2148_v40 = vsub.f32 %v4922_v7, %v2118_v29  ;;  %v2116_v49 = vpop.xlane.xlu1 %2115 }
 0x68a   : > { %v2147_v58 = vsub.f32 %v2036_v17, %v2116_v49 }
 0x68b   : > { %v2165_v30 = vmul.f32 1.442695, %v2148_v40 }
 0x68c   : > { %v2163_v34 = vmul.f32 1.442695, %v2147_v58 }
 0x68d   : > { %5728 = vpow2.f32 %v2165_v30  ;;  %v2122_v36 = vpop.xlane.xlu1 %2121 }
 0x68e   : > { %5730 = vpow2.f32 %v2163_v34  ;;  %v2150_v10 = vsub.f32 %v4925_v33, %v2122_v36 }
 0x690   : > { %v2169_v20 = vmul.f32 1.442695, %v2150_v10 }
 0x691   : > { %v2120_v63 = vpop.xlane.xlu1 %2119  ;;  %v2124_v26 = vpop.xlane.xlu0 %2123 }
 0x692   : > { %5732 = vpow2.f32 %v2169_v20  ;;  %v2149_v12 = vsub.f32 %v2046_v19, %v2120_v63  ;;  %v2151_v51 = vsub.f32 %v2056_v54, %v2124_v26 }
 0x694   : > { %v2167_v25 = vmul.f32 1.442695, %v2149_v12  ;;  %v2171_v62 = vmul.f32 1.442695, %v2151_v51 }
 0x695   : > { %v2126_v35 = vpop.xlane.xlu1 %2125  ;;  %v5661_v31 = vpop.permute.xlu0 %5660 }
 0x696   : > { %5734 = vpow2.f32 %v2167_v25  ;;  %v2152_v45 = vsub.f32 %v7418_v2, %v2126_v35  ;;  %v5663_v46 = vunpack.i.h.bf16 %v5661_v31  ;;  %v5662_v18 = vunpack.i.l.bf16 %v5661_v31 }
 0x697   : > { %v5729_v56 = vpop.eup %5728  ;;  %5736 = vpow2.f32 %v2171_v62 }
 0x698   : > { %v5731_v9 = vpop.eup %5730  ;;  %v2173_v59 = vmul.f32 1.442695, %v2152_v45  ;;  %2197 = vadd.xlane.f32.xlu1 %v5729_v56  ;;  %v5276_v17 = vpack.c.bf16 %v5663_v46, %v5662_v18 }
 0x699   : > { %4976 = vmatprep.mubr.f32.mxu0 %v5731_v9  ;;  %v5656_v60 = vpop.permute.xlu1 %5655  ;;  %2195 = vadd.xlane.f32.xlu0 %v5731_v9 }
 0x69a   : > { %5738 = vpow2.f32 %v2173_v59  ;;  %v5658_v27 = vunpack.i.h.bf16 %v5656_v60  ;;  %v5657_v61 = vunpack.i.l.bf16 %v5656_v60 }
 0x69c   : > { %v5733_v1 = vpop.eup %5732  ;;  %v5272_v7 = vpack.c.bf16 %v5658_v27, %v5657_v61 }
 0x69d   : > { %2201 = vadd.xlane.f32.xlu1 %v5733_v1 }
 0x69e   : > { %5273 = vmatprep.subr.bf16.mxu0 %v5272_v7 }
 0x69f   : > { %5275 = vmatpush3.bf16.msra.mxu0 %v5272_v7 }
 0x6a0   : > { %v5735_v33 = vpop.eup %5734  ;;  %5277 = vmatprep.subr.bf16.mxu0 %v5276_v17 }
 0x6a1   : > { %2199 = vadd.xlane.f32.xlu0 %v5735_v33  ;;  %v5737_v19 = vpop.eup %5736 }
 0x6a3   : > { %5279 = vmatpush3.bf16.msra.mxu0 %v5276_v17 }
 0x6a4   : > { %v5739_v2 = vpop.eup %5738 }
 0x6a5   : > { %2205 = vadd.xlane.f32.xlu1 %v5739_v2  ;;  %2203 = vadd.xlane.f32.xlu0 %v5737_v19 }
 0x6a6   : > { %4977 = vmatmul.mubr.f32.vlgmr.msra.gmra.mrb[48].mxu0 %v5729_v56 }
 0x6a7   : > { %4979 = vmatprep.mubr.f32.mxu0 %v5735_v33 }
 0x6aa   : > { %4980 = vmatmul.mubr.f32.gmra.mrb[50].mxu0 %v5733_v1 }
 0x6ab   : > { %4982 = vmatprep.mubr.f32.mxu0 %v5737_v19 }
 0x6ae   : > { %4983 = vmatmul.mubr.f32.gmra.mrb[52].mxu0 %v5739_v2 }
 0x6c6   : > { %v2130_v54 = vpop.xlane.xlu0 %2129 }
 0x6c7   : > { %v2154_v6 = vsub.f32 %v7420_v21, %v2130_v54 }
 0x6c9   : > { %v2177_v53 = vmul.f32 1.442695, %v2154_v6 }
 0x6ca   : > { %v2128_v29 = vpop.xlane.xlu1 %2127  ;;  %v2132_v40 = vpop.xlane.xlu0 %2131 }
 0x6cb   : > { %5740 = vpow2.f32 %v2177_v53  ;;  %v2153_v49 = vsub.f32 %v7422_v22, %v2128_v29  ;;  %v2155_v58 = vsub.f32 %v7427_v24, %v2132_v40 }
 0x6cd   : > { %v2175_v30 = vmul.f32 1.442695, %v2153_v49  ;;  %v2179_v34 = vmul.f32 1.442695, %v2155_v58 }
 0x6ce   : > { %v2134_v36 = vpop.xlane.xlu1 %2133  ;;  %v2136_v10 = vpop.xlane.xlu0 %2135 }
 0x6cf   : > { %5742 = vpow2.f32 %v2175_v30  ;;  %v2156_v20 = vsub.f32 %v7425_v23, %v2134_v36  ;;  %v2157_v63 = vsub.f32 %v7431_v37, %v2136_v10 }
 0x6d0   : > { %5744 = vpow2.f32 %v2179_v34 }
 0x6d1   : > { %v2181_v26 = vmul.f32 1.442695, %v2156_v20  ;;  %v2183_v21 = vmul.f32 1.442695, %v2157_v63 }
 0x6d2   : > { %v2138_v12 = vpop.xlane.xlu1 %2137  ;;  %v2140_v51 = vpop.xlane.xlu0 %2139 }
 0x6d3   : > { %5746 = vpow2.f32 %v2181_v26  ;;  %v2158_v25 = vsub.f32 %v7429_v55, %v2138_v12  ;;  %v2159_v22 = vsub.f32 %v7435_v42, %v2140_v51 }
 0x6d4   : > { %5748 = vpow2.f32 %v2183_v21 }
 0x6d5   : > { %v5741_v24 = vpop.eup %5740  ;;  %v2185_v62 = vmul.f32 1.442695, %v2158_v25  ;;  %v2187_v35 = vmul.f32 1.442695, %v2159_v22 }
 0x6d6   : > { %v2142_v45 = vpop.xlane.xlu1 %2141  ;;  %2209 = vadd.xlane.f32.xlu1 %v5741_v24  ;;  %v2144_v31 = vpop.xlane.xlu0 %2143 }
 0x6d7   : > { %5750 = vpow2.f32 %v2185_v62  ;;  %v2160_v23 = vsub.f32 %v7433_v15, %v2142_v45  ;;  %v2161_v37 = vsub.f32 %v7439_v50, %v2144_v31 }
 0x6d8   : > { %5752 = vpow2.f32 %v2187_v35 }
 0x6d9   : > { %v5743_v56 = vpop.eup %5742  ;;  %v2189_v9 = vmul.f32 1.442695, %v2160_v23  ;;  %v2191_v59 = vmul.f32 1.442695, %v2161_v37 }
 0x6da   : > { %4985 = vmatprep.mubr.f32.mxu0 %v5743_v56  ;;  %v2146_v55 = vpop.xlane.xlu1 %2145  ;;  %2207 = vadd.xlane.f32.xlu0 %v5743_v56  ;;  %v1622_v42 = vpop.xlane.xlu0 %1621 }
 0x6db   : > { %v5745_v46 = vpop.eup %5744  ;;  %5754 = vpow2.f32 %v2189_v9  ;;  %v2162_v60 = vsub.f32 %v7437_v48, %v2146_v55  ;;  %4986 = vmatmul.mubr.f32.gmra.mrb[54].mxu0 %v5741_v24  ;;  %v2566_v9 = vld [vmem:[#allocation12 + $0x8] sm:$0xff] }
 0x6dc   : > { %5756 = vpow2.f32 %v2191_v59  ;;  %4988 = vmatprep.mubr.f32.mxu0 %v5745_v46  ;;  %v2567_v59 = vld [vmem:[#allocation12 + $0x10] sm:$0xff] }
 0x6dd   : > { %v5747_v18 = vpop.eup %5746  ;;  %v2193_v27 = vmul.f32 1.442695, %v2162_v60  ;;  %5758 = vrcp.f32 %v1622_v42  ;;  %v2568_v42 = vld [vmem:[#allocation12 + $0x18] sm:$0xff]  ;;  %v2569_v60 = vld [vmem:[#allocation12 + $0x20] sm:$0xff] }
 0x6de   : > { %2213 = vadd.xlane.f32.xlu1 %v5747_v18  ;;  %v1618_v15 = vpop.xlane.xlu1 %1617  ;;  %2211 = vadd.xlane.f32.xlu0 %v5745_v46  ;;  %v1626_v50 = vpop.xlane.xlu0 %1625  ;;  %v5284_v46 = vpack.c.bf16 %v2568_v42, %v2567_v59 }
 0x6df   : > { %v5749_v61 = vpop.eup %5748  ;;  %5760 = vpow2.f32 %v2193_v27  ;;  %4989 = vmatmul.mubr.f32.gmra.mrb[56].mxu0 %v5747_v18  ;;  %v2572_v27 = vld [vmem:[#allocation12 + $0x38] sm:$0xff] }
 0x6e0   : > { %5762 = vrcp.f32 %v1618_v15  ;;  %4991 = vmatprep.mubr.f32.mxu0 %v5749_v61 }
 0x6e1   : > { %v5751_v1 = vpop.eup %5750  ;;  %5764 = vrcp.f32 %v1626_v50  ;;  %v2574_v50 = vld [vmem:[#allocation12 + $0x48] sm:$0xff] }
 0x6e2   : > { %2217 = vadd.xlane.f32.xlu1 %v5751_v1  ;;  %v1620_v7 = vpop.xlane.xlu1 %1619  ;;  %2215 = vadd.xlane.f32.xlu0 %v5749_v61  ;;  %v1630_v48 = vpop.xlane.xlu0 %1629 }
 0x6e3   : > { %v5753_v17 = vpop.eup %5752  ;;  %5766 = vrcp.f32 %v1620_v7  ;;  %4992 = vmatmul.mubr.f32.gmra.mrb[58].mxu0 %v5751_v1 }
 0x6e4   : > { %5768 = vrcp.f32 %v1630_v48  ;;  %4994 = vmatprep.mubr.f32.mxu0 %v5753_v17  ;;  %v2575_v48 = vld [vmem:[#allocation12 + $0x50] sm:$0xff] }
 0x6e5   : > { %v5755_v33 = vpop.eup %5754 }
 0x6e6   : > { %v5757_v19 = vpop.eup %5756  ;;  %2221 = vadd.xlane.f32.xlu1 %v5755_v33  ;;  %v1624_v2 = vpop.xlane.xlu1 %1623  ;;  %2219 = vadd.xlane.f32.xlu0 %v5753_v17  ;;  %v2576_v17 = vld [vmem:[#allocation12 + $0x58] sm:$0xff] }
 0x6e7   : > { %v1636_v54 = vpop.xlane.xlu0 %1635  ;;  %v5759_v6 = vpop.eup %5758  ;;  %5770 = vrcp.f32 %v1624_v2  ;;  %4995 = vmatmul.mubr.f32.gmra.mrb[60].mxu0 %v5755_v33  ;;  %v5300_v33 = vpack.c.bf16 %v2576_v17, %v2575_v48 }
 0x6e8   : > { %v1812_v53 = vmul.f32 %v5759_v6, %v7392_v11  ;;  %5772 = vrcp.f32 %v1636_v54  ;;  %4997 = vmatprep.mubr.f32.mxu0 %v5757_v19  ;;  %v2577_v54 = vld [vmem:[#allocation12 + $0x60] sm:$0xff]  ;;  %v2578_v6 = vld [vmem:[#allocation12 + $0x68] sm:$0xff] }
 0x6e9   : > { %v5761_v29 = vpop.eup %5760 }
 0x6ea   : > { %v5763_v40 = vpop.eup %5762  ;;  %1828 = vst.msk [vmem:[#allocation3 + $0x10] sm:$0xff] %vm1295_vm0, %v1812_v53  ;;  %v1628_v49 = vpop.xlane.xlu1 %1627  ;;  %2225 = vadd.xlane.f32.xlu0 %v5761_v29  ;;  %v5304_v53 = vpack.c.bf16 %v2578_v6, %v2577_v54 }
 0x6eb   : > { %v1640_v58 = vpop.xlane.xlu0 %1639  ;;  %v5765_v30 = vpop.eup %5764  ;;  %v1810_v34 = vmul.f32 %v5763_v40, %v7388_v41  ;;  %5774 = vrcp.f32 %v1628_v49  ;;  %4998 = vmatmul.mubr.f32.gmra.mrb[62].mxu0 %v5761_v29  ;;  %v2579_v40 = vld [vmem:[#allocation12 + $0x70] sm:$0xff]  ;;  %v2580_v49 = vld [vmem:[#allocation12 + $0x78] sm:$0xff] }
 0x6ec   : > { %v1814_v36 = vmul.f32 %v5765_v30, %v7396_v8  ;;  %5776 = vrcp.f32 %v1640_v58  ;;  %v5308_v30 = vpack.c.bf16 %v2580_v49, %v2579_v40 }
 0x6ed   : > { %v5767_v10 = vpop.eup %5766  ;;  %1826 = vst.msk [vmem:[#allocation3] sm:$0xff] %vm1295_vm0, %v1810_v34 }
 0x6ee   : > { %v5769_v11 = vpop.eup %5768  ;;  %1830 = vst.msk [vmem:[#allocation3 + $0x20] sm:$0xff] %vm1295_vm0, %v1814_v36  ;;  %v1811_v20 = vmul.f32 %v5767_v10, %v7386_v3  ;;  %v1632_v63 = vpop.xlane.xlu1 %1631  ;;  %2223 = vadd.xlane.f32.xlu0 %v5757_v19 }
 0x6ef   : > { %v1644_v26 = vpop.xlane.xlu0 %1643  ;;  %v1816_v21 = vmul.f32 %v5769_v11, %v7400_v32  ;;  %5778 = vrcp.f32 %v1632_v63 }
 0x6f0   : > { %1827 = vst.msk [vmem:[#allocation3 + $0x8] sm:$0xff] %vm1295_vm0, %v1811_v20  ;;  %5780 = vrcp.f32 %v1644_v26 }
 0x6f1   : > { %v5771_v41 = vpop.eup %5770  ;;  %1832 = vst.msk [vmem:[#allocation3 + $0x30] sm:$0xff] %vm1295_vm0, %v1816_v21 }
 0x6f2   : > { %v5773_v8 = vpop.eup %5772  ;;  %v1813_v12 = vmul.f32 %v5771_v41, %v7390_v47  ;;  %v1634_v51 = vpop.xlane.xlu1 %1633 }
 0x6f3   : > { %v1819_v25 = vmul.f32 %v5773_v8, %v7402_v38  ;;  %5782 = vrcp.f32 %v1634_v51 }
 0x6f4   : > { %1829 = vst.msk [vmem:[#allocation3 + $0x18] sm:$0xff] %vm1295_vm0, %v1813_v12 }
 0x6f5   : > { %v5775_v3 = vpop.eup %5774  ;;  %1835 = vst.msk [vmem:[#allocation3 + $0x48] sm:$0xff] %vm1295_vm0, %v1819_v25 }
 0x6f6   : > { %v5777_v32 = vpop.eup %5776  ;;  %v1815_v22 = vmul.f32 %v5775_v3, %v7394_v13  ;;  %v1638_v24 = vpop.xlane.xlu1 %1637 }
 0x6f7   : > { %v1821_v62 = vmul.f32 %v5777_v32, %v7406_v16  ;;  %5784 = vrcp.f32 %v1638_v24 }
 0x6f8   : > { %1831 = vst.msk [vmem:[#allocation3 + $0x28] sm:$0xff] %vm1295_vm0, %v1815_v22 }
 0x6f9   : > { %v5779_v35 = vpop.eup %5778  ;;  %1837 = vst.msk [vmem:[#allocation3 + $0x58] sm:$0xff] %vm1295_vm0, %v1821_v62 }
 0x6fa   : > { %v5781_v47 = vpop.eup %5780  ;;  %v1817_v38 = vmul.f32 %v5779_v35, %v7398_v28  ;;  %v1642_v45 = vpop.xlane.xlu1 %1641 }
 0x6fb   : > { %v1823_v31 = vmul.f32 %v5781_v47, %v7410_v5  ;;  %5786 = vrcp.f32 %v1642_v45  ;;  %v2565_v5 = vld [vmem:[#allocation12] sm:$0xff] }
 0x6fc   : > { %1833 = vst.msk [vmem:[#allocation3 + $0x38] sm:$0xff] %vm1295_vm0, %v1817_v38  ;;  %v5280_v55 = vpack.c.bf16 %v2566_v9, %v2565_v5 }
 0x6fd   : > { %v5783_v23 = vpop.eup %5782  ;;  %1839 = vst.msk [vmem:[#allocation3 + $0x68] sm:$0xff] %vm1295_vm0, %v1823_v31 }
 0x6fe   : > { %v1818_v13 = vmul.f32 %v5783_v23, %v7404_v44  ;;  %v2570_v44 = vld [vmem:[#allocation12 + $0x28] sm:$0xff]  ;;  %5281 = vmatprep.subr.bf16.mxu0 %v5280_v55 }
 0x6ff   : > { %5283 = vmatpush3.bf16.msra.mxu0 %v5280_v55  ;;  %v5288_v18 = vpack.c.bf16 %v2570_v44, %v2569_v60 }
 0x700   : > { %1834 = vst.msk [vmem:[#allocation3 + $0x40] sm:$0xff] %vm1295_vm0, %v1818_v13  ;;  %5285 = vmatprep.subr.bf16.mxu0 %v5284_v46 }
 0x701   : > { %v5785_v16 = vpop.eup %5784 }
 0x702   : > { %v1820_v37 = vmul.f32 %v5785_v16, %v7408_v43  ;;  %v2571_v43 = vld [vmem:[#allocation12 + $0x30] sm:$0xff] }
 0x703   : > { %5287 = vmatpush3.bf16.msra.mxu0 %v5284_v46  ;;  %v5292_v15 = vpack.c.bf16 %v2572_v27, %v2571_v43 }
 0x704   : > { %1836 = vst.msk [vmem:[#allocation3 + $0x50] sm:$0xff] %vm1295_vm0, %v1820_v37  ;;  %5289 = vmatprep.subr.bf16.mxu0 %v5288_v18 }
 0x705   : > { %v5787_v56 = vpop.eup %5786 }
 0x706   : > { %v1822_v28 = vmul.f32 %v5787_v56, %v7412_v52  ;;  %v2573_v52 = vld [vmem:[#allocation12 + $0x40] sm:$0xff] }
 0x707   : > { %5291 = vmatpush3.bf16.msra.mxu0 %v5288_v18  ;;  %v5296_v61 = vpack.c.bf16 %v2574_v50, %v2573_v52 }
 0x708   : > { %1838 = vst.msk [vmem:[#allocation3 + $0x60] sm:$0xff] %vm1295_vm0, %v1822_v28  ;;  %5293 = vmatprep.subr.bf16.mxu0 %v5292_v15 }
 0x70b   : > { %5295 = vmatpush3.bf16.msra.mxu0 %v5292_v15 }
 0x70c   : > { %5297 = vmatprep.subr.bf16.mxu0 %v5296_v61 }
 0x70f   : > { %5299 = vmatpush3.bf16.msra.mxu0 %v5296_v61 }
 0x710   : > { %5301 = vmatprep.subr.bf16.mxu0 %v5300_v33 }
 0x713   : > { %5303 = vmatpush3.bf16.msra.mxu0 %v5300_v33 }
 0x714   : > { %5305 = vmatprep.subr.bf16.mxu0 %v5304_v53 }
 0x717   : > { %5307 = vmatpush3.bf16.msra.mxu0 %v5304_v53 }
 0x718   : > { %5309 = vmatprep.subr.bf16.mxu0 %v5308_v30 }
 0x71b   : > { %5311 = vmatpush3.bf16.msra.mxu0 %v5308_v30 }
 0x725   : > { %v2198_v1 = vpop.xlane.xlu1 %2197 }
 0x726   : > { %v2196_v7 = vpop.xlane.xlu0 %2195  ;;  %5788 = vrcp.f32 %v2198_v1 }
 0x727   : > { %5790 = vrcp.f32 %v2196_v7 }
 0x72a   : > { %v2202_v2 = vpop.xlane.xlu1 %2201 }
 0x72b   : > { %5792 = vrcp.f32 %v2202_v2 }
 0x72e   : > { %v2200_v19 = vpop.xlane.xlu0 %2199 }
 0x72f   : > { %5794 = vrcp.f32 %v2200_v19 }
 0x730   : > { %v5789_v34 = vpop.eup %5788 }
 0x731   : > { %v5791_v10 = vpop.eup %5790 }
 0x732   : > { %v2206_v29 = vpop.xlane.xlu1 %2205  ;;  %v2204_v58 = vpop.xlane.xlu0 %2203 }
 0x733   : > { %5796 = vrcp.f32 %v2206_v29 }
 0x734   : > { %5798 = vrcp.f32 %v2204_v58 }
 0x735   : > { %v5793_v26 = vpop.eup %5792 }
 0x739   : > { %v5795_v41 = vpop.eup %5794 }
 0x73d   : > { %v5797_v25 = vpop.eup %5796 }
 0x73e   : > { %v5799_v32 = vpop.eup %5798 }
 0x763   : > { %v2210_v35 = vpop.xlane.xlu1 %2209 }
 0x764   : > { %5800 = vrcp.f32 %v2210_v35 }
 0x767   : > { %v2208_v47 = vpop.xlane.xlu0 %2207 }
 0x768   : > { %5802 = vrcp.f32 %v2208_v47 }
 0x76b   : > { %v2212_v46 = vpop.xlane.xlu0 %2211  ;;  %v2214_v18 = vpop.xlane.xlu1 %2213 }
 0x76c   : > { %5804 = vrcp.f32 %v2214_v18 }
 0x76d   : > { %5806 = vrcp.f32 %v2212_v46 }
 0x76e   : > { %v5801_v38 = vpop.eup %5800 }
 0x76f   : > { %v2216_v60 = vpop.xlane.xlu0 %2215  ;;  %v2218_v27 = vpop.xlane.xlu1 %2217 }
 0x770   : > { %5808 = vrcp.f32 %v2216_v60 }
 0x772   : > { %v5803_v31 = vpop.eup %5802 }
 0x773   : > { %v2220_v44 = vpop.xlane.xlu0 %2219  ;;  %v2222_v52 = vpop.xlane.xlu1 %2221 }
 0x774   : > { %5810 = vrcp.f32 %v2220_v44 }
 0x775   : > { %5812 = vrcp.f32 %v2218_v27 }
 0x776   : > { %v5805_v50 = vpop.eup %5804 }
 0x777   : > { %v2226_v43 = vpop.xlane.xlu0 %2225  ;;  %v5807_v61 = vpop.eup %5806 }
 0x779   : > { %v4978_v36 = vpop.f32.mrb[48].mxu0 }
 0x77a   : > { %v2453_v11 = vmul.f32 %v5789_v34, %v4978_v36  ;;  %v2357_v20 = vpop.f32.mrb[49].mxu0 }
 0x77b   : > { %v2452_v63 = vmul.f32 %v5791_v10, %v2357_v20  ;;  %v2224_v15 = vpop.xlane.xlu0 %2223 }
 0x77c   : > { %2486 = vrot.lane.b32.xlu1 %v2453_v11, %s6314_s24  ;;  %5814 = vrcp.f32 %v2224_v15  ;;  %v5985_v15 = vld [vmem:[%s6692_s5] sm:$0xff] }
 0x77d   : > { %v4981_v21 = vpop.f32.mrb[50].mxu0  ;;  %2484 = vrot.lane.b32.xlu0 %v2452_v63, %s6314_s24  ;;  %5816 = vrcp.f32 %v2222_v52 }
 0x77e   : > { %v2455_v8 = vmul.f32 %v5793_v26, %v4981_v21  ;;  %v2367_v12 = vpop.f32.mrb[51].mxu0  ;;  %5818 = vrcp.f32 %v2226_v43  ;;  %v5984_v43 = vld [vmem:[%s6692_s5 + $0x8] sm:$0xff] }
 0x77f   : > { %v2454_v51 = vmul.f32 %v5795_v41, %v2367_v12 }
 0x780   : > { %2490 = vrot.lane.b32.xlu1 %v2455_v8, %s6314_s24 }
 0x781   : > { %v4984_v3 = vpop.f32.mrb[52].mxu0  ;;  %2488 = vrot.lane.b32.xlu0 %v2454_v51, %s6314_s24 }
 0x782   : > { %v2457_v22 = vmul.f32 %v5797_v25, %v4984_v3  ;;  %v2377_v24 = vpop.f32.mrb[53].mxu0 }
 0x783   : > { %v2456_v62 = vmul.f32 %v5799_v32, %v2377_v24 }
 0x784   : > { %2494 = vrot.lane.b32.xlu1 %v2457_v22, %s6314_s24 }
 0x785   : > { %2492 = vrot.lane.b32.xlu0 %v2456_v62, %s6314_s24 }
 0x7ae   : > { %v4987_v45 = vpop.f32.mrb[54].mxu0 }
 0x7af   : > { %v2459_v23 = vmul.f32 %v5801_v38, %v4987_v45  ;;  %v2387_v13 = vpop.f32.mrb[55].mxu0 }
 0x7b0   : > { %v2458_v16 = vmul.f32 %v5803_v31, %v2387_v13 }
 0x7b1   : > { %2498 = vrot.lane.b32.xlu1 %v2459_v23, %s6314_s24 }
 0x7b2   : > { %v4990_v37 = vpop.f32.mrb[56].mxu0  ;;  %2496 = vrot.lane.b32.xlu0 %v2458_v16, %s6314_s24 }
 0x7b3   : > { %v2397_v56 = vpop.f32.mrb[57].mxu0  ;;  %v2461_v1 = vmul.f32 %v5805_v50, %v4990_v37 }
 0x7b4   : > { %v2460_v7 = vmul.f32 %v5807_v61, %v2397_v56 }
 0x7b6   : > { %v4993_v28 = vpop.f32.mrb[58].mxu0 }
 0x7b7   : > { %v2407_v5 = vpop.f32.mrb[59].mxu0 }
 0x7ba   : > { %v4996_v9 = vpop.f32.mrb[60].mxu0 }
 0x7bb   : > { %v2417_v59 = vpop.f32.mrb[61].mxu0 }
 0x7be   : > { %v4999_v55 = vpop.f32.mrb[62].mxu0 }
 0x7bf   : > { %v2427_v42 = vpop.f32.mrb[63].mxu0 }
 0x7d1   : > { %1647 = vadd.xlane.f32.xlu0 %v7365_v0  ;;  %v5809_v0 = vpop.eup %5808 }
 0x7d2   : > { %v2462_v48 = vmul.f32 %v5809_v0, %v2407_v5  ;;  %v5986_v0 = vld [vmem:[%s6692_s5 + $0x10] sm:$0xff] }
 0x7d5   : > { %1645 = vadd.xlane.f32.xlu1 %v7362_v4  ;;  %v5811_v4 = vpop.eup %5810 }
 0x7d6   : > { %v2464_v17 = vmul.f32 %v5811_v4, %v2417_v59  ;;  %v5813_v33 = vpop.eup %5812 }
 0x7d7   : > { %v5815_v19 = vpop.eup %5814  ;;  %v2463_v2 = vmul.f32 %v5813_v33, %v4993_v28 }
 0x7d8   : > { %v2466_v54 = vmul.f32 %v5815_v19, %v2427_v42  ;;  %v5817_v53 = vpop.eup %5816  ;;  %v7554_v42 = vld [vmem:[%s8388_s21] ss:$0 sm:$0xff]  ;;  %v5987_v19 = vld [vmem:[%s6692_s5 + $0x28] sm:$0xff]  ;;  %s8431_s21 = sld [smem:[#allocation55_spill]] }
 0x7d9   : > { %v2465_v40 = vmul.f32 %v5817_v53, %v4996_v9  ;;  %v5819_v58 = vpop.eup %5818 }
 0x7da   : > { %v2467_v34 = vmul.f32 %v5819_v58, %v4999_v55 }
 0x7de   : > { %s8242_s12 = scalar_lea.hbm %s8431_s21, %s4367_s3 }
 0x7e6   : > { %2502 = vrot.lane.b32.xlu1 %v2461_v1, %s6314_s24 }
 0x7e7   : > { %2500 = vrot.lane.b32.xlu0 %v2460_v7, %s6314_s24 }
 0x7ea   : > { %2504 = vrot.lane.b32.xlu1 %v2462_v48, %s6314_s24 }
 0x7eb   : > { %2508 = vrot.lane.b32.xlu0 %v2464_v17, %s6314_s24 }
 0x7ee   : > { %v2487_v6 = vpop.permute.xlu1 %2486  ;;  %2506 = vrot.lane.b32.xlu1 %v2463_v2, %s6314_s24 }
 0x7ef   : > { %2534 = vst.msk [vmem:[#allocation3 + $0x8] sm:$0xff] %vm2532_vm2, %v2487_v6  ;;  %2512 = vrot.lane.b32.xlu0 %v2466_v54, %s6314_s24  ;;  %v2485_v29 = vpop.permute.xlu0 %2484  ;;  %v5988_v54 = vld [vmem:[%s6692_s5 + $0x18] sm:$0xff] }
 0x7f0   : > { %2533 = vst.msk [vmem:[#allocation3] sm:$0xff] %vm2532_vm2, %v2485_v29  ;;  %v5989_v29 = vld [vmem:[%s6692_s5 + $0x20] sm:$0xff] }
 0x7f2   : > { %v2491_v49 = vpop.permute.xlu1 %2490  ;;  %2510 = vrot.lane.b32.xlu1 %v2465_v40, %s6314_s24 }
 0x7f3   : > { %2536 = vst.msk [vmem:[#allocation3 + $0x18] sm:$0xff] %vm2532_vm2, %v2491_v49  ;;  %v2489_v30 = vpop.permute.xlu0 %2488 }
 0x7f4   : > { %2535 = vst.msk [vmem:[#allocation3 + $0x10] sm:$0xff] %vm2532_vm2, %v2489_v30 }
 0x7f6   : > { %v2495_v36 = vpop.permute.xlu1 %2494  ;;  %2514 = vrot.lane.b32.xlu1 %v2467_v34, %s6314_s24  ;;  %v2550_v20 = vld [vmem:[#allocation3 + $0x8] sm:$0xff]  ;;  %s4109_s24 = sshll.u32 %s8192_s14, 4  ;;  %s8244_s24 = int_to_ptr.vmem [resolvable:$true] %s4109_s24 }
 0x7f7   : > { %2538 = vst.msk [vmem:[#allocation3 + $0x28] sm:$0xff] %vm2532_vm2, %v2495_v36  ;;  %v2493_v10 = vpop.permute.xlu0 %2492  ;;  %v2549_v11 = vld [vmem:[#allocation3] sm:$0xff]  ;;  %v5990_v36 = vld [vmem:[%s6692_s5 + $0x38] sm:$0xff]  ;;  %p6207_p2 = scmp.lt.s32.totalorder %s8244_s24, %s6205_s28 }
 0x7f8   : > { %2537 = vst.msk [vmem:[#allocation3 + $0x20] sm:$0xff] %vm2532_vm2, %v2493_v10  ;;  %5032 = vmatprep.mubr.f32.mxu0 %v2549_v11  ;;  %v5991_v11 = vld [vmem:[%s6692_s5 + $0x30] sm:$0xff] }
 0x7f9   : > { %5033 = vmatmul.mubr.f32.vlgmr.msra.gmra.mrb[64].mxu0 %v2550_v20 }
 0x7fa   : > { %v2552_v26 = vld [vmem:[#allocation3 + $0x18] sm:$0xff] }
 0x7fb   : > { %v2551_v63 = vld [vmem:[#allocation3 + $0x10] sm:$0xff] }
 0x7fc   : > { %5035 = vmatprep.mubr.f32.mxu0 %v2551_v63 }
 0x7fd   : > { %5036 = vmatmul.mubr.f32.gmra.mrb[66].mxu0 %v2552_v26 }
 0x7fe   : > { %v2554_v41 = vld [vmem:[#allocation3 + $0x28] sm:$0xff] }
 0x7ff   : > { %v2553_v21 = vld [vmem:[#allocation3 + $0x20] sm:$0xff] }
 0x800   : > { %5038 = vmatprep.mubr.f32.mxu0 %v2553_v21 }
 0x801   : > { %5039 = vmatmul.mubr.f32.gmra.mrb[68].mxu0 %v2554_v41 }
 0x823   : > { %v2499_v8 = vpop.permute.xlu1 %2498 }
 0x824   : > { %2540 = vst.msk [vmem:[#allocation3 + $0x38] sm:$0xff] %vm2532_vm2, %v2499_v8  ;;  %v2497_v12 = vpop.permute.xlu0 %2496  ;;  %v5992_v8 = vld [vmem:[%s6692_s5 + $0x48] sm:$0xff] }
 0x825   : > { %2539 = vst.msk [vmem:[#allocation3 + $0x30] sm:$0xff] %vm2532_vm2, %v2497_v12 }
 0x82b   : > { %v2556_v25 = vld [vmem:[#allocation3 + $0x38] sm:$0xff] }
 0x82c   : > { %v2555_v51 = vld [vmem:[#allocation3 + $0x30] sm:$0xff] }
 0x82d   : > { %5041 = vmatprep.mubr.f32.mxu0 %v2555_v51  ;;  %v5993_v51 = vld [vmem:[%s6692_s5 + $0x40] sm:$0xff] }
 0x82e   : > { %5042 = vmatmul.mubr.f32.gmra.mrb[70].mxu0 %v2556_v25 }
 0x85e   : > { %v1648_v3 = vpop.xlane.xlu0 %1647 }
 0x85f   : > { %5820 = vrcp.f32 %v1648_v3 }
 0x862   : > { %v1646_v32 = vpop.xlane.xlu1 %1645  ;;  %v2501_v22 = vpop.permute.xlu0 %2500 }
 0x863   : > { %5822 = vrcp.f32 %v1646_v32  ;;  %2541 = vst.msk [vmem:[#allocation3 + $0x40] sm:$0xff] %vm2532_vm2, %v2501_v22 }
 0x866   : > { %v2503_v24 = vpop.permute.xlu1 %2502  ;;  %v2509_v62 = vpop.permute.xlu0 %2508 }
 0x867   : > { %2542 = vst.msk [vmem:[#allocation3 + $0x48] sm:$0xff] %vm2532_vm2, %v2503_v24  ;;  %2545 = vst.msk [vmem:[#allocation3 + $0x60] sm:$0xff] %vm2532_vm2, %v2509_v62  ;;  %v5994_v62 = vld [vmem:[%s6692_s5 + $0x58] sm:$0xff] }
 0x869   : > { %v5821_v35 = vpop.eup %5820 }
 0x86a   : > { %v1825_v47 = vmul.f32 %v5821_v35, %v7414_v57  ;;  %v2505_v38 = vpop.permute.xlu1 %2504  ;;  %v2557_v45 = vld [vmem:[#allocation3 + $0x40] sm:$0xff]  ;;  %v2513_v37 = vpop.permute.xlu0 %2512 }
 0x86b   : > { %2543 = vst.msk [vmem:[#allocation3 + $0x50] sm:$0xff] %vm2532_vm2, %v2505_v38  ;;  %5044 = vmatprep.mubr.f32.mxu0 %v2557_v45 }
 0x86c   : > { %1841 = vst.msk [vmem:[#allocation3 + $0x78] sm:$0xff] %vm1295_vm0, %v1825_v47  ;;  %v5995_v47 = vld [vmem:[%s6692_s5 + $0x50] sm:$0xff] }
 0x86d   : > { %v5823_v31 = vpop.eup %5822 }
 0x86e   : > { %v1824_v23 = vmul.f32 %v5823_v31, %v7416_v39  ;;  %v2507_v13 = vpop.permute.xlu1 %2506  ;;  %v2558_v16 = vld [vmem:[#allocation3 + $0x48] sm:$0xff]  ;;  %v2561_v39 = vld [vmem:[#allocation3 + $0x60] sm:$0xff] }
 0x86f   : > { %2544 = vst.msk [vmem:[#allocation3 + $0x58] sm:$0xff] %vm2532_vm2, %v2507_v13  ;;  %5045 = vmatmul.mubr.f32.gmra.mrb[72].mxu0 %v2558_v16  ;;  %v5996_v16 = vld [vmem:[%s6692_s5 + $0x68] sm:$0xff] }
 0x870   : > { %1840 = vst.msk [vmem:[#allocation3 + $0x70] sm:$0xff] %vm1295_vm0, %v1824_v23 }
 0x871   : > { %2547 = vst.msk [vmem:[#allocation3 + $0x70] sm:$0xff] %vm2532_vm2, %v2513_v37 }
 0x872   : > { %v2511_v57 = vpop.permute.xlu1 %2510  ;;  %v2559_v56 = vld [vmem:[#allocation3 + $0x50] sm:$0xff] }
 0x873   : > { %2546 = vst.msk [vmem:[#allocation3 + $0x68] sm:$0xff] %vm2532_vm2, %v2511_v57  ;;  %5047 = vmatprep.mubr.f32.mxu0 %v2559_v56  ;;  %v5997_v57 = vld [vmem:[%s6692_s5 + $0x60] sm:$0xff] }
 0x876   : > { %v2515_v28 = vpop.permute.xlu1 %2514  ;;  %v2560_v5 = vld [vmem:[#allocation3 + $0x58] sm:$0xff] }
 0x877   : > { %2548 = vst.msk [vmem:[#allocation3 + $0x78] sm:$0xff] %vm2532_vm2, %v2515_v28  ;;  %5048 = vmatmul.mubr.f32.gmra.mrb[74].mxu0 %v2560_v5 }
 0x878   : > { %5050 = vmatprep.mubr.f32.mxu0 %v2561_v39  ;;  %v2563_v59 = vld [vmem:[#allocation3 + $0x70] sm:$0xff] }
 0x87a   : > { %v2562_v9 = vld [vmem:[#allocation3 + $0x68] sm:$0xff] }
 0x87b   : > { %5051 = vmatmul.mubr.f32.gmra.mrb[76].mxu0 %v2562_v9 }
 0x87c   : > { %5053 = vmatprep.mubr.f32.mxu0 %v2563_v59  ;;  %v5998_v59 = vld [vmem:[%s6692_s5 + $0x78] sm:$0xff] }
 0x87e   : > { %v2564_v55 = vld [vmem:[#allocation3 + $0x78] sm:$0xff] }
 0x87f   : > { %5054 = vmatmul.mubr.f32.gmra.mrb[78].mxu0 %v2564_v55 }
 0x880   : > { %3283 = vmatprep.mubr.f32.mxu0 %v8385_v14 }
 0x8cc   : > { %v5034_v46 = vpop.f32.mrb[64].mxu0 }
 0x8cd   : > { %v2660_v60 = vadd.f32 %v5034_v46, %v7554_v42  ;;  %v2654_v44 = vpop.f32.mrb[65].mxu0  ;;  %v5999_v46 = vld [vmem:[%s6692_s5 + $0x70] sm:$0xff]  ;;  %s8406_s5 = sld [smem:[#allocation50_spill]] }
 0x8ce   : > { %v2655_v18 = vadd.f32 %v7554_v42, %v2654_v44 }
 0x8cf   : > { %v7559_v27 = vadd.f32 %v5984_v43, %v2660_v60 }
 0x8d0   : > { %v7562_v52 = vadd.f32 %v5985_v15, %v2655_v18  ;;  %v5037_v50 = vpop.f32.mrb[66].mxu0 }
 0x8d1   : > { %8389 = vst [vmem:[#allocation25_spill] sm:$0xff] %v7559_v27  ;;  %2753 = vadd.xlane.f32.xlu1 %v7559_v27  ;;  %v2664_v61 = vpop.f32.mrb[67].mxu0  ;;  %v2670_v7 = vadd.f32 %v5037_v50, %v7554_v42 }
 0x8d2   : > { %8390 = vst [vmem:[#allocation26_spill] sm:$0xff] %v7562_v52  ;;  %v2665_v1 = vadd.f32 %v7554_v42, %v2664_v61  ;;  %2751 = vadd.xlane.f32.xlu0 %v7562_v52 }
 0x8d3   : > { %v7577_v6 = vadd.f32 %v5988_v54, %v2670_v7 }
 0x8d4   : > { %v7569_v4 = vadd.f32 %v5986_v0, %v2665_v1  ;;  %v5040_v48 = vpop.f32.mrb[68].mxu0 }
 0x8d5   : > { %v2680_v17 = vadd.f32 %v5040_v48, %v7554_v42  ;;  %v2674_v33 = vpop.f32.mrb[69].mxu0  ;;  %8393 = vst [vmem:[#allocation29_spill] sm:$0xff] %v7577_v6 }
 0x8d6   : > { %8391 = vst [vmem:[#allocation27_spill] sm:$0xff] %v7569_v4  ;;  %2755 = vadd.xlane.f32.xlu0 %v7569_v4  ;;  %v2675_v53 = vadd.f32 %v7554_v42, %v2674_v33 }
 0x8d7   : > { %v7574_v2 = vadd.f32 %v5987_v19, %v2680_v17 }
 0x8d8   : > { %v7583_v40 = vadd.f32 %v5989_v29, %v2675_v53  ;;  %v2973_v29 = vld [vmem:[#allocation13 + $0x8] sm:$0xff] }
 0x8d9   : > { %8392 = vst [vmem:[#allocation28_spill] sm:$0xff] %v7574_v2  ;;  %2761 = vadd.xlane.f32.xlu1 %v7574_v2 }
 0x8da   : > { %2757 = vadd.xlane.f32.xlu0 %v7577_v6  ;;  %8394 = vst [vmem:[#allocation30_spill] sm:$0xff] %v7583_v40 }
 0x8de   : > { %2759 = vadd.xlane.f32.xlu0 %v7583_v40 }
 0x901   : > { %v5043_v49 = vpop.f32.mrb[70].mxu0 }
 0x902   : > { %v2690_v58 = vadd.f32 %v5043_v49, %v7554_v42  ;;  %v2684_v30 = vpop.f32.mrb[71].mxu0  ;;  %v2977_v49 = vld [vmem:[#allocation13 + $0x28] sm:$0xff] }
 0x903   : > { %v2685_v34 = vadd.f32 %v7554_v42, %v2684_v30  ;;  %v5312_v30 = vpack.c.bf16 %v2977_v49, %v2973_v29  ;;  %v2997_v29 = vld [vmem:[#allocation13 + $0xc8] sm:$0xff] }
 0x904   : > { %v7589_v10 = vadd.f32 %v5990_v36, %v2690_v58  ;;  %v2975_v58 = vld [vmem:[#allocation13 + $0x18] sm:$0xff]  ;;  %v2972_v36 = vld [vmem:[#allocation13] sm:$0xff]  ;;  %v3001_v49 = vld [vmem:[#allocation13 + $0xe8] sm:$0xff] }
 0x905   : > { %v7592_v20 = vadd.f32 %v5991_v11, %v2685_v34  ;;  %v2979_v34 = vld [vmem:[#allocation13 + $0x38] sm:$0xff]  ;;  %v2976_v11 = vld [vmem:[#allocation13 + $0x20] sm:$0xff]  ;;  %5313 = vmatprep.subr.bf16.mxu1 %v5312_v30  ;;  %v5324_v30 = vpack.c.bf16 %v3001_v49, %v2997_v29 }
 0x906   : > { %8395 = vst [vmem:[#allocation31_spill] sm:$0xff] %v7589_v10  ;;  %2765 = vadd.xlane.f32.xlu1 %v7589_v10  ;;  %v3020_v29 = vld [vmem:[#allocation13 + $0x180] sm:$0xff] }
 0x907   : > { %8396 = vst [vmem:[#allocation32_spill] sm:$0xff] %v7592_v20  ;;  %2763 = vadd.xlane.f32.xlu0 %v7592_v20  ;;  %v3024_v49 = vld [vmem:[#allocation13 + $0x1a0] sm:$0xff] }
 0x942   : > { %v5046_v63 = vpop.f32.mrb[72].mxu0 }
 0x943   : > { %v2700_v26 = vadd.f32 %v5046_v63, %v7554_v42  ;;  %v2694_v21 = vpop.f32.mrb[73].mxu0 }
 0x944   : > { %v2695_v41 = vadd.f32 %v7554_v42, %v2694_v21  ;;  %v5314_v21 = vpack.c.bf16 %v2976_v11, %v2972_v36  ;;  %v2996_v36 = vld [vmem:[#allocation13 + $0xc0] sm:$0xff] }
 0x945   : > { %v7599_v12 = vadd.f32 %v5992_v8, %v2700_v26  ;;  %v5344_v26 = vpack.c.bf16 %v2979_v34, %v2975_v58  ;;  %v2978_v8 = vld [vmem:[#allocation13 + $0x30] sm:$0xff]  ;;  %v2999_v58 = vld [vmem:[#allocation13 + $0xd8] sm:$0xff]  ;;  %v3000_v11 = vld [vmem:[#allocation13 + $0xe0] sm:$0xff] }
 0x946   : > { %v7602_v25 = vadd.f32 %v5993_v51, %v2695_v41  ;;  %v2974_v41 = vld [vmem:[#allocation13 + $0x10] sm:$0xff]  ;;  %5315 = vmatpush1.bf16.msra.mxu1 %v5314_v21  ;;  %v3003_v34 = vld [vmem:[#allocation13 + $0xf8] sm:$0xff]  ;;  %v5326_v21 = vpack.c.bf16 %v3000_v11, %v2996_v36 }
 0x947   : > { %8397 = vst [vmem:[#allocation33_spill] sm:$0xff] %v7599_v12  ;;  %2769 = vadd.xlane.f32.xlu1 %v7599_v12  ;;  %5345 = vmatprep.subr.bf16.mxu0 %v5344_v26  ;;  %v5356_v26 = vpack.c.bf16 %v3003_v34, %v2999_v58  ;;  %v3022_v34 = vld [vmem:[#allocation13 + $0x190] sm:$0xff] }
 0x948   : > { %8398 = vst [vmem:[#allocation34_spill] sm:$0xff] %v7602_v25  ;;  %2767 = vadd.xlane.f32.xlu0 %v7602_v25  ;;  %v3026_v36 = vld [vmem:[#allocation13 + $0x1b0] sm:$0xff] }
 0x949   : > { %v5370_v11 = vpack.c.bf16 %v3026_v36, %v3022_v34 }
 0x94a   : > { %v5049_v3 = vpop.f32.mrb[74].mxu0 }
 0x94b   : > { %v2710_v32 = vadd.f32 %v5049_v3, %v7554_v42  ;;  %v2704_v22 = vpop.f32.mrb[75].mxu0 }
 0x94c   : > { %v2705_v24 = vadd.f32 %v7554_v42, %v2704_v22 }
 0x94d   : > { %v7609_v35 = vadd.f32 %v5994_v62, %v2710_v32  ;;  %v5346_v32 = vpack.c.bf16 %v2978_v8, %v2974_v41  ;;  %v2981_v62 = vld [vmem:[#allocation13 + $0x48] sm:$0xff]  ;;  %v2998_v41 = vld [vmem:[#allocation13 + $0xd0] sm:$0xff] }
 0x94e   : > { %v7612_v38 = vadd.f32 %v5995_v47, %v2705_v24  ;;  %v5052_v45 = vpop.f32.mrb[76].mxu0  ;;  %v2985_v47 = vld [vmem:[#allocation13 + $0x68] sm:$0xff]  ;;  %v3002_v8 = vld [vmem:[#allocation13 + $0xf0] sm:$0xff] }
 0x94f   : > { %8399 = vst [vmem:[#allocation35_spill] sm:$0xff] %v7609_v35  ;;  %v2720_v31 = vadd.f32 %v5052_v45, %v7554_v42  ;;  %2773 = vadd.xlane.f32.xlu1 %v7609_v35  ;;  %v2714_v23 = vpop.f32.mrb[77].mxu0  ;;  %v2983_v45 = vld [vmem:[#allocation13 + $0x58] sm:$0xff]  ;;  %5347 = vmatpush1.bf16.msra.mxu0 %v5346_v32  ;;  %v3005_v32 = vld [vmem:[#allocation13 + $0x108] sm:$0xff] }
 0x950   : > { %8400 = vst [vmem:[#allocation36_spill] sm:$0xff] %v7612_v38  ;;  %v2715_v13 = vadd.f32 %v7554_v42, %v2714_v23  ;;  %2771 = vadd.xlane.f32.xlu0 %v7612_v38  ;;  %v2987_v23 = vld [vmem:[#allocation13 + $0x78] sm:$0xff] }
 0x951   : > { %v7619_v37 = vadd.f32 %v5996_v16, %v2720_v31  ;;  %v5316_v31 = vpack.c.bf16 %v2985_v47, %v2981_v62  ;;  %v2984_v16 = vld [vmem:[#allocation13 + $0x60] sm:$0xff]  ;;  %v3011_v47 = vld [vmem:[#allocation13 + $0x138] sm:$0xff] }
 0x952   : > { %v7622_v56 = vadd.f32 %v5997_v57, %v2715_v13  ;;  %v5055_v28 = vpop.f32.mrb[78].mxu0  ;;  %v2980_v13 = vld [vmem:[#allocation13 + $0x40] sm:$0xff] }
 0x953   : > { %8401 = vst [vmem:[#allocation37_spill] sm:$0xff] %v7619_v37  ;;  %v2730_v5 = vadd.f32 %v5055_v28, %v7554_v42  ;;  %2777 = vadd.xlane.f32.xlu1 %v7619_v37  ;;  %v2724_v39 = vpop.f32.mrb[79].mxu0  ;;  %v5348_v28 = vpack.c.bf16 %v2987_v23, %v2983_v45  ;;  %5317 = vmatprep.subr.bf16.mxu1 %v5316_v31  ;;  %v3004_v45 = vld [vmem:[#allocation13 + $0x100] sm:$0xff] }
 0x954   : > { %8402 = vst [vmem:[#allocation38_spill] sm:$0xff] %v7622_v56  ;;  %v2725_v9 = vadd.f32 %v7554_v42, %v2724_v39  ;;  %2775 = vadd.xlane.f32.xlu0 %v7622_v56  ;;  %v2982_v39 = vld [vmem:[#allocation13 + $0x50] sm:$0xff]  ;;  %v3008_v31 = vld [vmem:[#allocation13 + $0x120] sm:$0xff] }
 0x955   : > { %v7629_v55 = vadd.f32 %v5998_v59, %v2730_v5  ;;  %v5318_v5 = vpack.c.bf16 %v2984_v16, %v2980_v13  ;;  %v2989_v59 = vld [vmem:[#allocation13 + $0x88] sm:$0xff]  ;;  %5349 = vmatprep.subr.bf16.mxu0 %v5348_v28  ;;  %v5330_v13 = vpack.c.bf16 %v3008_v31, %v3004_v45  ;;  %v3006_v16 = vld [vmem:[#allocation13 + $0x110] sm:$0xff] }
 0x956   : > { %v7632_v60 = vadd.f32 %v5999_v46, %v2725_v9  ;;  %v2986_v9 = vld [vmem:[#allocation13 + $0x70] sm:$0xff] }
 0x957   : > { %8403 = vst [vmem:[#allocation39_spill] sm:$0xff] %v7629_v55  ;;  %2781 = vadd.xlane.f32.xlu1 %v7629_v55  ;;  %5319 = vmatpush1.bf16.msra.mxu1 %v5318_v5  ;;  %v3010_v28 = vld [vmem:[#allocation13 + $0x130] sm:$0xff] }
 0x958   : > { %8404 = vst [vmem:[#allocation40_spill] sm:$0xff] %v7632_v60  ;;  %2779 = vadd.xlane.f32.xlu0 %v7632_v60  ;;  %v5362_v5 = vpack.c.bf16 %v3010_v28, %v3006_v16  ;;  %v3034_v45 = vld [vmem:[#allocation13 + $0x1f0] sm:$0xff] }
 0x95e   : > { %v2754_v44 = vpop.xlane.xlu1 %2753 }
 0x95f   : > { %v2785_v18 = vmul.f32 0.0078125, %v2754_v44  ;;  %v2752_v43 = vpop.xlane.xlu0 %2751  ;;  %v5350_v44 = vpack.c.bf16 %v2986_v9, %v2982_v39  ;;  %v3013_v39 = vld [vmem:[#allocation13 + $0x148] sm:$0xff] }
 0x960   : > { %v2784_v15 = vmul.f32 0.0078125, %v2752_v43  ;;  %v2991_v43 = vld [vmem:[#allocation13 + $0x98] sm:$0xff]  ;;  %v3017_v9 = vld [vmem:[#allocation13 + $0x168] sm:$0xff] }
 0x961   : > { %v7637_v50 = vsub.f32 %v7559_v27, %v2785_v18  ;;  %v2993_v18 = vld [vmem:[#allocation13 + $0xa8] sm:$0xff]  ;;  %5351 = vmatpush1.bf16.msra.mxu0 %v5350_v44  ;;  %v3019_v44 = vld [vmem:[#allocation13 + $0x178] sm:$0xff] }
 0x962   : > { %v7640_v42 = vsub.f32 %v7562_v52, %v2784_v15  ;;  %v2995_v15 = vld [vmem:[#allocation13 + $0xb8] sm:$0xff] }
 0x963   : > { %v2756_v61 = vpop.xlane.xlu0 %2755  ;;  %v2817_v1 = vmul.f32 %v7637_v50, %v7637_v50 }
 0x964   : > { %v2786_v7 = vmul.f32 0.0078125, %v2756_v61  ;;  %v2816_v0 = vmul.f32 %v7640_v42, %v7640_v42 }
 0x965   : > { %2834 = vadd.xlane.f32.xlu1 %v2817_v1  ;;  %v5320_v1 = vpack.c.bf16 %v2993_v18, %v2989_v59  ;;  %v3015_v59 = vld [vmem:[#allocation13 + $0x158] sm:$0xff]  ;;  %v3012_v18 = vld [vmem:[#allocation13 + $0x140] sm:$0xff] }
 0x966   : > { %v7647_v48 = vsub.f32 %v7569_v4, %v2786_v7  ;;  %v2762_v17 = vpop.xlane.xlu1 %2761  ;;  %2832 = vadd.xlane.f32.xlu0 %v2816_v0  ;;  %v5352_v7 = vpack.c.bf16 %v2995_v15, %v2991_v43  ;;  %v2988_v0 = vld [vmem:[#allocation13 + $0x80] sm:$0xff]  ;;  %v5364_v15 = vpack.c.bf16 %v3019_v44, %v3015_v59 }
 0x967   : > { %v2789_v33 = vmul.f32 0.0078125, %v2762_v17  ;;  %v2758_v19 = vpop.xlane.xlu0 %2757  ;;  %v2992_v17 = vld [vmem:[#allocation13 + $0xa0] sm:$0xff]  ;;  %5321 = vmatprep.subr.bf16.mxu1 %v5320_v1  ;;  %v3014_v1 = vld [vmem:[#allocation13 + $0x150] sm:$0xff] }
 0x968   : > { %v2787_v54 = vmul.f32 0.0078125, %v2758_v19  ;;  %v2818_v53 = vmul.f32 %v7647_v48, %v7647_v48  ;;  %v5322_v19 = vpack.c.bf16 %v2992_v17, %v2988_v0  ;;  %5353 = vmatprep.subr.bf16.mxu0 %v5352_v7  ;;  %v3016_v43 = vld [vmem:[#allocation13 + $0x160] sm:$0xff]  ;;  %v3018_v7 = vld [vmem:[#allocation13 + $0x170] sm:$0xff]  ;;  %v3021_v17 = vld [vmem:[#allocation13 + $0x188] sm:$0xff] }
 0x969   : > { %v7655_v51 = vsub.f32 %v7574_v2, %v2789_v33  ;;  %v2990_v33 = vld [vmem:[#allocation13 + $0x90] sm:$0xff]  ;;  %v5366_v0 = vpack.c.bf16 %v3018_v7, %v3014_v1 }
 0x96a   : > { %v7652_v63 = vsub.f32 %v7577_v6, %v2787_v54  ;;  %2836 = vadd.xlane.f32.xlu0 %v2818_v53  ;;  %v2994_v54 = vld [vmem:[#allocation13 + $0xb0] sm:$0xff]  ;;  %5323 = vmatpush1.bf16.msra.mxu1 %v5322_v19  ;;  %v3023_v19 = vld [vmem:[#allocation13 + $0x198] sm:$0xff] }
 0x96b   : > { %v2760_v3 = vpop.xlane.xlu0 %2759  ;;  %v2821_v46 = vmul.f32 %v7655_v51, %v7655_v51  ;;  %v5354_v53 = vpack.c.bf16 %v2994_v54, %v2990_v33  ;;  %5325 = vmatprep.subr.bf16.mxu1 %v5324_v30  ;;  %v3025_v33 = vld [vmem:[#allocation13 + $0x1a8] sm:$0xff]  ;;  %v5338_v30 = vpack.c.bf16 %v3024_v49, %v3020_v29 }
 0x96c   : > { %v2788_v22 = vmul.f32 0.0078125, %v2760_v3  ;;  %v2819_v24 = vmul.f32 %v7652_v63, %v7652_v63  ;;  %v5358_v3 = vpack.c.bf16 %v3002_v8, %v2998_v41  ;;  %v5336_v54 = vpack.c.bf16 %v3025_v33, %v3021_v17  ;;  %v3031_v41 = vld [vmem:[#allocation13 + $0x1d8] sm:$0xff] }
 0x96d   : > { %5355 = vmatpush1.bf16.msra.mxu0 %v5354_v53  ;;  %v3027_v53 = vld [vmem:[#allocation13 + $0x1b8] sm:$0xff] }
 0x96e   : > { %v7660_v57 = vsub.f32 %v7583_v40, %v2788_v22  ;;  %2838 = vadd.xlane.f32.xlu1 %v2819_v24  ;;  %5357 = vmatprep.subr.bf16.mxu0 %v5356_v26  ;;  %v3009_v22 = vld [vmem:[#allocation13 + $0x128] sm:$0xff]  ;;  %v3007_v24 = vld [vmem:[#allocation13 + $0x118] sm:$0xff]  ;;  %v5368_v58 = vpack.c.bf16 %v3027_v53, %v3023_v19 }
 0x96f   : > { %5327 = vmatpush1.bf16.msra.mxu1 %v5326_v21  ;;  %v5328_v62 = vpack.c.bf16 %v3009_v22, %v3005_v32  ;;  %v5360_v23 = vpack.c.bf16 %v3011_v47, %v3007_v24  ;;  %v3029_v26 = vld [vmem:[#allocation13 + $0x1c8] sm:$0xff]  ;;  %v3028_v32 = vld [vmem:[#allocation13 + $0x1c0] sm:$0xff]  ;;  %v3030_v47 = vld [vmem:[#allocation13 + $0x1d0] sm:$0xff] }
 0x970   : > { %v2820_v61 = vmul.f32 %v7660_v57, %v7660_v57  ;;  %v3033_v21 = vld [vmem:[#allocation13 + $0x1e8] sm:$0xff]  ;;  %v3032_v22 = vld [vmem:[#allocation13 + $0x1e0] sm:$0xff]  ;;  %v5374_v31 = vpack.c.bf16 %v3034_v45, %v3030_v47 }
 0x971   : > { %5359 = vmatpush1.bf16.msra.mxu0 %v5358_v3  ;;  %5329 = vmatprep.subr.bf16.mxu1 %v5328_v62  ;;  %v5340_v8 = vpack.c.bf16 %v3033_v21, %v3029_v26  ;;  %v3035_v3 = vld [vmem:[#allocation13 + $0x1f8] sm:$0xff]  ;;  %v5342_v62 = vpack.c.bf16 %v3032_v22, %v3028_v32 }
 0x972   : > { %2842 = vadd.xlane.f32.xlu1 %v2821_v46  ;;  %2840 = vadd.xlane.f32.xlu0 %v2820_v61  ;;  %v5332_v46 = vpack.c.bf16 %v3017_v9, %v3013_v39  ;;  %v5334_v61 = vpack.c.bf16 %v3016_v43, %v3012_v18  ;;  %v5372_v24 = vpack.c.bf16 %v3035_v3, %v3031_v41 }
 0x973   : > { %5361 = vmatprep.subr.bf16.mxu0 %v5360_v23  ;;  %5331 = vmatpush1.bf16.msra.mxu1 %v5330_v13 }
 0x974   : > { %5333 = vmatprep.subr.bf16.mxu1 %v5332_v46 }
 0x975   : > { %5363 = vmatpush1.bf16.msra.mxu0 %v5362_v5 }
 0x976   : > { %5365 = vmatprep.subr.bf16.mxu0 %v5364_v15 }
 0x977   : > { %5335 = vmatpush1.bf16.msra.mxu1 %v5334_v61 }
 0x978   : > { %5337 = vmatprep.subr.bf16.mxu1 %v5336_v54 }
 0x979   : > { %5367 = vmatpush1.bf16.msra.mxu0 %v5366_v0 }
 0x97a   : > { %5369 = vmatprep.subr.bf16.mxu0 %v5368_v58 }
 0x97b   : > { %5339 = vmatpush1.bf16.msra.mxu1 %v5338_v30 }
 0x97c   : > { %5341 = vmatprep.subr.bf16.mxu1 %v5340_v8 }
 0x97d   : > { %5371 = vmatpush1.bf16.msra.mxu0 %v5370_v11 }
 0x97e   : > { %5373 = vmatprep.subr.bf16.mxu0 %v5372_v24 }
 0x97f   : > { %5343 = vmatpush1.bf16.msra.mxu1 %v5342_v62 }
 0x981   : > { %5375 = vmatpush1.bf16.msra.mxu0 %v5374_v31 }
 0x993   : > { %v2766_v23 = vpop.xlane.xlu1 %2765 }
 0x994   : > { %v2791_v13 = vmul.f32 0.0078125, %v2766_v23  ;;  %v2764_v16 = vpop.xlane.xlu0 %2763 }
 0x995   : > { %v2790_v28 = vmul.f32 0.0078125, %v2764_v16 }
 0x996   : > { %v7667_v5 = vsub.f32 %v7589_v10, %v2791_v13 }
 0x997   : > { %v7670_v39 = vsub.f32 %v7592_v20, %v2790_v28 }
 0x998   : > { %v2823_v9 = vmul.f32 %v7667_v5, %v7667_v5 }
 0x999   : > { %v2822_v59 = vmul.f32 %v7670_v39, %v7670_v39 }
 0x99a   : > { %2846 = vadd.xlane.f32.xlu1 %v2823_v9 }
 0x99b   : > { %2844 = vadd.xlane.f32.xlu0 %v2822_v59 }
 0x9d4   : > { %v2770_v46 = vpop.xlane.xlu1 %2769 }
 0x9d5   : > { %v2793_v44 = vmul.f32 0.0078125, %v2770_v46  ;;  %v2768_v18 = vpop.xlane.xlu0 %2767 }
 0x9d6   : > { %v2792_v43 = vmul.f32 0.0078125, %v2768_v18 }
 0x9d7   : > { %v7677_v15 = vsub.f32 %v7599_v12, %v2793_v44 }
 0x9d8   : > { %v7680_v61 = vsub.f32 %v7602_v25, %v2792_v43 }
 0x9d9   : > { %v2825_v1 = vmul.f32 %v7677_v15, %v7677_v15 }
 0x9da   : > { %v2824_v7 = vmul.f32 %v7680_v61, %v7680_v61 }
 0x9db   : > { %2850 = vadd.xlane.f32.xlu1 %v2825_v1 }
 0x9dc   : > { %v2774_v0 = vpop.xlane.xlu1 %2773  ;;  %2848 = vadd.xlane.f32.xlu0 %v2824_v7 }
 0x9dd   : > { %v2795_v17 = vmul.f32 0.0078125, %v2774_v0  ;;  %v2772_v33 = vpop.xlane.xlu0 %2771 }
 0x9de   : > { %v2794_v19 = vmul.f32 0.0078125, %v2772_v33 }
 0x9df   : > { %v7687_v54 = vsub.f32 %v7609_v35, %v2795_v17 }
 0x9e0   : > { %v7690_v53 = vsub.f32 %v7612_v38, %v2794_v19  ;;  %v2778_v29 = vpop.xlane.xlu1 %2777 }
 0x9e1   : > { %v2797_v49 = vmul.f32 0.0078125, %v2778_v29  ;;  %v2776_v58 = vpop.xlane.xlu0 %2775  ;;  %v2827_v30 = vmul.f32 %v7687_v54, %v7687_v54 }
 0x9e2   : > { %v2796_v34 = vmul.f32 0.0078125, %v2776_v58  ;;  %v2826_v36 = vmul.f32 %v7690_v53, %v7690_v53 }
 0x9e3   : > { %v7697_v11 = vsub.f32 %v7619_v37, %v2797_v49  ;;  %2854 = vadd.xlane.f32.xlu1 %v2827_v30  ;;  %v7719_v30 = vld [vmem:[%s8405_s16] ss:$0 sm:$0xff]  ;;  %s6200_s16 = scalar_lea.vmem %s8244_s24, 2048 }
 0x9e4   : > { %v7700_v26 = vsub.f32 %v7622_v56, %v2796_v34  ;;  %v2782_v21 = vpop.xlane.xlu1 %2781  ;;  %2852 = vadd.xlane.f32.xlu0 %v2826_v36  ;;  %p6201_p6 = scmp.ne.s32.totalorder %s8244_s24, %s6200_s16 }
 0x9e5   : > { %v2799_v41 = vmul.f32 0.0078125, %v2782_v21  ;;  %v2780_v8 = vpop.xlane.xlu0 %2779  ;;  %v2829_v3 = vmul.f32 %v7697_v11, %v7697_v11  ;;  %v7726_v21 = vld [vmem:[%s8406_s5] ss:$0 sm:$0xff]  ;;  %s6206_s5 = scalar_lea.vmem %s6205_s28, 4096 }
 0x9e6   : > { %v2798_v32 = vmul.f32 0.0078125, %v2780_v8  ;;  %v2828_v22 = vmul.f32 %v7700_v26, %v7700_v26  ;;  %p6202_p7 = pnand %p6201_p6, %p8433_p0  ;;  %p6208_p4 = scmp.lt.s32.totalorder %s6206_s5, %s6200_s16 }
 0x9e7   : > { %v7707_v24 = vsub.f32 %v7629_v55, %v2799_v41  ;;  %2858 = vadd.xlane.f32.xlu1 %v2829_v3 }
 0x9e8   : > { %v7710_v62 = vsub.f32 %v7632_v60, %v2798_v32  ;;  %2856 = vadd.xlane.f32.xlu0 %v2828_v22  ;;  %p6203_p5 = pneg %p6202_p7  ;;  %p6209_p9 = por %p6208_p4, %p6207_p2 }
 0x9e9   : > { %v2831_v47 = vmul.f32 %v7707_v24, %v7707_v24 }
 0x9ea   : > { %v2830_v45 = vmul.f32 %v7710_v62, %v7710_v62  ;;  %p6210_p1 = pnand %p6209_p9, %p6203_p5 }
 0x9eb   : > { %2862 = vadd.xlane.f32.xlu1 %v2831_v47 }
 0x9ec   : > { %2860 = vadd.xlane.f32.xlu0 %v2830_v45 }
 0x9f2   : > { %v2835_v31 = vpop.xlane.xlu1 %2834 }
 0x9f3   : > { %v2865_v23 = vmul.f32 0.0078125, %v2835_v31  ;;  %v2833_v13 = vpop.xlane.xlu0 %2832 }
 0x9f4   : > { %v2864_v16 = vmul.f32 0.0078125, %v2833_v13 }
 0x9f5   : > { %v2881_v28 = vadd.f32 1e-05, %v2865_v23 }
 0x9f6   : > { %v2880_v9 = vadd.f32 1e-05, %v2864_v16 }
 0x9f7   : > { %5824 = vrsqrt.f32 %v2881_v28  ;;  %v2837_v59 = vpop.xlane.xlu0 %2836 }
 0x9f8   : > { %5826 = vrsqrt.f32 %v2880_v9  ;;  %v2866_v46 = vmul.f32 0.0078125, %v2837_v59 }
 0x9fa   : > { %v2882_v44 = vadd.f32 1e-05, %v2866_v46 }
 0x9fb   : > { %v2839_v18 = vpop.xlane.xlu1 %2838 }
 0x9fc   : > { %5828 = vrsqrt.f32 %v2882_v44  ;;  %v2867_v43 = vmul.f32 0.0078125, %v2839_v18  ;;  %v3716_v44 = vld [vmem:[#allocation15 + $0x80] sm:$0xff] }
 0x9fd   : > { %v3748_v18 = vld [vmem:[#allocation15 + $0x180] sm:$0xff] }
 0x9fe   : > { %v2883_v1 = vadd.f32 1e-05, %v2867_v43 }
 0x9ff   : > { %v2843_v7 = vpop.xlane.xlu1 %2842  ;;  %v2841_v0 = vpop.xlane.xlu0 %2840 }
 0xa00   : > { %5830 = vrsqrt.f32 %v2883_v1  ;;  %v2869_v17 = vmul.f32 0.0078125, %v2843_v7  ;;  %v2868_v33 = vmul.f32 0.0078125, %v2841_v0  ;;  %v3749_v1 = vld [vmem:[#allocation15 + $0x188] sm:$0xff]  ;;  %v3700_v7 = vld [vmem:[#allocation15] sm:$0xff] }
 0xa01   : > { %v5825_v19 = vpop.eup %5824  ;;  %v3701_v0 = vld [vmem:[#allocation15 + $0x8] sm:$0xff] }
 0xa02   : > { %v5827_v29 = vpop.eup %5826  ;;  %v2885_v49 = vadd.f32 1e-05, %v2869_v17  ;;  %v2884_v58 = vadd.f32 1e-05, %v2868_v33  ;;  %v2913_v36 = vmul.f32 %v5825_v19, %v7637_v50  ;;  %v7754_v17 = vpack.c.bf16 %v3749_v1, %v3748_v18  ;;  %v3732_v19 = vld [vmem:[#allocation15 + $0x100] sm:$0xff] }
 0xa03   : > { %v2912_v34 = vmul.f32 %v5827_v29, %v7640_v42  ;;  %v5378_v33 = vpack.c.bf16 %v3701_v0, %v3700_v7  ;;  %v3733_v29 = vld [vmem:[#allocation15 + $0x108] sm:$0xff] }
 0xa04   : > { %5832 = vrsqrt.f32 %v2884_v58  ;;  %v2935_v32 = vmul.f32 %v7719_v30, %v2913_v36  ;;  %v7758_v58 = vpack.c.bf16 %v3733_v29, %v3732_v19  ;;  %v3750_v36 = vld [vmem:[#allocation15 + $0x190] sm:$0xff]  ;;  %5409 = vmatprep.subr.bf16.mxu0 %v7754_v17 }
 0xa05   : > { %v2934_v41 = vmul.f32 %v7719_v30, %v2912_v34  ;;  %5834 = vrsqrt.f32 %v2885_v49  ;;  %v3718_v49 = vld [vmem:[#allocation15 + $0x90] sm:$0xff]  ;;  %v3719_v34 = vld [vmem:[#allocation15 + $0x98] sm:$0xff] }
 0xa06   : > { %v5829_v8 = vpop.eup %5828  ;;  %v2957_v50 = vadd.f32 %v7726_v21, %v2935_v32  ;;  %v3702_v32 = vld [vmem:[#allocation15 + $0x10] sm:$0xff] }
 0xa07   : > { %v2956_v3 = vadd.f32 %v7726_v21, %v2934_v41  ;;  %v2914_v22 = vmul.f32 %v5829_v8, %v7647_v48  ;;  %v3751_v41 = vld [vmem:[#allocation15 + $0x198] sm:$0xff]  ;;  %v5380_v8 = vpack.c.bf16 %v3719_v34, %v3718_v49 }
 0xa09   : > { %3123 = vmatmul.mubr.f32.vlgmr.msra.gmra.mrb[48].mxu1 %v2956_v3  ;;  %3284 = vmatmul.mubr.f32.vlgmr.msra.gmra.mrb[80].mxu0 %v2956_v3  ;;  %v2936_v47 = vmul.f32 %v7719_v30, %v2914_v22  ;;  %v7761_v3 = vpack.c.bf16 %v3751_v41, %v3750_v36  ;;  %v3703_v22 = vld [vmem:[#allocation15 + $0x18] sm:$0xff] }
 0xa0a   : > { %v5831_v42 = vpop.eup %5830  ;;  %3128 = vmatprep.mubr.f32.mxu1 %v8385_v14  ;;  %3289 = vmatprep.mubr.f32.mxu0 %v8385_v14 }
 0xa0b   : > { %v2915_v45 = vmul.f32 %v5831_v42, %v7652_v63  ;;  %v2958_v31 = vadd.f32 %v7726_v21, %v2936_v47  ;;  %v3734_v42 = vld [vmem:[#allocation15 + $0x110] sm:$0xff]  ;;  %5411 = vmatpush3.bf16.msra.mxu0 %v7758_v58  ;;  %v3735_v47 = vld [vmem:[#allocation15 + $0x118] sm:$0xff] }
 0xa0c   : > { %5413 = vmatprep.subr.bf16.mxu0 %v7761_v3 }
 0xa0d   : > { %3129 = vmatmul.mubr.f32.gmra.mrb[50].mxu1 %v2957_v50  ;;  %3290 = vmatmul.mubr.f32.gmra.mrb[82].mxu0 %v2957_v50  ;;  %v2937_v23 = vmul.f32 %v7719_v30, %v2915_v45  ;;  %v5382_v50 = vpack.c.bf16 %v3703_v22, %v3702_v32  ;;  %v3720_v45 = vld [vmem:[#allocation15 + $0xa0] sm:$0xff]  ;;  %v3754_v32 = vld [vmem:[#allocation15 + $0x1b0] sm:$0xff] }
 0xa0e   : > { %3134 = vmatprep.mubr.f32.mxu1 %v8385_v14  ;;  %3295 = vmatprep.mubr.f32.mxu0 %v8385_v14  ;;  %v5833_v48 = vpop.eup %5832 }
 0xa0f   : > { %v5835_v13 = vpop.eup %5834  ;;  %v2916_v16 = vmul.f32 %v5833_v48, %v7660_v57  ;;  %v2959_v63 = vadd.f32 %v7726_v21, %v2937_v23  ;;  %v3721_v48 = vld [vmem:[#allocation15 + $0xa8] sm:$0xff] }
 0xa10   : > { %v2917_v9 = vmul.f32 %v5835_v13, %v7655_v51  ;;  %v3717_v51 = vld [vmem:[#allocation15 + $0x88] sm:$0xff]  ;;  %v5384_v23 = vpack.c.bf16 %v3721_v48, %v3720_v45  ;;  %v3752_v13 = vld [vmem:[#allocation15 + $0x1a0] sm:$0xff] }
 0xa11   : > { %3135 = vmatmul.mubr.f32.gmra.mrb[52].mxu1 %v2958_v31  ;;  %3296 = vmatmul.mubr.f32.gmra.mrb[84].mxu0 %v2958_v31  ;;  %v2938_v28 = vmul.f32 %v7719_v30, %v2916_v16  ;;  %v5376_v43 = vpack.c.bf16 %v3717_v51, %v3716_v44  ;;  %v7765_v31 = vpack.c.bf16 %v3735_v47, %v3734_v42  ;;  %v3753_v16 = vld [vmem:[#allocation15 + $0x1a8] sm:$0xff]  ;;  %v3755_v42 = vld [vmem:[#allocation15 + $0x1b8] sm:$0xff] }
 0xa12   : > { %3140 = vmatprep.mubr.f32.mxu1 %v8385_v14  ;;  %3301 = vmatprep.mubr.f32.mxu0 %v8385_v14  ;;  %v2939_v59 = vmul.f32 %v7719_v30, %v2917_v9  ;;  %v3705_v9 = vld [vmem:[#allocation15 + $0x28] sm:$0xff]  ;;  %v3707_v47 = vld [vmem:[#allocation15 + $0x38] sm:$0xff]  ;;  %v7784_v45 = vpack.c.bf16 %v3755_v42, %v3754_v32 }
 0xa13   : > { %v2960_v57 = vadd.f32 %v7726_v21, %v2938_v28  ;;  %5377 = vmatprep.subr.bf16.mxu1 %v5376_v43  ;;  %v7767_v28 = vpack.c.bf16 %v3753_v16, %v3752_v13  ;;  %5415 = vmatpush3.bf16.msra.mxu0 %v7765_v31  ;;  %v3739_v13 = vld [vmem:[#allocation15 + $0x138] sm:$0xff] }
 0xa14   : > { %v2961_v46 = vadd.f32 %v7726_v21, %v2939_v59  ;;  %5379 = vmatpush3.bf16.msra.mxu1 %v5378_v33  ;;  %v3737_v59 = vld [vmem:[#allocation15 + $0x128] sm:$0xff]  ;;  %v3743_v42 = vld [vmem:[#allocation15 + $0x158] sm:$0xff] }
 0xa15   : > { %3141 = vmatmul.mubr.f32.gmra.mrb[54].mxu1 %v2959_v63  ;;  %3302 = vmatmul.mubr.f32.gmra.mrb[86].mxu0 %v2959_v63  ;;  %v3704_v63 = vld [vmem:[#allocation15 + $0x20] sm:$0xff] }
 0xa16   : > { %3146 = vmatprep.mubr.f32.mxu1 %v8385_v14  ;;  %3307 = vmatprep.mubr.f32.mxu0 %v8385_v14 }
 0xa17   : > { %5381 = vmatprep.subr.bf16.mxu1 %v5380_v8  ;;  %5417 = vmatprep.subr.bf16.mxu0 %v7767_v28 }
 0xa18   : > { %5383 = vmatpush3.bf16.msra.mxu1 %v5382_v50  ;;  %v3706_v50 = vld [vmem:[#allocation15 + $0x30] sm:$0xff] }
 0xa19   : > { %3147 = vmatmul.mubr.f32.gmra.mrb[56].mxu1 %v2960_v57  ;;  %3308 = vmatmul.mubr.f32.gmra.mrb[88].mxu0 %v2960_v57  ;;  %v3736_v57 = vld [vmem:[#allocation15 + $0x120] sm:$0xff]  ;;  %v5390_v48 = vpack.c.bf16 %v3707_v47, %v3706_v50 }
 0xa1a   : > { %3152 = vmatprep.mubr.f32.mxu1 %v8385_v14  ;;  %3313 = vmatprep.mubr.f32.mxu0 %v8385_v14  ;;  %v7770_v44 = vpack.c.bf16 %v3737_v59, %v3736_v57  ;;  %v3756_v57 = vld [vmem:[#allocation15 + $0x1c0] sm:$0xff] }
 0xa1b   : > { %5385 = vmatprep.subr.bf16.mxu1 %v5384_v23  ;;  %v3738_v23 = vld [vmem:[#allocation15 + $0x130] sm:$0xff] }
 0xa1c   : > { %5419 = vmatpush3.bf16.msra.mxu0 %v7770_v44  ;;  %v7786_v16 = vpack.c.bf16 %v3739_v13, %v3738_v23 }
 0xa1d   : > { %3153 = vmatmul.mubr.f32.gmra.mrb[58].mxu1 %v2961_v46  ;;  %3314 = vmatmul.mubr.f32.gmra.mrb[90].mxu0 %v2961_v46  ;;  %v5386_v46 = vpack.c.bf16 %v3705_v9, %v3704_v63  ;;  %v3724_v63 = vld [vmem:[#allocation15 + $0xc0] sm:$0xff]  ;;  %v3725_v9 = vld [vmem:[#allocation15 + $0xc8] sm:$0xff] }
 0xa1e   : > { %3158 = vmatprep.mubr.f32.mxu1 %v8385_v14  ;;  %3319 = vmatprep.mubr.f32.mxu0 %v8385_v14  ;;  %v5392_v59 = vpack.c.bf16 %v3725_v9, %v3724_v63  ;;  %v3728_v63 = vld [vmem:[#allocation15 + $0xe0] sm:$0xff]  ;;  %v3729_v9 = vld [vmem:[#allocation15 + $0xe8] sm:$0xff] }
 0xa1f   : > { %5387 = vmatpush3.bf16.msra.mxu1 %v5386_v46  ;;  %5421 = vmatprep.subr.bf16.mxu0 %v7784_v45  ;;  %v3757_v46 = vld [vmem:[#allocation15 + $0x1c8] sm:$0xff] }
 0xa20   : > { %5423 = vmatpush3.bf16.msra.mxu0 %v7786_v16 }
 0xa27   : > { %v2847_v51 = vpop.xlane.xlu1 %2846 }
 0xa28   : > { %v2871_v18 = vmul.f32 0.0078125, %v2847_v51  ;;  %v2845_v43 = vpop.xlane.xlu0 %2844  ;;  %v3708_v51 = vld [vmem:[#allocation15 + $0x40] sm:$0xff] }
 0xa29   : > { %v2870_v1 = vmul.f32 0.0078125, %v2845_v43  ;;  %v7790_v43 = vpack.c.bf16 %v3757_v46, %v3756_v57  ;;  %v3760_v57 = vld [vmem:[#allocation15 + $0x1e0] sm:$0xff]  ;;  %v5400_v46 = vpack.c.bf16 %v3729_v9, %v3728_v63  ;;  %v3746_v9 = vld [vmem:[#allocation15 + $0x170] sm:$0xff] }
 0xa2a   : > { %v2887_v7 = vadd.f32 1e-05, %v2871_v18  ;;  %v3709_v18 = vld [vmem:[#allocation15 + $0x48] sm:$0xff] }
 0xa2b   : > { %v2886_v0 = vadd.f32 1e-05, %v2870_v1  ;;  %v5394_v1 = vpack.c.bf16 %v3709_v18, %v3708_v51  ;;  %5425 = vmatprep.subr.bf16.mxu0 %v7790_v43  ;;  %v3761_v51 = vld [vmem:[#allocation15 + $0x1e8] sm:$0xff]  ;;  %v3712_v18 = vld [vmem:[#allocation15 + $0x60] sm:$0xff] }
 0xa2c   : > { %5836 = vrsqrt.f32 %v2887_v7  ;;  %v3740_v7 = vld [vmem:[#allocation15 + $0x140] sm:$0xff] }
 0xa2d   : > { %5838 = vrsqrt.f32 %v2886_v0  ;;  %v3741_v0 = vld [vmem:[#allocation15 + $0x148] sm:$0xff] }
 0xa36   : > { %v5837_v33 = vpop.eup %5836 }
 0xa37   : > { %v5839_v19 = vpop.eup %5838  ;;  %v2919_v49 = vmul.f32 %v5837_v33, %v7667_v5  ;;  %v3722_v5 = vld [vmem:[#allocation15 + $0xb0] sm:$0xff]  ;;  %v7792_v33 = vpack.c.bf16 %v3741_v0, %v3740_v7  ;;  %v7802_v7 = vpack.c.bf16 %v3761_v51, %v3760_v57  ;;  %v3747_v57 = vld [vmem:[#allocation15 + $0x178] sm:$0xff] }
 0xa38   : > { %v2918_v29 = vmul.f32 %v5839_v19, %v7670_v39  ;;  %v3723_v39 = vld [vmem:[#allocation15 + $0xb8] sm:$0xff]  ;;  %v3726_v19 = vld [vmem:[#allocation15 + $0xd0] sm:$0xff] }
 0xa39   : > { %v2941_v41 = vmul.f32 %v7719_v30, %v2919_v49  ;;  %v5388_v22 = vpack.c.bf16 %v3723_v39, %v3722_v5  ;;  %v3758_v49 = vld [vmem:[#allocation15 + $0x1d0] sm:$0xff]  ;;  %5427 = vmatpush3.bf16.msra.mxu0 %v7792_v33 }
 0xa3a   : > { %v2940_v34 = vmul.f32 %v7719_v30, %v2918_v29  ;;  %v3727_v29 = vld [vmem:[#allocation15 + $0xd8] sm:$0xff] }
 0xa3b   : > { %v2963_v8 = vadd.f32 %v7726_v21, %v2941_v41  ;;  %5389 = vmatprep.subr.bf16.mxu1 %v5388_v22  ;;  %v3710_v41 = vld [vmem:[#allocation15 + $0x50] sm:$0xff] }
 0xa3c   : > { %v2962_v36 = vadd.f32 %v7726_v21, %v2940_v34  ;;  %5391 = vmatpush3.bf16.msra.mxu1 %v5390_v48  ;;  %v5396_v34 = vpack.c.bf16 %v3727_v29, %v3726_v19  ;;  %v3742_v22 = vld [vmem:[#allocation15 + $0x150] sm:$0xff]  ;;  %v3744_v19 = vld [vmem:[#allocation15 + $0x160] sm:$0xff]  ;;  %v3745_v29 = vld [vmem:[#allocation15 + $0x168] sm:$0xff] }
 0xa3d   : > { %5393 = vmatprep.subr.bf16.mxu1 %v5392_v59  ;;  %v7798_v48 = vpack.c.bf16 %v3743_v42, %v3742_v22  ;;  %v3763_v42 = vld [vmem:[#allocation15 + $0x1f8] sm:$0xff] }
 0xa3e   : > { %3159 = vmatmul.mubr.f32.gmra.mrb[60].mxu1 %v2962_v36  ;;  %3320 = vmatmul.mubr.f32.gmra.mrb[92].mxu0 %v2962_v36  ;;  %v3759_v36 = vld [vmem:[#allocation15 + $0x1d8] sm:$0xff] }
 0xa3f   : > { %3164 = vmatprep.mubr.f32.mxu1 %v8385_v14  ;;  %3325 = vmatprep.mubr.f32.mxu0 %v8385_v14  ;;  %v7796_v39 = vpack.c.bf16 %v3759_v36, %v3758_v49  ;;  %v7804_v49 = vpack.c.bf16 %v3745_v29, %v3744_v19  ;;  %v3730_v36 = vld [vmem:[#allocation15 + $0xf0] sm:$0xff] }
 0xa40   : > { %5395 = vmatpush3.bf16.msra.mxu1 %v5394_v1  ;;  %v3713_v1 = vld [vmem:[#allocation15 + $0x68] sm:$0xff] }
 0xa41   : > { %5397 = vmatprep.subr.bf16.mxu1 %v5396_v34  ;;  %5429 = vmatprep.subr.bf16.mxu0 %v7796_v39  ;;  %v5402_v0 = vpack.c.bf16 %v3713_v1, %v3712_v18  ;;  %8407 = vst [vmem:[#allocation41_spill] sm:$0xff] %v7804_v49 }
 0xa42   : > { %3165 = vmatmul.mubr.f32.gmra.mrb[62].mxu1 %v2963_v8  ;;  %3326 = vmatmul.mubr.f32.gmra.mrb[94].mxu0 %v2963_v8  ;;  %v3711_v8 = vld [vmem:[#allocation15 + $0x58] sm:$0xff] }
 0xa43   : > { %3170 = vmatprep.mubr.f32.mxu1 %v8385_v14  ;;  %3331 = vmatprep.mubr.f32.mxu0 %v8385_v14  ;;  %v5398_v32 = vpack.c.bf16 %v3711_v8, %v3710_v41  ;;  %v3731_v41 = vld [vmem:[#allocation15 + $0xf8] sm:$0xff]  ;;  %v3762_v8 = vld [vmem:[#allocation15 + $0x1f0] sm:$0xff] }
 0xa44   : > { %5431 = vmatpush3.bf16.msra.mxu0 %v7798_v48  ;;  %v5404_v22 = vpack.c.bf16 %v3731_v41, %v3730_v36 }
 0xa45   : > { %5399 = vmatpush3.bf16.msra.mxu1 %v5398_v32  ;;  %5433 = vmatprep.subr.bf16.mxu0 %v7802_v7 }
 0xa46   : > { %5401 = vmatprep.subr.bf16.mxu1 %v5400_v46  ;;  %v7810_v46 = vpack.c.bf16 %v3747_v57, %v3746_v9 }
 0xa48   : > { %5435 = vmatpush3.bf16.msra.mxu0 %v7804_v49  ;;  %8409 = vst [vmem:[#allocation43_spill] sm:$0xff] %v7810_v46 }
 0xa49   : > { %5403 = vmatpush3.bf16.msra.mxu1 %v5402_v0 }
 0xa4a   : > { %5405 = vmatprep.subr.bf16.mxu1 %v5404_v22 }
 0xa68   : > { %v2851_v5 = vpop.xlane.xlu1 %2850 }
 0xa69   : > { %v2873_v50 = vmul.f32 0.0078125, %v2851_v5  ;;  %v2849_v47 = vpop.xlane.xlu0 %2848 }
 0xa6a   : > { %v2872_v23 = vmul.f32 0.0078125, %v2849_v47  ;;  %v3715_v47 = vld [vmem:[#allocation15 + $0x78] sm:$0xff] }
 0xa6b   : > { %v2889_v13 = vadd.f32 1e-05, %v2873_v50  ;;  %v3714_v50 = vld [vmem:[#allocation15 + $0x70] sm:$0xff] }
 0xa6c   : > { %v2888_v59 = vadd.f32 1e-05, %v2872_v23  ;;  %v5406_v63 = vpack.c.bf16 %v3715_v47, %v3714_v50 }
 0xa6d   : > { %5840 = vrsqrt.f32 %v2889_v13  ;;  %v7808_v13 = vpack.c.bf16 %v3763_v42, %v3762_v8 }
 0xa6e   : > { %5842 = vrsqrt.f32 %v2888_v59  ;;  %5407 = vmatpush3.bf16.msra.mxu1 %v5406_v63 }
 0xa6f   : > { %8408 = vst [vmem:[#allocation42_spill] sm:$0xff] %v7808_v13  ;;  %5437 = vmatprep.subr.bf16.mxu0 %v7808_v13  ;;  %5440 = vmatprep.subr.bf16.mxu1 %v7754_v17 }
 0xa70   : > { %v2855_v34 = vpop.xlane.xlu1 %2854  ;;  %5439 = vmatpush3.bf16.msra.mxu0 %v7810_v46 }
 0xa71   : > { %v2875_v5 = vmul.f32 0.0078125, %v2855_v34  ;;  %v2853_v32 = vpop.xlane.xlu0 %2852 }
 0xa72   : > { %v2874_v23 = vmul.f32 0.0078125, %v2853_v32 }
 0xa73   : > { %v2891_v59 = vadd.f32 1e-05, %v2875_v5 }
 0xa74   : > { %v2890_v51 = vadd.f32 1e-05, %v2874_v23  ;;  %v2859_v18 = vpop.xlane.xlu1 %2858 }
 0xa75   : > { %5844 = vrsqrt.f32 %v2891_v59  ;;  %v2877_v1 = vmul.f32 0.0078125, %v2859_v18  ;;  %v2857_v0 = vpop.xlane.xlu0 %2856 }
 0xa76   : > { %5846 = vrsqrt.f32 %v2890_v51  ;;  %v2876_v19 = vmul.f32 0.0078125, %v2857_v0 }
 0xa77   : > { %v5841_v29 = vpop.eup %5840  ;;  %v2893_v36 = vadd.f32 1e-05, %v2877_v1 }
 0xa78   : > { %v5843_v34 = vpop.eup %5842  ;;  %v2892_v41 = vadd.f32 1e-05, %v2876_v19  ;;  %v2863_v8 = vpop.xlane.xlu1 %2862  ;;  %v2921_v22 = vmul.f32 %v5841_v29, %v7677_v15 }
 0xa79   : > { %v2861_v5 = vpop.xlane.xlu0 %2860  ;;  %v2920_v32 = vmul.f32 %v5843_v34, %v7680_v61  ;;  %v2879_v47 = vmul.f32 0.0078125, %v2863_v8 }
 0xa7a   : > { %5848 = vrsqrt.f32 %v2892_v41  ;;  %v2878_v42 = vmul.f32 0.0078125, %v2861_v5  ;;  %v2943_v63 = vmul.f32 %v7719_v30, %v2921_v22 }
 0xa7b   : > { %v2942_v50 = vmul.f32 %v7719_v30, %v2920_v32  ;;  %5850 = vrsqrt.f32 %v2893_v36  ;;  %v2895_v59 = vadd.f32 1e-05, %v2879_v47 }
 0xa7c   : > { %v2894_v23 = vadd.f32 1e-05, %v2878_v42  ;;  %v2965_v15 = vadd.f32 %v7726_v21, %v2943_v63 }
 0xa7d   : > { %v2964_v17 = vadd.f32 %v7726_v21, %v2942_v50 }
 0xa7e   : > { %5852 = vrsqrt.f32 %v2894_v23 }
 0xa7f   : > { %v5845_v9 = vpop.eup %5844  ;;  %3171 = vmatmul.mubr.f32.gmra.mrb[64].mxu1 %v2964_v17  ;;  %3332 = vmatmul.mubr.f32.gmra.mrb[96].mxu0 %v2964_v17  ;;  %5854 = vrsqrt.f32 %v2895_v59 }
 0xa80   : > { %v5847_v57 = vpop.eup %5846  ;;  %3176 = vmatprep.mubr.f32.mxu1 %v8385_v14  ;;  %3337 = vmatprep.mubr.f32.mxu0 %v8385_v14  ;;  %v2923_v51 = vmul.f32 %v5845_v9, %v7687_v54  ;;  %v3036_v9 = vld [vmem:[%s8410_s26] sm:$0xf] }
 0xa81   : > { %v2922_v61 = vmul.f32 %v5847_v57, %v7690_v53 }
 0xa82   : > { %v2945_v19 = vmul.f32 %v7719_v30, %v2923_v51 }
 0xa83   : > { %3177 = vmatmul.mubr.f32.gmra.mrb[66].mxu1 %v2965_v15  ;;  %3338 = vmatmul.mubr.f32.gmra.mrb[98].mxu0 %v2965_v15  ;;  %v2944_v18 = vmul.f32 %v7719_v30, %v2922_v61 }
 0xa84   : > { %v5849_v1 = vpop.eup %5848  ;;  %3182 = vmatprep.mubr.f32.mxu1 %v8385_v14  ;;  %3343 = vmatprep.mubr.f32.mxu0 %v8385_v14  ;;  %v2967_v54 = vadd.f32 %v7726_v21, %v2945_v19 }
 0xa85   : > { %v2966_v0 = vadd.f32 %v7726_v21, %v2944_v18  ;;  %v2924_v29 = vmul.f32 %v5849_v1, %v7700_v26  ;;  %v5851_v34 = vpop.eup %5850 }
 0xa86   : > { %v2925_v36 = vmul.f32 %v5851_v34, %v7697_v11 }
 0xa87   : > { %3183 = vmatmul.mubr.f32.gmra.mrb[68].mxu1 %v2966_v0  ;;  %3344 = vmatmul.mubr.f32.gmra.mrb[100].mxu0 %v2966_v0  ;;  %v2946_v53 = vmul.f32 %v7719_v30, %v2924_v29 }
 0xa88   : > { %3188 = vmatprep.mubr.f32.mxu1 %v8385_v14  ;;  %3349 = vmatprep.mubr.f32.mxu0 %v8385_v14  ;;  %v5853_v41 = vpop.eup %5852  ;;  %v2947_v8 = vmul.f32 %v7719_v30, %v2925_v36 }
 0xa89   : > { %v2968_v26 = vadd.f32 %v7726_v21, %v2946_v53  ;;  %v2926_v5 = vmul.f32 %v5853_v41, %v7710_v62  ;;  %v5855_v32 = vpop.eup %5854 }
 0xa8a   : > { %v2969_v11 = vadd.f32 %v7726_v21, %v2947_v8  ;;  %v2927_v42 = vmul.f32 %v5855_v32, %v7707_v24  ;;  %v3038_v24 = vlaneseq }
 0xa8b   : > { %3189 = vmatmul.mubr.f32.gmra.mrb[70].mxu1 %v2967_v54  ;;  %3350 = vmatmul.mubr.f32.gmra.mrb[102].mxu0 %v2967_v54  ;;  %v2948_v22 = vmul.f32 %v7719_v30, %v2926_v5 }
 0xa8c   : > { %3194 = vmatprep.mubr.f32.mxu1 %v8385_v14  ;;  %3355 = vmatprep.mubr.f32.mxu0 %v8385_v14  ;;  %v2949_v50 = vmul.f32 %v7719_v30, %v2927_v42  ;;  %v3039_v23 = vshrl.u32 %v3038_v24, 7 }
 0xa8d   : > { %v2970_v62 = vadd.f32 %v7726_v21, %v2948_v22 }
 0xa8e   : > { %v2971_v47 = vadd.f32 %v7726_v21, %v2949_v50  ;;  %v3040_v17 = vsub.s32 0, %v3039_v23  ;;  %v3048_v63 = vsub.s32 2, %v3039_v23  ;;  %v3044_v57 = vsub.s32 1, %v3039_v23 }
 0xa8f   : > { %3195 = vmatmul.mubr.f32.gmra.mrb[72].mxu1 %v2968_v26  ;;  %3356 = vmatmul.mubr.f32.gmra.mrb[104].mxu0 %v2968_v26  ;;  %v3052_v30 = vsub.s32 3, %v3039_v23 }
 0xa90   : > { %3200 = vmatprep.mubr.f32.mxu1 %v8385_v14  ;;  %3361 = vmatprep.mubr.f32.mxu0 %v8385_v14  ;;  %v7856_v59 = vrot.slane %v3036_v9, %v3040_v17  ;;  %v7858_v15 = vrot.slane %v3036_v9, %v3048_v63  ;;  %v7860_v61 = vrot.slane %v3036_v9, %v3044_v57 }
 0xa91   : > { %v7862_v51 = vrot.slane %v3036_v9, %v3052_v30 }
 0xa93   : > { %3201 = vmatmul.mubr.f32.gmra.mrb[74].mxu1 %v2969_v11  ;;  %3362 = vmatmul.mubr.f32.gmra.mrb[106].mxu0 %v2969_v11 }
 0xa94   : > { %3206 = vmatprep.mubr.f32.mxu1 %v8385_v14  ;;  %3367 = vmatprep.mubr.f32.mxu0 %v8385_v14 }
 0xa97   : > { %3207 = vmatmul.mubr.f32.gmra.mrb[76].mxu1 %v2970_v62  ;;  %3368 = vmatmul.mubr.f32.gmra.mrb[108].mxu0 %v2970_v62 }
 0xa98   : > { %3212 = vmatprep.mubr.f32.mxu1 %v8385_v14  ;;  %3373 = vmatprep.mubr.f32.mxu0 %v8385_v14 }
 0xa9b   : > { %3213 = vmatmul.mubr.f32.gmra.mrb[78].mxu1 %v2971_v47  ;;  %3374 = vmatmul.mubr.f32.gmra.mrb[110].mxu0 %v2971_v47 }
 0xadc   : > { %v3124_v14 = vpop.f32.mrb[48].mxu1  ;;  %v3285_v21 = vpop.f32.mrb[80].mxu0 }
 0xadd   : > { %v3125_v18 = vadd.f32 %v3124_v14, %v7856_v59  ;;  %v7866_v1 = vadd.f32 %v3285_v21, %v7858_v15  ;;  %v3126_v0 = vpop.f32.mrb[49].mxu1  ;;  %v3287_v19 = vpop.f32.mrb[81].mxu0 }
 0xade   : > { %v7869_v29 = vadd.f32 %v3126_v0, %v7860_v61  ;;  %v7872_v54 = vadd.f32 %v3287_v19, %v7862_v51 }
 0xadf   : > { %v3444_v34 = vmul.f32 0.70710677, %v3125_v18  ;;  %v3446_v53 = vmul.f32 0.70710677, %v7866_v1  ;;  %v3382_v25 = vmul.f32 0.5, %v7866_v1 }
 0xae0   : > { %v3130_v36 = vpop.f32.mrb[50].mxu1  ;;  %v3291_v41 = vpop.f32.mrb[82].mxu0  ;;  %v3445_v26 = vmul.f32 0.70710677, %v7869_v29  ;;  %v3447_v42 = vmul.f32 0.70710677, %v7872_v54 }
 0xae1   : > { %5856 = verf.f32 %v3444_v34  ;;  %v7877_v8 = vadd.f32 %v3130_v36, %v7856_v59  ;;  %v3132_v5 = vpop.f32.mrb[51].mxu1  ;;  %v3293_v32 = vpop.f32.mrb[83].mxu0  ;;  %v7888_v24 = vadd.f32 %v3291_v41, %v7858_v15  ;;  %v3383_v10 = vmul.f32 0.5, %v7872_v54 }
 0xae2   : > { %v7880_v11 = vadd.f32 %v3132_v5, %v7860_v61  ;;  %v7883_v22 = vadd.f32 %v3293_v32, %v7862_v51  ;;  %5858 = verf.f32 %v3446_v53 }
 0xae3   : > { %v3448_v47 = vmul.f32 0.70710677, %v7877_v8  ;;  %5860 = verf.f32 %v3445_v26  ;;  %v3450_v36 = vmul.f32 0.70710677, %v7888_v24 }
 0xae4   : > { %v3136_v62 = vpop.f32.mrb[52].mxu1  ;;  %v3297_v50 = vpop.f32.mrb[84].mxu0  ;;  %v3449_v23 = vmul.f32 0.70710677, %v7880_v11  ;;  %v3451_v9 = vmul.f32 0.70710677, %v7883_v22  ;;  %5862 = verf.f32 %v3447_v42 }
 0xae5   : > { %v3138_v17 = vpop.f32.mrb[53].mxu1  ;;  %v3299_v63 = vpop.f32.mrb[85].mxu0  ;;  %v7893_v57 = vadd.f32 %v3136_v62, %v7856_v59  ;;  %v7902_v21 = vadd.f32 %v3297_v50, %v7858_v15  ;;  %5864 = verf.f32 %v3448_v47  ;;  %v3385_v2 = vmul.f32 0.5, %v7880_v11 }
 0xae6   : > { %v7896_v30 = vadd.f32 %v3138_v17, %v7860_v61  ;;  %v7899_v14 = vadd.f32 %v3299_v63, %v7862_v51  ;;  %5866 = verf.f32 %v3449_v23 }
 0xae7   : > { %5868 = verf.f32 %v3451_v9  ;;  %v3452_v5 = vmul.f32 0.70710677, %v7893_v57  ;;  %v3454_v50 = vmul.f32 0.70710677, %v7902_v21 }
 0xae8   : > { %v3142_v0 = vpop.f32.mrb[54].mxu1  ;;  %v3303_v19 = vpop.f32.mrb[86].mxu0  ;;  %v3453_v34 = vmul.f32 0.70710677, %v7896_v30  ;;  %v3455_v41 = vmul.f32 0.70710677, %v7899_v14 }
 0xae9   : > { %v3144_v53 = vpop.f32.mrb[55].mxu1  ;;  %v3305_v26 = vpop.f32.mrb[87].mxu0  ;;  %v7909_v32 = vadd.f32 %v3142_v0, %v7856_v59  ;;  %v7916_v47 = vadd.f32 %v3303_v19, %v7858_v15  ;;  %v3380_v0 = vmul.f32 0.5, %v3125_v18 }
 0xaea   : > { %v7912_v42 = vadd.f32 %v3144_v53, %v7860_v61  ;;  %5870 = verf.f32 %v3453_v34  ;;  %v7919_v23 = vadd.f32 %v3305_v26, %v7862_v51 }
 0xaeb   : > { %v5857_v62 = vpop.eup %5856  ;;  %5872 = verf.f32 %v3455_v41  ;;  %v3456_v37 = vmul.f32 0.70710677, %v7909_v32  ;;  %v3458_v19 = vmul.f32 0.70710677, %v7916_v47 }
 0xaec   : > { %v3148_v17 = vpop.f32.mrb[56].mxu1  ;;  %v3309_v63 = vpop.f32.mrb[88].mxu0  ;;  %5874 = verf.f32 %v3450_v36  ;;  %v3572_v53 = vadd.f32 1.0, %v5857_v62  ;;  %v3457_v34 = vmul.f32 0.70710677, %v7912_v42 }
 0xaed   : > { %v3150_v9 = vpop.f32.mrb[57].mxu1  ;;  %v3311_v55 = vpop.f32.mrb[89].mxu0  ;;  %5876 = verf.f32 %v3452_v5  ;;  %v3459_v26 = vmul.f32 0.70710677, %v7919_v23  ;;  %v7926_v35 = vadd.f32 %v3148_v17, %v7856_v59  ;;  %v7929_v18 = vadd.f32 %v3309_v63, %v7858_v15 }
 0xaee   : > { %v5859_v60 = vpop.eup %5858  ;;  %5878 = verf.f32 %v3454_v50  ;;  %v7932_v36 = vadd.f32 %v3150_v9, %v7860_v61  ;;  %v7935_v5 = vadd.f32 %v3311_v55, %v7862_v51  ;;  %v3381_v17 = vmul.f32 0.5, %v7869_v29 }
 0xaef   : > { %v5861_v56 = vpop.eup %5860  ;;  %5880 = verf.f32 %v3457_v34  ;;  %v3636_v20 = vmul.f32 %v3572_v53, %v3380_v0  ;;  %v3574_v63 = vadd.f32 1.0, %v5859_v60  ;;  %v3387_v9 = vmul.f32 0.5, %v7883_v22 }
 0xaf0   : > { %v3154_v41 = vpop.f32.mrb[58].mxu1  ;;  %v3315_v38 = vpop.f32.mrb[90].mxu0  ;;  %5882 = verf.f32 %v3459_v26  ;;  %v3573_v55 = vadd.f32 1.0, %v5861_v56  ;;  %v3460_v6 = vmul.f32 0.70710677, %v7926_v35 }
 0xaf1   : > { %v3156_v62 = vpop.f32.mrb[59].mxu1  ;;  %v3317_v50 = vpop.f32.mrb[91].mxu0  ;;  %5884 = verf.f32 %v3456_v37  ;;  %v3461_v4 = vmul.f32 0.70710677, %v7932_v36  ;;  %v3462_v29 = vmul.f32 0.70710677, %v7929_v18  ;;  %v7947_v0 = vadd.f32 %v3154_v41, %v7856_v59 }
 0xaf2   : > { %v5863_v12 = vpop.eup %5862  ;;  %5886 = verf.f32 %v3458_v19  ;;  %v3463_v54 = vmul.f32 0.70710677, %v7935_v5  ;;  %v7950_v22 = vadd.f32 %v3315_v38, %v7858_v15  ;;  %v7953_v37 = vadd.f32 %v3156_v62, %v7860_v61 }
 0xaf3   : > { %v5865_v34 = vpop.eup %5864  ;;  %v3575_v11 = vadd.f32 1.0, %v5863_v12  ;;  %5888 = verf.f32 %v3461_v4  ;;  %v3638_v53 = vmul.f32 %v3574_v63, %v3382_v25  ;;  %v3464_v19 = vmul.f32 0.70710677, %v7947_v0 }
 0xaf4   : > { %v5867_v40 = vpop.eup %5866  ;;  %5890 = verf.f32 %v3463_v54  ;;  %v3576_v52 = vadd.f32 1.0, %v5865_v34  ;;  %v3466_v41 = vmul.f32 0.70710677, %v7950_v22  ;;  %v3465_v38 = vmul.f32 0.70710677, %v7953_v37 }
 0xaf5   : > { %v5869_v1 = vpop.eup %5868  ;;  %v3577_v26 = vadd.f32 1.0, %v5867_v40  ;;  %5892 = verf.f32 %v3460_v6  ;;  %v7959_v62 = vadd.f32 %v3317_v50, %v7862_v51  ;;  %v3637_v40 = vmul.f32 %v3573_v55, %v3381_v17 }
 0xaf6   : > { %v5871_v60 = vpop.eup %5870  ;;  %v3579_v46 = vadd.f32 1.0, %v5869_v1  ;;  %5894 = verf.f32 %v3462_v29  ;;  %v3639_v63 = vmul.f32 %v3575_v11, %v3383_v10  ;;  %v3391_v29 = vmul.f32 0.5, %v7899_v14 }
 0xaf7   : > { %v5873_v56 = vpop.eup %5872  ;;  %v3581_v4 = vadd.f32 1.0, %v5871_v60  ;;  %5896 = verf.f32 %v3464_v19  ;;  %v3467_v6 = vmul.f32 0.70710677, %v7959_v62  ;;  %v3641_v34 = vmul.f32 %v3577_v26, %v3385_v2  ;;  %3835 = vmatprep.mubr.f32.mxu1 %v3637_v40 }
 0xaf8   : > { %v5875_v27 = vpop.eup %5874  ;;  %v3583_v25 = vadd.f32 1.0, %v5873_v56  ;;  %5898 = verf.f32 %v3465_v38  ;;  %v3389_v60 = vmul.f32 0.5, %v7896_v30  ;;  %3980 = vmatprep.mubr.f32.mxu0 %v3639_v63  ;;  %v3643_v50 = vmul.f32 %v3579_v46, %v3387_v9  ;;  %3836 = vmatmul.mubr.f32.vlgmr.msra.gmra.mrb[80].mxu1 %v3636_v20 }
 0xaf9   : > { %v5877_v12 = vpop.eup %5876  ;;  %v3578_v49 = vadd.f32 1.0, %v5875_v27  ;;  %5900 = verf.f32 %v3466_v41  ;;  %v3384_v56 = vmul.f32 0.5, %v7877_v8  ;;  %v3386_v17 = vmul.f32 0.5, %v7888_v24  ;;  %3981 = vmatmul.mubr.f32.vlgmr.msra.gmra.mrb[112].mxu0 %v3638_v53  ;;  %3840 = vmatprep.mubr.f32.mxu1 %v3641_v34 }
 0xafa   : > { %v5879_v13 = vpop.eup %5878  ;;  %5902 = verf.f32 %v3467_v6  ;;  %3985 = vmatprep.mubr.f32.mxu0 %v3643_v50  ;;  %v3645_v2 = vmul.f32 %v3581_v4, %v3389_v60  ;;  %v3647_v30 = vmul.f32 %v3583_v25, %v3391_v29  ;;  %v3580_v14 = vadd.f32 1.0, %v5877_v12  ;;  %5448 = vmatpush3.bf16.msra.mxu1 %v7758_v58 }
 0xafb   : > { %v5881_v54 = vpop.eup %5880  ;;  %v3582_v26 = vadd.f32 1.0, %v5879_v13  ;;  %v3640_v19 = vmul.f32 %v3576_v52, %v3384_v56  ;;  %v3642_v41 = vmul.f32 %v3578_v49, %v3386_v17  ;;  %v3393_v8 = vmul.f32 0.5, %v7912_v42  ;;  %5441 = vmatprep.subr.bf16.mxu1 %v7761_v3 }
 0xafc   : > { %v5883_v1 = vpop.eup %5882  ;;  %v3585_v10 = vadd.f32 1.0, %v5881_v54  ;;  %v3395_v20 = vmul.f32 0.5, %v7919_v23  ;;  %v3388_v9 = vmul.f32 0.5, %v7893_v57  ;;  %v3390_v53 = vmul.f32 0.5, %v7902_v21 }
 0xafd   : > { %v5885_v27 = vpop.eup %5884  ;;  %v3587_v55 = vadd.f32 1.0, %v5883_v1  ;;  %3841 = vmatmul.mubr.f32.gmra.mrb[82].mxu1 %v3640_v19  ;;  %3986 = vmatmul.mubr.f32.gmra.mrb[114].mxu0 %v3642_v41  ;;  %v3397_v57 = vmul.f32 0.5, %v7932_v36  ;;  %v3399_v21 = vmul.f32 0.5, %v7935_v5  ;;  %v3392_v63 = vmul.f32 0.5, %v7909_v32 }
 0xafe   : > { %v5887_v11 = vpop.eup %5886  ;;  %3845 = vmatprep.mubr.f32.mxu1 %v3645_v2  ;;  %3990 = vmatprep.mubr.f32.mxu0 %v3647_v30  ;;  %v3649_v58 = vmul.f32 %v3585_v10, %v3393_v8  ;;  %v3584_v42 = vadd.f32 1.0, %v5885_v27  ;;  %v3644_v23 = vmul.f32 %v3580_v14, %v3388_v9  ;;  %v3646_v25 = vmul.f32 %v3582_v26, %v3390_v53 }
 0xaff   : > { %v5889_v46 = vpop.eup %5888  ;;  %v3651_v49 = vmul.f32 %v3587_v55, %v3395_v20  ;;  %v3586_v38 = vadd.f32 1.0, %v5887_v11  ;;  %5449 = vmatpush3.bf16.msra.mxu1 %v7765_v31  ;;  %v3394_v54 = vmul.f32 0.5, %v7916_v47  ;;  %v3403_v32 = vmul.f32 0.5, %v7959_v62 }
 0xb00   : > { %v5891_v24 = vpop.eup %5890  ;;  %v3589_v13 = vadd.f32 1.0, %v5889_v46  ;;  %5442 = vmatprep.subr.bf16.mxu1 %v7767_v28  ;;  %v3648_v50 = vmul.f32 %v3584_v42, %v3392_v63  ;;  %v3401_v28 = vmul.f32 0.5, %v7953_v37  ;;  %v3396_v56 = vmul.f32 0.5, %v7926_v35  ;;  %v8413_v42 = vld [vmem:[#allocation43_spill] sm:$0xff] }
 0xb01   : > { %v5893_v12 = vpop.eup %5892  ;;  %v3591_v52 = vadd.f32 1.0, %v5891_v24  ;;  %3846 = vmatmul.mubr.f32.gmra.mrb[84].mxu1 %v3644_v23  ;;  %3991 = vmatmul.mubr.f32.gmra.mrb[116].mxu0 %v3646_v25  ;;  %v3650_v5 = vmul.f32 %v3586_v38, %v3394_v54  ;;  %v3398_v17 = vmul.f32 0.5, %v7929_v18  ;;  %v3402_v35 = vmul.f32 0.5, %v7950_v22 }
 0xb02   : > { %v5895_v4 = vpop.eup %5894  ;;  %3850 = vmatprep.mubr.f32.mxu1 %v3649_v58  ;;  %3995 = vmatprep.mubr.f32.mxu0 %v3651_v49  ;;  %v3653_v1 = vmul.f32 %v3589_v13, %v3397_v57  ;;  %v3588_v29 = vadd.f32 1.0, %v5893_v12  ;;  %v8411_v12 = vld [vmem:[#allocation41_spill] sm:$0xff] }
 0xb03   : > { %v5897_v3 = vpop.eup %5896  ;;  %v3655_v31 = vmul.f32 %v3591_v52, %v3399_v21  ;;  %v3590_v36 = vadd.f32 1.0, %v5895_v4  ;;  %5450 = vmatpush3.bf16.msra.mxu1 %v7770_v44 }
 0xb04   : > { %v5899_v40 = vpop.eup %5898  ;;  %5443 = vmatprep.subr.bf16.mxu1 %v7784_v45  ;;  %v3592_v55 = vadd.f32 1.0, %v5897_v3  ;;  %v3652_v44 = vmul.f32 %v3588_v29, %v3396_v56  ;;  %v3400_v45 = vmul.f32 0.5, %v7947_v0 }
 0xb05   : > { %v5901_v6 = vpop.eup %5900  ;;  %v3593_v34 = vadd.f32 1.0, %v5899_v40  ;;  %3851 = vmatmul.mubr.f32.gmra.mrb[86].mxu1 %v3648_v50  ;;  %3996 = vmatmul.mubr.f32.gmra.mrb[118].mxu0 %v3650_v5  ;;  %v3654_v30 = vmul.f32 %v3590_v36, %v3398_v17 }
 0xb06   : > { %v5903_v60 = vpop.eup %5902  ;;  %3855 = vmatprep.mubr.f32.mxu1 %v3653_v1  ;;  %4000 = vmatprep.mubr.f32.mxu0 %v3655_v31  ;;  %v3594_v2 = vadd.f32 1.0, %v5901_v6  ;;  %v3656_v18 = vmul.f32 %v3592_v55, %v3400_v45 }
 0xb07   : > { %v3595_v47 = vadd.f32 1.0, %v5903_v60  ;;  %v3657_v27 = vmul.f32 %v3593_v34, %v3401_v28  ;;  %5451 = vmatpush3.bf16.msra.mxu1 %v7786_v16 }
 0xb08   : > { %5444 = vmatprep.subr.bf16.mxu1 %v7790_v43  ;;  %v3658_v37 = vmul.f32 %v3594_v2, %v3402_v35 }
 0xb09   : > { %v3659_v10 = vmul.f32 %v3595_v47, %v3403_v32  ;;  %3856 = vmatmul.mubr.f32.gmra.mrb[88].mxu1 %v3652_v44  ;;  %4001 = vmatmul.mubr.f32.gmra.mrb[120].mxu0 %v3654_v30 }
 0xb0a   : > { %3860 = vmatprep.mubr.f32.mxu1 %v3657_v27 }
 0xb0b   : > { %4005 = vmatprep.mubr.f32.mxu0 %v3659_v10  ;;  %5452 = vmatpush3.bf16.msra.mxu1 %v7792_v33 }
 0xb0c   : > { %5445 = vmatprep.subr.bf16.mxu1 %v7796_v39 }
 0xb0d   : > { %3861 = vmatmul.mubr.f32.gmra.mrb[90].mxu1 %v3656_v18  ;;  %4006 = vmatmul.mubr.f32.gmra.mrb[122].mxu0 %v3658_v37 }
 0xb0f   : > { %5453 = vmatpush3.bf16.msra.mxu1 %v7798_v48 }
 0xb10   : > { %5446 = vmatprep.subr.bf16.mxu1 %v7802_v7  ;;  %v8412_v7 = vld [vmem:[#allocation42_spill] sm:$0xff] }
 0xb11   : > { %v3160_v62 = vpop.f32.mrb[60].mxu1  ;;  %v3321_v16 = vpop.f32.mrb[92].mxu0 }
 0xb12   : > { %v3161_v43 = vadd.f32 %v3160_v62, %v7856_v59  ;;  %v3322_v0 = vadd.f32 %v3321_v16, %v7858_v15  ;;  %v3162_v11 = vpop.f32.mrb[61].mxu1  ;;  %v3323_v22 = vpop.f32.mrb[93].mxu0 }
 0xb13   : > { %v3163_v14 = vadd.f32 %v3162_v11, %v7860_v61  ;;  %v3324_v26 = vadd.f32 %v3323_v22, %v7862_v51  ;;  %5454 = vmatpush3.bf16.msra.mxu1 %v8411_v12 }
 0xb14   : > { %v3468_v19 = vmul.f32 0.70710677, %v3161_v43  ;;  %v3470_v33 = vmul.f32 0.70710677, %v3322_v0  ;;  %5447 = vmatprep.subr.bf16.mxu1 %v8412_v7  ;;  %v3404_v54 = vmul.f32 0.5, %v3161_v43  ;;  %v3406_v31 = vmul.f32 0.5, %v3322_v0 }
 0xb15   : > { %v3469_v39 = vmul.f32 0.70710677, %v3163_v14  ;;  %v3471_v41 = vmul.f32 0.70710677, %v3324_v26  ;;  %v3166_v46 = vpop.f32.mrb[62].mxu1  ;;  %v3327_v8 = vpop.f32.mrb[94].mxu0 }
 0xb16   : > { %5904 = verf.f32 %v3468_v19  ;;  %v3167_v20 = vadd.f32 %v3166_v46, %v7856_v59  ;;  %v3328_v24 = vadd.f32 %v3327_v8, %v7858_v15  ;;  %v3168_v9 = vpop.f32.mrb[63].mxu1  ;;  %v3329_v53 = vpop.f32.mrb[95].mxu0  ;;  %v3405_v40 = vmul.f32 0.5, %v3163_v14 }
 0xb17   : > { %5906 = verf.f32 %v3470_v33  ;;  %v3169_v48 = vadd.f32 %v3168_v9, %v7860_v61  ;;  %v3330_v13 = vadd.f32 %v3329_v53, %v7862_v51  ;;  %5455 = vmatpush3.bf16.msra.mxu1 %v8413_v42  ;;  %v3407_v6 = vmul.f32 0.5, %v3324_v26 }
 0xb18   : > { %5908 = verf.f32 %v3469_v39  ;;  %v3472_v52 = vmul.f32 0.70710677, %v3167_v20  ;;  %v3474_v58 = vmul.f32 0.70710677, %v3328_v24  ;;  %v3408_v10 = vmul.f32 0.5, %v3167_v20 }
 0xb19   : > { %5910 = verf.f32 %v3471_v41  ;;  %v3473_v49 = vmul.f32 0.70710677, %v3169_v48  ;;  %v3475_v4 = vmul.f32 0.70710677, %v3330_v13  ;;  %v3409_v17 = vmul.f32 0.5, %v3169_v48 }
 0xb1a   : > { %5912 = verf.f32 %v3472_v52  ;;  %v3411_v55 = vmul.f32 0.5, %v3330_v13  ;;  %v3410_v44 = vmul.f32 0.5, %v3328_v24 }
 0xb1b   : > { %5914 = verf.f32 %v3474_v58 }
 0xb1c   : > { %5916 = verf.f32 %v3473_v49 }
 0xb1d   : > { %5918 = verf.f32 %v3475_v4 }
 0xb20   : > { %v5905_v38 = vpop.eup %5904 }
 0xb21   : > { %v5907_v23 = vpop.eup %5906  ;;  %v3596_v3 = vadd.f32 1.0, %v5905_v38 }
 0xb22   : > { %v5909_v25 = vpop.eup %5908  ;;  %v3598_v21 = vadd.f32 1.0, %v5907_v23 }
 0xb23   : > { %v5911_v57 = vpop.eup %5910  ;;  %v3597_v63 = vadd.f32 1.0, %v5909_v25  ;;  %v3660_v50 = vmul.f32 %v3596_v3, %v3404_v54 }
 0xb24   : > { %v3599_v34 = vadd.f32 1.0, %v5911_v57  ;;  %v5913_v1 = vpop.eup %5912  ;;  %v3662_v32 = vmul.f32 %v3598_v21, %v3406_v31 }
 0xb25   : > { %v3661_v60 = vmul.f32 %v3597_v63, %v3405_v40  ;;  %v5915_v29 = vpop.eup %5914  ;;  %v3600_v28 = vadd.f32 1.0, %v5913_v1 }
 0xb26   : > { %v3663_v36 = vmul.f32 %v3599_v34, %v3407_v6  ;;  %v5917_v5 = vpop.eup %5916  ;;  %v3602_v56 = vadd.f32 1.0, %v5915_v29 }
 0xb27   : > { %3865 = vmatprep.mubr.f32.mxu1 %v3661_v60  ;;  %v5919_v47 = vpop.eup %5918  ;;  %v3601_v27 = vadd.f32 1.0, %v5917_v5  ;;  %v3664_v35 = vmul.f32 %v3600_v28, %v3408_v10 }
 0xb28   : > { %4010 = vmatprep.mubr.f32.mxu0 %v3663_v36  ;;  %3866 = vmatmul.mubr.f32.gmra.mrb[92].mxu1 %v3660_v50  ;;  %v3603_v2 = vadd.f32 1.0, %v5919_v47  ;;  %v3666_v18 = vmul.f32 %v3602_v56, %v3410_v44 }
 0xb29   : > { %4011 = vmatmul.mubr.f32.gmra.mrb[124].mxu0 %v3662_v32  ;;  %v3665_v30 = vmul.f32 %v3601_v27, %v3409_v17 }
 0xb2a   : > { %v3667_v45 = vmul.f32 %v3603_v2, %v3411_v55 }
 0xb2b   : > { %3870 = vmatprep.mubr.f32.mxu1 %v3665_v30 }
 0xb2c   : > { %4015 = vmatprep.mubr.f32.mxu0 %v3667_v45  ;;  %3871 = vmatmul.mubr.f32.gmra.mrb[94].mxu1 %v3664_v35 }
 0xb2d   : > { %4016 = vmatmul.mubr.f32.gmra.mrb[126].mxu0 %v3666_v18 }
 0xb52   : > { %v3172_v37 = vpop.f32.mrb[64].mxu1  ;;  %v3333_v62 = vpop.f32.mrb[96].mxu0 }
 0xb53   : > { %v3174_v16 = vpop.f32.mrb[65].mxu1  ;;  %v3335_v43 = vpop.f32.mrb[97].mxu0  ;;  %v8007_v11 = vadd.f32 %v3172_v37, %v7856_v59  ;;  %v8013_v19 = vadd.f32 %v3333_v62, %v7858_v15 }
 0xb54   : > { %v8004_v0 = vadd.f32 %v3174_v16, %v7860_v61  ;;  %v8010_v22 = vadd.f32 %v3335_v43, %v7862_v51 }
 0xb55   : > { %v3476_v46 = vmul.f32 0.70710677, %v8007_v11  ;;  %v3478_v53 = vmul.f32 0.70710677, %v8013_v19 }
 0xb56   : > { %v3178_v14 = vpop.f32.mrb[66].mxu1  ;;  %v3339_v26 = vpop.f32.mrb[98].mxu0  ;;  %v3477_v33 = vmul.f32 0.70710677, %v8004_v0  ;;  %v3479_v9 = vmul.f32 0.70710677, %v8010_v22 }
 0xb57   : > { %v3180_v39 = vpop.f32.mrb[67].mxu1  ;;  %v3341_v41 = vpop.f32.mrb[99].mxu0  ;;  %v8023_v12 = vadd.f32 %v3178_v14, %v7856_v59  ;;  %v8029_v52 = vadd.f32 %v3339_v26, %v7858_v15  ;;  %v3413_v14 = vmul.f32 0.5, %v8004_v0 }
 0xb58   : > { %v8018_v8 = vadd.f32 %v3180_v39, %v7860_v61  ;;  %5920 = verf.f32 %v3477_v33  ;;  %v8026_v7 = vadd.f32 %v3341_v41, %v7862_v51 }
 0xb59   : > { %5922 = verf.f32 %v3476_v46  ;;  %v3480_v38 = vmul.f32 0.70710677, %v8023_v12  ;;  %v3482_v21 = vmul.f32 0.70710677, %v8029_v52 }
 0xb5a   : > { %v3184_v20 = vpop.f32.mrb[68].mxu1  ;;  %v3345_v24 = vpop.f32.mrb[100].mxu0  ;;  %v3481_v58 = vmul.f32 0.70710677, %v8018_v8  ;;  %5924 = verf.f32 %v3479_v9  ;;  %v3483_v3 = vmul.f32 0.70710677, %v8026_v7 }
 0xb5b   : > { %v3186_v48 = vpop.f32.mrb[69].mxu1  ;;  %v3347_v13 = vpop.f32.mrb[101].mxu0  ;;  %5926 = verf.f32 %v3478_v53  ;;  %v8034_v23 = vadd.f32 %v3184_v20, %v7856_v59  ;;  %v8042_v40 = vadd.f32 %v3345_v24, %v7858_v15 }
 0xb5c   : > { %v8038_v57 = vadd.f32 %v3186_v48, %v7860_v61  ;;  %5928 = verf.f32 %v3481_v58  ;;  %v8047_v6 = vadd.f32 %v3347_v13, %v7862_v51  ;;  %v3415_v13 = vmul.f32 0.5, %v8010_v22 }
 0xb5d   : > { %5930 = verf.f32 %v3480_v38  ;;  %v3484_v31 = vmul.f32 0.70710677, %v8034_v23  ;;  %v3486_v5 = vmul.f32 0.70710677, %v8042_v40  ;;  %v3414_v38 = vmul.f32 0.5, %v8013_v19 }
 0xb5e   : > { %v3190_v49 = vpop.f32.mrb[70].mxu1  ;;  %v3351_v4 = vpop.f32.mrb[102].mxu0  ;;  %5932 = verf.f32 %v3483_v3  ;;  %v3485_v29 = vmul.f32 0.70710677, %v8038_v57  ;;  %v3487_v56 = vmul.f32 0.70710677, %v8047_v6 }
 0xb5f   : > { %v3192_v42 = vpop.f32.mrb[71].mxu1  ;;  %v3353_v25 = vpop.f32.mrb[103].mxu0  ;;  %v8053_v60 = vadd.f32 %v3190_v49, %v7856_v59  ;;  %5934 = verf.f32 %v3482_v21  ;;  %v8067_v17 = vadd.f32 %v3351_v4, %v7858_v15 }
 0xb60   : > { %v8057_v36 = vadd.f32 %v3192_v42, %v7860_v61  ;;  %v8061_v28 = vadd.f32 %v3353_v25, %v7862_v51  ;;  %5936 = verf.f32 %v3484_v31  ;;  %v3412_v42 = vmul.f32 0.5, %v8007_v11 }
 0xb61   : > { %v3488_v2 = vmul.f32 0.70710677, %v8053_v60  ;;  %5938 = verf.f32 %v3485_v29  ;;  %v3490_v26 = vmul.f32 0.70710677, %v8067_v17 }
 0xb62   : > { %v3196_v63 = vpop.f32.mrb[72].mxu1  ;;  %v8044_v54 = vpop.f32.mrb[104].mxu0  ;;  %v3489_v35 = vmul.f32 0.70710677, %v8057_v36  ;;  %5940 = verf.f32 %v3486_v5  ;;  %v3491_v37 = vmul.f32 0.70710677, %v8061_v28 }
 0xb63   : > { %v3198_v34 = vpop.f32.mrb[73].mxu1  ;;  %v8049_v1 = vpop.f32.mrb[105].mxu0  ;;  %5942 = verf.f32 %v3487_v56  ;;  %v8088_v53 = vadd.f32 %v3196_v63, %v7856_v59  ;;  %v3417_v63 = vmul.f32 0.5, %v8018_v8 }
 0xb64   : > { %v5921_v50 = vpop.eup %5920  ;;  %v8073_v44 = vadd.f32 %v3198_v34, %v7860_v61  ;;  %5944 = verf.f32 %v3488_v2 }
 0xb65   : > { %v5923_v55 = vpop.eup %5922  ;;  %v3605_v45 = vadd.f32 1.0, %v5921_v50  ;;  %5946 = verf.f32 %v3489_v35  ;;  %v3492_v29 = vmul.f32 0.70710677, %v8088_v53  ;;  %v3416_v35 = vmul.f32 0.5, %v8023_v12 }
 0xb66   : > { %v3202_v32 = vpop.f32.mrb[74].mxu1  ;;  %v8063_v47 = vpop.f32.mrb[106].mxu0  ;;  %v3604_v43 = vadd.f32 1.0, %v5923_v55  ;;  %v3493_v20 = vmul.f32 0.70710677, %v8073_v44  ;;  %5948 = verf.f32 %v3491_v37  ;;  %v3422_v12 = vmul.f32 0.5, %v8042_v40 }
 0xb67   : > { %v3204_v27 = vpop.f32.mrb[75].mxu1  ;;  %v8069_v10 = vpop.f32.mrb[107].mxu0  ;;  %v3669_v0 = vmul.f32 %v3605_v45, %v3413_v14  ;;  %5950 = verf.f32 %v3490_v26  ;;  %v8101_v50 = vadd.f32 %v3202_v32, %v7856_v59  ;;  %v3418_v32 = vmul.f32 0.5, %v8029_v52 }
 0xb68   : > { %v5925_v30 = vpop.eup %5924  ;;  %v8085_v24 = vadd.f32 %v3204_v27, %v7860_v61  ;;  %5952 = verf.f32 %v3493_v20  ;;  %v3668_v11 = vmul.f32 %v3604_v43, %v3412_v42  ;;  %v3425_v42 = vmul.f32 0.5, %v8057_v36 }
 0xb69   : > { %v5927_v18 = vpop.eup %5926  ;;  %v3607_v46 = vadd.f32 1.0, %v5925_v30  ;;  %3875 = vmatprep.mubr.f32.mxu1 %v3669_v0  ;;  %v3496_v43 = vmul.f32 0.70710677, %v8101_v50  ;;  %v3427_v36 = vmul.f32 0.5, %v8061_v28 }
 0xb6a   : > { %v3208_v62 = vpop.f32.mrb[76].mxu1  ;;  %v8077_v16 = vpop.f32.mrb[108].mxu0  ;;  %v3606_v9 = vadd.f32 1.0, %v5927_v18  ;;  %v3497_v34 = vmul.f32 0.70710677, %v8085_v24  ;;  %3876 = vmatmul.mubr.f32.gmra.mrb[96].mxu1 %v3668_v11  ;;  %v3419_v18 = vmul.f32 0.5, %v8026_v7 }
 0xb6b   : > { %v3210_v33 = vpop.f32.mrb[77].mxu1  ;;  %v8081_v39 = vpop.f32.mrb[109].mxu0  ;;  %v3671_v22 = vmul.f32 %v3607_v46, %v3415_v13  ;;  %v8111_v14 = vadd.f32 %v3208_v62, %v7856_v59  ;;  %v3421_v7 = vmul.f32 0.5, %v8038_v57  ;;  %v3423_v13 = vmul.f32 0.5, %v8047_v6 }
 0xb6c   : > { %v5929_v41 = vpop.eup %5928  ;;  %v3670_v19 = vmul.f32 %v3606_v9, %v3414_v38  ;;  %v8104_v8 = vadd.f32 %v3210_v33, %v7860_v61  ;;  %5954 = verf.f32 %v3497_v34  ;;  %v8119_v9 = vadd.f32 %v8049_v1, %v7862_v51 }
 0xb6d   : > { %v5931_v48 = vpop.eup %5930  ;;  %v3609_v25 = vadd.f32 1.0, %v5929_v41  ;;  %4020 = vmatprep.mubr.f32.mxu0 %v3671_v22  ;;  %5956 = verf.f32 %v3492_v29  ;;  %v3420_v41 = vmul.f32 0.5, %v8034_v23  ;;  %v3500_v40 = vmul.f32 0.70710677, %v8111_v14 }
 0xb6e   : > { %v3214_v58 = vpop.f32.mrb[78].mxu1  ;;  %v8091_v49 = vpop.f32.mrb[110].mxu0  ;;  %v3608_v55 = vadd.f32 1.0, %v5931_v48  ;;  %4021 = vmatmul.mubr.f32.gmra.mrb[128].mxu0 %v3670_v19  ;;  %v3501_v26 = vmul.f32 0.70710677, %v8104_v8  ;;  %v8133_v22 = vadd.f32 %v8044_v54, %v7858_v15 }
 0xb6f   : > { %v5933_v4 = vpop.eup %5932  ;;  %v3216_v3 = vpop.f32.mrb[79].mxu1  ;;  %v3673_v30 = vmul.f32 %v3609_v25, %v3417_v63  ;;  %v8125_v57 = vadd.f32 %v3214_v58, %v7856_v59  ;;  %v3495_v29 = vmul.f32 0.70710677, %v8119_v9 }
 0xb70   : > { %v5935_v21 = vpop.eup %5934  ;;  %v8097_v31 = vpop.f32.mrb[111].mxu0  ;;  %v3611_v56 = vadd.f32 1.0, %v5933_v4  ;;  %v3672_v0 = vmul.f32 %v3608_v55, %v3416_v35  ;;  %5958 = verf.f32 %v3501_v26  ;;  %v8128_v1 = vadd.f32 %v3216_v3, %v7860_v61 }
 0xb71   : > { %v5937_v5 = vpop.eup %5936  ;;  %v3610_v2 = vadd.f32 1.0, %v5935_v21  ;;  %3880 = vmatprep.mubr.f32.mxu1 %v3673_v30  ;;  %5960 = verf.f32 %v3496_v43  ;;  %v8138_v61 = vadd.f32 %v8069_v10, %v7862_v51  ;;  %v3504_v28 = vmul.f32 0.70710677, %v8125_v57 }
 0xb72   : > { %v5939_v27 = vpop.eup %5938  ;;  %v3675_v52 = vmul.f32 %v3611_v56, %v3419_v18  ;;  %3881 = vmatmul.mubr.f32.gmra.mrb[98].mxu1 %v3672_v0  ;;  %v3612_v25 = vadd.f32 1.0, %v5937_v5  ;;  %v3505_v58 = vmul.f32 0.70710677, %v8128_v1  ;;  %5962 = verf.f32 %v3500_v40 }
 0xb73   : > { %v5941_v45 = vpop.eup %5940  ;;  %v3613_v46 = vadd.f32 1.0, %v5939_v27  ;;  %v3674_v62 = vmul.f32 %v3610_v2, %v3418_v32  ;;  %v3424_v2 = vmul.f32 0.5, %v8053_v60  ;;  %v3429_v30 = vmul.f32 0.5, %v8073_v44 }
 0xb74   : > { %v5943_v37 = vpop.eup %5942  ;;  %4025 = vmatprep.mubr.f32.mxu0 %v3675_v52  ;;  %v3614_v6 = vadd.f32 1.0, %v5941_v45  ;;  %5964 = verf.f32 %v3505_v58  ;;  %v3676_v54 = vmul.f32 %v3612_v25, %v3420_v41  ;;  %v3426_v45 = vmul.f32 0.5, %v8067_v17 }
 0xb75   : > { %v5945_v33 = vpop.eup %5944  ;;  %v3615_v4 = vadd.f32 1.0, %v5943_v37  ;;  %4026 = vmatmul.mubr.f32.gmra.mrb[130].mxu0 %v3674_v62  ;;  %v3677_v63 = vmul.f32 %v3613_v46, %v3421_v7  ;;  %v3494_v35 = vmul.f32 0.70710677, %v8133_v22  ;;  %5966 = verf.f32 %v3495_v29 }
 0xb76   : > { %v5947_v20 = vpop.eup %5946  ;;  %v3616_v11 = vadd.f32 1.0, %v5945_v33  ;;  %v3678_v56 = vmul.f32 %v3614_v6, %v3422_v12  ;;  %v8148_v32 = vadd.f32 %v8063_v47, %v7858_v15  ;;  %v3499_v37 = vmul.f32 0.70710677, %v8138_v61 }
 0xb77   : > { %v5949_v48 = vpop.eup %5948  ;;  %v3617_v21 = vadd.f32 1.0, %v5947_v20  ;;  %3885 = vmatprep.mubr.f32.mxu1 %v3677_v63  ;;  %v3679_v19 = vmul.f32 %v3615_v4, %v3423_v13  ;;  %5968 = verf.f32 %v3504_v28  ;;  %v8153_v17 = vadd.f32 %v8081_v39, %v7862_v51 }
 0xb78   : > { %v5951_v23 = vpop.eup %5950  ;;  %v3619_v34 = vadd.f32 1.0, %v5949_v48  ;;  %3886 = vmatmul.mubr.f32.gmra.mrb[100].mxu1 %v3676_v54  ;;  %v3680_v26 = vmul.f32 %v3616_v11, %v3424_v2  ;;  %v3433_v47 = vmul.f32 0.5, %v8085_v24  ;;  %v3428_v12 = vmul.f32 0.5, %v8088_v53 }
 0xb79   : > { %v5953_v38 = vpop.eup %5952  ;;  %v3618_v59 = vadd.f32 1.0, %v5951_v23  ;;  %v3681_v27 = vmul.f32 %v3617_v21, %v3425_v42  ;;  %4030 = vmatprep.mubr.f32.mxu0 %v3679_v19  ;;  %5970 = verf.f32 %v3494_v35  ;;  %v3498_v46 = vmul.f32 0.70710677, %v8148_v32 }
 0xb7a   : > { %v3621_v3 = vadd.f32 1.0, %v5953_v38  ;;  %v5955_v5 = vpop.eup %5954  ;;  %v3683_v10 = vmul.f32 %v3619_v34, %v3427_v36  ;;  %4031 = vmatmul.mubr.f32.gmra.mrb[132].mxu0 %v3678_v56  ;;  %5972 = verf.f32 %v3499_v37  ;;  %v8160_v52 = vadd.f32 %v8077_v16, %v7858_v15 }
 0xb7b   : > { %v5957_v55 = vpop.eup %5956  ;;  %v3625_v18 = vadd.f32 1.0, %v5955_v5  ;;  %3890 = vmatprep.mubr.f32.mxu1 %v3681_v27  ;;  %v3682_v33 = vmul.f32 %v3618_v59, %v3426_v45  ;;  %v3503_v0 = vmul.f32 0.70710677, %v8153_v17  ;;  %v8165_v24 = vadd.f32 %v8097_v31, %v7862_v51 }
 0xb7c   : > { %4035 = vmatprep.mubr.f32.mxu0 %v3683_v10  ;;  %v3685_v60 = vmul.f32 %v3621_v3, %v3429_v30  ;;  %v5959_v44 = vpop.eup %5958  ;;  %v3620_v43 = vadd.f32 1.0, %v5957_v55  ;;  %3891 = vmatmul.mubr.f32.gmra.mrb[102].mxu1 %v3680_v26  ;;  %v3437_v48 = vmul.f32 0.5, %v8104_v8  ;;  %v3432_v4 = vmul.f32 0.5, %v8101_v50 }
 0xb7d   : > { %v5961_v41 = vpop.eup %5960  ;;  %v3629_v20 = vadd.f32 1.0, %v5959_v44  ;;  %v3689_v39 = vmul.f32 %v3625_v18, %v3433_v47  ;;  %5974 = verf.f32 %v3498_v46  ;;  %v3502_v16 = vmul.f32 0.70710677, %v8160_v52  ;;  %v8186_v47 = vld [vmem:[%s8414_s27] ss:$0 sm:$0xff] }
 0xb7e   : > { %4036 = vmatmul.mubr.f32.gmra.mrb[134].mxu0 %v3682_v33  ;;  %3895 = vmatprep.mubr.f32.mxu1 %v3685_v60  ;;  %v3624_v7 = vadd.f32 1.0, %v5961_v41  ;;  %v3684_v53 = vmul.f32 %v3620_v43, %v3428_v12  ;;  %v5963_v62 = vpop.eup %5962  ;;  %v3376_v42 = vadd.f32 %v8091_v49, %v7858_v15  ;;  %5976 = verf.f32 %v3503_v0 }
 0xb7f   : > { %v5965_v13 = vpop.eup %5964  ;;  %v3693_v40 = vmul.f32 %v3629_v20, %v3437_v48  ;;  %v3628_v51 = vadd.f32 1.0, %v5963_v62  ;;  %v3507_v31 = vmul.f32 0.70710677, %v8165_v24  ;;  %v3441_v6 = vmul.f32 0.5, %v8128_v1 }
 0xb80   : > { %3896 = vmatmul.mubr.f32.gmra.mrb[104].mxu1 %v3684_v53  ;;  %v3633_v23 = vadd.f32 1.0, %v5965_v13  ;;  %v5967_v38 = vpop.eup %5966  ;;  %v3688_v25 = vmul.f32 %v3624_v7, %v3432_v4  ;;  %v3436_v50 = vmul.f32 0.5, %v8111_v14  ;;  %5978 = verf.f32 %v3502_v16  ;;  %v8415_v4 = vld [vmem:[#allocation26_spill] sm:$0xff] }
 0xb81   : > { %3900 = vmatprep.mubr.f32.mxu1 %v3689_v39  ;;  %v5969_v8 = vpop.eup %5968  ;;  %v3506_v21 = vmul.f32 0.70710677, %v3376_v42  ;;  %5980 = verf.f32 %v3507_v31  ;;  %v3623_v29 = vadd.f32 1.0, %v5967_v38  ;;  %v3440_v11 = vmul.f32 0.5, %v8125_v57 }
 0xb82   : > { %v3697_v63 = vmul.f32 %v3633_v23, %v3441_v6  ;;  %v3632_v49 = vadd.f32 1.0, %v5969_v8  ;;  %v3692_v36 = vmul.f32 %v3628_v51, %v3436_v50  ;;  %v3431_v59 = vmul.f32 0.5, %v8119_v9  ;;  %v8416_v6 = vld [vmem:[#allocation25_spill] sm:$0xff] }
 0xb83   : > { %v5971_v15 = vpop.eup %5970  ;;  %5982 = verf.f32 %v3506_v21  ;;  %v3430_v5 = vmul.f32 0.5, %v8133_v22  ;;  %v3435_v54 = vmul.f32 0.5, %v8138_v61  ;;  %v3434_v30 = vmul.f32 0.5, %v8148_v32 }
 0xb84   : > { %3901 = vmatmul.mubr.f32.gmra.mrb[106].mxu1 %v3688_v25  ;;  %v5973_v34 = vpop.eup %5972  ;;  %v3622_v14 = vadd.f32 1.0, %v5971_v15  ;;  %v3696_v58 = vmul.f32 %v3632_v49, %v3440_v11  ;;  %v3687_v28 = vmul.f32 %v3623_v29, %v3431_v59  ;;  %v3439_v10 = vmul.f32 0.5, %v8153_v17  ;;  %v8417_v59 = vld [vmem:[#allocation27_spill] sm:$0xff] }
 0xb85   : > { %3905 = vmatprep.mubr.f32.mxu1 %v3693_v40  ;;  %v3627_v3 = vadd.f32 1.0, %v5973_v34  ;;  %v3438_v61 = vmul.f32 0.5, %v8160_v52  ;;  %v3443_v60 = vmul.f32 0.5, %v8165_v24  ;;  %v3442_v33 = vmul.f32 0.5, %v3376_v42 }
 0xb86   : > { %v3686_v56 = vmul.f32 %v3622_v14, %v3430_v5 }
 0xb87   : > { %v5975_v1 = vpop.eup %5974  ;;  %v3691_v2 = vmul.f32 %v3627_v3, %v3435_v54 }
 0xb88   : > { %3906 = vmatmul.mubr.f32.gmra.mrb[108].mxu1 %v3692_v36  ;;  %v5977_v19 = vpop.eup %5976  ;;  %v3626_v27 = vadd.f32 1.0, %v5975_v1 }
 0xb89   : > { %3910 = vmatprep.mubr.f32.mxu1 %v3697_v63  ;;  %v3631_v55 = vadd.f32 1.0, %v5977_v19 }
 0xb8a   : > { %v5979_v57 = vpop.eup %5978  ;;  %v3690_v35 = vmul.f32 %v3626_v27, %v3434_v30  ;;  %v8418_v27 = vld [vmem:[#allocation29_spill] sm:$0xff] }
 0xb8b   : > { %v5981_v9 = vpop.eup %5980  ;;  %v3630_v45 = vadd.f32 1.0, %v5979_v57  ;;  %v3695_v37 = vmul.f32 %v3631_v55, %v3439_v10 }
 0xb8c   : > { %3911 = vmatmul.mubr.f32.gmra.mrb[110].mxu1 %v3696_v58  ;;  %v3635_v22 = vadd.f32 1.0, %v5981_v9 }
 0xb8d   : > { %4040 = vmatprep.mubr.f32.mxu1 %v3687_v28  ;;  %v5983_v18 = vpop.eup %5982  ;;  %v3694_v43 = vmul.f32 %v3630_v45, %v3438_v61 }
 0xb8e   : > { %v3634_v44 = vadd.f32 1.0, %v5983_v18  ;;  %v3699_v26 = vmul.f32 %v3635_v22, %v3443_v60  ;;  %v8419_v22 = vld [vmem:[#allocation30_spill] sm:$0xff] }
 0xb90   : > { %4041 = vmatmul.mubr.f32.vlgmr.msra.gmra.mrb[112].mxu1 %v3686_v56  ;;  %v3698_v32 = vmul.f32 %v3634_v44, %v3442_v33  ;;  %v8420_v44 = vld [vmem:[#allocation28_spill] sm:$0xff] }
 0xb91   : > { %4045 = vmatprep.mubr.f32.mxu1 %v3691_v2 }
 0xb94   : > { %4046 = vmatmul.mubr.f32.gmra.mrb[114].mxu1 %v3690_v35 }
 0xb95   : > { %4050 = vmatprep.mubr.f32.mxu1 %v3695_v37 }
 0xb98   : > { %4051 = vmatmul.mubr.f32.gmra.mrb[116].mxu1 %v3694_v43 }
 0xb99   : > { %4055 = vmatprep.mubr.f32.mxu1 %v3699_v26 }
 0xb9c   : > { %4056 = vmatmul.mubr.f32.gmra.mrb[118].mxu1 %v3698_v32 }
 0xbcb   : > { %v4592_v17 = vpop.f32.mrb[80].mxu1 }
 0xbcc   : > { %v4672_v41 = vpop.f32.mrb[112].mxu0  ;;  %v4593_v12 = vpop.f32.mrb[81].mxu1 }
 0xbcd   : > { %v4673_v46 = vpop.f32.mrb[113].mxu0  ;;  %v4594_v52 = vadd.f32 %v4593_v12, %v4592_v17 }
 0xbce   : > { %v4674_v20 = vadd.f32 %v4673_v46, %v4672_v41 }
 0xbcf   : > { %v3838_v39 = vadd.f32 %v4594_v52, %v8186_v47 }
 0xbd0   : > { %v4595_v7 = vpop.f32.mrb[82].mxu1  ;;  %v4675_v0 = vpop.f32.mrb[114].mxu0 }
 0xbd1   : > { %v4596_v24 = vpop.f32.mrb[83].mxu1  ;;  %v4676_v53 = vpop.f32.mrb[115].mxu0  ;;  %v3983_v62 = vadd.f32 %v4674_v20, %v3838_v39 }
 0xbd2   : > { %v4597_v48 = vadd.f32 %v4596_v24, %v4595_v7  ;;  %v4677_v13 = vadd.f32 %v4676_v53, %v4675_v0  ;;  %v8421_v53 = vld [vmem:[#allocation32_spill] sm:$0xff] }
 0xbd3   : > { %v4061_v16 = vadd.f32 %v3983_v62, %v8415_v4 }
 0xbd4   : > { %v3843_v42 = vadd.f32 %v4597_v48, %v8186_v47  ;;  %v4598_v23 = vpop.f32.mrb[84].mxu1  ;;  %v4678_v40 = vpop.f32.mrb[116].mxu0 }
 0xbd5   : > { %v4599_v38 = vpop.f32.mrb[85].mxu1  ;;  %v4679_v51 = vpop.f32.mrb[117].mxu0  ;;  %4077 = vst [vmem:[%s8192_s14] sm:$0xff] %v4061_v16  ;;  %v8422_v16 = vld [vmem:[#allocation31_spill] sm:$0xff] }
 0xbd6   : > { %v3988_v31 = vadd.f32 %v4677_v13, %v3843_v42  ;;  %v4600_v25 = vadd.f32 %v4599_v38, %v4598_v23  ;;  %v4680_v8 = vadd.f32 %v4679_v51, %v4678_v40 }
 0xbd8   : > { %v4062_v50 = vadd.f32 %v3988_v31, %v8416_v6  ;;  %v3848_v21 = vadd.f32 %v4600_v25, %v8186_v47  ;;  %v4601_v63 = vpop.f32.mrb[86].mxu1  ;;  %v4681_v15 = vpop.f32.mrb[118].mxu0 }
 0xbd9   : > { %v4602_v49 = vpop.f32.mrb[87].mxu1  ;;  %v4682_v36 = vpop.f32.mrb[119].mxu0 }
 0xbda   : > { %4078 = vst [vmem:[%s8192_s14 + $0x8] sm:$0xff] %v4062_v50  ;;  %v3993_v34 = vadd.f32 %v4680_v8, %v3848_v21  ;;  %v4603_v29 = vadd.f32 %v4602_v49, %v4601_v63  ;;  %v4683_v11 = vadd.f32 %v4682_v36, %v4681_v15  ;;  %v8423_v49 = vld [vmem:[#allocation34_spill] sm:$0xff] }
 0xbdc   : > { %v4063_v1 = vadd.f32 %v3993_v34, %v8417_v59  ;;  %v3853_v14 = vadd.f32 %v4603_v29, %v8186_v47  ;;  %v4604_v58 = vpop.f32.mrb[88].mxu1  ;;  %v4684_v3 = vpop.f32.mrb[120].mxu0 }
 0xbdd   : > { %v4605_v28 = vpop.f32.mrb[89].mxu1  ;;  %v4685_v19 = vpop.f32.mrb[121].mxu0 }
 0xbde   : > { %4079 = vst [vmem:[%s8192_s14 + $0x10] sm:$0xff] %v4063_v1  ;;  %v3998_v5 = vadd.f32 %v4683_v11, %v3853_v14  ;;  %v4606_v54 = vadd.f32 %v4605_v28, %v4604_v58  ;;  %v4686_v56 = vadd.f32 %v4685_v19, %v4684_v3  ;;  %v8424_v58 = vld [vmem:[#allocation33_spill] sm:$0xff] }
 0xbe0   : > { %v4064_v57 = vadd.f32 %v3998_v5, %v8418_v27  ;;  %v3858_v55 = vadd.f32 %v4606_v54, %v8186_v47  ;;  %v4607_v2 = vpop.f32.mrb[90].mxu1  ;;  %v4687_v9 = vpop.f32.mrb[122].mxu0 }
 0xbe1   : > { %v4608_v30 = vpop.f32.mrb[91].mxu1  ;;  %v4688_v10 = vpop.f32.mrb[123].mxu0 }
 0xbe2   : > { %4080 = vst [vmem:[%s8192_s14 + $0x18] sm:$0xff] %v4064_v57  ;;  %v4003_v45 = vadd.f32 %v4686_v56, %v3858_v55  ;;  %v4609_v35 = vadd.f32 %v4608_v30, %v4607_v2  ;;  %v4689_v18 = vadd.f32 %v4688_v10, %v4687_v9 }
 0xbe4   : > { %v4065_v37 = vadd.f32 %v4003_v45, %v8419_v22  ;;  %v3863_v61 = vadd.f32 %v4609_v35, %v8186_v47  ;;  %v8425_v45 = vld [vmem:[#allocation36_spill] sm:$0xff] }
 0xbe6   : > { %4081 = vst [vmem:[%s8192_s14 + $0x20] sm:$0xff] %v4065_v37  ;;  %v4008_v60 = vadd.f32 %v4689_v18, %v3863_v61 }
 0xbe8   : > { %v4066_v43 = vadd.f32 %v4008_v60, %v8420_v44  ;;  %v8426_v44 = vld [vmem:[#allocation35_spill] sm:$0xff] }
 0xbea   : > { %4082 = vst [vmem:[%s8192_s14 + $0x28] sm:$0xff] %v4066_v43 }
 0xbfb   : > { %v4610_v26 = vpop.f32.mrb[92].mxu1 }
 0xbfc   : > { %v4690_v33 = vpop.f32.mrb[124].mxu0  ;;  %v4611_v32 = vpop.f32.mrb[93].mxu1 }
 0xbfd   : > { %v4612_v17 = vadd.f32 %v4611_v32, %v4610_v26  ;;  %v4691_v41 = vpop.f32.mrb[125].mxu0 }
 0xbfe   : > { %v4692_v12 = vadd.f32 %v4691_v41, %v4690_v33 }
 0xbff   : > { %v3868_v46 = vadd.f32 %v4612_v17, %v8186_v47  ;;  %v4613_v52 = vpop.f32.mrb[94].mxu1 }
 0xc00   : > { %v4693_v39 = vpop.f32.mrb[126].mxu0  ;;  %v4614_v7 = vpop.f32.mrb[95].mxu1 }
 0xc01   : > { %v4013_v20 = vadd.f32 %v4692_v12, %v3868_v46  ;;  %v4615_v0 = vadd.f32 %v4614_v7, %v4613_v52  ;;  %v4694_v24 = vpop.f32.mrb[127].mxu0 }
 0xc02   : > { %v4695_v48 = vadd.f32 %v4694_v24, %v4693_v39 }
 0xc03   : > { %v4067_v62 = vadd.f32 %v4013_v20, %v8421_v53  ;;  %v3873_v13 = vadd.f32 %v4615_v0, %v8186_v47 }
 0xc05   : > { %4083 = vst [vmem:[%s8192_s14 + $0x30] sm:$0xff] %v4067_v62  ;;  %v4018_v4 = vadd.f32 %v4695_v48, %v3873_v13 }
 0xc07   : > { %v4068_v42 = vadd.f32 %v4018_v4, %v8422_v16  ;;  %v8427_v4 = vld [vmem:[#allocation38_spill] sm:$0xff] }
 0xc09   : > { %4084 = vst [vmem:[%s8192_s14 + $0x38] sm:$0xff] %v4068_v42 }
 0xc3d   : > { %v4616_v23 = vpop.f32.mrb[96].mxu1 }
 0xc3e   : > { %v4617_v38 = vpop.f32.mrb[97].mxu1 }
 0xc3f   : > { %v4618_v31 = vadd.f32 %v4617_v38, %v4616_v23 }
 0xc41   : > { %v4696_v40 = vpop.f32.mrb[128].mxu0  ;;  %v3878_v8 = vadd.f32 %v4618_v31, %v8186_v47  ;;  %v8429_v31 = vld [vmem:[#allocation37_spill] sm:$0xff] }
 0xc42   : > { %v4697_v51 = vpop.f32.mrb[129].mxu0 }
 0xc43   : > { %v4698_v25 = vadd.f32 %v4697_v51, %v4696_v40 }
 0xc45   : > { %v4023_v6 = vadd.f32 %v4698_v25, %v3878_v8  ;;  %v4619_v50 = vpop.f32.mrb[98].mxu1 }
 0xc46   : > { %v4620_v63 = vpop.f32.mrb[99].mxu1 }
 0xc47   : > { %v4069_v36 = vadd.f32 %v4023_v6, %v8423_v49  ;;  %v4621_v34 = vadd.f32 %v4620_v63, %v4619_v50 }
 0xc48   : > { %v4699_v21 = vpop.f32.mrb[130].mxu0 }
 0xc49   : > { %v4700_v15 = vpop.f32.mrb[131].mxu0  ;;  %4085 = vst [vmem:[%s8192_s14 + $0x40] sm:$0xff] %v4069_v36  ;;  %v3883_v11 = vadd.f32 %v4621_v34, %v8186_v47 }
 0xc4a   : > { %v4701_v29 = vadd.f32 %v4700_v15, %v4699_v21  ;;  %v8430_v15 = vld [vmem:[#allocation40_spill] sm:$0xff] }
 0xc4b   : > { %v4622_v1 = vpop.f32.mrb[100].mxu1 }
 0xc4c   : > { %v4028_v59 = vadd.f32 %v4701_v29, %v3883_v11  ;;  %v4623_v28 = vpop.f32.mrb[101].mxu1  ;;  %v8432_v29 = vld [vmem:[#allocation39_spill] sm:$0xff] }
 0xc4d   : > { %v4702_v14 = vpop.f32.mrb[132].mxu0  ;;  %v4624_v5 = vadd.f32 %v4623_v28, %v4622_v1 }
 0xc4e   : > { %v4070_v3 = vadd.f32 %v4028_v59, %v8424_v58  ;;  %v4703_v19 = vpop.f32.mrb[133].mxu0 }
 0xc4f   : > { %v4704_v54 = vadd.f32 %v4703_v19, %v4702_v14  ;;  %v3888_v56 = vadd.f32 %v4624_v5, %v8186_v47  ;;  %v4625_v27 = vpop.f32.mrb[102].mxu1 }
 0xc50   : > { %4086 = vst [vmem:[%s8192_s14 + $0x48] sm:$0xff] %v4070_v3  ;;  %v4626_v55 = vpop.f32.mrb[103].mxu1 }
 0xc51   : > { %v4705_v57 = vpop.f32.mrb[134].mxu0  ;;  %v4033_v9 = vadd.f32 %v4704_v54, %v3888_v56  ;;  %v4627_v30 = vadd.f32 %v4626_v55, %v4625_v27 }
 0xc52   : > { %v4706_v2 = vpop.f32.mrb[135].mxu0 }
 0xc53   : > { %v4707_v10 = vadd.f32 %v4706_v2, %v4705_v57  ;;  %v4071_v35 = vadd.f32 %v4033_v9, %v8425_v45  ;;  %v3893_v18 = vadd.f32 %v4627_v30, %v8186_v47  ;;  %v4628_v22 = vpop.f32.mrb[104].mxu1 }
 0xc54   : > { %v4629_v37 = vpop.f32.mrb[105].mxu1 }
 0xc55   : > { %4087 = vst [vmem:[%s8192_s14 + $0x50] sm:$0xff] %v4071_v35  ;;  %v4038_v61 = vadd.f32 %v4707_v10, %v3893_v18  ;;  %v4630_v60 = vadd.f32 %v4629_v37, %v4628_v22 }
 0xc57   : > { %v4072_v43 = vadd.f32 %v4038_v61, %v8426_v44  ;;  %v4631_v26 = vpop.f32.mrb[106].mxu1  ;;  %v3898_v0 = vadd.f32 %v4630_v60, %v8186_v47 }
 0xc58   : > { %v4632_v33 = vpop.f32.mrb[107].mxu1 }
 0xc59   : > { %4088 = vst [vmem:[%s8192_s14 + $0x58] sm:$0xff] %v4072_v43  ;;  %v4633_v32 = vadd.f32 %v4632_v33, %v4631_v26 }
 0xc5b   : > { %v4634_v17 = vpop.f32.mrb[108].mxu1  ;;  %v3903_v13 = vadd.f32 %v4633_v32, %v8186_v47 }
 0xc5c   : > { %v4635_v41 = vpop.f32.mrb[109].mxu1 }
 0xc5d   : > { %v4636_v12 = vadd.f32 %v4635_v41, %v4634_v17 }
 0xc5f   : > { %v4637_v46 = vpop.f32.mrb[110].mxu1  ;;  %v3908_v51 = vadd.f32 %v4636_v12, %v8186_v47 }
 0xc60   : > { %v4638_v52 = vpop.f32.mrb[111].mxu1 }
 0xc61   : > { %v4639_v20 = vadd.f32 %v4638_v52, %v4637_v46 }
 0xc63   : > { %v4708_v39 = vpop.f32.mrb[112].mxu1  ;;  %v3913_v63 = vadd.f32 %v4639_v20, %v8186_v47 }
 0xc64   : > { %v4709_v7 = vpop.f32.mrb[113].mxu1 }
 0xc65   : > { %v4710_v24 = vadd.f32 %v4709_v7, %v4708_v39 }
 0xc67   : > { %v4043_v53 = vadd.f32 %v4710_v24, %v3898_v0  ;;  %v4711_v62 = vpop.f32.mrb[114].mxu1 }
 0xc68   : > { %v4712_v48 = vpop.f32.mrb[115].mxu1 }
 0xc69   : > { %v4073_v16 = vadd.f32 %v4043_v53, %v8427_v4  ;;  %v4713_v42 = vadd.f32 %v4712_v48, %v4711_v62 }
 0xc6b   : > { %4089 = vst [vmem:[%s8192_s14 + $0x60] sm:$0xff] %v4073_v16  ;;  %v4048_v23 = vadd.f32 %v4713_v42, %v3903_v13  ;;  %v4714_v40 = vpop.f32.mrb[116].mxu1 }
 0xc6c   : > { %v4715_v38 = vpop.f32.mrb[117].mxu1 }
 0xc6d   : > { %v4074_v25 = vadd.f32 %v4048_v23, %v8429_v31  ;;  %v4716_v8 = vadd.f32 %v4715_v38, %v4714_v40 }
 0xc6f   : > { %4090 = vst [vmem:[%s8192_s14 + $0x68] sm:$0xff] %v4074_v25  ;;  %v4053_v6 = vadd.f32 %v4716_v8, %v3908_v51  ;;  %v4717_v50 = vpop.f32.mrb[118].mxu1 }
 0xc70   : > { %v4718_v21 = vpop.f32.mrb[119].mxu1 }
 0xc71   : > { %v4075_v49 = vadd.f32 %v4053_v6, %v8430_v15  ;;  %v4719_v36 = vadd.f32 %v4718_v21, %v4717_v50 }
 0xc73   : > { %4091 = vst [vmem:[%s8192_s14 + $0x70] sm:$0xff] %v4075_v49  ;;  %v4058_v34 = vadd.f32 %v4719_v36, %v3913_v63 }
 0xc75   : > { %v4076_v11 = vadd.f32 %v4058_v34, %v8432_v29 }
 0xc77   : > { %4092 = vst [vmem:[%s8192_s14 + $0x78] sm:$0xff] %v4076_v11 }
 0xc78   : > { %6213 = shalt.err (!%p6210_p1)
}
 0xc79   : > { %s6214_s10 = scalar_lea.hbm %s8242_s12, 2048  ;;  %s6218_s19 = scalar_lea.hbm %s8431_s21, 4096 }
 0xc7a   : > { %p6215_p10 = scmp.ne.s32.totalorder %s8242_s12, %s6214_s10  ;;  %p6219_p3 = scmp.lt.u32.totalorder %s8242_s12, %s8431_s21 }
 0xc7b   : > { %p6220_p12 = scmp.lt.u32.totalorder %s6218_s19, %s6214_s10  ;;  %p6222_p6 = scmp.lt.u32.totalorder %s6214_s10, %s8242_s12 }
 0xc7c   : > { %p6216_p11 = pnand %p6215_p10, %p8433_p0 }
 0xc7d   : > { %p6221_p13 = por %p6220_p12, %p6219_p3 }
 0xc7e   : > { %p6217_p8 = pneg %p6216_p11 }
 0xc7f   : > { %p6223_p7 = por %p6222_p6, %p6221_p13 }
 0xc81   : > { %p6224_p5 = pnand %p6223_p7, %p6217_p8 }
 0xc83   : > { %6227 = shalt.err (!%p6224_p5)
}
 0xc84   : > { %s6316_s14 = smov 128   ;;  %s6317_s6 = smov 8  }
 0xc85   : > { %5480 = dma.vmem_to_hbm [thread:$0]  (%p8433_p0), %s8244_s24, 2048, %s8242_s12, %s4094_s8, %s6316_s14, %s6316_s14, %s6317_s6  }
 0xc86 PF: > { %s4124_s3 = sand.u32 1, %s6278_s29   ;;  %p8434_p2 = scmp.ne.s32.totalorder %s8368_s7, 0 }
 0xc87   : > { %p8435_p4 = scmp.ge.s32.totalorder %s6298_s18, 2  ;;  %s4125_s11 = scalar_lea.sflag [#allocation6], %s4124_s3 }
 0xc89   : > { %p5506_p9 = pnand %p8435_p4, %p8434_p2 }
 0xc8b   : > { %6273 = dma.done.wait (!%p5506_p9), %s4125_s11, 2048  }
 0xc8c   : > { %6275 = vsyncadd (!%p5506_p9), %s4125_s11, 4294965248  ;;  %s35_s18 = sadd.s32 1, %s6298_s18   ;;  %s8436_s4 = sld [smem:[#allocation24_spill]] }
 0xc8d   : > { %p32_p1 = scmp.ge.s32.totalorder %s35_s18, 4   ;;  %s8437_s29 = smov %s6282_s30 }
 0xc8e   : > { %s8438_s30 = smov %s6286_s15  ;;  %s8439_s15 = smov %s6590_s13 }
 0xc8f   : > { %s8440_s16 = smov %s6294_s17  ;;  %34 = sbr.rel (!%p32_p1) target bundleno = 23 (0x17), region = 158 }
 0xc92   : > { %s8441_s17 = smov %s8436_s4 }
 0xc96   :  { %4130 = vsyncpa [#allocation5], 1 }
 0xc97   :  { %4132 = vsyncpa [#allocation5 + $0x1], 1 }
 0xc98   :  { %4133 = vsyncpa [#allocation8], 1 }
 0xc99   :  { %4135 = vsyncpa [#allocation8 + $0x1], 1 }
 0xc9a   :  { %4136 = vsyncpa [#allocation11], 1 }
 0xc9b   :  { %4137 = vsyncpa [#allocation14], 1 }
 0xc9c   :  { %4138 = vsyncpa [#allocation6], 1 }
 0xc9d   :  { %4140 = vsyncpa [#allocation6 + $0x1], 1 }

// kernel: tpu_custom_call.1
= control target key start
LH: loop header
LB: loop body
LE: loop exit
PB: predicated region body
PF: predicated region fallthrough
CT: control target
= control target key end

     0   :  { %s8295_s0 = inlined_call_operand.hbm [shape: f32[2,128,128], index: 0, kind: input, shape index: {}]   ;;  %s8296_s1 = inlined_call_operand.hbm [shape: f32[2,128,128], index: 1, kind: input, shape index: {}]   ;;  %s8297_s2 = inlined_call_operand.vmem [shape: f32[1,128], index: 2, kind: input, shape index: {}]   ;;  %s8298_s3 = inlined_call_operand.vmem [shape: f32[1,128], index: 3, kind: input, shape index: {}]   ;;  %s8299_s4 = inlined_call_operand.hbm [shape: f32[128,128], index: 4, kind: input, shape index: {}]   ;;  %s8300_s5 = inlined_call_operand.hbm [shape: f32[128,256], index: 5, kind: input, shape index: {}]   ;;  %s8301_s6 = inlined_call_operand.hbm [shape: f32[128,128], index: 6, kind: input, shape index: {}]   ;;  %s8302_s7 = inlined_call_operand.vmem [shape: f32[1,128], index: 7, kind: input, shape index: {}]   ;;  %s8303_s8 = inlined_call_operand.vmem [shape: f32[1,128], index: 8, kind: input, shape index: {}]   ;;  %s8304_s9 = inlined_call_operand.vmem [shape: f32[1,128], index: 9, kind: input, shape index: {}]   ;;  %s8305_s10 = inlined_call_operand.hbm [shape: f32[128,512], index: 10, kind: input, shape index: {}]   ;;  %s8306_s11 = inlined_call_operand.vmem [shape: f32[1,512], index: 11, kind: input, shape index: {}]   ;;  %s8307_s12 = inlined_call_operand.hbm [shape: f32[512,128], index: 12, kind: input, shape index: {}]   ;;  %s8308_s13 = inlined_call_operand.vmem [shape: f32[1,128], index: 13, kind: input, shape index: {}]   ;;  %s8309_s14 = inlined_call_operand.hbm [shape: f32[2,128,128], index: 14, kind: output, shape index: {}]  }
   0x1   :  { %8340 = sst [smem:[#allocation44_spill]] %s8298_s3 }
   0x2   :  { %8341 = sst [smem:[#allocation45_spill]] %s8299_s4 }
   0x3   :  { %8342 = sst [smem:[#allocation46_spill]] %s8300_s5 }
   0x4   :  { %8343 = sst [smem:[#allocation47_spill]] %s8301_s6 }
   0x5   :  { %8344 = sst [smem:[#allocation48_spill]] %s8302_s7 }
   0x6   :  { %8345 = sst [smem:[#allocation49_spill]] %s8303_s8 }
   0x7   :  { %8346 = sst [smem:[#allocation50_spill]] %s8304_s9 }
   0x8   :  { %8347 = sst [smem:[#allocation51_spill]] %s8305_s10 }
   0x9   :  { %8348 = sst [smem:[#allocation52_spill]] %s8306_s11 }
   0xa   :  { %8349 = sst [smem:[#allocation53_spill]] %s8307_s12 }
   0xb   :  { %8350 = sst [smem:[#allocation54_spill]] %s8308_s13 }
   0xc   :  { %8351 = sst [smem:[#allocation55_spill]] %s8309_s14 }
   0xd   :  { %19 = vsyncpa [#allocation5], 0 }
   0xe   :  { %21 = vsyncpa [#allocation5 + $0x1], 0 }
   0xf   :  { %22 = vsyncpa [#allocation8], 0 }
  0x10   :  { %24 = vsyncpa [#allocation8 + $0x1], 0 }
  0x11   :  { %25 = vsyncpa [#allocation11], 0 }
  0x12   :  { %26 = vsyncpa [#allocation14], 0 }
  0x13   :  { %27 = vsyncpa [#allocation6], 0 }
  0x14   :  { %29 = vsyncpa [#allocation6 + $0x1], 0  ;;  %s6393_s29 = smov 0   ;;  %s6395_s30 = smov 0  }
  0x15   :  { %s6397_s15 = smov 0   ;;  %s6399_s16 = smov 0  }
  0x16   :  { %s6401_s17 = smov 0   ;;  %s6403_s18 = smov 0  }
  0x17 LB: > { %8352 = sst [smem:[#allocation23_spill]] %s6290_s16  ;;  %s6424_s19 = sadd.s32 4294967295, %s6298_s18   ;;  %s6298_s18 = sphi %s6403_s18, %s35_s18   ;;  %s6294_s17 = sphi %s6401_s17, %s8441_s17   ;;  %s6290_s16 = sphi %s6399_s16, %s8440_s16   ;;  %s6286_s15 = sphi %s6397_s15, %s8439_s15   ;;  %s6282_s30 = sphi %s6395_s30, %s8438_s30   ;;  %s6278_s29 = sphi %s6393_s29, %s8437_s29  }
  0x18   : > { %p4268_p0 = scmp.ge.s32.totalorder %s6298_s18, 1  ;;  %p8315_p1 = scmp.eq.s32.totalorder %s6424_s19, 0 }
  0x19   : > { %p386_p2 = scmp.lt.s32.totalorder %s6298_s18, 3  ;;  %s6300_s21 = smov [#allocation9]  }
  0x1a   : > { %s404_s22 = sshll.u32 %s6300_s21, 4  ;;  %s6301_s24 = smov [#allocation10]   ;;  %s6433_s22 = int_to_ptr.vmem [resolvable:$true] %s404_s22 }
  0x1b   : > { %p6429_p3 = pnand %p4268_p0, %p386_p2  ;;  %s417_s25 = sshll.u32 %s6301_s24, 4  ;;  %s6444_s25 = int_to_ptr.vmem [resolvable:$true] %s417_s25 }
  0x1c   : > { %s8355_s4 = sld [smem:[#allocation45_spill]] }
  0x1d   : > { %s8353_s20 = scalar_select %p6429_p3, 1, 0 }
  0x1e   : > { %p5482_p4 = pneg %p6429_p3 }
  0x20   : > { %p6440_p6 = pnand %p5482_p4, %p8315_p1 }
  0x22   : > { %s6000_s28 = scalar_lea.hbm %s8355_s4, 2048  ;;  %p6454_p8 = pneg %p6440_p6 }
  0x23   : > { %p6001_p7 = scmp.ne.s32.totalorder %s8355_s4, %s6000_s28  ;;  %p6007_p11 = scmp.lt.u32.totalorder %s6000_s28, %s8355_s4 }
  0x25   : > { %p6003_p9 = pnand %p6454_p8, %p6001_p7 }
  0x27   : > { %p6004_p10 = pneg %p6003_p9 }
  0x29   : > { %p6009_p12 = pnand %p6007_p11, %p6004_p10 }
  0x2b   : > { %6012 = shalt.err (!%p6009_p12)
}
  0x2c   : > { %s6013_s14 = scalar_lea.vmem %s6433_s22, 2048  ;;  %p6021_p4 = scmp.lt.s32.totalorder %s6433_s22, %s6433_s22 }
  0x2d   : > { %p6014_p13 = scmp.ne.s32.totalorder %s6433_s22, %s6013_s14  ;;  %p6022_p5 = scmp.lt.s32.totalorder %s6013_s14, %s6013_s14 }
  0x2f   : > { %p6016_p0 = pnand %p6014_p13, %p6454_p8  ;;  %p6023_p7 = por %p6022_p5, %p6021_p4 }
  0x31   : > { %p6017_p2 = pneg %p6016_p0 }
  0x33   : > { %p6024_p9 = pnand %p6023_p7, %p6017_p2 }
  0x35   : > { %6027 = shalt.err (!%p6024_p9)
}
  0x36   : > { %s8311_s26 = smov 128   ;;  %s8313_s13 = smov 8  }
  0x37   : > { %5485 = dma.hbm_to_vmem [thread:$0]  (!%p6440_p6), %s8355_s4, 2048, %s6433_s22, [#allocation8], %s8311_s26, %s8311_s26, %s8313_s13  }
  0x38   : > { %s8357_s5 = sld [smem:[#allocation46_spill]] }
  0x3e   : > { %s6028_s14 = scalar_lea.hbm %s8357_s5, 4096 }
  0x3f   : > { %p6029_p5 = scmp.ne.s32.totalorder %s8357_s5, %s6028_s14  ;;  %p6035_p12 = scmp.lt.u32.totalorder %s6028_s14, %s8357_s5 }
  0x41   : > { %p6031_p10 = pnand %p6029_p5, %p6454_p8 }
  0x43   : > { %p6032_p11 = pneg %p6031_p10 }
  0x45   : > { %p6037_p13 = pnand %p6035_p12, %p6032_p11 }
  0x47   : > { %6040 = shalt.err (!%p6037_p13)
}
  0x48   : > { %s6041_s22 = scalar_lea.vmem %s6444_s25, 4096  ;;  %p6049_p7 = scmp.lt.s32.totalorder %s6444_s25, %s6444_s25 }
  0x49   : > { %p6042_p0 = scmp.ne.s32.totalorder %s6444_s25, %s6041_s22  ;;  %p6050_p9 = scmp.lt.s32.totalorder %s6041_s22, %s6041_s22 }
  0x4b   : > { %p6044_p2 = pnand %p6042_p0, %p6454_p8  ;;  %p6051_p5 = por %p6050_p9, %p6049_p7 }
  0x4d   : > { %p6045_p4 = pneg %p6044_p2 }
  0x4f   : > { %p6052_p10 = pnand %p6051_p5, %p6045_p4 }
  0x51   : > { %6055 = shalt.err (!%p6052_p10)
}
  0x52   : > { %s6304_s9 = smov 256   ;;  %s6305_s7 = smov 16  }
  0x53   : > { %5488 = dma.hbm_to_vmem [thread:$0]  (!%p6440_p6), %s8357_s5, 4096, %s6444_s25, [#allocation11], %s6304_s9, %s6304_s9, %s6305_s7  }
  0x54   : > { %s6306_s27 = smov [#allocation13]   ;;  %s8358_s10 = sld [smem:[#allocation51_spill]] }
  0x55   : > { %s452_s28 = sshll.u32 %s6306_s27, 4  ;;  %s453_s28 = int_to_ptr.vmem [resolvable:$true] %s452_s28 }
  0x5a   : > { %s6056_s14 = scalar_lea.hbm %s8358_s10, 8192 }
  0x5b   : > { %p6057_p11 = scmp.ne.s32.totalorder %s8358_s10, %s6056_s14  ;;  %p6063_p0 = scmp.lt.u32.totalorder %s6056_s14, %s8358_s10 }
  0x5d   : > { %p6059_p12 = pnand %p6057_p11, %p6454_p8 }
  0x5f   : > { %p6060_p13 = pneg %p6059_p12 }
  0x61   : > { %p6065_p2 = pnand %p6063_p0, %p6060_p13 }
  0x63   : > { %6068 = shalt.err (!%p6065_p2)
}
  0x64   : > { %s6069_s25 = scalar_lea.vmem %s453_s28, 8192  ;;  %p6077_p5 = scmp.lt.s32.totalorder %s453_s28, %s453_s28 }
  0x65   : > { %p6070_p4 = scmp.ne.s32.totalorder %s453_s28, %s6069_s25  ;;  %p6078_p10 = scmp.lt.s32.totalorder %s6069_s25, %s6069_s25 }
  0x67   : > { %p6072_p7 = pnand %p6070_p4, %p6454_p8  ;;  %p6079_p1 = por %p6078_p10, %p6077_p5 }
  0x69   : > { %p6073_p9 = pneg %p6072_p7 }
  0x6b   : > { %p6080_p3 = pnand %p6079_p1, %p6073_p9 }
  0x6d   : > { %6083 = shalt.err (!%p6080_p3)
}
  0x6e   : > { %s6307_s26 = smov 512   ;;  %s6308_s9 = smov 32  }
  0x6f   : > { %5494 = dma.hbm_to_vmem [thread:$0]  (!%p6440_p6), %s8358_s10, 8192, %s453_s28, [#allocation14], %s6307_s26, %s6307_s26, %s6308_s9  }
  0x70   : > { %s6309_s7 = smov [#allocation12]   ;;  %s6310_s11 = smov [#allocation15]  }
  0x71   : > { %s430_s8 = sshll.u32 %s6309_s7, 4  ;;  %s468_s27 = sshll.u32 %s6310_s11, 4  ;;  %s431_s8 = int_to_ptr.vmem [resolvable:$true] %s430_s8  ;;  %s469_s27 = int_to_ptr.vmem [resolvable:$true] %s468_s27 }
  0x72   : > { %s8359_s6 = sld [smem:[#allocation47_spill]] }
  0x78   : > { %s6084_s14 = scalar_lea.hbm %s8359_s6, 2048 }
  0x79   : > { %p6085_p1 = scmp.ne.s32.totalorder %s8359_s6, %s6084_s14  ;;  %p6091_p12 = scmp.lt.u32.totalorder %s6084_s14, %s8359_s6 }
  0x7b   : > { %p6087_p3 = pnand %p6085_p1, %p6454_p8 }
  0x7d   : > { %p6088_p11 = pneg %p6087_p3 }
  0x7f   : > { %p6093_p13 = pnand %p6091_p12, %p6088_p11 }
  0x81   : > { %6096 = shalt.err (!%p6093_p13)
}
  0x82   : > { %s6097_s28 = scalar_lea.vmem %s431_s8, 2048  ;;  %p6105_p7 = scmp.lt.s32.totalorder %s431_s8, %s431_s8 }
  0x83   : > { %p6098_p0 = scmp.ne.s32.totalorder %s431_s8, %s6097_s28  ;;  %p6106_p9 = scmp.lt.s32.totalorder %s6097_s28, %s6097_s28 }
  0x85   : > { %p6100_p2 = pnand %p6098_p0, %p6454_p8  ;;  %p6107_p5 = por %p6106_p9, %p6105_p7 }
  0x87   : > { %p6101_p4 = pneg %p6100_p2 }
  0x89   : > { %p6108_p10 = pnand %p6107_p5, %p6101_p4 }
  0x8b   : > { %6111 = shalt.err (!%p6108_p10)
}
  0x8c   : > { %s8360_s26 = smov 8   ;;  %s8361_s9 = smov 128  }
  0x8d   : > { %5491 = dma.hbm_to_vmem [thread:$0]  (!%p6440_p6), %s8359_s6, 2048, %s431_s8, [#allocation11], %s8361_s9, %s8361_s9, %s8360_s26  }
  0x8e   : > { %s8362_s12 = sld [smem:[#allocation53_spill]] }
  0x94   : > { %s6112_s7 = scalar_lea.hbm %s8362_s12, 8192 }
  0x95   : > { %p6113_p1 = scmp.ne.s32.totalorder %s8362_s12, %s6112_s7  ;;  %p6119_p12 = scmp.lt.u32.totalorder %s6112_s7, %s8362_s12 }
  0x97   : > { %p6115_p3 = pnand %p6113_p1, %p6454_p8 }
  0x99   : > { %p6116_p11 = pneg %p6115_p3 }
  0x9b   : > { %p6121_p13 = pnand %p6119_p12, %p6116_p11 }
  0x9d   : > { %6124 = shalt.err (!%p6121_p13)
}
  0x9e   : > { %s6125_s22 = scalar_lea.vmem %s469_s27, 8192  ;;  %p6133_p7 = scmp.lt.s32.totalorder %s469_s27, %s469_s27 }
  0x9f   : > { %p6126_p0 = scmp.ne.s32.totalorder %s469_s27, %s6125_s22  ;;  %p6134_p9 = scmp.lt.s32.totalorder %s6125_s22, %s6125_s22 }
  0xa1   : > { %p6128_p2 = pnand %p6126_p0, %p6454_p8  ;;  %p6135_p5 = por %p6134_p9, %p6133_p7 }
  0xa3   : > { %p6129_p4 = pneg %p6128_p2 }
  0xa5   : > { %p6136_p10 = pnand %p6135_p5, %p6129_p4 }
  0xa7   : > { %6139 = shalt.err (!%p6136_p10)
}
  0xa8   : > { %5497 = dma.hbm_to_vmem [thread:$0]  (!%p6440_p6), %s8362_s12, 8192, %s469_s27, [#allocation14], %s8361_s9, %s8361_s9, %s8360_s26  }
  0xa9   : > { %s4267_s16 = sadd.s32 4294967294, %s6298_s18   ;;  %s47_s23 = sadd.s32 1, %s6294_s17 }
  0xaa   : > { %s56_s28 = sadd.s32 1, %s6286_s15  ;;  %p49_p8 = scmp.ge.s32.totalorder %s47_s23, 2 }
  0xab   : > { %p63_p1 = scmp.ne.s32.totalorder %s6286_s15, %s6282_s30  ;;  %p64_p3 = scmp.eq.s32.totalorder %s6298_s18, 0 }
  0xac   : > { %p69_p11 = scmp.ne.s32.totalorder %s6282_s30, %s6278_s29  ;;  %s8443_s23 = smov (%p49_p8, %s47_s23), 0 }
  0xad   : > { %8363 = sst [smem:[#allocation24_spill]] %s8443_s23  ;;  %p6571_p12 = por %p64_p3, %p63_p1 }
  0xae   : > { %p8365_p13 = scmp.eq.s32.totalorder %s6424_s19, 0  ;;  %s51_s5 = ssub.s32 %s6294_s17, %s8443_s23 }
  0xaf   : > { %p373_p0 = scmp.eq.s32.totalorder %s6424_s19, 1  ;;  %p54_p2 = scmp.eq.s32.totalorder %s51_s5, 0 }
  0xb0   : > { %p6577_p6 = por %p8365_p13, %p69_p11  ;;  %p379_p4 = scmp.eq.s32.totalorder %s4267_s16, 1 }
  0xb1   : > { %p6584_p7 = por %p373_p0, %p63_p1  ;;  %p5514_p9 = scmp.lt.s32.totalorder %s6298_s18, 2 }
  0xb2   : > { %s6590_s13 = scalar_select %p54_p2, %s6286_s15, %s56_s28  }
  0xb3   : > { %s8367_s4 = scalar_select %p6584_p7, 1, 0 }
  0xb4   : > { %p6592_p5 = por %p379_p4, %p69_p11  ;;  %s485_s11 = sand.u32 1, %s6286_s15  }
  0xb5   : > { %s4275_s21 = sshll.u32 %s485_s11, 7  ;;  %s4365_s24 = sshll.u32 %s6294_s17, 11 }
  0xb6   : > { %s8368_s7 = scalar_select %p6592_p5, 1, 0 }
  0xb7   : > { %s6601_s8 = scalar_lea.hbm %s8295_s0, %s4365_s24  ;;  %s489_s25 = scalar_lea.vmem [#allocation4], %s4275_s21 }
  0xb8   : > { %s498_s16 = sshll.u32 %s489_s25, 4  ;;  %p6607_p10 = pnand %p5514_p9, %p6571_p12  ;;  %s6603_s16 = int_to_ptr.vmem [resolvable:$true] %s498_s16 }
  0xb9   : > { %s6614_s14 = scalar_lea.hbm %s8296_s1, %s4365_s24  ;;  %s512_s22 = scalar_lea.vmem [#allocation7], %s4275_s21 }
  0xba   : > { %s6616_s10 = sshll.u32 %s512_s22, 4  ;;  %s6618_s12 = scalar_lea.sflag [#allocation5], %s485_s11  ;;  %s6650_s10 = int_to_ptr.vmem [resolvable:$true] %s6616_s10 }
  0xbb   : > { %s6140_s25 = scalar_lea.hbm %s6601_s8, 2048  ;;  %p6142_p1 = pneg %p6607_p10 }
  0xbc   : > { %p6141_p8 = scmp.ne.s32.totalorder %s6601_s8, %s6140_s25  ;;  %s6145_s6 = scalar_lea.hbm %s8295_s0, 4096 }
  0xbd   : > { %p6146_p12 = scmp.lt.u32.totalorder %s6601_s8, %s8295_s0  ;;  %p6147_p13 = scmp.lt.u32.totalorder %s6145_s6, %s6140_s25 }
  0xbe   : > { %p6143_p3 = pnand %p6142_p1, %p6141_p8  ;;  %p6149_p2 = scmp.lt.u32.totalorder %s6140_s25, %s6601_s8 }
  0xbf   : > { %p6148_p0 = por %p6147_p13, %p6146_p12 }
  0xc0   : > { %p6144_p11 = pneg %p6143_p3 }
  0xc1   : > { %p6150_p4 = por %p6149_p2, %p6148_p0 }
  0xc3   : > { %p6151_p9 = pnand %p6150_p4, %p6144_p11 }
  0xc5   : > { %6154 = shalt.err (!%p6151_p9)
}
  0xc6   : > { %s6155_s11 = scalar_lea.vmem %s6603_s16, 2048  ;;  %s6311_s23 = smov [#allocation4]  }
  0xc7   : > { %p6156_p8 = scmp.ne.s32.totalorder %s6603_s16, %s6155_s11  ;;  %s6160_s21 = sshll.u32 %s6311_s23, 4  ;;  %s6161_s21 = int_to_ptr.vmem [resolvable:$false] %s6160_s21 }
  0xc8   : > { %s6162_s22 = scalar_lea.vmem %s6161_s21, 4096  ;;  %p6163_p7 = scmp.lt.s32.totalorder %s6603_s16, %s6161_s21 }
  0xc9   : > { %p6158_p3 = pnand %p6156_p8, %p6142_p1  ;;  %p6164_p12 = scmp.lt.s32.totalorder %s6162_s22, %s6155_s11 }
  0xcb   : > { %p6159_p5 = pneg %p6158_p3  ;;  %p6165_p13 = por %p6164_p12, %p6163_p7 }
  0xcd   : > { %p6166_p0 = pnand %p6165_p13, %p6159_p5 }
  0xcf   : > { %6169 = shalt.err (!%p6166_p0)
}
  0xd0   : > { %5501 = dma.hbm_to_vmem [thread:$0]  (!%p6607_p10), %s6601_s8, 2048, %s6603_s16, %s6618_s12, %s8361_s9, %s8361_s9, %s8360_s26  }
  0xd1   : > { %s508_s25 = sand.u32 1, %s6298_s18   ;;  %s6170_s6 = scalar_lea.hbm %s6614_s14, 2048 }
  0xd2   : > { %s6653_s3 = scalar_lea.sflag [#allocation8], %s508_s25  ;;  %p6171_p7 = scmp.ne.s32.totalorder %s6614_s14, %s6170_s6 }
  0xd3   : > { %s6175_s11 = scalar_lea.hbm %s8296_s1, 4096  ;;  %p6176_p2 = scmp.lt.u32.totalorder %s6614_s14, %s8296_s1 }
  0xd4   : > { %p6173_p5 = pnand %p6171_p7, %p6142_p1  ;;  %p6177_p4 = scmp.lt.u32.totalorder %s6175_s11, %s6170_s6 }
  0xd5   : > { %p6179_p8 = scmp.lt.u32.totalorder %s6170_s6, %s6614_s14 }
  0xd6   : > { %p6174_p11 = pneg %p6173_p5  ;;  %p6178_p9 = por %p6177_p4, %p6176_p2 }
  0xd8   : > { %p6180_p3 = por %p6179_p8, %p6178_p9 }
  0xda   : > { %p6181_p12 = pnand %p6180_p3, %p6174_p11 }
  0xdc   : > { %6184 = shalt.err (!%p6181_p12)
}
  0xdd   : > { %s6185_s12 = scalar_lea.vmem %s6650_s10, 2048  ;;  %s6312_s8 = smov [#allocation7]  }
  0xde   : > { %p6186_p13 = scmp.ne.s32.totalorder %s6650_s10, %s6185_s12  ;;  %s6190_s16 = sshll.u32 %s6312_s8, 4  ;;  %s6191_s16 = int_to_ptr.vmem [resolvable:$false] %s6190_s16 }
  0xdf   : > { %s6192_s22 = scalar_lea.vmem %s6191_s16, 4096  ;;  %p6193_p5 = scmp.lt.s32.totalorder %s6650_s10, %s6191_s16 }
  0xe0   : > { %p6188_p0 = pnand %p6186_p13, %p6142_p1  ;;  %p6194_p2 = scmp.lt.s32.totalorder %s6192_s22, %s6185_s12 }
  0xe2   : > { %p6189_p7 = pneg %p6188_p0  ;;  %p6195_p4 = por %p6194_p2, %p6193_p5 }
  0xe4   : > { %p6196_p9 = pnand %p6195_p4, %p6189_p7 }
  0xe6   : > { %6199 = shalt.err (!%p6196_p9)
}
  0xe7   : > { %5504 = dma.hbm_to_vmem [thread:$0]  (!%p6607_p10), %s6614_s14, 2048, %s6650_s10, %s6653_s3, %s8361_s9, %s8361_s9, %s8360_s26  }
  0xe8   : > { %p8370_p1 = scmp.ne.s32.totalorder %s8353_s20, 0 }
  0xea   : > { %531 = sbr.rel (%p8370_p1) target bundleno = 3206 (0xc86), region = 76 }
  0xf1   : > { %s6685_s25 = sand.u32 1, %s6282_s30  }
  0xf2   : > { %s6688_s6 = sshll.u32 %s6685_s25, 7  ;;  %s534_s28 = scalar_lea.sflag [#allocation5], %s6685_s25 }
  0xf3   : > { %s6692_s5 = scalar_lea.vmem [#allocation4], %s6688_s6 }
  0xf4   : > { %6253 = dma.done.wait (%p6577_p6), %s534_s28, 2048  }
  0xf5   : > { %6255 = vsyncadd (%p6577_p6), %s534_s28, 4294965248  ;;  %s542_s10 = sand.u32 1, %s6424_s19   ;;  %s6700_s26 = scalar_lea.vmem [#allocation7], %s6688_s6 }
  0xf6   : > { %s543_s20 = scalar_lea.sflag [#allocation8], %s542_s10 }
  0xf7   : > { %6257 = dma.done.wait (%p6577_p6), %s543_s20, 2048  }
  0xf8   : > { %6259 = vsyncadd (%p6577_p6), %s543_s20, 4294965248  ;;  %p8371_p10 = scmp.eq.s32.totalorder %s6424_s19, 0 }
  0xfa   : > { %6261 = dma.done.wait (%p8371_p10), [#allocation8], 2048   ;;  %p8372_p11 = pmov %p8371_p10 }
  0xfb   : > { %p8373_p8 = pmov %p8371_p10 }
  0xfc   : > { %6263 = vsyncadd (%p8372_p11), [#allocation8], 4294965248 }
  0xfd   : > { %6265 = dma.done.wait (%p8373_p8), [#allocation11], 6144   ;;  %p8374_p3 = pmov %p8373_p8 }
  0xff   : > { %6267 = vsyncadd (%p8374_p3), [#allocation11], 4294961152  ;;  %p8375_p12 = pmov %p8374_p3 }
 0x100   : > { %p8376_p13 = pmov %p8374_p3 }
 0x101   : > { %6269 = dma.done.wait (%p8375_p12), [#allocation14], 16384  }
 0x102   : > { %6271 = vsyncadd (%p8376_p13), [#allocation14], 4294950912  ;;  %v622_v0 = vld [vmem:[%s6700_s26] sm:$0xff]  ;;  %v624_v1 = vld [vmem:[%s6700_s26 + $0x10] sm:$0xff]  ;;  %s8377_s3 = sld [smem:[#allocation44_spill]]  ;;  %vm1295_vm0 = vcmask 523264  }
 0x103   : > { %640 = vadd.xlane.f32.xlu0 %v622_v0  ;;  %644 = vadd.xlane.f32.xlu1 %v624_v1  ;;  %v6721_v2 = vld [vmem:[%s6700_s26 + $0x8] sm:$0xff]  ;;  %v6724_v3 = vld [vmem:[%s6700_s26 + $0x18] sm:$0xff]  ;;  %v6729_v4 = vld [vmem:[%s6700_s26 + $0x20] sm:$0xff]  ;;  %s6314_s24 = smov 64   ;;  %vm2532_vm2 = vcmask 1048064   ;;  %s8388_s21 = sld [smem:[#allocation48_spill]] }
 0x104   : > { %v6732_v5 = vld [vmem:[%s6700_s26 + $0x28] sm:$0xff]  ;;  %v6737_v6 = vld [vmem:[%s6700_s26 + $0x30] sm:$0xff]  ;;  %v6740_v7 = vld [vmem:[%s6700_s26 + $0x38] sm:$0xff]  ;;  %s8405_s16 = sld [smem:[#allocation49_spill]]  ;;  %s8414_s27 = sld [smem:[#allocation54_spill]] }
 0x105   : > { %v6745_v8 = vld [vmem:[%s6700_s26 + $0x40] sm:$0xff]  ;;  %v6748_v9 = vld [vmem:[%s6700_s26 + $0x48] sm:$0xff]  ;;  %v6753_v10 = vld [vmem:[%s6700_s26 + $0x50] sm:$0xff]  ;;  %s8192_s14 = scalar_lea.vmem [#allocation16], %s6688_s6  ;;  %s8428_s6 = sld [smem:[#allocation23_spill]] }
 0x106   : > { %v6756_v11 = vld [vmem:[%s6700_s26 + $0x58] sm:$0xff]  ;;  %v6761_v12 = vld [vmem:[%s6700_s26 + $0x60] sm:$0xff]  ;;  %v6764_v13 = vld [vmem:[%s6700_s26 + $0x68] sm:$0xff]  ;;  %s4094_s8 = scalar_lea.sflag [#allocation6], %s6685_s25  ;;  %p8433_p0 = scmp.ne.s32.totalorder %s8367_s4, 0 }
 0x107   : > { %642 = vadd.xlane.f32.xlu0 %v6721_v2  ;;  %646 = vadd.xlane.f32.xlu1 %v6724_v3  ;;  %v6769_v14 = vld [vmem:[%s6700_s26 + $0x70] sm:$0xff]  ;;  %v6772_v15 = vld [vmem:[%s6700_s26 + $0x78] sm:$0xff]  ;;  %v862_v16 = vld [vmem:[#allocation10 + $0x8] sm:$0xff]  ;;  %s8410_s26 = sld [smem:[#allocation52_spill]]  ;;  %s6315_s22 = smov [#allocation16]  }
 0x108   : > { %v864_v17 = vld [vmem:[#allocation10 + $0x18] sm:$0xff]  ;;  %v861_v18 = vld [vmem:[#allocation10] sm:$0xff]  ;;  %v863_v20 = vld [vmem:[#allocation10 + $0x10] sm:$0xff]  ;;  %s6204_s28 = sshll.u32 %s6315_s22, 4  ;;  %s6205_s28 = int_to_ptr.vmem [resolvable:$false] %s6204_s28 }
 0x109   : > { %v5056_v19 = vpack.c.bf16 %v864_v17, %v862_v16  ;;  %v866_v21 = vld [vmem:[#allocation10 + $0x28] sm:$0xff]  ;;  %v868_v22 = vld [vmem:[#allocation10 + $0x38] sm:$0xff]  ;;  %v5058_v23 = vpack.c.bf16 %v863_v20, %v861_v18  ;;  %v865_v25 = vld [vmem:[#allocation10 + $0x20] sm:$0xff] }
 0x10a   : > { %v5060_v24 = vpack.c.bf16 %v868_v22, %v866_v21  ;;  %v867_v26 = vld [vmem:[#allocation10 + $0x30] sm:$0xff]  ;;  %v870_v27 = vld [vmem:[#allocation10 + $0x48] sm:$0xff]  ;;  %v872_v28 = vld [vmem:[#allocation10 + $0x58] sm:$0xff] }
 0x10b   : > { %648 = vadd.xlane.f32.xlu0 %v6729_v4  ;;  %650 = vadd.xlane.f32.xlu1 %v6732_v5  ;;  %v5062_v29 = vpack.c.bf16 %v867_v26, %v865_v25  ;;  %v5064_v30 = vpack.c.bf16 %v872_v28, %v870_v27  ;;  %v869_v31 = vld [vmem:[#allocation10 + $0x40] sm:$0xff]  ;;  %v871_v32 = vld [vmem:[#allocation10 + $0x50] sm:$0xff]  ;;  %v876_v17 = vld [vmem:[#allocation10 + $0x78] sm:$0xff] }
 0x10c   : > { %5057 = vmatprep.subr.bf16.mxu0 %v5056_v19  ;;  %v5066_v33 = vpack.c.bf16 %v871_v32, %v869_v31  ;;  %v873_v21 = vld [vmem:[#allocation10 + $0x60] sm:$0xff]  ;;  %v875_v22 = vld [vmem:[#allocation10 + $0x70] sm:$0xff]  ;;  %v880_v31 = vld [vmem:[#allocation10 + $0x98] sm:$0xff] }
 0x10d   : > { %5059 = vmatpush1.bf16.msra.mxu0 %v5058_v23  ;;  %v5070_v26 = vpack.c.bf16 %v875_v22, %v873_v21  ;;  %v1104_v22 = vld [vmem:[#allocation9 + $0x10] sm:$0xff]  ;;  %vm6978_vm1 = vmpackc.low %vm1295_vm0, %vm1295_vm0 }
 0x10e   : > { %5061 = vmatprep.subr.bf16.mxu0 %v5060_v24 }
 0x10f   : > { %652 = vadd.xlane.f32.xlu0 %v6737_v6  ;;  %654 = vadd.xlane.f32.xlu1 %v6740_v7 }
 0x111   : > { %5063 = vmatpush1.bf16.msra.mxu0 %v5062_v29 }
 0x112   : > { %5065 = vmatprep.subr.bf16.mxu0 %v5064_v30  ;;  %v878_v30 = vld [vmem:[#allocation10 + $0x88] sm:$0xff] }
 0x113   : > { %656 = vadd.xlane.f32.xlu0 %v6745_v8  ;;  %658 = vadd.xlane.f32.xlu1 %v6748_v9 }
 0x115   : > { %5067 = vmatpush1.bf16.msra.mxu0 %v5066_v33 }
 0x117   : > { %660 = vadd.xlane.f32.xlu0 %v6753_v10  ;;  %662 = vadd.xlane.f32.xlu1 %v6756_v11 }
 0x11b   : > { %664 = vadd.xlane.f32.xlu0 %v6761_v12  ;;  %666 = vadd.xlane.f32.xlu1 %v6764_v13 }
 0x11f   : > { %668 = vadd.xlane.f32.xlu0 %v6769_v14  ;;  %670 = vadd.xlane.f32.xlu1 %v6772_v15 }
 0x190   : > { %v641_v34 = vpop.xlane.xlu0 %640  ;;  %v645_v35 = vpop.xlane.xlu1 %644 }
 0x191   : > { %v673_v36 = vmul.f32 0.0078125, %v641_v34  ;;  %v675_v37 = vmul.f32 0.0078125, %v645_v35  ;;  %v877_v35 = vld [vmem:[#allocation10 + $0x80] sm:$0xff] }
 0x193   : > { %v6776_v38 = vsub.f32 %v622_v0, %v673_v36  ;;  %v6778_v39 = vsub.f32 %v624_v1, %v675_v37  ;;  %v879_v36 = vld [vmem:[#allocation10 + $0x90] sm:$0xff]  ;;  %v5072_v37 = vpack.c.bf16 %v880_v31, %v878_v30  ;;  %v1110_v31 = vld [vmem:[#allocation9 + $0x40] sm:$0xff] }
 0x194   : > { %v643_v40 = vpop.xlane.xlu0 %642  ;;  %v647_v41 = vpop.xlane.xlu1 %646 }
 0x195   : > { %v674_v42 = vmul.f32 0.0078125, %v643_v40  ;;  %v705_v43 = vmul.f32 %v6776_v38, %v6776_v38  ;;  %v676_v44 = vmul.f32 0.0078125, %v647_v41  ;;  %v707_v45 = vmul.f32 %v6778_v39, %v6778_v39 }
 0x196   : > { %v5074_v40 = vpack.c.bf16 %v879_v36, %v877_v35  ;;  %v1113_v35 = vld [vmem:[#allocation9 + $0x58] sm:$0xff] }
 0x197   : > { %721 = vadd.xlane.f32.xlu0 %v705_v43  ;;  %v6785_v46 = vsub.f32 %v6721_v2, %v674_v42  ;;  %v6788_v47 = vsub.f32 %v6724_v3, %v676_v44  ;;  %v882_v44 = vld [vmem:[#allocation10 + $0xa8] sm:$0xff] }
 0x198   : > { %v649_v48 = vpop.xlane.xlu0 %648  ;;  %v651_v49 = vpop.xlane.xlu1 %650 }
 0x199   : > { %v677_v50 = vmul.f32 0.0078125, %v649_v48  ;;  %v706_v51 = vmul.f32 %v6785_v46, %v6785_v46  ;;  %v678_v52 = vmul.f32 0.0078125, %v651_v49  ;;  %v708_v53 = vmul.f32 %v6788_v47, %v6788_v47 }
 0x19b   : > { %725 = vadd.xlane.f32.xlu0 %v707_v45  ;;  %723 = vadd.xlane.f32.xlu1 %v706_v51  ;;  %v6795_v54 = vsub.f32 %v6729_v4, %v677_v50  ;;  %v6798_v55 = vsub.f32 %v6732_v5, %v678_v52  ;;  %v884_v45 = vld [vmem:[#allocation10 + $0xb8] sm:$0xff]  ;;  %v881_v51 = vld [vmem:[#allocation10 + $0xa0] sm:$0xff]  ;;  %v883_v52 = vld [vmem:[#allocation10 + $0xb0] sm:$0xff] }
 0x19c   : > { %v653_v56 = vpop.xlane.xlu0 %652  ;;  %v655_v57 = vpop.xlane.xlu1 %654 }
 0x19d   : > { %v679_v58 = vmul.f32 0.0078125, %v653_v56  ;;  %v709_v59 = vmul.f32 %v6795_v54, %v6795_v54  ;;  %v680_v60 = vmul.f32 0.0078125, %v655_v57  ;;  %v710_v61 = vmul.f32 %v6798_v55, %v6798_v55 }
 0x19e   : > { %v5078_v56 = vpack.c.bf16 %v883_v52, %v881_v51  ;;  %v1090_v51 = vld [vmem:[%s6692_s5 + $0x20] sm:$0xff]  ;;  %v1091_v52 = vld [vmem:[%s6692_s5 + $0x28] sm:$0xff] }
 0x19f   : > { %727 = vadd.xlane.f32.xlu1 %v708_v53  ;;  %729 = vadd.xlane.f32.xlu0 %v709_v59  ;;  %v6805_v62 = vsub.f32 %v6737_v6, %v679_v58  ;;  %v6808_v63 = vsub.f32 %v6740_v7, %v680_v60  ;;  %v874_v7 = vld [vmem:[#allocation10 + $0x68] sm:$0xff]  ;;  %v5076_v53 = vpack.c.bf16 %v884_v45, %v882_v44  ;;  %v888_v59 = vld [vmem:[#allocation10 + $0xd8] sm:$0xff]  ;;  %v1086_v44 = vld [vmem:[%s6692_s5] sm:$0xff] }
 0x1a0   : > { %v657_v0 = vpop.xlane.xlu0 %656  ;;  %v659_v1 = vpop.xlane.xlu1 %658  ;;  %v5068_v20 = vpack.c.bf16 %v876_v17, %v874_v7  ;;  %v886_v58 = vld [vmem:[#allocation10 + $0xc8] sm:$0xff]  ;;  %v891_v7 = vld [vmem:[#allocation10 + $0xf0] sm:$0xff]  ;;  %4752 = vmatprep.mubr.f32.mxu1 %v1086_v44 }
 0x1a1   : > { %v681_v2 = vmul.f32 0.0078125, %v657_v0  ;;  %v711_v3 = vmul.f32 %v6805_v62, %v6805_v62  ;;  %v682_v4 = vmul.f32 0.0078125, %v659_v1  ;;  %v712_v5 = vmul.f32 %v6808_v63, %v6808_v63  ;;  %v885_v0 = vld [vmem:[#allocation10 + $0xc0] sm:$0xff]  ;;  %v887_v1 = vld [vmem:[#allocation10 + $0xd0] sm:$0xff] }
 0x1a2   : > { %5069 = vmatprep.subr.bf16.mxu0 %v5068_v20  ;;  %v1103_v20 = vld [vmem:[#allocation9 + $0x8] sm:$0xff] }
 0x1a3   : > { %731 = vadd.xlane.f32.xlu1 %v710_v61  ;;  %733 = vadd.xlane.f32.xlu0 %v711_v3  ;;  %v6815_v16 = vsub.f32 %v6745_v8, %v681_v2  ;;  %v6818_v6 = vsub.f32 %v6748_v9, %v682_v4  ;;  %v5080_v61 = vpack.c.bf16 %v888_v59, %v886_v58  ;;  %v890_v3 = vld [vmem:[#allocation10 + $0xe8] sm:$0xff]  ;;  %v1096_v59 = vld [vmem:[%s6692_s5 + $0x50] sm:$0xff] }
 0x1a4   : > { %v661_v18 = vpop.xlane.xlu0 %660  ;;  %v663_v19 = vpop.xlane.xlu1 %662  ;;  %5071 = vmatpush1.bf16.msra.mxu0 %v5070_v26  ;;  %v5082_v2 = vpack.c.bf16 %v887_v1, %v885_v0  ;;  %v1107_v26 = vld [vmem:[#allocation9 + $0x28] sm:$0xff]  ;;  %v1100_v1 = vld [vmem:[%s6692_s5 + $0x70] sm:$0xff] }
 0x1a5   : > { %v683_v23 = vmul.f32 0.0078125, %v661_v18  ;;  %v713_v24 = vmul.f32 %v6815_v16, %v6815_v16  ;;  %v684_v25 = vmul.f32 0.0078125, %v663_v19  ;;  %v714_v8 = vmul.f32 %v6818_v6, %v6818_v6  ;;  %5073 = vmatprep.subr.bf16.mxu0 %v5072_v37  ;;  %v1102_v19 = vld [vmem:[#allocation9] sm:$0xff]  ;;  %v1095_v58 = vld [vmem:[%s6692_s5 + $0x48] sm:$0xff] }
 0x1a6   : > { %v8319_v18 = vmov 0.0   ;;  %v5088_v21 = vpack.c.bf16 %v1103_v20, %v1102_v19  ;;  %v1114_v37 = vld [vmem:[#allocation9 + $0x60] sm:$0xff]  ;;  %v1099_v0 = vld [vmem:[%s6692_s5 + $0x68] sm:$0xff] }
 0x1a7   : > { %735 = vadd.xlane.f32.xlu1 %v712_v5  ;;  %737 = vadd.xlane.f32.xlu0 %v713_v24  ;;  %v6825_v9 = vsub.f32 %v6753_v10, %v683_v23  ;;  %v6828_v27 = vsub.f32 %v6756_v11, %v684_v25  ;;  %v889_v5 = vld [vmem:[#allocation10 + $0xe0] sm:$0xff]  ;;  %v1105_v23 = vld [vmem:[#allocation9 + $0x18] sm:$0xff] }
 0x1a8   : > { %v665_v28 = vpop.xlane.xlu0 %664  ;;  %v667_v29 = vpop.xlane.xlu1 %666  ;;  %5075 = vmatpush1.bf16.msra.mxu0 %v5074_v40  ;;  %v5086_v17 = vpack.c.bf16 %v891_v7, %v889_v5  ;;  %957 = vmatprep.mubr.f32.mxu0 %v8319_v18  ;;  %v5092_v24 = vpack.c.bf16 %v1105_v23, %v1104_v22  ;;  %v1106_v25 = vld [vmem:[#allocation9 + $0x20] sm:$0xff]  ;;  %v1115_v40 = vld [vmem:[#allocation9 + $0x68] sm:$0xff] }
 0x1a9   : > { %v685_v32 = vmul.f32 0.0078125, %v665_v28  ;;  %v715_v33 = vmul.f32 %v6825_v9, %v6825_v9  ;;  %v686_v34 = vmul.f32 0.0078125, %v667_v29  ;;  %v716_v10 = vmul.f32 %v6828_v27, %v6828_v27  ;;  %5077 = vmatprep.subr.bf16.mxu0 %v5076_v53  ;;  %5089 = vmatprep.subr.bf16.mxu1 %v5088_v21  ;;  %v1108_v28 = vld [vmem:[#allocation9 + $0x30] sm:$0xff]  ;;  %v1109_v29 = vld [vmem:[#allocation9 + $0x38] sm:$0xff] }
 0x1aa   : > { %5091 = vmatpush3.bf16.msra.mxu1 %v5088_v21  ;;  %v5100_v30 = vpack.c.bf16 %v1109_v29, %v1108_v28  ;;  %v1092_v53 = vld [vmem:[%s6692_s5 + $0x30] sm:$0xff] }
 0x1ab   : > { %739 = vadd.xlane.f32.xlu1 %v714_v8  ;;  %741 = vadd.xlane.f32.xlu0 %v715_v33  ;;  %v6835_v11 = vsub.f32 %v6761_v12, %v685_v32  ;;  %v6838_v41 = vsub.f32 %v6764_v13, %v686_v34  ;;  %v5096_v8 = vpack.c.bf16 %v1107_v26, %v1106_v25  ;;  %v1111_v32 = vld [vmem:[#allocation9 + $0x48] sm:$0xff]  ;;  %v1112_v34 = vld [vmem:[#allocation9 + $0x50] sm:$0xff] }
 0x1ac   : > { %v669_v42 = vpop.xlane.xlu0 %668  ;;  %v671_v43 = vpop.xlane.xlu1 %670  ;;  %5079 = vmatpush1.bf16.msra.mxu0 %v5078_v56  ;;  %5093 = vmatprep.subr.bf16.mxu1 %v5092_v24  ;;  %v5104_v33 = vpack.c.bf16 %v1111_v32, %v1110_v31  ;;  %v5108_v36 = vpack.c.bf16 %v1113_v35, %v1112_v34  ;;  %v1093_v56 = vld [vmem:[%s6692_s5 + $0x38] sm:$0xff] }
 0x1ad   : > { %v687_v48 = vmul.f32 0.0078125, %v669_v42  ;;  %v717_v49 = vmul.f32 %v6835_v11, %v6835_v11  ;;  %v688_v50 = vmul.f32 0.0078125, %v671_v43  ;;  %v718_v12 = vmul.f32 %v6838_v41, %v6838_v41  ;;  %5081 = vmatprep.subr.bf16.mxu0 %v5080_v61  ;;  %v1116_v42 = vld [vmem:[#allocation9 + $0x70] sm:$0xff]  ;;  %v1117_v43 = vld [vmem:[#allocation9 + $0x78] sm:$0xff]  ;;  %v1098_v61 = vld [vmem:[%s6692_s5 + $0x60] sm:$0xff] }
 0x1ae   : > { %5095 = vmatpush3.bf16.msra.mxu1 %v5092_v24  ;;  %v5116_v45 = vpack.c.bf16 %v1117_v43, %v1116_v42 }
 0x1af   : > { %743 = vadd.xlane.f32.xlu1 %v716_v10  ;;  %745 = vadd.xlane.f32.xlu0 %v717_v49  ;;  %v6845_v13 = vsub.f32 %v6769_v14, %v687_v48  ;;  %v6848_v57 = vsub.f32 %v6772_v15, %v688_v50  ;;  %v892_v15 = vld [vmem:[#allocation10 + $0xf8] sm:$0xff]  ;;  %v5112_v10 = vpack.c.bf16 %v1115_v40, %v1114_v37  ;;  %v1087_v48 = vld [vmem:[%s6692_s5 + $0x8] sm:$0xff]  ;;  %v1088_v49 = vld [vmem:[%s6692_s5 + $0x10] sm:$0xff] }
 0x1b0   : > { %5083 = vmatpush1.bf16.msra.mxu0 %v5082_v2  ;;  %v5084_v4 = vpack.c.bf16 %v892_v15, %v890_v3  ;;  %5097 = vmatprep.subr.bf16.mxu1 %v5096_v8  ;;  %v1089_v50 = vld [vmem:[%s6692_s5 + $0x18] sm:$0xff] }
 0x1b1   : > { %v719_v60 = vmul.f32 %v6845_v13, %v6845_v13  ;;  %v720_v14 = vmul.f32 %v6848_v57, %v6848_v57  ;;  %v1101_v2 = vld [vmem:[%s6692_s5 + $0x78] sm:$0xff] }
 0x1b2   : > { %5085 = vmatprep.subr.bf16.mxu0 %v5084_v4  ;;  %5099 = vmatpush3.bf16.msra.mxu1 %v5096_v8 }
 0x1b3   : > { %747 = vadd.xlane.f32.xlu1 %v718_v12  ;;  %749 = vadd.xlane.f32.xlu0 %v719_v60  ;;  %v1094_v12 = vld [vmem:[%s6692_s5 + $0x40] sm:$0xff]  ;;  %v1097_v60 = vld [vmem:[%s6692_s5 + $0x58] sm:$0xff] }
 0x1b4   : > { %5087 = vmatpush1.bf16.msra.mxu0 %v5086_v17  ;;  %5101 = vmatprep.subr.bf16.mxu1 %v5100_v30 }
 0x1b6   : > { %5103 = vmatpush3.bf16.msra.mxu1 %v5100_v30 }
 0x1b7   : > { %751 = vadd.xlane.f32.xlu1 %v720_v14  ;;  %5105 = vmatprep.subr.bf16.mxu1 %v5104_v33 }
 0x1ba   : > { %5107 = vmatpush3.bf16.msra.mxu1 %v5104_v33  ;;  %v6874_v33 = vld [vmem:[%s8297_s2] ss:$0 sm:$0xff] }
 0x1bb   : > { %5109 = vmatprep.subr.bf16.mxu1 %v5108_v36 }
 0x1be   : > { %5111 = vmatpush3.bf16.msra.mxu1 %v5108_v36  ;;  %v6880_v36 = vld [vmem:[%s8377_s3] ss:$0 sm:$0xff]  ;;  %s4367_s3 = sshll.u32 %s8428_s6, 11 }
 0x1bf   : > { %5113 = vmatprep.subr.bf16.mxu1 %v5112_v10 }
 0x1c2   : > { %5115 = vmatpush3.bf16.msra.mxu1 %v5112_v10 }
 0x1c3   : > { %5117 = vmatprep.subr.bf16.mxu1 %v5116_v45 }
 0x1c6   : > { %5119 = vmatpush3.bf16.msra.mxu1 %v5116_v45 }
 0x1c9   : > { %4753 = vmatmul.mubr.f32.vlgmr.msra.gmra.mrb[0].mxu1 %v1087_v48 }
 0x1ca   : > { %4755 = vmatprep.mubr.f32.mxu1 %v1088_v49 }
 0x1cd   : > { %4756 = vmatmul.mubr.f32.gmra.mrb[2].mxu1 %v1089_v50 }
 0x1ce   : > { %4758 = vmatprep.mubr.f32.mxu1 %v1090_v51 }
 0x1d1   : > { %4759 = vmatmul.mubr.f32.gmra.mrb[4].mxu1 %v1091_v52 }
 0x1d2   : > { %4761 = vmatprep.mubr.f32.mxu1 %v1092_v53 }
 0x1d5   : > { %4762 = vmatmul.mubr.f32.gmra.mrb[6].mxu1 %v1093_v56 }
 0x1d6   : > { %4764 = vmatprep.mubr.f32.mxu1 %v1094_v12 }
 0x1d9   : > { %4765 = vmatmul.mubr.f32.gmra.mrb[8].mxu1 %v1095_v58 }
 0x1da   : > { %4767 = vmatprep.mubr.f32.mxu1 %v1096_v59 }
 0x1dd   : > { %4768 = vmatmul.mubr.f32.gmra.mrb[10].mxu1 %v1097_v60 }
 0x1de   : > { %4770 = vmatprep.mubr.f32.mxu1 %v1098_v61 }
 0x1e1   : > { %4771 = vmatmul.mubr.f32.gmra.mrb[12].mxu1 %v1099_v0 }
 0x1e2   : > { %4773 = vmatprep.mubr.f32.mxu1 %v1100_v1 }
 0x1e5   : > { %4774 = vmatmul.mubr.f32.gmra.mrb[14].mxu1 %v1101_v2 }
 0x224   : > { %v722_v14 = vpop.xlane.xlu0 %721 }
 0x225   : > { %v753_v3 = vmul.f32 0.0078125, %v722_v14 }
 0x227   : > { %v769_v15 = vadd.f32 1e-05, %v753_v3 }
 0x228   : > { %v724_v4 = vpop.xlane.xlu1 %723  ;;  %v726_v5 = vpop.xlane.xlu0 %725 }
 0x229   : > { %5664 = vrsqrt.f32 %v769_v15  ;;  %v754_v7 = vmul.f32 0.0078125, %v724_v4  ;;  %v755_v17 = vmul.f32 0.0078125, %v726_v5 }
 0x22b   : > { %v770_v19 = vadd.f32 1e-05, %v754_v7  ;;  %v771_v20 = vadd.f32 1e-05, %v755_v17 }
 0x22c   : > { %v728_v21 = vpop.xlane.xlu1 %727  ;;  %v730_v22 = vpop.xlane.xlu0 %729 }
 0x22d   : > { %5666 = vrsqrt.f32 %v770_v19  ;;  %v756_v23 = vmul.f32 0.0078125, %v728_v21  ;;  %v757_v24 = vmul.f32 0.0078125, %v730_v22 }
 0x22e   : > { %5668 = vrsqrt.f32 %v771_v20 }
 0x22f   : > { %v772_v25 = vadd.f32 1e-05, %v756_v23  ;;  %v773_v26 = vadd.f32 1e-05, %v757_v24 }
 0x230   : > { %v732_v8 = vpop.xlane.xlu1 %731  ;;  %v734_v28 = vpop.xlane.xlu0 %733 }
 0x231   : > { %5670 = vrsqrt.f32 %v772_v25  ;;  %v758_v29 = vmul.f32 0.0078125, %v732_v8  ;;  %v759_v32 = vmul.f32 0.0078125, %v734_v28 }
 0x232   : > { %5672 = vrsqrt.f32 %v773_v26 }
 0x233   : > { %v5665_v30 = vpop.eup %5664  ;;  %v774_v31 = vadd.f32 1e-05, %v758_v29  ;;  %v775_v10 = vadd.f32 1e-05, %v759_v32 }
 0x234   : > { %v736_v34 = vpop.xlane.xlu1 %735  ;;  %v801_v35 = vmul.f32 %v5665_v30, %v6776_v38  ;;  %v738_v44 = vpop.xlane.xlu0 %737 }
 0x235   : > { %5674 = vrsqrt.f32 %v774_v31  ;;  %v760_v42 = vmul.f32 0.0078125, %v736_v34  ;;  %v761_v52 = vmul.f32 0.0078125, %v738_v44 }
 0x236   : > { %v823_v37 = vmul.f32 %v6874_v33, %v801_v35  ;;  %5676 = vrsqrt.f32 %v775_v10 }
 0x237   : > { %v5667_v40 = vpop.eup %5666  ;;  %v776_v51 = vadd.f32 1e-05, %v760_v42 }
 0x238   : > { %v5669_v43 = vpop.eup %5668  ;;  %v845_v45 = vadd.f32 %v6880_v36, %v823_v37  ;;  %v802_v48 = vmul.f32 %v5667_v40, %v6785_v46  ;;  %v740_v53 = vpop.xlane.xlu1 %739 }
 0x239   : > { %v803_v49 = vmul.f32 %v5669_v43, %v6778_v39  ;;  %5678 = vrsqrt.f32 %v776_v51  ;;  %v777_v39 = vadd.f32 1e-05, %v761_v52  ;;  %v762_v46 = vmul.f32 0.0078125, %v740_v53  ;;  %v742_v60 = vpop.xlane.xlu0 %741 }
 0x23a   : > { %958 = vmatmul.mubr.f32.vlgmr.msra.gmra.mrb[0].mxu0 %v845_v45  ;;  %v824_v38 = vmul.f32 %v6874_v33, %v802_v48  ;;  %v763_v3 = vmul.f32 0.0078125, %v742_v60 }
 0x23b   : > { %v5671_v50 = vpop.eup %5670  ;;  %963 = vmatprep.mubr.f32.mxu0 %v8319_v18  ;;  %v825_v12 = vmul.f32 %v6874_v33, %v803_v49  ;;  %5680 = vrsqrt.f32 %v777_v39  ;;  %v778_v14 = vadd.f32 1e-05, %v762_v46 }
 0x23c   : > { %v846_v56 = vadd.f32 %v6880_v36, %v824_v38  ;;  %v804_v58 = vmul.f32 %v5671_v50, %v6788_v47  ;;  %v5673_v59 = vpop.eup %5672  ;;  %v744_v47 = vpop.xlane.xlu1 %743  ;;  %v779_v17 = vadd.f32 1e-05, %v763_v3 }
 0x23d   : > { %v847_v61 = vadd.f32 %v6880_v36, %v825_v12  ;;  %v805_v1 = vmul.f32 %v5673_v59, %v6795_v54  ;;  %5682 = vrsqrt.f32 %v778_v14  ;;  %v764_v19 = vmul.f32 0.0078125, %v744_v47  ;;  %v746_v54 = vpop.xlane.xlu0 %745 }
 0x23e   : > { %964 = vmatmul.mubr.f32.gmra.mrb[2].mxu0 %v846_v56  ;;  %v826_v0 = vmul.f32 %v6874_v33, %v804_v58  ;;  %5684 = vrsqrt.f32 %v779_v17  ;;  %v765_v25 = vmul.f32 0.0078125, %v746_v54 }
 0x23f   : > { %969 = vmatprep.mubr.f32.mxu0 %v8319_v18  ;;  %v5675_v2 = vpop.eup %5674  ;;  %v827_v4 = vmul.f32 %v6874_v33, %v805_v1  ;;  %v780_v24 = vadd.f32 1e-05, %v764_v19 }
 0x240   : > { %v848_v15 = vadd.f32 %v6880_v36, %v826_v0  ;;  %v806_v5 = vmul.f32 %v5675_v2, %v6798_v55  ;;  %v5677_v7 = vpop.eup %5676  ;;  %v748_v55 = vpop.xlane.xlu1 %747  ;;  %v781_v30 = vadd.f32 1e-05, %v765_v25 }
 0x241   : > { %v849_v20 = vadd.f32 %v6880_v36, %v827_v4  ;;  %v807_v22 = vmul.f32 %v5677_v7, %v6805_v62  ;;  %5686 = vrsqrt.f32 %v780_v24  ;;  %v766_v31 = vmul.f32 0.0078125, %v748_v55  ;;  %v750_v62 = vpop.xlane.xlu0 %749 }
 0x242   : > { %970 = vmatmul.mubr.f32.gmra.mrb[4].mxu0 %v847_v61  ;;  %v828_v21 = vmul.f32 %v6874_v33, %v806_v5  ;;  %5688 = vrsqrt.f32 %v781_v30  ;;  %v767_v10 = vmul.f32 0.0078125, %v750_v62 }
 0x243   : > { %975 = vmatprep.mubr.f32.mxu0 %v8319_v18  ;;  %v5679_v23 = vpop.eup %5678  ;;  %v829_v8 = vmul.f32 %v6874_v33, %v807_v22  ;;  %v782_v40 = vadd.f32 1e-05, %v766_v31 }
 0x244   : > { %v850_v26 = vadd.f32 %v6880_v36, %v828_v21  ;;  %v808_v28 = vmul.f32 %v5679_v23, %v6808_v63  ;;  %v752_v63 = vpop.xlane.xlu1 %751  ;;  %v783_v48 = vadd.f32 1e-05, %v767_v10 }
 0x245   : > { %v5681_v29 = vpop.eup %5680  ;;  %v851_v32 = vadd.f32 %v6880_v36, %v829_v8  ;;  %5690 = vrsqrt.f32 %v782_v40  ;;  %v768_v49 = vmul.f32 0.0078125, %v752_v63 }
 0x246   : > { %976 = vmatmul.mubr.f32.gmra.mrb[6].mxu0 %v848_v15  ;;  %v830_v34 = vmul.f32 %v6874_v33, %v808_v28  ;;  %v809_v35 = vmul.f32 %v5681_v29, %v6815_v16  ;;  %5692 = vrsqrt.f32 %v783_v48 }
 0x247   : > { %981 = vmatprep.mubr.f32.mxu0 %v8319_v18  ;;  %v5683_v37 = vpop.eup %5682  ;;  %v784_v52 = vadd.f32 1e-05, %v768_v49 }
 0x248   : > { %v852_v42 = vadd.f32 %v6880_v36, %v830_v34  ;;  %v831_v43 = vmul.f32 %v6874_v33, %v809_v35  ;;  %v810_v44 = vmul.f32 %v5683_v37, %v6818_v6  ;;  %v5685_v45 = vpop.eup %5684 }
 0x249   : > { %v811_v50 = vmul.f32 %v5685_v45, %v6825_v9  ;;  %5694 = vrsqrt.f32 %v784_v52 }
 0x24a   : > { %982 = vmatmul.mubr.f32.gmra.mrb[8].mxu0 %v849_v20  ;;  %v853_v16 = vadd.f32 %v6880_v36, %v831_v43  ;;  %v832_v38 = vmul.f32 %v6874_v33, %v810_v44 }
 0x24b   : > { %987 = vmatprep.mubr.f32.mxu0 %v8319_v18  ;;  %v5687_v51 = vpop.eup %5686  ;;  %v833_v53 = vmul.f32 %v6874_v33, %v811_v50 }
 0x24c   : > { %v854_v6 = vadd.f32 %v6880_v36, %v832_v38  ;;  %v812_v56 = vmul.f32 %v5687_v51, %v6828_v27  ;;  %v5689_v12 = vpop.eup %5688 }
 0x24d   : > { %v855_v58 = vadd.f32 %v6880_v36, %v833_v53  ;;  %v813_v59 = vmul.f32 %v5689_v12, %v6835_v11 }
 0x24e   : > { %988 = vmatmul.mubr.f32.gmra.mrb[10].mxu0 %v850_v26  ;;  %v834_v9 = vmul.f32 %v6874_v33, %v812_v56 }
 0x24f   : > { %993 = vmatprep.mubr.f32.mxu0 %v8319_v18  ;;  %v5691_v39 = vpop.eup %5690  ;;  %v835_v60 = vmul.f32 %v6874_v33, %v813_v59 }
 0x250   : > { %v856_v46 = vadd.f32 %v6880_v36, %v834_v9  ;;  %v814_v27 = vmul.f32 %v5691_v39, %v6838_v41  ;;  %v5693_v61 = vpop.eup %5692 }
 0x251   : > { %v857_v0 = vadd.f32 %v6880_v36, %v835_v60  ;;  %v815_v11 = vmul.f32 %v5693_v61, %v6845_v13 }
 0x252   : > { %994 = vmatmul.mubr.f32.gmra.mrb[12].mxu0 %v851_v32  ;;  %v836_v1 = vmul.f32 %v6874_v33, %v814_v27 }
 0x253   : > { %999 = vmatprep.mubr.f32.mxu0 %v8319_v18  ;;  %v5695_v2 = vpop.eup %5694  ;;  %v837_v3 = vmul.f32 %v6874_v33, %v815_v11 }
 0x254   : > { %v858_v14 = vadd.f32 %v6880_v36, %v836_v1  ;;  %v816_v41 = vmul.f32 %v5695_v2, %v6848_v57 }
 0x255   : > { %v859_v47 = vadd.f32 %v6880_v36, %v837_v3 }
 0x256   : > { %1000 = vmatmul.mubr.f32.gmra.mrb[14].mxu0 %v852_v42  ;;  %v838_v15 = vmul.f32 %v6874_v33, %v816_v41 }
 0x257   : > { %1005 = vmatprep.mubr.f32.mxu0 %v8319_v18 }
 0x258   : > { %v860_v13 = vadd.f32 %v6880_v36, %v838_v15 }
 0x25a   : > { %1006 = vmatmul.mubr.f32.gmra.mrb[16].mxu0 %v853_v16 }
 0x25b   : > { %1011 = vmatprep.mubr.f32.mxu0 %v8319_v18 }
 0x25e   : > { %1012 = vmatmul.mubr.f32.gmra.mrb[18].mxu0 %v854_v6 }
 0x25f   : > { %1017 = vmatprep.mubr.f32.mxu0 %v8319_v18 }
 0x262   : > { %1018 = vmatmul.mubr.f32.gmra.mrb[20].mxu0 %v855_v58 }
 0x263   : > { %1023 = vmatprep.mubr.f32.mxu0 %v8319_v18 }
 0x266   : > { %1024 = vmatmul.mubr.f32.gmra.mrb[22].mxu0 %v856_v46 }
 0x267   : > { %1029 = vmatprep.mubr.f32.mxu0 %v8319_v18 }
 0x26a   : > { %1030 = vmatmul.mubr.f32.gmra.mrb[24].mxu0 %v857_v0 }
 0x26b   : > { %1035 = vmatprep.mubr.f32.mxu0 %v8319_v18 }
 0x26e   : > { %1036 = vmatmul.mubr.f32.gmra.mrb[26].mxu0 %v858_v14 }
 0x26f   : > { %1041 = vmatprep.mubr.f32.mxu0 %v8319_v18 }
 0x272   : > { %1042 = vmatmul.mubr.f32.gmra.mrb[28].mxu0 %v859_v47 }
 0x273   : > { %1047 = vmatprep.mubr.f32.mxu0 %v8319_v18 }
 0x276   : > { %1048 = vmatmul.mubr.f32.gmra.mrb[30].mxu0 %v860_v13 }
 0x29c   : > { %v6944_v4 = vpop.f32.mrb[0].mxu1 }
 0x29d   : > { %v6946_v5 = vpop.f32.mrb[1].mxu1 }
 0x29e   : > { %4808 = vmatprep.mubr.msk.f32.mxu0 %vm1295_vm0, %v6946_v5 }
 0x2a0   : > { %v6950_v57 = vpop.f32.mrb[2].mxu1 }
 0x2a1   : > { %v6952_v7 = vpop.f32.mrb[3].mxu1 }
 0x2a4   : > { %v6954_v17 = vpop.f32.mrb[4].mxu1 }
 0x2a5   : > { %v6956_v33 = vpop.f32.mrb[5].mxu1 }
 0x2a8   : > { %v6958_v19 = vpop.f32.mrb[6].mxu1 }
 0x2a9   : > { %v6960_v36 = vpop.f32.mrb[7].mxu1 }
 0x2ac   : > { %v6962_v54 = vpop.f32.mrb[8].mxu1 }
 0x2ad   : > { %v6964_v20 = vpop.f32.mrb[9].mxu1 }
 0x2b0   : > { %v6966_v21 = vpop.f32.mrb[10].mxu1 }
 0x2b1   : > { %v6968_v22 = vpop.f32.mrb[11].mxu1 }
 0x2b4   : > { %v6970_v23 = vpop.f32.mrb[12].mxu1 }
 0x2b5   : > { %v6972_v24 = vpop.f32.mrb[13].mxu1 }
 0x2b8   : > { %v6995_v37 = vpop.f32.mrb[14].mxu1 }
 0x2b9   : > { %v6999_v42 = vpop.f32.mrb[15].mxu1 }
 0x30d   : > { %v959_v25 = vpop.f32.mrb[0].mxu0 }
 0x30e   : > { %v6974_v55 = vpop.f32.mrb[1].mxu0 }
 0x311   : > { %v965_v26 = vpop.f32.mrb[2].mxu0 }
 0x312   : > { %v5584_v28 = vpack.i.bf16 %v965_v26, %v959_v25  ;;  %v5120_v29 = vpack.c.bf16 %v965_v26, %v959_v25  ;;  %v6982_v30 = vpop.f32.mrb[3].mxu0 }
 0x313   : > { %v5168_v62 = vpack.c.bf16 %v6982_v30, %v6974_v55 }
 0x314   : > { %5585 = vrot.lane.b32.xlu0 %v5584_v28, %s6314_s24  ;;  %5122 = vmatprep.subr.msk.bf16.mxu0 %vm6978_vm1, %v5120_v29 }
 0x315   : > { %v971_v32 = vpop.f32.mrb[4].mxu0  ;;  %5125 = vmatpush3.bf16.xpose.msk.msra.mxu0 %vm6978_vm1, %v5120_v29  ;;  %5169 = vmatprep.subr.bf16.mxu1 %v5168_v62 }
 0x316   : > { %v6993_v34 = vpop.f32.mrb[5].mxu0  ;;  %5171 = vmatpush3.bf16.msra.mxu1 %v5168_v62 }
 0x319   : > { %v977_v35 = vpop.f32.mrb[6].mxu0 }
 0x31a   : > { %v5589_v40 = vpack.i.bf16 %v977_v35, %v971_v32  ;;  %v5126_v10 = vpack.c.bf16 %v977_v35, %v971_v32  ;;  %v6997_v63 = vpop.f32.mrb[7].mxu0 }
 0x31b   : > { %v5172_v44 = vpack.c.bf16 %v6997_v63, %v6993_v34 }
 0x31c   : > { %5590 = vrot.lane.b32.xlu1 %v5589_v40, %s6314_s24  ;;  %5128 = vmatprep.subr.msk.bf16.mxu0 %vm6978_vm1, %v5126_v10 }
 0x31d   : > { %v983_v45 = vpop.f32.mrb[8].mxu0  ;;  %5131 = vmatpush3.bf16.xpose.msk.msra.mxu0 %vm6978_vm1, %v5126_v10  ;;  %5173 = vmatprep.subr.bf16.mxu1 %v5172_v44 }
 0x31e   : > { %v7010_v48 = vpop.f32.mrb[9].mxu0  ;;  %5175 = vmatpush3.bf16.msra.mxu1 %v5172_v44 }
 0x321   : > { %v989_v49 = vpop.f32.mrb[10].mxu0 }
 0x322   : > { %v5594_v16 = vpack.i.bf16 %v989_v49, %v983_v45  ;;  %v5132_v38 = vpack.c.bf16 %v989_v49, %v983_v45  ;;  %v7012_v50 = vpop.f32.mrb[11].mxu0 }
 0x323   : > { %v5176_v52 = vpack.c.bf16 %v7012_v50, %v7010_v48 }
 0x324   : > { %5595 = vrot.lane.b32.xlu1 %v5594_v16, %s6314_s24  ;;  %5134 = vmatprep.subr.msk.bf16.mxu0 %vm6978_vm1, %v5132_v38 }
 0x325   : > { %v7021_v6 = vpop.f32.mrb[12].mxu0  ;;  %5137 = vmatpush3.bf16.xpose.msk.msra.mxu0 %vm6978_vm1, %v5132_v38  ;;  %5177 = vmatprep.subr.bf16.mxu1 %v5176_v52 }
 0x326   : > { %v7025_v53 = vpop.f32.mrb[13].mxu0  ;;  %5179 = vmatpush3.bf16.msra.mxu1 %v5176_v52 }
 0x329   : > { %v7027_v56 = vpop.f32.mrb[14].mxu0 }
 0x32a   : > { %v5599_v12 = vpack.i.bf16 %v7027_v56, %v7021_v6  ;;  %v5138_v58 = vpack.c.bf16 %v7027_v56, %v7021_v6  ;;  %v7033_v9 = vpop.f32.mrb[15].mxu0 }
 0x32b   : > { %v5639_v59 = vpack.i.bf16 %v7033_v9, %v7025_v53  ;;  %v5180_v39 = vpack.c.bf16 %v7033_v9, %v7025_v53 }
 0x32c   : > { %5140 = vmatprep.subr.msk.bf16.mxu0 %vm6978_vm1, %v5138_v58 }
 0x32d   : > { %v7041_v46 = vpop.f32.mrb[16].mxu0  ;;  %5143 = vmatpush3.bf16.xpose.msk.msra.mxu0 %vm6978_vm1, %v5138_v58  ;;  %5181 = vmatprep.subr.bf16.mxu1 %v5180_v39 }
 0x32e   : > { %v7045_v60 = vpop.f32.mrb[17].mxu0  ;;  %5183 = vmatpush3.bf16.msra.mxu1 %v5180_v39 }
 0x331   : > { %v7047_v27 = vpop.f32.mrb[18].mxu0 }
 0x332   : > { %v5604_v61 = vpack.i.bf16 %v7047_v27, %v7041_v46  ;;  %v5144_v0 = vpack.c.bf16 %v7047_v27, %v7041_v46  ;;  %v7053_v1 = vpop.f32.mrb[19].mxu0 }
 0x333   : > { %v5184_v2 = vpack.c.bf16 %v7053_v1, %v7045_v60 }
 0x334   : > { %5146 = vmatprep.subr.msk.bf16.mxu0 %vm6978_vm1, %v5144_v0 }
 0x335   : > { %v7061_v14 = vpop.f32.mrb[20].mxu0  ;;  %5149 = vmatpush3.bf16.xpose.msk.msra.mxu0 %vm6978_vm1, %v5144_v0  ;;  %5185 = vmatprep.subr.bf16.mxu1 %v5184_v2 }
 0x336   : > { %v7065_v3 = vpop.f32.mrb[21].mxu0  ;;  %5187 = vmatpush3.bf16.msra.mxu1 %v5184_v2 }
 0x339   : > { %v7067_v41 = vpop.f32.mrb[22].mxu0 }
 0x33a   : > { %v5609_v47 = vpack.i.bf16 %v7067_v41, %v7061_v14  ;;  %v5150_v15 = vpack.c.bf16 %v7067_v41, %v7061_v14  ;;  %v7073_v13 = vpop.f32.mrb[23].mxu0 }
 0x33b   : > { %v5188_v26 = vpack.c.bf16 %v7073_v13, %v7065_v3 }
 0x33c   : > { %5152 = vmatprep.subr.msk.bf16.mxu0 %vm6978_vm1, %v5150_v15 }
 0x33d   : > { %v7081_v28 = vpop.f32.mrb[24].mxu0  ;;  %5155 = vmatpush3.bf16.xpose.msk.msra.mxu0 %vm6978_vm1, %v5150_v15  ;;  %5189 = vmatprep.subr.bf16.mxu1 %v5188_v26 }
 0x33e   : > { %v7085_v29 = vpop.f32.mrb[25].mxu0  ;;  %5191 = vmatpush3.bf16.msra.mxu1 %v5188_v26 }
 0x341   : > { %v7087_v62 = vpop.f32.mrb[26].mxu0 }
 0x342   : > { %v5614_v32 = vpack.i.bf16 %v7087_v62, %v7081_v28  ;;  %v5156_v35 = vpack.c.bf16 %v7087_v62, %v7081_v28  ;;  %v7093_v40 = vpop.f32.mrb[27].mxu0 }
 0x343   : > { %v5192_v44 = vpack.c.bf16 %v7093_v40, %v7085_v29 }
 0x344   : > { %5158 = vmatprep.subr.msk.bf16.mxu0 %vm6978_vm1, %v5156_v35 }
 0x345   : > { %v7101_v45 = vpop.f32.mrb[28].mxu0  ;;  %5161 = vmatpush3.bf16.xpose.msk.msra.mxu0 %vm6978_vm1, %v5156_v35  ;;  %5193 = vmatprep.subr.bf16.mxu1 %v5192_v44 }
 0x346   : > { %v7105_v49 = vpop.f32.mrb[29].mxu0  ;;  %5195 = vmatpush3.bf16.msra.mxu1 %v5192_v44 }
 0x349   : > { %v7107_v16 = vpop.f32.mrb[30].mxu0 }
 0x34a   : > { %v5619_v38 = vpack.i.bf16 %v7107_v16, %v7101_v45  ;;  %v5162_v52 = vpack.c.bf16 %v7107_v16, %v7101_v45  ;;  %v7113_v58 = vpop.f32.mrb[31].mxu0 }
 0x34b   : > { %v5196_v0 = vpack.c.bf16 %v7113_v58, %v7105_v49 }
 0x34c   : > { %5164 = vmatprep.subr.msk.bf16.mxu0 %vm6978_vm1, %v5162_v52 }
 0x34d   : > { %5167 = vmatpush3.bf16.xpose.msk.msra.mxu0 %vm6978_vm1, %v5162_v52  ;;  %5197 = vmatprep.subr.bf16.mxu1 %v5196_v0 }
 0x34e   : > { %5199 = vmatpush3.bf16.msra.mxu1 %v5196_v0 }
 0x354   : > { %4809 = vmatmul.mubr.msk.f32.vlgmr.msra.gmra.mrb[32].mxu0 %vm1295_vm0, %v6944_v4 }
 0x355   : > { %4811 = vmatprep.mubr.msk.f32.mxu0 %vm1295_vm0, %v6952_v7 }
 0x358   : > { %4812 = vmatmul.mubr.msk.f32.gmra.mrb[34].mxu0 %vm1295_vm0, %v6950_v57 }
 0x359   : > { %4814 = vmatprep.mubr.msk.f32.mxu0 %vm1295_vm0, %v6956_v33 }
 0x35c   : > { %4815 = vmatmul.mubr.msk.f32.gmra.mrb[36].mxu0 %vm1295_vm0, %v6954_v17 }
 0x35d   : > { %4817 = vmatprep.mubr.msk.f32.mxu0 %vm1295_vm0, %v6960_v36 }
 0x360   : > { %4818 = vmatmul.mubr.msk.f32.gmra.mrb[38].mxu0 %vm1295_vm0, %v6958_v19 }
 0x361   : > { %4820 = vmatprep.mubr.msk.f32.mxu0 %vm1295_vm0, %v6964_v20 }
 0x364   : > { %4821 = vmatmul.mubr.msk.f32.gmra.mrb[40].mxu0 %vm1295_vm0, %v6962_v54 }
 0x365   : > { %4823 = vmatprep.mubr.msk.f32.mxu0 %vm1295_vm0, %v6968_v22 }
 0x368   : > { %4824 = vmatmul.mubr.msk.f32.gmra.mrb[42].mxu0 %vm1295_vm0, %v6966_v21 }
 0x369   : > { %4826 = vmatprep.mubr.msk.f32.mxu0 %vm1295_vm0, %v6972_v24 }
 0x36c   : > { %4827 = vmatmul.mubr.msk.f32.gmra.mrb[44].mxu0 %vm1295_vm0, %v6970_v23 }
 0x36d   : > { %4829 = vmatprep.mubr.msk.f32.mxu0 %vm1295_vm0, %v6999_v42 }
 0x370   : > { %4830 = vmatmul.mubr.msk.f32.gmra.mrb[46].mxu0 %vm1295_vm0, %v6995_v37 }
 0x386   : > { %v5586_v2 = vpop.permute.xlu0 %5585 }
 0x387   : > { %v5588_v15 = vunpack.i.h.bf16 %v5586_v2  ;;  %v5587_v26 = vunpack.i.l.bf16 %v5586_v2 }
 0x389   : > { %v7153_v35 = vpack.c.bf16 %v5588_v15, %v5587_v26 }
 0x38b   : > { %5202 = vmatprep.subr.msk.bf16.mxu1 %vm6978_vm1, %v7153_v35 }
 0x427   : > { %v4810_v44 = vpop.f32.mrb[32].mxu0 }
 0x428   : > { %1539 = vmax.xlane.f32.xlu1 %v4810_v44  ;;  %v1458_v45 = vpop.f32.mrb[33].mxu0 }
 0x429   : > { %1537 = vmax.xlane.f32.xlu0 %v1458_v45 }
 0x42b   : > { %v7158_v16 = vpop.f32.mrb[34].mxu0 }
 0x42c   : > { %v7160_v52 = vpop.f32.mrb[35].mxu0 }
 0x42f   : > { %v7162_v0 = vpop.f32.mrb[36].mxu0 }
 0x430   : > { %v7164_v39 = vpop.f32.mrb[37].mxu0 }
 0x433   : > { %v7166_v10 = vpop.f32.mrb[38].mxu0 }
 0x434   : > { %v7168_v2 = vpop.f32.mrb[39].mxu0 }
 0x437   : > { %v7170_v15 = vpop.f32.mrb[40].mxu0 }
 0x438   : > { %v7172_v26 = vpop.f32.mrb[41].mxu0 }
 0x439   : > { %5600 = vrot.lane.b32.xlu1 %v5599_v12, %s6314_s24 }
 0x43b   : > { %v7178_v18 = vpop.f32.mrb[42].mxu0 }
 0x43c   : > { %v7180_v25 = vpop.f32.mrb[43].mxu0 }
 0x43f   : > { %5605 = vrot.lane.b32.xlu0 %v5604_v61, %s6314_s24  ;;  %v7186_v11 = vpop.f32.mrb[44].mxu0 }
 0x440   : > { %v7188_v51 = vpop.f32.mrb[45].mxu0 }
 0x443   : > { %v7190_v43 = vpop.f32.mrb[46].mxu0 }
 0x444   : > { %v7192_v31 = vpop.f32.mrb[47].mxu0 }
 0x45d   : > { %1543 = vmax.xlane.f32.xlu1 %v7158_v16 }
 0x45e   : > { %1547 = vmax.xlane.f32.xlu0 %v7162_v0 }
 0x461   : > { %1541 = vmax.xlane.f32.xlu1 %v7160_v52 }
 0x462   : > { %1545 = vmax.xlane.f32.xlu0 %v7164_v39 }
 0x465   : > { %1561 = vmax.xlane.f32.xlu1 %v7188_v51 }
 0x466   : > { %1551 = vmax.xlane.f32.xlu0 %v7166_v10 }
 0x46a   : > { %1549 = vmax.xlane.f32.xlu0 %v7168_v2 }
 0x46e   : > { %1555 = vmax.xlane.f32.xlu0 %v7170_v15 }
 0x472   : > { %1553 = vmax.xlane.f32.xlu0 %v7172_v26 }
 0x476   : > { %1559 = vmax.xlane.f32.xlu0 %v7178_v18  ;;  %5610 = vrot.lane.b32.xlu1 %v5609_v47, %s6314_s24 }
 0x47a   : > { %1557 = vmax.xlane.f32.xlu0 %v7180_v25  ;;  %5615 = vrot.lane.b32.xlu1 %v5614_v32, %s6314_s24 }
 0x47e   : > { %1563 = vmax.xlane.f32.xlu0 %v7186_v11  ;;  %5620 = vrot.lane.b32.xlu1 %v5619_v38, %s6314_s24 }
 0x482   : > { %1842 = vrot.lane.b32.xlu1 %v6946_v5, %s6314_s24  ;;  %1565 = vmax.xlane.f32.xlu0 %v7192_v31  ;;  %v8380_v5 = vpack.i.bf16 %v6982_v30, %v6974_v55 }
 0x486   : > { %1846 = vrot.lane.b32.xlu1 %v6952_v7, %s6314_s24  ;;  %1567 = vmax.xlane.f32.xlu0 %v7190_v43  ;;  %v8381_v7 = vpack.i.bf16 %v6997_v63, %v6993_v34 }
 0x48a   : > { %1848 = vrot.lane.b32.xlu1 %v6950_v57, %s6314_s24 }
 0x48e   : > { %1850 = vrot.lane.b32.xlu1 %v6956_v33, %s6314_s24 }
 0x492   : > { %1852 = vrot.lane.b32.xlu1 %v6954_v17, %s6314_s24 }
 0x496   : > { %1854 = vrot.lane.b32.xlu1 %v6960_v36, %s6314_s24 }
 0x49a   : > { %1856 = vrot.lane.b32.xlu1 %v6958_v19, %s6314_s24 }
 0x49c   : > { %1844 = vrot.lane.b32.xlu0 %v6944_v4, %s6314_s24  ;;  %v5591_v4 = vpop.permute.xlu1 %5590 }
 0x49d   : > { %v5592_v55 = vunpack.i.l.bf16 %v5591_v4 }
 0x49e   : > { %1860 = vrot.lane.b32.xlu1 %v6962_v54, %s6314_s24 }
 0x4a0   : > { %1858 = vrot.lane.b32.xlu0 %v6964_v20, %s6314_s24  ;;  %v5596_v57 = vpop.permute.xlu1 %5595  ;;  %v8382_v20 = vpack.i.bf16 %v7012_v50, %v7010_v48 }
 0x4a1   : > { %v5598_v63 = vunpack.i.h.bf16 %v5596_v57 }
 0x4a2   : > { %1864 = vrot.lane.b32.xlu1 %v6966_v21, %s6314_s24 }
 0x4a4   : > { %1862 = vrot.lane.b32.xlu0 %v6968_v22, %s6314_s24  ;;  %v8383_v22 = vpack.i.bf16 %v7053_v1, %v7045_v60 }
 0x4a6   : > { %1868 = vrot.lane.b32.xlu1 %v6970_v23, %s6314_s24  ;;  %v8384_v23 = vpack.i.bf16 %v7073_v13, %v7065_v3 }
 0x4a8   : > { %1866 = vrot.lane.b32.xlu0 %v6972_v24, %s6314_s24  ;;  %v5593_v24 = vunpack.i.h.bf16 %v5591_v4 }
 0x4aa   : > { %1872 = vrot.lane.b32.xlu1 %v6995_v37, %s6314_s24  ;;  %v5206_v37 = vpack.c.bf16 %v5593_v24, %v5592_v55 }
 0x4ac   : > { %1870 = vrot.lane.b32.xlu0 %v6999_v42, %s6314_s24  ;;  %v5597_v42 = vunpack.i.l.bf16 %v5596_v57 }
 0x4ae   : > { %5640 = vrot.lane.b32.xlu1 %v5639_v59, %s6314_s24  ;;  %v5212_v48 = vpack.c.bf16 %v5598_v63, %v5597_v42 }
 0x4b0   : > { %5625 = vrot.lane.b32.xlu0 %v8380_v5, %s6314_s24 }
 0x4b4   : > { %5630 = vrot.lane.b32.xlu0 %v8381_v7, %s6314_s24 }
 0x4b5   : > { %v1540_v17 = vpop.xlane.xlu1 %1539 }
 0x4b6   : > { %v1570_v33 = vsub.f32 %v4810_v44, %v1540_v17  ;;  %v1538_v19 = vpop.xlane.xlu0 %1537 }
 0x4b7   : > { %v1569_v36 = vsub.f32 %v1458_v45, %v1538_v19 }
 0x4b8   : > { %v1587_v54 = vmul.f32 1.442695, %v1570_v33  ;;  %5635 = vrot.lane.b32.xlu0 %v8382_v20, %s6314_s24 }
 0x4b9   : > { %v1585_v21 = vmul.f32 1.442695, %v1569_v36  ;;  %v5601_v50 = vpop.permute.xlu1 %5600 }
 0x4ba   : > { %v5603_v6 = vunpack.i.h.bf16 %v5601_v50  ;;  %v5602_v53 = vunpack.i.l.bf16 %v5601_v50  ;;  %v5606_v12 = vpop.permute.xlu0 %5605 }
 0x4bb   : > { %5696 = vpow2.f32 %v1585_v21  ;;  %v5608_v9 = vunpack.i.h.bf16 %v5606_v12  ;;  %v5607_v59 = vunpack.i.l.bf16 %v5606_v12 }
 0x4bc   : > { %5698 = vpow2.f32 %v1587_v54  ;;  %5645 = vrot.lane.b32.xlu0 %v8383_v22, %s6314_s24  ;;  %v5218_v56 = vpack.c.bf16 %v5603_v6, %v5602_v53 }
 0x4bd   : > { %v5224_v46 = vpack.c.bf16 %v5608_v9, %v5607_v59 }
 0x4c0   : > { %5650 = vrot.lane.b32.xlu0 %v8384_v23, %s6314_s24 }
 0x4c5   : > { %v7273_v30 = vpop.eup %5696 }
 0x4c6   : > { %v7275_v34 = vpop.eup %5698  ;;  %4864 = vmatprep.mubr.f32.mxu1 %v7273_v30 }
 0x4c7   : > { %4865 = vmatmul.mubr.f32.vlgmr.msra.gmra.mrb[16].mxu1 %v7275_v34 }
 0x4c8   : > { %5205 = vmatpush3.bf16.xpose.msk.msra.mxu1 %vm6978_vm1, %v7153_v35 }
 0x4c9   : > { %5208 = vmatprep.subr.msk.bf16.mxu1 %vm6978_vm1, %v5206_v37 }
 0x4d0   : > { %5211 = vmatpush3.bf16.xpose.msk.msra.mxu1 %vm6978_vm1, %v5206_v37 }
 0x4d1   : > { %5214 = vmatprep.subr.msk.bf16.mxu1 %vm6978_vm1, %v5212_v48 }
 0x4d8   : > { %5217 = vmatpush3.bf16.xpose.msk.msra.mxu1 %vm6978_vm1, %v5212_v48 }
 0x4d9   : > { %5220 = vmatprep.subr.msk.bf16.mxu1 %vm6978_vm1, %v5218_v56 }
 0x4e0   : > { %5223 = vmatpush3.bf16.xpose.msk.msra.mxu1 %vm6978_vm1, %v5218_v56 }
 0x4e1   : > { %5226 = vmatprep.subr.msk.bf16.mxu1 %vm6978_vm1, %v5224_v46 }
 0x4e8   : > { %5229 = vmatpush3.bf16.xpose.msk.msra.mxu1 %vm6978_vm1, %v5224_v46 }
 0x4ea   : > { %v1544_v60 = vpop.xlane.xlu1 %1543 }
 0x4eb   : > { %v1572_v27 = vsub.f32 %v7158_v16, %v1544_v60  ;;  %v1548_v61 = vpop.xlane.xlu0 %1547 }
 0x4ec   : > { %v1574_v47 = vsub.f32 %v7162_v0, %v1548_v61 }
 0x4ed   : > { %v1591_v1 = vmul.f32 1.442695, %v1572_v27 }
 0x4ee   : > { %v1542_v14 = vpop.xlane.xlu1 %1541  ;;  %v1595_v35 = vmul.f32 1.442695, %v1574_v47 }
 0x4ef   : > { %v1571_v3 = vsub.f32 %v7160_v52, %v1542_v14  ;;  %v1546_v41 = vpop.xlane.xlu0 %1545  ;;  %5700 = vpow2.f32 %v1591_v1 }
 0x4f0   : > { %v1573_v13 = vsub.f32 %v7164_v39, %v1546_v41 }
 0x4f1   : > { %v1589_v28 = vmul.f32 1.442695, %v1571_v3 }
 0x4f2   : > { %v1593_v62 = vmul.f32 1.442695, %v1573_v13  ;;  %v1562_v32 = vpop.xlane.xlu1 %1561 }
 0x4f3   : > { %5702 = vpow2.f32 %v1589_v28  ;;  %v1552_v38 = vpop.xlane.xlu0 %1551  ;;  %v1581_v53 = vsub.f32 %v7188_v51, %v1562_v32 }
 0x4f4   : > { %5704 = vpow2.f32 %v1593_v62  ;;  %v1576_v44 = vsub.f32 %v7166_v10, %v1552_v38 }
 0x4f5   : > { %5706 = vpow2.f32 %v1595_v35  ;;  %v1609_v60 = vmul.f32 1.442695, %v1581_v53 }
 0x4f6   : > { %v5611_v45 = vpop.permute.xlu1 %5610  ;;  %v1599_v0 = vmul.f32 1.442695, %v1576_v44 }
 0x4f7   : > { %v5613_v16 = vunpack.i.h.bf16 %v5611_v45  ;;  %v5612_v4 = vunpack.i.l.bf16 %v5611_v45  ;;  %v1550_v5 = vpop.xlane.xlu0 %1549 }
 0x4f8   : > { %v1575_v52 = vsub.f32 %v7168_v2, %v1550_v5 }
 0x4f9   : > { %v5230_v57 = vpack.c.bf16 %v5613_v16, %v5612_v4  ;;  %v7306_v36 = vpop.eup %5700 }
 0x4fa   : > { %v1597_v39 = vmul.f32 1.442695, %v1575_v52  ;;  %v5616_v7 = vpop.permute.xlu1 %5615 }
 0x4fb   : > { %v5618_v17 = vunpack.i.h.bf16 %v5616_v7  ;;  %v5617_v33 = vunpack.i.l.bf16 %v5616_v7  ;;  %v1556_v19 = vpop.xlane.xlu0 %1555  ;;  %5232 = vmatprep.subr.msk.bf16.mxu1 %vm6978_vm1, %v5230_v57 }
 0x4fc   : > { %5708 = vpow2.f32 %v1597_v39  ;;  %5235 = vmatpush3.bf16.xpose.msk.msra.mxu1 %vm6978_vm1, %v5230_v57  ;;  %v1578_v54 = vsub.f32 %v7170_v15, %v1556_v19 }
 0x4fd   : > { %v7310_v10 = vpop.eup %5702  ;;  %5710 = vpow2.f32 %v1599_v0  ;;  %v5236_v2 = vpack.c.bf16 %v5618_v17, %v5617_v33 }
 0x4fe   : > { %v7313_v20 = vpop.eup %5704  ;;  %v5621_v21 = vpop.permute.xlu1 %5620  ;;  %4867 = vmatprep.mubr.f32.mxu1 %v7310_v10  ;;  %v1603_v37 = vmul.f32 1.442695, %v1578_v54 }
 0x4ff   : > { %v5623_v22 = vunpack.i.h.bf16 %v5621_v21  ;;  %v5622_v23 = vunpack.i.l.bf16 %v5621_v21  ;;  %4868 = vmatmul.mubr.f32.gmra.mrb[18].mxu1 %v7306_v36  ;;  %v1554_v24 = vpop.xlane.xlu0 %1553  ;;  %5238 = vmatprep.subr.msk.bf16.mxu1 %vm6978_vm1, %v5236_v2  ;;  %v7321_v63 = vpop.eup %5706 }
 0x500   : > { %v1577_v55 = vsub.f32 %v7172_v26, %v1554_v24  ;;  %4870 = vmatprep.mubr.f32.mxu1 %v7313_v20 }
 0x501   : > { %v5242_v48 = vpack.c.bf16 %v5623_v22, %v5622_v23 }
 0x502   : > { %v1601_v15 = vmul.f32 1.442695, %v1577_v55  ;;  %v7323_v42 = vpop.permute.xlu1 %1842 }
 0x503   : > { %4871 = vmatmul.mubr.f32.gmra.mrb[20].mxu1 %v7321_v63  ;;  %v1560_v50 = vpop.xlane.xlu0 %1559 }
 0x504   : > { %5712 = vpow2.f32 %v1601_v15  ;;  %5241 = vmatpush3.bf16.xpose.msk.msra.mxu1 %vm6978_vm1, %v5236_v2  ;;  %v1580_v6 = vsub.f32 %v7178_v18, %v1560_v50 }
 0x505   : > { %5714 = vpow2.f32 %v1603_v37  ;;  %5244 = vmatprep.subr.msk.bf16.mxu1 %vm6978_vm1, %v5242_v48 }
 0x506   : > { %v7331_v26 = vpop.eup %5708  ;;  %v1847_v56 = vpop.permute.xlu1 %1846  ;;  %v1607_v46 = vmul.f32 1.442695, %v1580_v6 }
 0x507   : > { %v7334_v12 = vpop.eup %5710  ;;  %4873 = vmatprep.mubr.f32.mxu1 %v7331_v26  ;;  %v1558_v9 = vpop.xlane.xlu0 %1557 }
 0x508   : > { %v1579_v59 = vsub.f32 %v7180_v25, %v1558_v9  ;;  %4874 = vmatmul.mubr.f32.gmra.mrb[22].mxu1 %v7334_v12 }
 0x50a   : > { %v1605_v18 = vmul.f32 1.442695, %v1579_v59  ;;  %v1849_v27 = vpop.permute.xlu1 %1848 }
 0x50b   : > { %v1564_v61 = vpop.xlane.xlu0 %1563 }
 0x50c   : > { %5716 = vpow2.f32 %v1605_v18  ;;  %v1582_v1 = vsub.f32 %v7186_v11, %v1564_v61  ;;  %5247 = vmatpush3.bf16.xpose.msk.msra.mxu1 %vm6978_vm1, %v5242_v48 }
 0x50d   : > { %5718 = vpow2.f32 %v1607_v46 }
 0x50e   : > { %v7342_v51 = vpop.eup %5712  ;;  %5720 = vpow2.f32 %v1609_v60  ;;  %v1611_v14 = vmul.f32 1.442695, %v1582_v1  ;;  %v1851_v3 = vpop.permute.xlu1 %1850 }
 0x50f   : > { %v7344_v25 = vpop.eup %5714  ;;  %4876 = vmatprep.mubr.f32.mxu1 %v7342_v51  ;;  %v1566_v41 = vpop.xlane.xlu0 %1565 }
 0x510   : > { %5722 = vpow2.f32 %v1611_v14  ;;  %v1583_v47 = vsub.f32 %v7192_v31, %v1566_v41  ;;  %4877 = vmatmul.mubr.f32.gmra.mrb[24].mxu1 %v7344_v25  ;;  %v8385_v14 = vmov 0.0  }
 0x512   : > { %v1613_v11 = vmul.f32 1.442695, %v1583_v47  ;;  %v1853_v13 = vpop.permute.xlu1 %1852 }
 0x513   : > { %v1568_v8 = vpop.xlane.xlu0 %1567 }
 0x514   : > { %5724 = vpow2.f32 %v1613_v11  ;;  %v1584_v28 = vsub.f32 %v7190_v43, %v1568_v8 }
 0x516   : > { %v7350_v62 = vpop.eup %5716  ;;  %v1615_v32 = vmul.f32 1.442695, %v1584_v28  ;;  %v1855_v38 = vpop.permute.xlu1 %1854 }
 0x517   : > { %v7352_v35 = vpop.eup %5718  ;;  %4879 = vmatprep.mubr.f32.mxu1 %v7350_v62  ;;  %v1845_v44 = vpop.permute.xlu0 %1844 }
 0x518   : > { %v7355_v45 = vpop.eup %5720  ;;  %5726 = vpow2.f32 %v1615_v32  ;;  %4880 = vmatmul.mubr.f32.gmra.mrb[26].mxu1 %v7352_v35 }
 0x519   : > { %4882 = vmatprep.mubr.f32.mxu1 %v7355_v45 }
 0x51a   : > { %v7359_v31 = vpop.eup %5722  ;;  %v1857_v16 = vpop.permute.xlu1 %1856 }
 0x51b   : > { %v1859_v43 = vpop.permute.xlu0 %1858 }
 0x51c   : > { %4883 = vmatmul.mubr.f32.gmra.mrb[28].mxu1 %v7359_v31 }
 0x51e   : > { %v7362_v4 = vpop.eup %5724  ;;  %v1861_v5 = vpop.permute.xlu1 %1860 }
 0x51f   : > { %4885 = vmatprep.mubr.f32.mxu1 %v7362_v4  ;;  %v1863_v52 = vpop.permute.xlu0 %1862 }
 0x522   : > { %v7365_v0 = vpop.eup %5726  ;;  %v1865_v57 = vpop.permute.xlu1 %1864 }
 0x523   : > { %4886 = vmatmul.mubr.f32.gmra.mrb[30].mxu1 %v7365_v0  ;;  %v1867_v39 = vpop.permute.xlu0 %1866 }
 0x524   : > { %4920 = vmatprep.mubr.msk.f32.mxu1 %vm1295_vm0, %v7323_v42 }
 0x526   : > { %v1869_v7 = vpop.permute.xlu1 %1868 }
 0x527   : > { %v1871_v17 = vpop.permute.xlu0 %1870  ;;  %4921 = vmatmul.mubr.msk.f32.vlgmr.msra.gmra.mrb[32].mxu1 %vm1295_vm0, %v1845_v44 }
 0x528   : > { %4923 = vmatprep.mubr.msk.f32.mxu1 %vm1295_vm0, %v1847_v56 }
 0x52a   : > { %v1873_v33 = vpop.permute.xlu1 %1872 }
 0x52b   : > { %v5626_v19 = vpop.permute.xlu0 %5625  ;;  %4924 = vmatmul.mubr.msk.f32.gmra.mrb[34].mxu1 %vm1295_vm0, %v1849_v27 }
 0x52c   : > { %v5628_v2 = vunpack.i.h.bf16 %v5626_v19  ;;  %v5627_v54 = vunpack.i.l.bf16 %v5626_v19  ;;  %4926 = vmatprep.mubr.msk.f32.mxu1 %vm1295_vm0, %v1851_v3 }
 0x52e   : > { %v5248_v21 = vpack.c.bf16 %v5628_v2, %v5627_v54  ;;  %v5641_v55 = vpop.permute.xlu1 %5640 }
 0x52f   : > { %v5631_v22 = vpop.permute.xlu0 %5630  ;;  %4927 = vmatmul.mubr.msk.f32.gmra.mrb[36].mxu1 %vm1295_vm0, %v1853_v13  ;;  %v5643_v42 = vunpack.i.h.bf16 %v5641_v55  ;;  %v5642_v48 = vunpack.i.l.bf16 %v5641_v55 }
 0x530   : > { %v5633_v23 = vunpack.i.h.bf16 %v5631_v22  ;;  %v5632_v24 = vunpack.i.l.bf16 %v5631_v22  ;;  %4929 = vmatprep.mubr.msk.f32.mxu1 %vm1295_vm0, %v1855_v38  ;;  %5249 = vmatprep.subr.bf16.mxu0 %v5248_v21 }
 0x531   : > { %5251 = vmatpush3.bf16.msra.mxu0 %v5248_v21  ;;  %v5260_v46 = vpack.c.bf16 %v5643_v42, %v5642_v48 }
 0x532   : > { %v5252_v37 = vpack.c.bf16 %v5633_v23, %v5632_v24 }
 0x533   : > { %v5636_v15 = vpop.permute.xlu0 %5635  ;;  %4930 = vmatmul.mubr.msk.f32.gmra.mrb[38].mxu1 %vm1295_vm0, %v1857_v16 }
 0x534   : > { %v5638_v50 = vunpack.i.h.bf16 %v5636_v15  ;;  %v5637_v6 = vunpack.i.l.bf16 %v5636_v15  ;;  %4932 = vmatprep.mubr.msk.f32.mxu1 %vm1295_vm0, %v1859_v43  ;;  %5253 = vmatprep.subr.bf16.mxu0 %v5252_v37 }
 0x535   : > { %5255 = vmatpush3.bf16.msra.mxu0 %v5252_v37 }
 0x536   : > { %v5256_v53 = vpack.c.bf16 %v5638_v50, %v5637_v6  ;;  %v8386_v6 = vpack.i.bf16 %v7093_v40, %v7085_v29 }
 0x537   : > { %v5646_v56 = vpop.permute.xlu0 %5645  ;;  %4933 = vmatmul.mubr.msk.f32.gmra.mrb[40].mxu1 %vm1295_vm0, %v1861_v5 }
 0x538   : > { %v5648_v9 = vunpack.i.h.bf16 %v5646_v56  ;;  %v5647_v59 = vunpack.i.l.bf16 %v5646_v56  ;;  %4935 = vmatprep.mubr.msk.f32.mxu1 %vm1295_vm0, %v1863_v52  ;;  %5257 = vmatprep.subr.bf16.mxu0 %v5256_v53 }
 0x539   : > { %5259 = vmatpush3.bf16.msra.mxu0 %v5256_v53  ;;  %v8387_v53 = vpack.i.bf16 %v7113_v58, %v7105_v49 }
 0x53a   : > { %5261 = vmatprep.subr.bf16.mxu0 %v5260_v46  ;;  %v5264_v61 = vpack.c.bf16 %v5648_v9, %v5647_v59 }
 0x53b   : > { %v5651_v60 = vpop.permute.xlu0 %5650  ;;  %4936 = vmatmul.mubr.msk.f32.gmra.mrb[42].mxu1 %vm1295_vm0, %v1865_v57 }
 0x53c   : > { %v5653_v18 = vunpack.i.h.bf16 %v5651_v60  ;;  %v5652_v27 = vunpack.i.l.bf16 %v5651_v60  ;;  %4938 = vmatprep.mubr.msk.f32.mxu1 %vm1295_vm0, %v1867_v39 }
 0x53d   : > { %5263 = vmatpush3.bf16.msra.mxu0 %v5260_v46 }
 0x53e   : > { %5265 = vmatprep.subr.bf16.mxu0 %v5264_v61  ;;  %v5268_v1 = vpack.c.bf16 %v5653_v18, %v5652_v27 }
 0x53f   : > { %4939 = vmatmul.mubr.msk.f32.gmra.mrb[44].mxu1 %vm1295_vm0, %v1869_v7 }
 0x540   : > { %4941 = vmatprep.mubr.msk.f32.mxu1 %vm1295_vm0, %v1871_v17 }
 0x541   : > { %5267 = vmatpush3.bf16.msra.mxu0 %v5264_v61 }
 0x542   : > { %5269 = vmatprep.subr.bf16.mxu0 %v5268_v1 }
 0x543   : > { %4942 = vmatmul.mubr.msk.f32.gmra.mrb[46].mxu1 %vm1295_vm0, %v1873_v33 }
 0x544   : > { %3122 = vmatprep.mubr.f32.mxu1 %v8385_v14 }
 0x545   : > { %5271 = vmatpush3.bf16.msra.mxu0 %v5268_v1 }
 0x59a   : > { %v7386_v3 = vpop.f32.mrb[16].mxu1 }
 0x59b   : > { %v7388_v41 = vpop.f32.mrb[17].mxu1 }
 0x5d2   : > { %v7390_v47 = vpop.f32.mrb[18].mxu1 }
 0x5d3   : > { %v7392_v11 = vpop.f32.mrb[19].mxu1 }
 0x5d6   : > { %v7394_v13 = vpop.f32.mrb[20].mxu1 }
 0x5d7   : > { %v7396_v8 = vpop.f32.mrb[21].mxu1 }
 0x5db   : > { %v7398_v28 = vpop.f32.mrb[22].mxu1 }
 0x5dc   : > { %v7400_v32 = vpop.f32.mrb[23].mxu1 }
 0x5e3   : > { %v7402_v38 = vpop.f32.mrb[24].mxu1 }
 0x5e4   : > { %v7404_v44 = vpop.f32.mrb[25].mxu1 }
 0x5eb   : > { %v7406_v16 = vpop.f32.mrb[26].mxu1 }
 0x5ec   : > { %v7408_v43 = vpop.f32.mrb[27].mxu1 }
 0x5ef   : > { %v7410_v5 = vpop.f32.mrb[28].mxu1 }
 0x5f0   : > { %v7412_v52 = vpop.f32.mrb[29].mxu1 }
 0x5f6   : > { %v7414_v57 = vpop.f32.mrb[30].mxu1 }
 0x5f7   : > { %v7416_v39 = vpop.f32.mrb[31].mxu1 }
 0x5fa   : > { %v4922_v7 = vpop.f32.mrb[32].mxu1 }
 0x5fb   : > { %2117 = vmax.xlane.f32.xlu0 %v4922_v7  ;;  %v2036_v17 = vpop.f32.mrb[33].mxu1 }
 0x5fc   : > { %2115 = vmax.xlane.f32.xlu1 %v2036_v17 }
 0x5fe   : > { %v4925_v33 = vpop.f32.mrb[34].mxu1 }
 0x5ff   : > { %v2046_v19 = vpop.f32.mrb[35].mxu1 }
 0x600   : > { %2121 = vmax.xlane.f32.xlu1 %v4925_v33 }
 0x602   : > { %v7418_v2 = vpop.f32.mrb[36].mxu1 }
 0x603   : > { %v2056_v54 = vpop.f32.mrb[37].mxu1 }
 0x604   : > { %2119 = vmax.xlane.f32.xlu1 %v2046_v19  ;;  %2123 = vmax.xlane.f32.xlu0 %v2056_v54 }
 0x606   : > { %v7420_v21 = vpop.f32.mrb[38].mxu1 }
 0x607   : > { %v7422_v22 = vpop.f32.mrb[39].mxu1 }
 0x608   : > { %2125 = vmax.xlane.f32.xlu1 %v7418_v2 }
 0x60a   : > { %v7425_v23 = vpop.f32.mrb[40].mxu1 }
 0x60b   : > { %v7427_v24 = vpop.f32.mrb[41].mxu1 }
 0x60e   : > { %v7429_v55 = vpop.f32.mrb[42].mxu1 }
 0x60f   : > { %v7431_v37 = vpop.f32.mrb[43].mxu1 }
 0x612   : > { %v7433_v15 = vpop.f32.mrb[44].mxu1 }
 0x613   : > { %v7435_v42 = vpop.f32.mrb[45].mxu1 }
 0x616   : > { %v7437_v48 = vpop.f32.mrb[46].mxu1 }
 0x617   : > { %v7439_v50 = vpop.f32.mrb[47].mxu1 }
 0x619   : > { %5655 = vrot.lane.b32.xlu1 %v8386_v6, %s6314_s24 }
 0x61a   : > { %5660 = vrot.lane.b32.xlu0 %v8387_v53, %s6314_s24 }
 0x639   : > { %2129 = vmax.xlane.f32.xlu0 %v7420_v21 }
 0x63d   : > { %2127 = vmax.xlane.f32.xlu1 %v7422_v22  ;;  %2131 = vmax.xlane.f32.xlu0 %v7427_v24 }
 0x641   : > { %2133 = vmax.xlane.f32.xlu1 %v7425_v23  ;;  %2135 = vmax.xlane.f32.xlu0 %v7431_v37 }
 0x645   : > { %2137 = vmax.xlane.f32.xlu1 %v7429_v55  ;;  %2139 = vmax.xlane.f32.xlu0 %v7435_v42 }
 0x649   : > { %2141 = vmax.xlane.f32.xlu1 %v7433_v15  ;;  %2143 = vmax.xlane.f32.xlu0 %v7439_v50 }
 0x64d   : > { %2145 = vmax.xlane.f32.xlu1 %v7437_v48  ;;  %1621 = vadd.xlane.f32.xlu0 %v7310_v10 }
 0x651   : > { %1617 = vadd.xlane.f32.xlu1 %v7273_v30  ;;  %1625 = vadd.xlane.f32.xlu0 %v7313_v20 }
 0x655   : > { %1619 = vadd.xlane.f32.xlu1 %v7275_v34  ;;  %1629 = vadd.xlane.f32.xlu0 %v7331_v26 }
 0x659   : > { %1623 = vadd.xlane.f32.xlu1 %v7306_v36  ;;  %1635 = vadd.xlane.f32.xlu0 %v7344_v25 }
 0x65d   : > { %1627 = vadd.xlane.f32.xlu1 %v7321_v63  ;;  %1639 = vadd.xlane.f32.xlu0 %v7352_v35 }
 0x661   : > { %1631 = vadd.xlane.f32.xlu1 %v7334_v12  ;;  %1643 = vadd.xlane.f32.xlu0 %v7359_v31 }
 0x665   : > { %1633 = vadd.xlane.f32.xlu1 %v7342_v51 }
 0x669   : > { %1637 = vadd.xlane.f32.xlu1 %v7350_v62 }
 0x66d   : > { %1641 = vadd.xlane.f32.xlu1 %v7355_v45 }
 0x688   : > { %v2118_v29 = vpop.xlane.xlu0 %2117 }
 0x689   : > { %v2148_v40 = vsub.f32 %v4922_v7, %v2118_v29  ;;  %v2116_v49 = vpop.xlane.xlu1 %2115 }
 0x68a   : > { %v2147_v58 = vsub.f32 %v2036_v17, %v2116_v49 }
 0x68b   : > { %v2165_v30 = vmul.f32 1.442695, %v2148_v40 }
 0x68c   : > { %v2163_v34 = vmul.f32 1.442695, %v2147_v58 }
 0x68d   : > { %5728 = vpow2.f32 %v2165_v30  ;;  %v2122_v36 = vpop.xlane.xlu1 %2121 }
 0x68e   : > { %5730 = vpow2.f32 %v2163_v34  ;;  %v2150_v10 = vsub.f32 %v4925_v33, %v2122_v36 }
 0x690   : > { %v2169_v20 = vmul.f32 1.442695, %v2150_v10 }
 0x691   : > { %v2120_v63 = vpop.xlane.xlu1 %2119  ;;  %v2124_v26 = vpop.xlane.xlu0 %2123 }
 0x692   : > { %5732 = vpow2.f32 %v2169_v20  ;;  %v2149_v12 = vsub.f32 %v2046_v19, %v2120_v63  ;;  %v2151_v51 = vsub.f32 %v2056_v54, %v2124_v26 }
 0x694   : > { %v2167_v25 = vmul.f32 1.442695, %v2149_v12  ;;  %v2171_v62 = vmul.f32 1.442695, %v2151_v51 }
 0x695   : > { %v2126_v35 = vpop.xlane.xlu1 %2125  ;;  %v5661_v31 = vpop.permute.xlu0 %5660 }
 0x696   : > { %5734 = vpow2.f32 %v2167_v25  ;;  %v2152_v45 = vsub.f32 %v7418_v2, %v2126_v35  ;;  %v5663_v46 = vunpack.i.h.bf16 %v5661_v31  ;;  %v5662_v18 = vunpack.i.l.bf16 %v5661_v31 }
 0x697   : > { %v5729_v56 = vpop.eup %5728  ;;  %5736 = vpow2.f32 %v2171_v62 }
 0x698   : > { %v5731_v9 = vpop.eup %5730  ;;  %v2173_v59 = vmul.f32 1.442695, %v2152_v45  ;;  %2197 = vadd.xlane.f32.xlu1 %v5729_v56  ;;  %v5276_v17 = vpack.c.bf16 %v5663_v46, %v5662_v18 }
 0x699   : > { %4976 = vmatprep.mubr.f32.mxu0 %v5731_v9  ;;  %v5656_v60 = vpop.permute.xlu1 %5655  ;;  %2195 = vadd.xlane.f32.xlu0 %v5731_v9 }
 0x69a   : > { %5738 = vpow2.f32 %v2173_v59  ;;  %v5658_v27 = vunpack.i.h.bf16 %v5656_v60  ;;  %v5657_v61 = vunpack.i.l.bf16 %v5656_v60 }
 0x69c   : > { %v5733_v1 = vpop.eup %5732  ;;  %v5272_v7 = vpack.c.bf16 %v5658_v27, %v5657_v61 }
 0x69d   : > { %2201 = vadd.xlane.f32.xlu1 %v5733_v1 }
 0x69e   : > { %5273 = vmatprep.subr.bf16.mxu0 %v5272_v7 }
 0x69f   : > { %5275 = vmatpush3.bf16.msra.mxu0 %v5272_v7 }
 0x6a0   : > { %v5735_v33 = vpop.eup %5734  ;;  %5277 = vmatprep.subr.bf16.mxu0 %v5276_v17 }
 0x6a1   : > { %2199 = vadd.xlane.f32.xlu0 %v5735_v33  ;;  %v5737_v19 = vpop.eup %5736 }
 0x6a3   : > { %5279 = vmatpush3.bf16.msra.mxu0 %v5276_v17 }
 0x6a4   : > { %v5739_v2 = vpop.eup %5738 }
 0x6a5   : > { %2205 = vadd.xlane.f32.xlu1 %v5739_v2  ;;  %2203 = vadd.xlane.f32.xlu0 %v5737_v19 }
 0x6a6   : > { %4977 = vmatmul.mubr.f32.vlgmr.msra.gmra.mrb[48].mxu0 %v5729_v56 }
 0x6a7   : > { %4979 = vmatprep.mubr.f32.mxu0 %v5735_v33 }
 0x6aa   : > { %4980 = vmatmul.mubr.f32.gmra.mrb[50].mxu0 %v5733_v1 }
 0x6ab   : > { %4982 = vmatprep.mubr.f32.mxu0 %v5737_v19 }
 0x6ae   : > { %4983 = vmatmul.mubr.f32.gmra.mrb[52].mxu0 %v5739_v2 }
 0x6c6   : > { %v2130_v54 = vpop.xlane.xlu0 %2129 }
 0x6c7   : > { %v2154_v6 = vsub.f32 %v7420_v21, %v2130_v54 }
 0x6c9   : > { %v2177_v53 = vmul.f32 1.442695, %v2154_v6 }
 0x6ca   : > { %v2128_v29 = vpop.xlane.xlu1 %2127  ;;  %v2132_v40 = vpop.xlane.xlu0 %2131 }
 0x6cb   : > { %5740 = vpow2.f32 %v2177_v53  ;;  %v2153_v49 = vsub.f32 %v7422_v22, %v2128_v29  ;;  %v2155_v58 = vsub.f32 %v7427_v24, %v2132_v40 }
 0x6cd   : > { %v2175_v30 = vmul.f32 1.442695, %v2153_v49  ;;  %v2179_v34 = vmul.f32 1.442695, %v2155_v58 }
 0x6ce   : > { %v2134_v36 = vpop.xlane.xlu1 %2133  ;;  %v2136_v10 = vpop.xlane.xlu0 %2135 }
 0x6cf   : > { %5742 = vpow2.f32 %v2175_v30  ;;  %v2156_v20 = vsub.f32 %v7425_v23, %v2134_v36  ;;  %v2157_v63 = vsub.f32 %v7431_v37, %v2136_v10 }
 0x6d0   : > { %5744 = vpow2.f32 %v2179_v34 }
 0x6d1   : > { %v2181_v26 = vmul.f32 1.442695, %v2156_v20  ;;  %v2183_v21 = vmul.f32 1.442695, %v2157_v63 }
 0x6d2   : > { %v2138_v12 = vpop.xlane.xlu1 %2137  ;;  %v2140_v51 = vpop.xlane.xlu0 %2139 }
 0x6d3   : > { %5746 = vpow2.f32 %v2181_v26  ;;  %v2158_v25 = vsub.f32 %v7429_v55, %v2138_v12  ;;  %v2159_v22 = vsub.f32 %v7435_v42, %v2140_v51 }
 0x6d4   : > { %5748 = vpow2.f32 %v2183_v21 }
 0x6d5   : > { %v5741_v24 = vpop.eup %5740  ;;  %v2185_v62 = vmul.f32 1.442695, %v2158_v25  ;;  %v2187_v35 = vmul.f32 1.442695, %v2159_v22 }
 0x6d6   : > { %v2142_v45 = vpop.xlane.xlu1 %2141  ;;  %2209 = vadd.xlane.f32.xlu1 %v5741_v24  ;;  %v2144_v31 = vpop.xlane.xlu0 %2143 }
 0x6d7   : > { %5750 = vpow2.f32 %v2185_v62  ;;  %v2160_v23 = vsub.f32 %v7433_v15, %v2142_v45  ;;  %v2161_v37 = vsub.f32 %v7439_v50, %v2144_v31 }
 0x6d8   : > { %5752 = vpow2.f32 %v2187_v35 }
 0x6d9   : > { %v5743_v56 = vpop.eup %5742  ;;  %v2189_v9 = vmul.f32 1.442695, %v2160_v23  ;;  %v2191_v59 = vmul.f32 1.442695, %v2161_v37 }
 0x6da   : > { %4985 = vmatprep.mubr.f32.mxu0 %v5743_v56  ;;  %v2146_v55 = vpop.xlane.xlu1 %2145  ;;  %2207 = vadd.xlane.f32.xlu0 %v5743_v56  ;;  %v1622_v42 = vpop.xlane.xlu0 %1621 }
 0x6db   : > { %v5745_v46 = vpop.eup %5744  ;;  %5754 = vpow2.f32 %v2189_v9  ;;  %v2162_v60 = vsub.f32 %v7437_v48, %v2146_v55  ;;  %4986 = vmatmul.mubr.f32.gmra.mrb[54].mxu0 %v5741_v24  ;;  %v2566_v9 = vld [vmem:[#allocation12 + $0x8] sm:$0xff] }
 0x6dc   : > { %5756 = vpow2.f32 %v2191_v59  ;;  %4988 = vmatprep.mubr.f32.mxu0 %v5745_v46  ;;  %v2567_v59 = vld [vmem:[#allocation12 + $0x10] sm:$0xff] }
 0x6dd   : > { %v5747_v18 = vpop.eup %5746  ;;  %v2193_v27 = vmul.f32 1.442695, %v2162_v60  ;;  %5758 = vrcp.f32 %v1622_v42  ;;  %v2568_v42 = vld [vmem:[#allocation12 + $0x18] sm:$0xff]  ;;  %v2569_v60 = vld [vmem:[#allocation12 + $0x20] sm:$0xff] }
 0x6de   : > { %2213 = vadd.xlane.f32.xlu1 %v5747_v18  ;;  %v1618_v15 = vpop.xlane.xlu1 %1617  ;;  %2211 = vadd.xlane.f32.xlu0 %v5745_v46  ;;  %v1626_v50 = vpop.xlane.xlu0 %1625  ;;  %v5284_v46 = vpack.c.bf16 %v2568_v42, %v2567_v59 }
 0x6df   : > { %v5749_v61 = vpop.eup %5748  ;;  %5760 = vpow2.f32 %v2193_v27  ;;  %4989 = vmatmul.mubr.f32.gmra.mrb[56].mxu0 %v5747_v18  ;;  %v2572_v27 = vld [vmem:[#allocation12 + $0x38] sm:$0xff] }
 0x6e0   : > { %5762 = vrcp.f32 %v1618_v15  ;;  %4991 = vmatprep.mubr.f32.mxu0 %v5749_v61 }
 0x6e1   : > { %v5751_v1 = vpop.eup %5750  ;;  %5764 = vrcp.f32 %v1626_v50  ;;  %v2574_v50 = vld [vmem:[#allocation12 + $0x48] sm:$0xff] }
 0x6e2   : > { %2217 = vadd.xlane.f32.xlu1 %v5751_v1  ;;  %v1620_v7 = vpop.xlane.xlu1 %1619  ;;  %2215 = vadd.xlane.f32.xlu0 %v5749_v61  ;;  %v1630_v48 = vpop.xlane.xlu0 %1629 }
 0x6e3   : > { %v5753_v17 = vpop.eup %5752  ;;  %5766 = vrcp.f32 %v1620_v7  ;;  %4992 = vmatmul.mubr.f32.gmra.mrb[58].mxu0 %v5751_v1 }
 0x6e4   : > { %5768 = vrcp.f32 %v1630_v48  ;;  %4994 = vmatprep.mubr.f32.mxu0 %v5753_v17  ;;  %v2575_v48 = vld [vmem:[#allocation12 + $0x50] sm:$0xff] }
 0x6e5   : > { %v5755_v33 = vpop.eup %5754 }
 0x6e6   : > { %v5757_v19 = vpop.eup %5756  ;;  %2221 = vadd.xlane.f32.xlu1 %v5755_v33  ;;  %v1624_v2 = vpop.xlane.xlu1 %1623  ;;  %2219 = vadd.xlane.f32.xlu0 %v5753_v17  ;;  %v2576_v17 = vld [vmem:[#allocation12 + $0x58] sm:$0xff] }
 0x6e7   : > { %v1636_v54 = vpop.xlane.xlu0 %1635  ;;  %v5759_v6 = vpop.eup %5758  ;;  %5770 = vrcp.f32 %v1624_v2  ;;  %4995 = vmatmul.mubr.f32.gmra.mrb[60].mxu0 %v5755_v33  ;;  %v5300_v33 = vpack.c.bf16 %v2576_v17, %v2575_v48 }
 0x6e8   : > { %v1812_v53 = vmul.f32 %v5759_v6, %v7392_v11  ;;  %5772 = vrcp.f32 %v1636_v54  ;;  %4997 = vmatprep.mubr.f32.mxu0 %v5757_v19  ;;  %v2577_v54 = vld [vmem:[#allocation12 + $0x60] sm:$0xff]  ;;  %v2578_v6 = vld [vmem:[#allocation12 + $0x68] sm:$0xff] }
 0x6e9   : > { %v5761_v29 = vpop.eup %5760 }
 0x6ea   : > { %v5763_v40 = vpop.eup %5762  ;;  %1828 = vst.msk [vmem:[#allocation3 + $0x10] sm:$0xff] %vm1295_vm0, %v1812_v53  ;;  %v1628_v49 = vpop.xlane.xlu1 %1627  ;;  %2225 = vadd.xlane.f32.xlu0 %v5761_v29  ;;  %v5304_v53 = vpack.c.bf16 %v2578_v6, %v2577_v54 }
 0x6eb   : > { %v1640_v58 = vpop.xlane.xlu0 %1639  ;;  %v5765_v30 = vpop.eup %5764  ;;  %v1810_v34 = vmul.f32 %v5763_v40, %v7388_v41  ;;  %5774 = vrcp.f32 %v1628_v49  ;;  %4998 = vmatmul.mubr.f32.gmra.mrb[62].mxu0 %v5761_v29  ;;  %v2579_v40 = vld [vmem:[#allocation12 + $0x70] sm:$0xff]  ;;  %v2580_v49 = vld [vmem:[#allocation12 + $0x78] sm:$0xff] }
 0x6ec   : > { %v1814_v36 = vmul.f32 %v5765_v30, %v7396_v8  ;;  %5776 = vrcp.f32 %v1640_v58  ;;  %v5308_v30 = vpack.c.bf16 %v2580_v49, %v2579_v40 }
 0x6ed   : > { %v5767_v10 = vpop.eup %5766  ;;  %1826 = vst.msk [vmem:[#allocation3] sm:$0xff] %vm1295_vm0, %v1810_v34 }
 0x6ee   : > { %v5769_v11 = vpop.eup %5768  ;;  %1830 = vst.msk [vmem:[#allocation3 + $0x20] sm:$0xff] %vm1295_vm0, %v1814_v36  ;;  %v1811_v20 = vmul.f32 %v5767_v10, %v7386_v3  ;;  %v1632_v63 = vpop.xlane.xlu1 %1631  ;;  %2223 = vadd.xlane.f32.xlu0 %v5757_v19 }
 0x6ef   : > { %v1644_v26 = vpop.xlane.xlu0 %1643  ;;  %v1816_v21 = vmul.f32 %v5769_v11, %v7400_v32  ;;  %5778 = vrcp.f32 %v1632_v63 }
 0x6f0   : > { %1827 = vst.msk [vmem:[#allocation3 + $0x8] sm:$0xff] %vm1295_vm0, %v1811_v20  ;;  %5780 = vrcp.f32 %v1644_v26 }
 0x6f1   : > { %v5771_v41 = vpop.eup %5770  ;;  %1832 = vst.msk [vmem:[#allocation3 + $0x30] sm:$0xff] %vm1295_vm0, %v1816_v21 }
 0x6f2   : > { %v5773_v8 = vpop.eup %5772  ;;  %v1813_v12 = vmul.f32 %v5771_v41, %v7390_v47  ;;  %v1634_v51 = vpop.xlane.xlu1 %1633 }
 0x6f3   : > { %v1819_v25 = vmul.f32 %v5773_v8, %v7402_v38  ;;  %5782 = vrcp.f32 %v1634_v51 }
 0x6f4   : > { %1829 = vst.msk [vmem:[#allocation3 + $0x18] sm:$0xff] %vm1295_vm0, %v1813_v12 }
 0x6f5   : > { %v5775_v3 = vpop.eup %5774  ;;  %1835 = vst.msk [vmem:[#allocation3 + $0x48] sm:$0xff] %vm1295_vm0, %v1819_v25 }
 0x6f6   : > { %v5777_v32 = vpop.eup %5776  ;;  %v1815_v22 = vmul.f32 %v5775_v3, %v7394_v13  ;;  %v1638_v24 = vpop.xlane.xlu1 %1637 }
 0x6f7   : > { %v1821_v62 = vmul.f32 %v5777_v32, %v7406_v16  ;;  %5784 = vrcp.f32 %v1638_v24 }
 0x6f8   : > { %1831 = vst.msk [vmem:[#allocation3 + $0x28] sm:$0xff] %vm1295_vm0, %v1815_v22 }
 0x6f9   : > { %v5779_v35 = vpop.eup %5778  ;;  %1837 = vst.msk [vmem:[#allocation3 + $0x58] sm:$0xff] %vm1295_vm0, %v1821_v62 }
 0x6fa   : > { %v5781_v47 = vpop.eup %5780  ;;  %v1817_v38 = vmul.f32 %v5779_v35, %v7398_v28  ;;  %v1642_v45 = vpop.xlane.xlu1 %1641 }
 0x6fb   : > { %v1823_v31 = vmul.f32 %v5781_v47, %v7410_v5  ;;  %5786 = vrcp.f32 %v1642_v45  ;;  %v2565_v5 = vld [vmem:[#allocation12] sm:$0xff] }
 0x6fc   : > { %1833 = vst.msk [vmem:[#allocation3 + $0x38] sm:$0xff] %vm1295_vm0, %v1817_v38  ;;  %v5280_v55 = vpack.c.bf16 %v2566_v9, %v2565_v5 }
 0x6fd   : > { %v5783_v23 = vpop.eup %5782  ;;  %1839 = vst.msk [vmem:[#allocation3 + $0x68] sm:$0xff] %vm1295_vm0, %v1823_v31 }
 0x6fe   : > { %v1818_v13 = vmul.f32 %v5783_v23, %v7404_v44  ;;  %v2570_v44 = vld [vmem:[#allocation12 + $0x28] sm:$0xff]  ;;  %5281 = vmatprep.subr.bf16.mxu0 %v5280_v55 }
 0x6ff   : > { %5283 = vmatpush3.bf16.msra.mxu0 %v5280_v55  ;;  %v5288_v18 = vpack.c.bf16 %v2570_v44, %v2569_v60 }
 0x700   : > { %1834 = vst.msk [vmem:[#allocation3 + $0x40] sm:$0xff] %vm1295_vm0, %v1818_v13  ;;  %5285 = vmatprep.subr.bf16.mxu0 %v5284_v46 }
 0x701   : > { %v5785_v16 = vpop.eup %5784 }
 0x702   : > { %v1820_v37 = vmul.f32 %v5785_v16, %v7408_v43  ;;  %v2571_v43 = vld [vmem:[#allocation12 + $0x30] sm:$0xff] }
 0x703   : > { %5287 = vmatpush3.bf16.msra.mxu0 %v5284_v46  ;;  %v5292_v15 = vpack.c.bf16 %v2572_v27, %v2571_v43 }
 0x704   : > { %1836 = vst.msk [vmem:[#allocation3 + $0x50] sm:$0xff] %vm1295_vm0, %v1820_v37  ;;  %5289 = vmatprep.subr.bf16.mxu0 %v5288_v18 }
 0x705   : > { %v5787_v56 = vpop.eup %5786 }
 0x706   : > { %v1822_v28 = vmul.f32 %v5787_v56, %v7412_v52  ;;  %v2573_v52 = vld [vmem:[#allocation12 + $0x40] sm:$0xff] }
 0x707   : > { %5291 = vmatpush3.bf16.msra.mxu0 %v5288_v18  ;;  %v5296_v61 = vpack.c.bf16 %v2574_v50, %v2573_v52 }
 0x708   : > { %1838 = vst.msk [vmem:[#allocation3 + $0x60] sm:$0xff] %vm1295_vm0, %v1822_v28  ;;  %5293 = vmatprep.subr.bf16.mxu0 %v5292_v15 }
 0x70b   : > { %5295 = vmatpush3.bf16.msra.mxu0 %v5292_v15 }
 0x70c   : > { %5297 = vmatprep.subr.bf16.mxu0 %v5296_v61 }
 0x70f   : > { %5299 = vmatpush3.bf16.msra.mxu0 %v5296_v61 }
 0x710   : > { %5301 = vmatprep.subr.bf16.mxu0 %v5300_v33 }
 0x713   : > { %5303 = vmatpush3.bf16.msra.mxu0 %v5300_v33 }
 0x714   : > { %5305 = vmatprep.subr.bf16.mxu0 %v5304_v53 }
 0x717   : > { %5307 = vmatpush3.bf16.msra.mxu0 %v5304_v53 }
 0x718   : > { %5309 = vmatprep.subr.bf16.mxu0 %v5308_v30 }
 0x71b   : > { %5311 = vmatpush3.bf16.msra.mxu0 %v5308_v30 }
 0x725   : > { %v2198_v1 = vpop.xlane.xlu1 %2197 }
 0x726   : > { %v2196_v7 = vpop.xlane.xlu0 %2195  ;;  %5788 = vrcp.f32 %v2198_v1 }
 0x727   : > { %5790 = vrcp.f32 %v2196_v7 }
 0x72a   : > { %v2202_v2 = vpop.xlane.xlu1 %2201 }
 0x72b   : > { %5792 = vrcp.f32 %v2202_v2 }
 0x72e   : > { %v2200_v19 = vpop.xlane.xlu0 %2199 }
 0x72f   : > { %5794 = vrcp.f32 %v2200_v19 }
 0x730   : > { %v5789_v34 = vpop.eup %5788 }
 0x731   : > { %v5791_v10 = vpop.eup %5790 }
 0x732   : > { %v2206_v29 = vpop.xlane.xlu1 %2205  ;;  %v2204_v58 = vpop.xlane.xlu0 %2203 }
 0x733   : > { %5796 = vrcp.f32 %v2206_v29 }
 0x734   : > { %5798 = vrcp.f32 %v2204_v58 }
 0x735   : > { %v5793_v26 = vpop.eup %5792 }
 0x739   : > { %v5795_v41 = vpop.eup %5794 }
 0x73d   : > { %v5797_v25 = vpop.eup %5796 }
 0x73e   : > { %v5799_v32 = vpop.eup %5798 }
 0x763   : > { %v2210_v35 = vpop.xlane.xlu1 %2209 }
 0x764   : > { %5800 = vrcp.f32 %v2210_v35 }
 0x767   : > { %v2208_v47 = vpop.xlane.xlu0 %2207 }
 0x768   : > { %5802 = vrcp.f32 %v2208_v47 }
 0x76b   : > { %v2212_v46 = vpop.xlane.xlu0 %2211  ;;  %v2214_v18 = vpop.xlane.xlu1 %2213 }
 0x76c   : > { %5804 = vrcp.f32 %v2214_v18 }
 0x76d   : > { %5806 = vrcp.f32 %v2212_v46 }
 0x76e   : > { %v5801_v38 = vpop.eup %5800 }
 0x76f   : > { %v2216_v60 = vpop.xlane.xlu0 %2215  ;;  %v2218_v27 = vpop.xlane.xlu1 %2217 }
 0x770   : > { %5808 = vrcp.f32 %v2216_v60 }
 0x772   : > { %v5803_v31 = vpop.eup %5802 }
 0x773   : > { %v2220_v44 = vpop.xlane.xlu0 %2219  ;;  %v2222_v52 = vpop.xlane.xlu1 %2221 }
 0x774   : > { %5810 = vrcp.f32 %v2220_v44 }
 0x775   : > { %5812 = vrcp.f32 %v2218_v27 }
 0x776   : > { %v5805_v50 = vpop.eup %5804 }
 0x777   : > { %v2226_v43 = vpop.xlane.xlu0 %2225  ;;  %v5807_v61 = vpop.eup %5806 }
 0x779   : > { %v4978_v36 = vpop.f32.mrb[48].mxu0 }
 0x77a   : > { %v2453_v11 = vmul.f32 %v5789_v34, %v4978_v36  ;;  %v2357_v20 = vpop.f32.mrb[49].mxu0 }
 0x77b   : > { %v2452_v63 = vmul.f32 %v5791_v10, %v2357_v20  ;;  %v2224_v15 = vpop.xlane.xlu0 %2223 }
 0x77c   : > { %2486 = vrot.lane.b32.xlu1 %v2453_v11, %s6314_s24  ;;  %5814 = vrcp.f32 %v2224_v15  ;;  %v5985_v15 = vld [vmem:[%s6692_s5] sm:$0xff] }
 0x77d   : > { %v4981_v21 = vpop.f32.mrb[50].mxu0  ;;  %2484 = vrot.lane.b32.xlu0 %v2452_v63, %s6314_s24  ;;  %5816 = vrcp.f32 %v2222_v52 }
 0x77e   : > { %v2455_v8 = vmul.f32 %v5793_v26, %v4981_v21  ;;  %v2367_v12 = vpop.f32.mrb[51].mxu0  ;;  %5818 = vrcp.f32 %v2226_v43  ;;  %v5984_v43 = vld [vmem:[%s6692_s5 + $0x8] sm:$0xff] }
 0x77f   : > { %v2454_v51 = vmul.f32 %v5795_v41, %v2367_v12 }
 0x780   : > { %2490 = vrot.lane.b32.xlu1 %v2455_v8, %s6314_s24 }
 0x781   : > { %v4984_v3 = vpop.f32.mrb[52].mxu0  ;;  %2488 = vrot.lane.b32.xlu0 %v2454_v51, %s6314_s24 }
 0x782   : > { %v2457_v22 = vmul.f32 %v5797_v25, %v4984_v3  ;;  %v2377_v24 = vpop.f32.mrb[53].mxu0 }
 0x783   : > { %v2456_v62 = vmul.f32 %v5799_v32, %v2377_v24 }
 0x784   : > { %2494 = vrot.lane.b32.xlu1 %v2457_v22, %s6314_s24 }
 0x785   : > { %2492 = vrot.lane.b32.xlu0 %v2456_v62, %s6314_s24 }
 0x7ae   : > { %v4987_v45 = vpop.f32.mrb[54].mxu0 }
 0x7af   : > { %v2459_v23 = vmul.f32 %v5801_v38, %v4987_v45  ;;  %v2387_v13 = vpop.f32.mrb[55].mxu0 }
 0x7b0   : > { %v2458_v16 = vmul.f32 %v5803_v31, %v2387_v13 }
 0x7b1   : > { %2498 = vrot.lane.b32.xlu1 %v2459_v23, %s6314_s24 }
 0x7b2   : > { %v4990_v37 = vpop.f32.mrb[56].mxu0  ;;  %2496 = vrot.lane.b32.xlu0 %v2458_v16, %s6314_s24 }
 0x7b3   : > { %v2397_v56 = vpop.f32.mrb[57].mxu0  ;;  %v2461_v1 = vmul.f32 %v5805_v50, %v4990_v37 }
 0x7b4   : > { %v2460_v7 = vmul.f32 %v5807_v61, %v2397_v56 }
 0x7b6   : > { %v4993_v28 = vpop.f32.mrb[58].mxu0 }
 0x7b7   : > { %v2407_v5 = vpop.f32.mrb[59].mxu0 }
 0x7ba   : > { %v4996_v9 = vpop.f32.mrb[60].mxu0 }
 0x7bb   : > { %v2417_v59 = vpop.f32.mrb[61].mxu0 }
 0x7be   : > { %v4999_v55 = vpop.f32.mrb[62].mxu0 }
 0x7bf   : > { %v2427_v42 = vpop.f32.mrb[63].mxu0 }
 0x7d1   : > { %1647 = vadd.xlane.f32.xlu0 %v7365_v0  ;;  %v5809_v0 = vpop.eup %5808 }
 0x7d2   : > { %v2462_v48 = vmul.f32 %v5809_v0, %v2407_v5  ;;  %v5986_v0 = vld [vmem:[%s6692_s5 + $0x10] sm:$0xff] }
 0x7d5   : > { %1645 = vadd.xlane.f32.xlu1 %v7362_v4  ;;  %v5811_v4 = vpop.eup %5810 }
 0x7d6   : > { %v2464_v17 = vmul.f32 %v5811_v4, %v2417_v59  ;;  %v5813_v33 = vpop.eup %5812 }
 0x7d7   : > { %v5815_v19 = vpop.eup %5814  ;;  %v2463_v2 = vmul.f32 %v5813_v33, %v4993_v28 }
 0x7d8   : > { %v2466_v54 = vmul.f32 %v5815_v19, %v2427_v42  ;;  %v5817_v53 = vpop.eup %5816  ;;  %v7554_v42 = vld [vmem:[%s8388_s21] ss:$0 sm:$0xff]  ;;  %v5987_v19 = vld [vmem:[%s6692_s5 + $0x28] sm:$0xff]  ;;  %s8431_s21 = sld [smem:[#allocation55_spill]] }
 0x7d9   : > { %v2465_v40 = vmul.f32 %v5817_v53, %v4996_v9  ;;  %v5819_v58 = vpop.eup %5818 }
 0x7da   : > { %v2467_v34 = vmul.f32 %v5819_v58, %v4999_v55 }
 0x7de   : > { %s8242_s12 = scalar_lea.hbm %s8431_s21, %s4367_s3 }
 0x7e6   : > { %2502 = vrot.lane.b32.xlu1 %v2461_v1, %s6314_s24 }
 0x7e7   : > { %2500 = vrot.lane.b32.xlu0 %v2460_v7, %s6314_s24 }
 0x7ea   : > { %2504 = vrot.lane.b32.xlu1 %v2462_v48, %s6314_s24 }
 0x7eb   : > { %2508 = vrot.lane.b32.xlu0 %v2464_v17, %s6314_s24 }
 0x7ee   : > { %v2487_v6 = vpop.permute.xlu1 %2486  ;;  %2506 = vrot.lane.b32.xlu1 %v2463_v2, %s6314_s24 }
 0x7ef   : > { %2534 = vst.msk [vmem:[#allocation3 + $0x8] sm:$0xff] %vm2532_vm2, %v2487_v6  ;;  %2512 = vrot.lane.b32.xlu0 %v2466_v54, %s6314_s24  ;;  %v2485_v29 = vpop.permute.xlu0 %2484  ;;  %v5988_v54 = vld [vmem:[%s6692_s5 + $0x18] sm:$0xff] }
 0x7f0   : > { %2533 = vst.msk [vmem:[#allocation3] sm:$0xff] %vm2532_vm2, %v2485_v29  ;;  %v5989_v29 = vld [vmem:[%s6692_s5 + $0x20] sm:$0xff] }
 0x7f2   : > { %v2491_v49 = vpop.permute.xlu1 %2490  ;;  %2510 = vrot.lane.b32.xlu1 %v2465_v40, %s6314_s24 }
 0x7f3   : > { %2536 = vst.msk [vmem:[#allocation3 + $0x18] sm:$0xff] %vm2532_vm2, %v2491_v49  ;;  %v2489_v30 = vpop.permute.xlu0 %2488 }
 0x7f4   : > { %2535 = vst.msk [vmem:[#allocation3 + $0x10] sm:$0xff] %vm2532_vm2, %v2489_v30 }
 0x7f6   : > { %v2495_v36 = vpop.permute.xlu1 %2494  ;;  %2514 = vrot.lane.b32.xlu1 %v2467_v34, %s6314_s24  ;;  %v2550_v20 = vld [vmem:[#allocation3 + $0x8] sm:$0xff]  ;;  %s4109_s24 = sshll.u32 %s8192_s14, 4  ;;  %s8244_s24 = int_to_ptr.vmem [resolvable:$true] %s4109_s24 }
 0x7f7   : > { %2538 = vst.msk [vmem:[#allocation3 + $0x28] sm:$0xff] %vm2532_vm2, %v2495_v36  ;;  %v2493_v10 = vpop.permute.xlu0 %2492  ;;  %v2549_v11 = vld [vmem:[#allocation3] sm:$0xff]  ;;  %v5990_v36 = vld [vmem:[%s6692_s5 + $0x38] sm:$0xff]  ;;  %p6207_p2 = scmp.lt.s32.totalorder %s8244_s24, %s6205_s28 }
 0x7f8   : > { %2537 = vst.msk [vmem:[#allocation3 + $0x20] sm:$0xff] %vm2532_vm2, %v2493_v10  ;;  %5032 = vmatprep.mubr.f32.mxu0 %v2549_v11  ;;  %v5991_v11 = vld [vmem:[%s6692_s5 + $0x30] sm:$0xff] }
 0x7f9   : > { %5033 = vmatmul.mubr.f32.vlgmr.msra.gmra.mrb[64].mxu0 %v2550_v20 }
 0x7fa   : > { %v2552_v26 = vld [vmem:[#allocation3 + $0x18] sm:$0xff] }
 0x7fb   : > { %v2551_v63 = vld [vmem:[#allocation3 + $0x10] sm:$0xff] }
 0x7fc   : > { %5035 = vmatprep.mubr.f32.mxu0 %v2551_v63 }
 0x7fd   : > { %5036 = vmatmul.mubr.f32.gmra.mrb[66].mxu0 %v2552_v26 }
 0x7fe   : > { %v2554_v41 = vld [vmem:[#allocation3 + $0x28] sm:$0xff] }
 0x7ff   : > { %v2553_v21 = vld [vmem:[#allocation3 + $0x20] sm:$0xff] }
 0x800   : > { %5038 = vmatprep.mubr.f32.mxu0 %v2553_v21 }
 0x801   : > { %5039 = vmatmul.mubr.f32.gmra.mrb[68].mxu0 %v2554_v41 }
 0x823   : > { %v2499_v8 = vpop.permute.xlu1 %2498 }
 0x824   : > { %2540 = vst.msk [vmem:[#allocation3 + $0x38] sm:$0xff] %vm2532_vm2, %v2499_v8  ;;  %v2497_v12 = vpop.permute.xlu0 %2496  ;;  %v5992_v8 = vld [vmem:[%s6692_s5 + $0x48] sm:$0xff] }
 0x825   : > { %2539 = vst.msk [vmem:[#allocation3 + $0x30] sm:$0xff] %vm2532_vm2, %v2497_v12 }
 0x82b   : > { %v2556_v25 = vld [vmem:[#allocation3 + $0x38] sm:$0xff] }
 0x82c   : > { %v2555_v51 = vld [vmem:[#allocation3 + $0x30] sm:$0xff] }
 0x82d   : > { %5041 = vmatprep.mubr.f32.mxu0 %v2555_v51  ;;  %v5993_v51 = vld [vmem:[%s6692_s5 + $0x40] sm:$0xff] }
 0x82e   : > { %5042 = vmatmul.mubr.f32.gmra.mrb[70].mxu0 %v2556_v25 }
 0x85e   : > { %v1648_v3 = vpop.xlane.xlu0 %1647 }
 0x85f   : > { %5820 = vrcp.f32 %v1648_v3 }
 0x862   : > { %v1646_v32 = vpop.xlane.xlu1 %1645  ;;  %v2501_v22 = vpop.permute.xlu0 %2500 }
 0x863   : > { %5822 = vrcp.f32 %v1646_v32  ;;  %2541 = vst.msk [vmem:[#allocation3 + $0x40] sm:$0xff] %vm2532_vm2, %v2501_v22 }
 0x866   : > { %v2503_v24 = vpop.permute.xlu1 %2502  ;;  %v2509_v62 = vpop.permute.xlu0 %2508 }
 0x867   : > { %2542 = vst.msk [vmem:[#allocation3 + $0x48] sm:$0xff] %vm2532_vm2, %v2503_v24  ;;  %2545 = vst.msk [vmem:[#allocation3 + $0x60] sm:$0xff] %vm2532_vm2, %v2509_v62  ;;  %v5994_v62 = vld [vmem:[%s6692_s5 + $0x58] sm:$0xff] }
 0x869   : > { %v5821_v35 = vpop.eup %5820 }
 0x86a   : > { %v1825_v47 = vmul.f32 %v5821_v35, %v7414_v57  ;;  %v2505_v38 = vpop.permute.xlu1 %2504  ;;  %v2557_v45 = vld [vmem:[#allocation3 + $0x40] sm:$0xff]  ;;  %v2513_v37 = vpop.permute.xlu0 %2512 }
 0x86b   : > { %2543 = vst.msk [vmem:[#allocation3 + $0x50] sm:$0xff] %vm2532_vm2, %v2505_v38  ;;  %5044 = vmatprep.mubr.f32.mxu0 %v2557_v45 }
 0x86c   : > { %1841 = vst.msk [vmem:[#allocation3 + $0x78] sm:$0xff] %vm1295_vm0, %v1825_v47  ;;  %v5995_v47 = vld [vmem:[%s6692_s5 + $0x50] sm:$0xff] }
 0x86d   : > { %v5823_v31 = vpop.eup %5822 }
 0x86e   : > { %v1824_v23 = vmul.f32 %v5823_v31, %v7416_v39  ;;  %v2507_v13 = vpop.permute.xlu1 %2506  ;;  %v2558_v16 = vld [vmem:[#allocation3 + $0x48] sm:$0xff]  ;;  %v2561_v39 = vld [vmem:[#allocation3 + $0x60] sm:$0xff] }
 0x86f   : > { %2544 = vst.msk [vmem:[#allocation3 + $0x58] sm:$0xff] %vm2532_vm2, %v2507_v13  ;;  %5045 = vmatmul.mubr.f32.gmra.mrb[72].mxu0 %v2558_v16  ;;  %v5996_v16 = vld [vmem:[%s6692_s5 + $0x68] sm:$0xff] }
 0x870   : > { %1840 = vst.msk [vmem:[#allocation3 + $0x70] sm:$0xff] %vm1295_vm0, %v1824_v23 }
 0x871   : > { %2547 = vst.msk [vmem:[#allocation3 + $0x70] sm:$0xff] %vm2532_vm2, %v2513_v37 }
 0x872   : > { %v2511_v57 = vpop.permute.xlu1 %2510  ;;  %v2559_v56 = vld [vmem:[#allocation3 + $0x50] sm:$0xff] }
 0x873   : > { %2546 = vst.msk [vmem:[#allocation3 + $0x68] sm:$0xff] %vm2532_vm2, %v2511_v57  ;;  %5047 = vmatprep.mubr.f32.mxu0 %v2559_v56  ;;  %v5997_v57 = vld [vmem:[%s6692_s5 + $0x60] sm:$0xff] }
 0x876   : > { %v2515_v28 = vpop.permute.xlu1 %2514  ;;  %v2560_v5 = vld [vmem:[#allocation3 + $0x58] sm:$0xff] }
 0x877   : > { %2548 = vst.msk [vmem:[#allocation3 + $0x78] sm:$0xff] %vm2532_vm2, %v2515_v28  ;;  %5048 = vmatmul.mubr.f32.gmra.mrb[74].mxu0 %v2560_v5 }
 0x878   : > { %5050 = vmatprep.mubr.f32.mxu0 %v2561_v39  ;;  %v2563_v59 = vld [vmem:[#allocation3 + $0x70] sm:$0xff] }
 0x87a   : > { %v2562_v9 = vld [vmem:[#allocation3 + $0x68] sm:$0xff] }
 0x87b   : > { %5051 = vmatmul.mubr.f32.gmra.mrb[76].mxu0 %v2562_v9 }
 0x87c   : > { %5053 = vmatprep.mubr.f32.mxu0 %v2563_v59  ;;  %v5998_v59 = vld [vmem:[%s6692_s5 + $0x78] sm:$0xff] }
 0x87e   : > { %v2564_v55 = vld [vmem:[#allocation3 + $0x78] sm:$0xff] }
 0x87f   : > { %5054 = vmatmul.mubr.f32.gmra.mrb[78].mxu0 %v2564_v55 }
 0x880   : > { %3283 = vmatprep.mubr.f32.mxu0 %v8385_v14 }
 0x8cc   : > { %v5034_v46 = vpop.f32.mrb[64].mxu0 }
 0x8cd   : > { %v2660_v60 = vadd.f32 %v5034_v46, %v7554_v42  ;;  %v2654_v44 = vpop.f32.mrb[65].mxu0  ;;  %v5999_v46 = vld [vmem:[%s6692_s5 + $0x70] sm:$0xff]  ;;  %s8406_s5 = sld [smem:[#allocation50_spill]] }
 0x8ce   : > { %v2655_v18 = vadd.f32 %v7554_v42, %v2654_v44 }
 0x8cf   : > { %v7559_v27 = vadd.f32 %v5984_v43, %v2660_v60 }
 0x8d0   : > { %v7562_v52 = vadd.f32 %v5985_v15, %v2655_v18  ;;  %v5037_v50 = vpop.f32.mrb[66].mxu0 }
 0x8d1   : > { %8389 = vst [vmem:[#allocation25_spill] sm:$0xff] %v7559_v27  ;;  %2753 = vadd.xlane.f32.xlu1 %v7559_v27  ;;  %v2664_v61 = vpop.f32.mrb[67].mxu0  ;;  %v2670_v7 = vadd.f32 %v5037_v50, %v7554_v42 }
 0x8d2   : > { %8390 = vst [vmem:[#allocation26_spill] sm:$0xff] %v7562_v52  ;;  %v2665_v1 = vadd.f32 %v7554_v42, %v2664_v61  ;;  %2751 = vadd.xlane.f32.xlu0 %v7562_v52 }
 0x8d3   : > { %v7577_v6 = vadd.f32 %v5988_v54, %v2670_v7 }
 0x8d4   : > { %v7569_v4 = vadd.f32 %v5986_v0, %v2665_v1  ;;  %v5040_v48 = vpop.f32.mrb[68].mxu0 }
 0x8d5   : > { %v2680_v17 = vadd.f32 %v5040_v48, %v7554_v42  ;;  %v2674_v33 = vpop.f32.mrb[69].mxu0  ;;  %8393 = vst [vmem:[#allocation29_spill] sm:$0xff] %v7577_v6 }
 0x8d6   : > { %8391 = vst [vmem:[#allocation27_spill] sm:$0xff] %v7569_v4  ;;  %2755 = vadd.xlane.f32.xlu0 %v7569_v4  ;;  %v2675_v53 = vadd.f32 %v7554_v42, %v2674_v33 }
 0x8d7   : > { %v7574_v2 = vadd.f32 %v5987_v19, %v2680_v17 }
 0x8d8   : > { %v7583_v40 = vadd.f32 %v5989_v29, %v2675_v53  ;;  %v2973_v29 = vld [vmem:[#allocation13 + $0x8] sm:$0xff] }
 0x8d9   : > { %8392 = vst [vmem:[#allocation28_spill] sm:$0xff] %v7574_v2  ;;  %2761 = vadd.xlane.f32.xlu1 %v7574_v2 }
 0x8da   : > { %2757 = vadd.xlane.f32.xlu0 %v7577_v6  ;;  %8394 = vst [vmem:[#allocation30_spill] sm:$0xff] %v7583_v40 }
 0x8de   : > { %2759 = vadd.xlane.f32.xlu0 %v7583_v40 }
 0x901   : > { %v5043_v49 = vpop.f32.mrb[70].mxu0 }
 0x902   : > { %v2690_v58 = vadd.f32 %v5043_v49, %v7554_v42  ;;  %v2684_v30 = vpop.f32.mrb[71].mxu0  ;;  %v2977_v49 = vld [vmem:[#allocation13 + $0x28] sm:$0xff] }
 0x903   : > { %v2685_v34 = vadd.f32 %v7554_v42, %v2684_v30  ;;  %v5312_v30 = vpack.c.bf16 %v2977_v49, %v2973_v29  ;;  %v2997_v29 = vld [vmem:[#allocation13 + $0xc8] sm:$0xff] }
 0x904   : > { %v7589_v10 = vadd.f32 %v5990_v36, %v2690_v58  ;;  %v2975_v58 = vld [vmem:[#allocation13 + $0x18] sm:$0xff]  ;;  %v2972_v36 = vld [vmem:[#allocation13] sm:$0xff]  ;;  %v3001_v49 = vld [vmem:[#allocation13 + $0xe8] sm:$0xff] }
 0x905   : > { %v7592_v20 = vadd.f32 %v5991_v11, %v2685_v34  ;;  %v2979_v34 = vld [vmem:[#allocation13 + $0x38] sm:$0xff]  ;;  %v2976_v11 = vld [vmem:[#allocation13 + $0x20] sm:$0xff]  ;;  %5313 = vmatprep.subr.bf16.mxu1 %v5312_v30  ;;  %v5324_v30 = vpack.c.bf16 %v3001_v49, %v2997_v29 }
 0x906   : > { %8395 = vst [vmem:[#allocation31_spill] sm:$0xff] %v7589_v10  ;;  %2765 = vadd.xlane.f32.xlu1 %v7589_v10  ;;  %v3020_v29 = vld [vmem:[#allocation13 + $0x180] sm:$0xff] }
 0x907   : > { %8396 = vst [vmem:[#allocation32_spill] sm:$0xff] %v7592_v20  ;;  %2763 = vadd.xlane.f32.xlu0 %v7592_v20  ;;  %v3024_v49 = vld [vmem:[#allocation13 + $0x1a0] sm:$0xff] }
 0x942   : > { %v5046_v63 = vpop.f32.mrb[72].mxu0 }
 0x943   : > { %v2700_v26 = vadd.f32 %v5046_v63, %v7554_v42  ;;  %v2694_v21 = vpop.f32.mrb[73].mxu0 }
 0x944   : > { %v2695_v41 = vadd.f32 %v7554_v42, %v2694_v21  ;;  %v5314_v21 = vpack.c.bf16 %v2976_v11, %v2972_v36  ;;  %v2996_v36 = vld [vmem:[#allocation13 + $0xc0] sm:$0xff] }
 0x945   : > { %v7599_v12 = vadd.f32 %v5992_v8, %v2700_v26  ;;  %v5344_v26 = vpack.c.bf16 %v2979_v34, %v2975_v58  ;;  %v2978_v8 = vld [vmem:[#allocation13 + $0x30] sm:$0xff]  ;;  %v2999_v58 = vld [vmem:[#allocation13 + $0xd8] sm:$0xff]  ;;  %v3000_v11 = vld [vmem:[#allocation13 + $0xe0] sm:$0xff] }
 0x946   : > { %v7602_v25 = vadd.f32 %v5993_v51, %v2695_v41  ;;  %v2974_v41 = vld [vmem:[#allocation13 + $0x10] sm:$0xff]  ;;  %5315 = vmatpush1.bf16.msra.mxu1 %v5314_v21  ;;  %v3003_v34 = vld [vmem:[#allocation13 + $0xf8] sm:$0xff]  ;;  %v5326_v21 = vpack.c.bf16 %v3000_v11, %v2996_v36 }
 0x947   : > { %8397 = vst [vmem:[#allocation33_spill] sm:$0xff] %v7599_v12  ;;  %2769 = vadd.xlane.f32.xlu1 %v7599_v12  ;;  %5345 = vmatprep.subr.bf16.mxu0 %v5344_v26  ;;  %v5356_v26 = vpack.c.bf16 %v3003_v34, %v2999_v58  ;;  %v3022_v34 = vld [vmem:[#allocation13 + $0x190] sm:$0xff] }
 0x948   : > { %8398 = vst [vmem:[#allocation34_spill] sm:$0xff] %v7602_v25  ;;  %2767 = vadd.xlane.f32.xlu0 %v7602_v25  ;;  %v3026_v36 = vld [vmem:[#allocation13 + $0x1b0] sm:$0xff] }
 0x949   : > { %v5370_v11 = vpack.c.bf16 %v3026_v36, %v3022_v34 }
 0x94a   : > { %v5049_v3 = vpop.f32.mrb[74].mxu0 }
 0x94b   : > { %v2710_v32 = vadd.f32 %v5049_v3, %v7554_v42  ;;  %v2704_v22 = vpop.f32.mrb[75].mxu0 }
 0x94c   : > { %v2705_v24 = vadd.f32 %v7554_v42, %v2704_v22 }
 0x94d   : > { %v7609_v35 = vadd.f32 %v5994_v62, %v2710_v32  ;;  %v5346_v32 = vpack.c.bf16 %v2978_v8, %v2974_v41  ;;  %v2981_v62 = vld [vmem:[#allocation13 + $0x48] sm:$0xff]  ;;  %v2998_v41 = vld [vmem:[#allocation13 + $0xd0] sm:$0xff] }
 0x94e   : > { %v7612_v38 = vadd.f32 %v5995_v47, %v2705_v24  ;;  %v5052_v45 = vpop.f32.mrb[76].mxu0  ;;  %v2985_v47 = vld [vmem:[#allocation13 + $0x68] sm:$0xff]  ;;  %v3002_v8 = vld [vmem:[#allocation13 + $0xf0] sm:$0xff] }
 0x94f   : > { %8399 = vst [vmem:[#allocation35_spill] sm:$0xff] %v7609_v35  ;;  %v2720_v31 = vadd.f32 %v5052_v45, %v7554_v42  ;;  %2773 = vadd.xlane.f32.xlu1 %v7609_v35  ;;  %v2714_v23 = vpop.f32.mrb[77].mxu0  ;;  %v2983_v45 = vld [vmem:[#allocation13 + $0x58] sm:$0xff]  ;;  %5347 = vmatpush1.bf16.msra.mxu0 %v5346_v32  ;;  %v3005_v32 = vld [vmem:[#allocation13 + $0x108] sm:$0xff] }
 0x950   : > { %8400 = vst [vmem:[#allocation36_spill] sm:$0xff] %v7612_v38  ;;  %v2715_v13 = vadd.f32 %v7554_v42, %v2714_v23  ;;  %2771 = vadd.xlane.f32.xlu0 %v7612_v38  ;;  %v2987_v23 = vld [vmem:[#allocation13 + $0x78] sm:$0xff] }
 0x951   : > { %v7619_v37 = vadd.f32 %v5996_v16, %v2720_v31  ;;  %v5316_v31 = vpack.c.bf16 %v2985_v47, %v2981_v62  ;;  %v2984_v16 = vld [vmem:[#allocation13 + $0x60] sm:$0xff]  ;;  %v3011_v47 = vld [vmem:[#allocation13 + $0x138] sm:$0xff] }
 0x952   : > { %v7622_v56 = vadd.f32 %v5997_v57, %v2715_v13  ;;  %v5055_v28 = vpop.f32.mrb[78].mxu0  ;;  %v2980_v13 = vld [vmem:[#allocation13 + $0x40] sm:$0xff] }
 0x953   : > { %8401 = vst [vmem:[#allocation37_spill] sm:$0xff] %v7619_v37  ;;  %v2730_v5 = vadd.f32 %v5055_v28, %v7554_v42  ;;  %2777 = vadd.xlane.f32.xlu1 %v7619_v37  ;;  %v2724_v39 = vpop.f32.mrb[79].mxu0  ;;  %v5348_v28 = vpack.c.bf16 %v2987_v23, %v2983_v45  ;;  %5317 = vmatprep.subr.bf16.mxu1 %v5316_v31  ;;  %v3004_v45 = vld [vmem:[#allocation13 + $0x100] sm:$0xff] }
 0x954   : > { %8402 = vst [vmem:[#allocation38_spill] sm:$0xff] %v7622_v56  ;;  %v2725_v9 = vadd.f32 %v7554_v42, %v2724_v39  ;;  %2775 = vadd.xlane.f32.xlu0 %v7622_v56  ;;  %v2982_v39 = vld [vmem:[#allocation13 + $0x50] sm:$0xff]  ;;  %v3008_v31 = vld [vmem:[#allocation13 + $0x120] sm:$0xff] }
 0x955   : > { %v7629_v55 = vadd.f32 %v5998_v59, %v2730_v5  ;;  %v5318_v5 = vpack.c.bf16 %v2984_v16, %v2980_v13  ;;  %v2989_v59 = vld [vmem:[#allocation13 + $0x88] sm:$0xff]  ;;  %5349 = vmatprep.subr.bf16.mxu0 %v5348_v28  ;;  %v5330_v13 = vpack.c.bf16 %v3008_v31, %v3004_v45  ;;  %v3006_v16 = vld [vmem:[#allocation13 + $0x110] sm:$0xff] }
 0x956   : > { %v7632_v60 = vadd.f32 %v5999_v46, %v2725_v9  ;;  %v2986_v9 = vld [vmem:[#allocation13 + $0x70] sm:$0xff] }
 0x957   : > { %8403 = vst [vmem:[#allocation39_spill] sm:$0xff] %v7629_v55  ;;  %2781 = vadd.xlane.f32.xlu1 %v7629_v55  ;;  %5319 = vmatpush1.bf16.msra.mxu1 %v5318_v5  ;;  %v3010_v28 = vld [vmem:[#allocation13 + $0x130] sm:$0xff] }
 0x958   : > { %8404 = vst [vmem:[#allocation40_spill] sm:$0xff] %v7632_v60  ;;  %2779 = vadd.xlane.f32.xlu0 %v7632_v60  ;;  %v5362_v5 = vpack.c.bf16 %v3010_v28, %v3006_v16  ;;  %v3034_v45 = vld [vmem:[#allocation13 + $0x1f0] sm:$0xff] }
 0x95e   : > { %v2754_v44 = vpop.xlane.xlu1 %2753 }
 0x95f   : > { %v2785_v18 = vmul.f32 0.0078125, %v2754_v44  ;;  %v2752_v43 = vpop.xlane.xlu0 %2751  ;;  %v5350_v44 = vpack.c.bf16 %v2986_v9, %v2982_v39  ;;  %v3013_v39 = vld [vmem:[#allocation13 + $0x148] sm:$0xff] }
 0x960   : > { %v2784_v15 = vmul.f32 0.0078125, %v2752_v43  ;;  %v2991_v43 = vld [vmem:[#allocation13 + $0x98] sm:$0xff]  ;;  %v3017_v9 = vld [vmem:[#allocation13 + $0x168] sm:$0xff] }
 0x961   : > { %v7637_v50 = vsub.f32 %v7559_v27, %v2785_v18  ;;  %v2993_v18 = vld [vmem:[#allocation13 + $0xa8] sm:$0xff]  ;;  %5351 = vmatpush1.bf16.msra.mxu0 %v5350_v44  ;;  %v3019_v44 = vld [vmem:[#allocation13 + $0x178] sm:$0xff] }
 0x962   : > { %v7640_v42 = vsub.f32 %v7562_v52, %v2784_v15  ;;  %v2995_v15 = vld [vmem:[#allocation13 + $0xb8] sm:$0xff] }
 0x963   : > { %v2756_v61 = vpop.xlane.xlu0 %2755  ;;  %v2817_v1 = vmul.f32 %v7637_v50, %v7637_v50 }
 0x964   : > { %v2786_v7 = vmul.f32 0.0078125, %v2756_v61  ;;  %v2816_v0 = vmul.f32 %v7640_v42, %v7640_v42 }
 0x965   : > { %2834 = vadd.xlane.f32.xlu1 %v2817_v1  ;;  %v5320_v1 = vpack.c.bf16 %v2993_v18, %v2989_v59  ;;  %v3015_v59 = vld [vmem:[#allocation13 + $0x158] sm:$0xff]  ;;  %v3012_v18 = vld [vmem:[#allocation13 + $0x140] sm:$0xff] }
 0x966   : > { %v7647_v48 = vsub.f32 %v7569_v4, %v2786_v7  ;;  %v2762_v17 = vpop.xlane.xlu1 %2761  ;;  %2832 = vadd.xlane.f32.xlu0 %v2816_v0  ;;  %v5352_v7 = vpack.c.bf16 %v2995_v15, %v2991_v43  ;;  %v2988_v0 = vld [vmem:[#allocation13 + $0x80] sm:$0xff]  ;;  %v5364_v15 = vpack.c.bf16 %v3019_v44, %v3015_v59 }
 0x967   : > { %v2789_v33 = vmul.f32 0.0078125, %v2762_v17  ;;  %v2758_v19 = vpop.xlane.xlu0 %2757  ;;  %v2992_v17 = vld [vmem:[#allocation13 + $0xa0] sm:$0xff]  ;;  %5321 = vmatprep.subr.bf16.mxu1 %v5320_v1  ;;  %v3014_v1 = vld [vmem:[#allocation13 + $0x150] sm:$0xff] }
 0x968   : > { %v2787_v54 = vmul.f32 0.0078125, %v2758_v19  ;;  %v2818_v53 = vmul.f32 %v7647_v48, %v7647_v48  ;;  %v5322_v19 = vpack.c.bf16 %v2992_v17, %v2988_v0  ;;  %5353 = vmatprep.subr.bf16.mxu0 %v5352_v7  ;;  %v3016_v43 = vld [vmem:[#allocation13 + $0x160] sm:$0xff]  ;;  %v3018_v7 = vld [vmem:[#allocation13 + $0x170] sm:$0xff]  ;;  %v3021_v17 = vld [vmem:[#allocation13 + $0x188] sm:$0xff] }
 0x969   : > { %v7655_v51 = vsub.f32 %v7574_v2, %v2789_v33  ;;  %v2990_v33 = vld [vmem:[#allocation13 + $0x90] sm:$0xff]  ;;  %v5366_v0 = vpack.c.bf16 %v3018_v7, %v3014_v1 }
 0x96a   : > { %v7652_v63 = vsub.f32 %v7577_v6, %v2787_v54  ;;  %2836 = vadd.xlane.f32.xlu0 %v2818_v53  ;;  %v2994_v54 = vld [vmem:[#allocation13 + $0xb0] sm:$0xff]  ;;  %5323 = vmatpush1.bf16.msra.mxu1 %v5322_v19  ;;  %v3023_v19 = vld [vmem:[#allocation13 + $0x198] sm:$0xff] }
 0x96b   : > { %v2760_v3 = vpop.xlane.xlu0 %2759  ;;  %v2821_v46 = vmul.f32 %v7655_v51, %v7655_v51  ;;  %v5354_v53 = vpack.c.bf16 %v2994_v54, %v2990_v33  ;;  %5325 = vmatprep.subr.bf16.mxu1 %v5324_v30  ;;  %v3025_v33 = vld [vmem:[#allocation13 + $0x1a8] sm:$0xff]  ;;  %v5338_v30 = vpack.c.bf16 %v3024_v49, %v3020_v29 }
 0x96c   : > { %v2788_v22 = vmul.f32 0.0078125, %v2760_v3  ;;  %v2819_v24 = vmul.f32 %v7652_v63, %v7652_v63  ;;  %v5358_v3 = vpack.c.bf16 %v3002_v8, %v2998_v41  ;;  %v5336_v54 = vpack.c.bf16 %v3025_v33, %v3021_v17  ;;  %v3031_v41 = vld [vmem:[#allocation13 + $0x1d8] sm:$0xff] }
 0x96d   : > { %5355 = vmatpush1.bf16.msra.mxu0 %v5354_v53  ;;  %v3027_v53 = vld [vmem:[#allocation13 + $0x1b8] sm:$0xff] }
 0x96e   : > { %v7660_v57 = vsub.f32 %v7583_v40, %v2788_v22  ;;  %2838 = vadd.xlane.f32.xlu1 %v2819_v24  ;;  %5357 = vmatprep.subr.bf16.mxu0 %v5356_v26  ;;  %v3009_v22 = vld [vmem:[#allocation13 + $0x128] sm:$0xff]  ;;  %v3007_v24 = vld [vmem:[#allocation13 + $0x118] sm:$0xff]  ;;  %v5368_v58 = vpack.c.bf16 %v3027_v53, %v3023_v19 }
 0x96f   : > { %5327 = vmatpush1.bf16.msra.mxu1 %v5326_v21  ;;  %v5328_v62 = vpack.c.bf16 %v3009_v22, %v3005_v32  ;;  %v5360_v23 = vpack.c.bf16 %v3011_v47, %v3007_v24  ;;  %v3029_v26 = vld [vmem:[#allocation13 + $0x1c8] sm:$0xff]  ;;  %v3028_v32 = vld [vmem:[#allocation13 + $0x1c0] sm:$0xff]  ;;  %v3030_v47 = vld [vmem:[#allocation13 + $0x1d0] sm:$0xff] }
 0x970   : > { %v2820_v61 = vmul.f32 %v7660_v57, %v7660_v57  ;;  %v3033_v21 = vld [vmem:[#allocation13 + $0x1e8] sm:$0xff]  ;;  %v3032_v22 = vld [vmem:[#allocation13 + $0x1e0] sm:$0xff]  ;;  %v5374_v31 = vpack.c.bf16 %v3034_v45, %v3030_v47 }
 0x971   : > { %5359 = vmatpush1.bf16.msra.mxu0 %v5358_v3  ;;  %5329 = vmatprep.subr.bf16.mxu1 %v5328_v62  ;;  %v5340_v8 = vpack.c.bf16 %v3033_v21, %v3029_v26  ;;  %v3035_v3 = vld [vmem:[#allocation13 + $0x1f8] sm:$0xff]  ;;  %v5342_v62 = vpack.c.bf16 %v3032_v22, %v3028_v32 }
 0x972   : > { %2842 = vadd.xlane.f32.xlu1 %v2821_v46  ;;  %2840 = vadd.xlane.f32.xlu0 %v2820_v61  ;;  %v5332_v46 = vpack.c.bf16 %v3017_v9, %v3013_v39  ;;  %v5334_v61 = vpack.c.bf16 %v3016_v43, %v3012_v18  ;;  %v5372_v24 = vpack.c.bf16 %v3035_v3, %v3031_v41 }
 0x973   : > { %5361 = vmatprep.subr.bf16.mxu0 %v5360_v23  ;;  %5331 = vmatpush1.bf16.msra.mxu1 %v5330_v13 }
 0x974   : > { %5333 = vmatprep.subr.bf16.mxu1 %v5332_v46 }
 0x975   : > { %5363 = vmatpush1.bf16.msra.mxu0 %v5362_v5 }
 0x976   : > { %5365 = vmatprep.subr.bf16.mxu0 %v5364_v15 }
 0x977   : > { %5335 = vmatpush1.bf16.msra.mxu1 %v5334_v61 }
 0x978   : > { %5337 = vmatprep.subr.bf16.mxu1 %v5336_v54 }
 0x979   : > { %5367 = vmatpush1.bf16.msra.mxu0 %v5366_v0 }
 0x97a   : > { %5369 = vmatprep.subr.bf16.mxu0 %v5368_v58 }
 0x97b   : > { %5339 = vmatpush1.bf16.msra.mxu1 %v5338_v30 }
 0x97c   : > { %5341 = vmatprep.subr.bf16.mxu1 %v5340_v8 }
 0x97d   : > { %5371 = vmatpush1.bf16.msra.mxu0 %v5370_v11 }
 0x97e   : > { %5373 = vmatprep.subr.bf16.mxu0 %v5372_v24 }
 0x97f   : > { %5343 = vmatpush1.bf16.msra.mxu1 %v5342_v62 }
 0x981   : > { %5375 = vmatpush1.bf16.msra.mxu0 %v5374_v31 }
 0x993   : > { %v2766_v23 = vpop.xlane.xlu1 %2765 }
 0x994   : > { %v2791_v13 = vmul.f32 0.0078125, %v2766_v23  ;;  %v2764_v16 = vpop.xlane.xlu0 %2763 }
 0x995   : > { %v2790_v28 = vmul.f32 0.0078125, %v2764_v16 }
 0x996   : > { %v7667_v5 = vsub.f32 %v7589_v10, %v2791_v13 }
 0x997   : > { %v7670_v39 = vsub.f32 %v7592_v20, %v2790_v28 }
 0x998   : > { %v2823_v9 = vmul.f32 %v7667_v5, %v7667_v5 }
 0x999   : > { %v2822_v59 = vmul.f32 %v7670_v39, %v7670_v39 }
 0x99a   : > { %2846 = vadd.xlane.f32.xlu1 %v2823_v9 }
 0x99b   : > { %2844 = vadd.xlane.f32.xlu0 %v2822_v59 }
 0x9d4   : > { %v2770_v46 = vpop.xlane.xlu1 %2769 }
 0x9d5   : > { %v2793_v44 = vmul.f32 0.0078125, %v2770_v46  ;;  %v2768_v18 = vpop.xlane.xlu0 %2767 }
 0x9d6   : > { %v2792_v43 = vmul.f32 0.0078125, %v2768_v18 }
 0x9d7   : > { %v7677_v15 = vsub.f32 %v7599_v12, %v2793_v44 }
 0x9d8   : > { %v7680_v61 = vsub.f32 %v7602_v25, %v2792_v43 }
 0x9d9   : > { %v2825_v1 = vmul.f32 %v7677_v15, %v7677_v15 }
 0x9da   : > { %v2824_v7 = vmul.f32 %v7680_v61, %v7680_v61 }
 0x9db   : > { %2850 = vadd.xlane.f32.xlu1 %v2825_v1 }
 0x9dc   : > { %v2774_v0 = vpop.xlane.xlu1 %2773  ;;  %2848 = vadd.xlane.f32.xlu0 %v2824_v7 }
 0x9dd   : > { %v2795_v17 = vmul.f32 0.0078125, %v2774_v0  ;;  %v2772_v33 = vpop.xlane.xlu0 %2771 }
 0x9de   : > { %v2794_v19 = vmul.f32 0.0078125, %v2772_v33 }
 0x9df   : > { %v7687_v54 = vsub.f32 %v7609_v35, %v2795_v17 }
 0x9e0   : > { %v7690_v53 = vsub.f32 %v7612_v38, %v2794_v19  ;;  %v2778_v29 = vpop.xlane.xlu1 %2777 }
 0x9e1   : > { %v2797_v49 = vmul.f32 0.0078125, %v2778_v29  ;;  %v2776_v58 = vpop.xlane.xlu0 %2775  ;;  %v2827_v30 = vmul.f32 %v7687_v54, %v7687_v54 }
 0x9e2   : > { %v2796_v34 = vmul.f32 0.0078125, %v2776_v58  ;;  %v2826_v36 = vmul.f32 %v7690_v53, %v7690_v53 }
 0x9e3   : > { %v7697_v11 = vsub.f32 %v7619_v37, %v2797_v49  ;;  %2854 = vadd.xlane.f32.xlu1 %v2827_v30  ;;  %v7719_v30 = vld [vmem:[%s8405_s16] ss:$0 sm:$0xff]  ;;  %s6200_s16 = scalar_lea.vmem %s8244_s24, 2048 }
 0x9e4   : > { %v7700_v26 = vsub.f32 %v7622_v56, %v2796_v34  ;;  %v2782_v21 = vpop.xlane.xlu1 %2781  ;;  %2852 = vadd.xlane.f32.xlu0 %v2826_v36  ;;  %p6201_p6 = scmp.ne.s32.totalorder %s8244_s24, %s6200_s16 }
 0x9e5   : > { %v2799_v41 = vmul.f32 0.0078125, %v2782_v21  ;;  %v2780_v8 = vpop.xlane.xlu0 %2779  ;;  %v2829_v3 = vmul.f32 %v7697_v11, %v7697_v11  ;;  %v7726_v21 = vld [vmem:[%s8406_s5] ss:$0 sm:$0xff]  ;;  %s6206_s5 = scalar_lea.vmem %s6205_s28, 4096 }
 0x9e6   : > { %v2798_v32 = vmul.f32 0.0078125, %v2780_v8  ;;  %v2828_v22 = vmul.f32 %v7700_v26, %v7700_v26  ;;  %p6202_p7 = pnand %p6201_p6, %p8433_p0  ;;  %p6208_p4 = scmp.lt.s32.totalorder %s6206_s5, %s6200_s16 }
 0x9e7   : > { %v7707_v24 = vsub.f32 %v7629_v55, %v2799_v41  ;;  %2858 = vadd.xlane.f32.xlu1 %v2829_v3 }
 0x9e8   : > { %v7710_v62 = vsub.f32 %v7632_v60, %v2798_v32  ;;  %2856 = vadd.xlane.f32.xlu0 %v2828_v22  ;;  %p6203_p5 = pneg %p6202_p7  ;;  %p6209_p9 = por %p6208_p4, %p6207_p2 }
 0x9e9   : > { %v2831_v47 = vmul.f32 %v7707_v24, %v7707_v24 }
 0x9ea   : > { %v2830_v45 = vmul.f32 %v7710_v62, %v7710_v62  ;;  %p6210_p1 = pnand %p6209_p9, %p6203_p5 }
 0x9eb   : > { %2862 = vadd.xlane.f32.xlu1 %v2831_v47 }
 0x9ec   : > { %2860 = vadd.xlane.f32.xlu0 %v2830_v45 }
 0x9f2   : > { %v2835_v31 = vpop.xlane.xlu1 %2834 }
 0x9f3   : > { %v2865_v23 = vmul.f32 0.0078125, %v2835_v31  ;;  %v2833_v13 = vpop.xlane.xlu0 %2832 }
 0x9f4   : > { %v2864_v16 = vmul.f32 0.0078125, %v2833_v13 }
 0x9f5   : > { %v2881_v28 = vadd.f32 1e-05, %v2865_v23 }
 0x9f6   : > { %v2880_v9 = vadd.f32 1e-05, %v2864_v16 }
 0x9f7   : > { %5824 = vrsqrt.f32 %v2881_v28  ;;  %v2837_v59 = vpop.xlane.xlu0 %2836 }
 0x9f8   : > { %5826 = vrsqrt.f32 %v2880_v9  ;;  %v2866_v46 = vmul.f32 0.0078125, %v2837_v59 }
 0x9fa   : > { %v2882_v44 = vadd.f32 1e-05, %v2866_v46 }
 0x9fb   : > { %v2839_v18 = vpop.xlane.xlu1 %2838 }
 0x9fc   : > { %5828 = vrsqrt.f32 %v2882_v44  ;;  %v2867_v43 = vmul.f32 0.0078125, %v2839_v18  ;;  %v3716_v44 = vld [vmem:[#allocation15 + $0x80] sm:$0xff] }
 0x9fd   : > { %v3748_v18 = vld [vmem:[#allocation15 + $0x180] sm:$0xff] }
 0x9fe   : > { %v2883_v1 = vadd.f32 1e-05, %v2867_v43 }
 0x9ff   : > { %v2843_v7 = vpop.xlane.xlu1 %2842  ;;  %v2841_v0 = vpop.xlane.xlu0 %2840 }
 0xa00   : > { %5830 = vrsqrt.f32 %v2883_v1  ;;  %v2869_v17 = vmul.f32 0.0078125, %v2843_v7  ;;  %v2868_v33 = vmul.f32 0.0078125, %v2841_v0  ;;  %v3749_v1 = vld [vmem:[#allocation15 + $0x188] sm:$0xff]  ;;  %v3700_v7 = vld [vmem:[#allocation15] sm:$0xff] }
 0xa01   : > { %v5825_v19 = vpop.eup %5824  ;;  %v3701_v0 = vld [vmem:[#allocation15 + $0x8] sm:$0xff] }
 0xa02   : > { %v5827_v29 = vpop.eup %5826  ;;  %v2885_v49 = vadd.f32 1e-05, %v2869_v17  ;;  %v2884_v58 = vadd.f32 1e-05, %v2868_v33  ;;  %v2913_v36 = vmul.f32 %v5825_v19, %v7637_v50  ;;  %v7754_v17 = vpack.c.bf16 %v3749_v1, %v3748_v18  ;;  %v3732_v19 = vld [vmem:[#allocation15 + $0x100] sm:$0xff] }
 0xa03   : > { %v2912_v34 = vmul.f32 %v5827_v29, %v7640_v42  ;;  %v5378_v33 = vpack.c.bf16 %v3701_v0, %v3700_v7  ;;  %v3733_v29 = vld [vmem:[#allocation15 + $0x108] sm:$0xff] }
 0xa04   : > { %5832 = vrsqrt.f32 %v2884_v58  ;;  %v2935_v32 = vmul.f32 %v7719_v30, %v2913_v36  ;;  %v7758_v58 = vpack.c.bf16 %v3733_v29, %v3732_v19  ;;  %v3750_v36 = vld [vmem:[#allocation15 + $0x190] sm:$0xff]  ;;  %5409 = vmatprep.subr.bf16.mxu0 %v7754_v17 }
 0xa05   : > { %v2934_v41 = vmul.f32 %v7719_v30, %v2912_v34  ;;  %5834 = vrsqrt.f32 %v2885_v49  ;;  %v3718_v49 = vld [vmem:[#allocation15 + $0x90] sm:$0xff]  ;;  %v3719_v34 = vld [vmem:[#allocation15 + $0x98] sm:$0xff] }
 0xa06   : > { %v5829_v8 = vpop.eup %5828  ;;  %v2957_v50 = vadd.f32 %v7726_v21, %v2935_v32  ;;  %v3702_v32 = vld [vmem:[#allocation15 + $0x10] sm:$0xff] }
 0xa07   : > { %v2956_v3 = vadd.f32 %v7726_v21, %v2934_v41  ;;  %v2914_v22 = vmul.f32 %v5829_v8, %v7647_v48  ;;  %v3751_v41 = vld [vmem:[#allocation15 + $0x198] sm:$0xff]  ;;  %v5380_v8 = vpack.c.bf16 %v3719_v34, %v3718_v49 }
 0xa09   : > { %3123 = vmatmul.mubr.f32.vlgmr.msra.gmra.mrb[48].mxu1 %v2956_v3  ;;  %3284 = vmatmul.mubr.f32.vlgmr.msra.gmra.mrb[80].mxu0 %v2956_v3  ;;  %v2936_v47 = vmul.f32 %v7719_v30, %v2914_v22  ;;  %v7761_v3 = vpack.c.bf16 %v3751_v41, %v3750_v36  ;;  %v3703_v22 = vld [vmem:[#allocation15 + $0x18] sm:$0xff] }
 0xa0a   : > { %v5831_v42 = vpop.eup %5830  ;;  %3128 = vmatprep.mubr.f32.mxu1 %v8385_v14  ;;  %3289 = vmatprep.mubr.f32.mxu0 %v8385_v14 }
 0xa0b   : > { %v2915_v45 = vmul.f32 %v5831_v42, %v7652_v63  ;;  %v2958_v31 = vadd.f32 %v7726_v21, %v2936_v47  ;;  %v3734_v42 = vld [vmem:[#allocation15 + $0x110] sm:$0xff]  ;;  %5411 = vmatpush3.bf16.msra.mxu0 %v7758_v58  ;;  %v3735_v47 = vld [vmem:[#allocation15 + $0x118] sm:$0xff] }
 0xa0c   : > { %5413 = vmatprep.subr.bf16.mxu0 %v7761_v3 }
 0xa0d   : > { %3129 = vmatmul.mubr.f32.gmra.mrb[50].mxu1 %v2957_v50  ;;  %3290 = vmatmul.mubr.f32.gmra.mrb[82].mxu0 %v2957_v50  ;;  %v2937_v23 = vmul.f32 %v7719_v30, %v2915_v45  ;;  %v5382_v50 = vpack.c.bf16 %v3703_v22, %v3702_v32  ;;  %v3720_v45 = vld [vmem:[#allocation15 + $0xa0] sm:$0xff]  ;;  %v3754_v32 = vld [vmem:[#allocation15 + $0x1b0] sm:$0xff] }
 0xa0e   : > { %3134 = vmatprep.mubr.f32.mxu1 %v8385_v14  ;;  %3295 = vmatprep.mubr.f32.mxu0 %v8385_v14  ;;  %v5833_v48 = vpop.eup %5832 }
 0xa0f   : > { %v5835_v13 = vpop.eup %5834  ;;  %v2916_v16 = vmul.f32 %v5833_v48, %v7660_v57  ;;  %v2959_v63 = vadd.f32 %v7726_v21, %v2937_v23  ;;  %v3721_v48 = vld [vmem:[#allocation15 + $0xa8] sm:$0xff] }
 0xa10   : > { %v2917_v9 = vmul.f32 %v5835_v13, %v7655_v51  ;;  %v3717_v51 = vld [vmem:[#allocation15 + $0x88] sm:$0xff]  ;;  %v5384_v23 = vpack.c.bf16 %v3721_v48, %v3720_v45  ;;  %v3752_v13 = vld [vmem:[#allocation15 + $0x1a0] sm:$0xff] }
 0xa11   : > { %3135 = vmatmul.mubr.f32.gmra.mrb[52].mxu1 %v2958_v31  ;;  %3296 = vmatmul.mubr.f32.gmra.mrb[84].mxu0 %v2958_v31  ;;  %v2938_v28 = vmul.f32 %v7719_v30, %v2916_v16  ;;  %v5376_v43 = vpack.c.bf16 %v3717_v51, %v3716_v44  ;;  %v7765_v31 = vpack.c.bf16 %v3735_v47, %v3734_v42  ;;  %v3753_v16 = vld [vmem:[#allocation15 + $0x1a8] sm:$0xff]  ;;  %v3755_v42 = vld [vmem:[#allocation15 + $0x1b8] sm:$0xff] }
 0xa12   : > { %3140 = vmatprep.mubr.f32.mxu1 %v8385_v14  ;;  %3301 = vmatprep.mubr.f32.mxu0 %v8385_v14  ;;  %v2939_v59 = vmul.f32 %v7719_v30, %v2917_v9  ;;  %v3705_v9 = vld [vmem:[#allocation15 + $0x28] sm:$0xff]  ;;  %v3707_v47 = vld [vmem:[#allocation15 + $0x38] sm:$0xff]  ;;  %v7784_v45 = vpack.c.bf16 %v3755_v42, %v3754_v32 }
 0xa13   : > { %v2960_v57 = vadd.f32 %v7726_v21, %v2938_v28  ;;  %5377 = vmatprep.subr.bf16.mxu1 %v5376_v43  ;;  %v7767_v28 = vpack.c.bf16 %v3753_v16, %v3752_v13  ;;  %5415 = vmatpush3.bf16.msra.mxu0 %v7765_v31  ;;  %v3739_v13 = vld [vmem:[#allocation15 + $0x138] sm:$0xff] }
 0xa14   : > { %v2961_v46 = vadd.f32 %v7726_v21, %v2939_v59  ;;  %5379 = vmatpush3.bf16.msra.mxu1 %v5378_v33  ;;  %v3737_v59 = vld [vmem:[#allocation15 + $0x128] sm:$0xff]  ;;  %v3743_v42 = vld [vmem:[#allocation15 + $0x158] sm:$0xff] }
 0xa15   : > { %3141 = vmatmul.mubr.f32.gmra.mrb[54].mxu1 %v2959_v63  ;;  %3302 = vmatmul.mubr.f32.gmra.mrb[86].mxu0 %v2959_v63  ;;  %v3704_v63 = vld [vmem:[#allocation15 + $0x20] sm:$0xff] }
 0xa16   : > { %3146 = vmatprep.mubr.f32.mxu1 %v8385_v14  ;;  %3307 = vmatprep.mubr.f32.mxu0 %v8385_v14 }
 0xa17   : > { %5381 = vmatprep.subr.bf16.mxu1 %v5380_v8  ;;  %5417 = vmatprep.subr.bf16.mxu0 %v7767_v28 }
 0xa18   : > { %5383 = vmatpush3.bf16.msra.mxu1 %v5382_v50  ;;  %v3706_v50 = vld [vmem:[#allocation15 + $0x30] sm:$0xff] }
 0xa19   : > { %3147 = vmatmul.mubr.f32.gmra.mrb[56].mxu1 %v2960_v57  ;;  %3308 = vmatmul.mubr.f32.gmra.mrb[88].mxu0 %v2960_v57  ;;  %v3736_v57 = vld [vmem:[#allocation15 + $0x120] sm:$0xff]  ;;  %v5390_v48 = vpack.c.bf16 %v3707_v47, %v3706_v50 }
 0xa1a   : > { %3152 = vmatprep.mubr.f32.mxu1 %v8385_v14  ;;  %3313 = vmatprep.mubr.f32.mxu0 %v8385_v14  ;;  %v7770_v44 = vpack.c.bf16 %v3737_v59, %v3736_v57  ;;  %v3756_v57 = vld [vmem:[#allocation15 + $0x1c0] sm:$0xff] }
 0xa1b   : > { %5385 = vmatprep.subr.bf16.mxu1 %v5384_v23  ;;  %v3738_v23 = vld [vmem:[#allocation15 + $0x130] sm:$0xff] }
 0xa1c   : > { %5419 = vmatpush3.bf16.msra.mxu0 %v7770_v44  ;;  %v7786_v16 = vpack.c.bf16 %v3739_v13, %v3738_v23 }
 0xa1d   : > { %3153 = vmatmul.mubr.f32.gmra.mrb[58].mxu1 %v2961_v46  ;;  %3314 = vmatmul.mubr.f32.gmra.mrb[90].mxu0 %v2961_v46  ;;  %v5386_v46 = vpack.c.bf16 %v3705_v9, %v3704_v63  ;;  %v3724_v63 = vld [vmem:[#allocation15 + $0xc0] sm:$0xff]  ;;  %v3725_v9 = vld [vmem:[#allocation15 + $0xc8] sm:$0xff] }
 0xa1e   : > { %3158 = vmatprep.mubr.f32.mxu1 %v8385_v14  ;;  %3319 = vmatprep.mubr.f32.mxu0 %v8385_v14  ;;  %v5392_v59 = vpack.c.bf16 %v3725_v9, %v3724_v63  ;;  %v3728_v63 = vld [vmem:[#allocation15 + $0xe0] sm:$0xff]  ;;  %v3729_v9 = vld [vmem:[#allocation15 + $0xe8] sm:$0xff] }
 0xa1f   : > { %5387 = vmatpush3.bf16.msra.mxu1 %v5386_v46  ;;  %5421 = vmatprep.subr.bf16.mxu0 %v7784_v45  ;;  %v3757_v46 = vld [vmem:[#allocation15 + $0x1c8] sm:$0xff] }
 0xa20   : > { %5423 = vmatpush3.bf16.msra.mxu0 %v7786_v16 }
 0xa27   : > { %v2847_v51 = vpop.xlane.xlu1 %2846 }
 0xa28   : > { %v2871_v18 = vmul.f32 0.0078125, %v2847_v51  ;;  %v2845_v43 = vpop.xlane.xlu0 %2844  ;;  %v3708_v51 = vld [vmem:[#allocation15 + $0x40] sm:$0xff] }
 0xa29   : > { %v2870_v1 = vmul.f32 0.0078125, %v2845_v43  ;;  %v7790_v43 = vpack.c.bf16 %v3757_v46, %v3756_v57  ;;  %v3760_v57 = vld [vmem:[#allocation15 + $0x1e0] sm:$0xff]  ;;  %v5400_v46 = vpack.c.bf16 %v3729_v9, %v3728_v63  ;;  %v3746_v9 = vld [vmem:[#allocation15 + $0x170] sm:$0xff] }
 0xa2a   : > { %v2887_v7 = vadd.f32 1e-05, %v2871_v18  ;;  %v3709_v18 = vld [vmem:[#allocation15 + $0x48] sm:$0xff] }
 0xa2b   : > { %v2886_v0 = vadd.f32 1e-05, %v2870_v1  ;;  %v5394_v1 = vpack.c.bf16 %v3709_v18, %v3708_v51  ;;  %5425 = vmatprep.subr.bf16.mxu0 %v7790_v43  ;;  %v3761_v51 = vld [vmem:[#allocation15 + $0x1e8] sm:$0xff]  ;;  %v3712_v18 = vld [vmem:[#allocation15 + $0x60] sm:$0xff] }
 0xa2c   : > { %5836 = vrsqrt.f32 %v2887_v7  ;;  %v3740_v7 = vld [vmem:[#allocation15 + $0x140] sm:$0xff] }
 0xa2d   : > { %5838 = vrsqrt.f32 %v2886_v0  ;;  %v3741_v0 = vld [vmem:[#allocation15 + $0x148] sm:$0xff] }
 0xa36   : > { %v5837_v33 = vpop.eup %5836 }
 0xa37   : > { %v5839_v19 = vpop.eup %5838  ;;  %v2919_v49 = vmul.f32 %v5837_v33, %v7667_v5  ;;  %v3722_v5 = vld [vmem:[#allocation15 + $0xb0] sm:$0xff]  ;;  %v7792_v33 = vpack.c.bf16 %v3741_v0, %v3740_v7  ;;  %v7802_v7 = vpack.c.bf16 %v3761_v51, %v3760_v57  ;;  %v3747_v57 = vld [vmem:[#allocation15 + $0x178] sm:$0xff] }
 0xa38   : > { %v2918_v29 = vmul.f32 %v5839_v19, %v7670_v39  ;;  %v3723_v39 = vld [vmem:[#allocation15 + $0xb8] sm:$0xff]  ;;  %v3726_v19 = vld [vmem:[#allocation15 + $0xd0] sm:$0xff] }
 0xa39   : > { %v2941_v41 = vmul.f32 %v7719_v30, %v2919_v49  ;;  %v5388_v22 = vpack.c.bf16 %v3723_v39, %v3722_v5  ;;  %v3758_v49 = vld [vmem:[#allocation15 + $0x1d0] sm:$0xff]  ;;  %5427 = vmatpush3.bf16.msra.mxu0 %v7792_v33 }
 0xa3a   : > { %v2940_v34 = vmul.f32 %v7719_v30, %v2918_v29  ;;  %v3727_v29 = vld [vmem:[#allocation15 + $0xd8] sm:$0xff] }
 0xa3b   : > { %v2963_v8 = vadd.f32 %v7726_v21, %v2941_v41  ;;  %5389 = vmatprep.subr.bf16.mxu1 %v5388_v22  ;;  %v3710_v41 = vld [vmem:[#allocation15 + $0x50] sm:$0xff] }
 0xa3c   : > { %v2962_v36 = vadd.f32 %v7726_v21, %v2940_v34  ;;  %5391 = vmatpush3.bf16.msra.mxu1 %v5390_v48  ;;  %v5396_v34 = vpack.c.bf16 %v3727_v29, %v3726_v19  ;;  %v3742_v22 = vld [vmem:[#allocation15 + $0x150] sm:$0xff]  ;;  %v3744_v19 = vld [vmem:[#allocation15 + $0x160] sm:$0xff]  ;;  %v3745_v29 = vld [vmem:[#allocation15 + $0x168] sm:$0xff] }
 0xa3d   : > { %5393 = vmatprep.subr.bf16.mxu1 %v5392_v59  ;;  %v7798_v48 = vpack.c.bf16 %v3743_v42, %v3742_v22  ;;  %v3763_v42 = vld [vmem:[#allocation15 + $0x1f8] sm:$0xff] }
 0xa3e   : > { %3159 = vmatmul.mubr.f32.gmra.mrb[60].mxu1 %v2962_v36  ;;  %3320 = vmatmul.mubr.f32.gmra.mrb[92].mxu0 %v2962_v36  ;;  %v3759_v36 = vld [vmem:[#allocation15 + $0x1d8] sm:$0xff] }
 0xa3f   : > { %3164 = vmatprep.mubr.f32.mxu1 %v8385_v14  ;;  %3325 = vmatprep.mubr.f32.mxu0 %v8385_v14  ;;  %v7796_v39 = vpack.c.bf16 %v3759_v36, %v3758_v49  ;;  %v7804_v49 = vpack.c.bf16 %v3745_v29, %v3744_v19  ;;  %v3730_v36 = vld [vmem:[#allocation15 + $0xf0] sm:$0xff] }
 0xa40   : > { %5395 = vmatpush3.bf16.msra.mxu1 %v5394_v1  ;;  %v3713_v1 = vld [vmem:[#allocation15 + $0x68] sm:$0xff] }
 0xa41   : > { %5397 = vmatprep.subr.bf16.mxu1 %v5396_v34  ;;  %5429 = vmatprep.subr.bf16.mxu0 %v7796_v39  ;;  %v5402_v0 = vpack.c.bf16 %v3713_v1, %v3712_v18  ;;  %8407 = vst [vmem:[#allocation41_spill] sm:$0xff] %v7804_v49 }
 0xa42   : > { %3165 = vmatmul.mubr.f32.gmra.mrb[62].mxu1 %v2963_v8  ;;  %3326 = vmatmul.mubr.f32.gmra.mrb[94].mxu0 %v2963_v8  ;;  %v3711_v8 = vld [vmem:[#allocation15 + $0x58] sm:$0xff] }
 0xa43   : > { %3170 = vmatprep.mubr.f32.mxu1 %v8385_v14  ;;  %3331 = vmatprep.mubr.f32.mxu0 %v8385_v14  ;;  %v5398_v32 = vpack.c.bf16 %v3711_v8, %v3710_v41  ;;  %v3731_v41 = vld [vmem:[#allocation15 + $0xf8] sm:$0xff]  ;;  %v3762_v8 = vld [vmem:[#allocation15 + $0x1f0] sm:$0xff] }
 0xa44   : > { %5431 = vmatpush3.bf16.msra.mxu0 %v7798_v48  ;;  %v5404_v22 = vpack.c.bf16 %v3731_v41, %v3730_v36 }
 0xa45   : > { %5399 = vmatpush3.bf16.msra.mxu1 %v5398_v32  ;;  %5433 = vmatprep.subr.bf16.mxu0 %v7802_v7 }
 0xa46   : > { %5401 = vmatprep.subr.bf16.mxu1 %v5400_v46  ;;  %v7810_v46 = vpack.c.bf16 %v3747_v57, %v3746_v9 }
 0xa48   : > { %5435 = vmatpush3.bf16.msra.mxu0 %v7804_v49  ;;  %8409 = vst [vmem:[#allocation43_spill] sm:$0xff] %v7810_v46 }
 0xa49   : > { %5403 = vmatpush3.bf16.msra.mxu1 %v5402_v0 }
 0xa4a   : > { %5405 = vmatprep.subr.bf16.mxu1 %v5404_v22 }
 0xa68   : > { %v2851_v5 = vpop.xlane.xlu1 %2850 }
 0xa69   : > { %v2873_v50 = vmul.f32 0.0078125, %v2851_v5  ;;  %v2849_v47 = vpop.xlane.xlu0 %2848 }
 0xa6a   : > { %v2872_v23 = vmul.f32 0.0078125, %v2849_v47  ;;  %v3715_v47 = vld [vmem:[#allocation15 + $0x78] sm:$0xff] }
 0xa6b   : > { %v2889_v13 = vadd.f32 1e-05, %v2873_v50  ;;  %v3714_v50 = vld [vmem:[#allocation15 + $0x70] sm:$0xff] }
 0xa6c   : > { %v2888_v59 = vadd.f32 1e-05, %v2872_v23  ;;  %v5406_v63 = vpack.c.bf16 %v3715_v47, %v3714_v50 }
 0xa6d   : > { %5840 = vrsqrt.f32 %v2889_v13  ;;  %v7808_v13 = vpack.c.bf16 %v3763_v42, %v3762_v8 }
 0xa6e   : > { %5842 = vrsqrt.f32 %v2888_v59  ;;  %5407 = vmatpush3.bf16.msra.mxu1 %v5406_v63 }
 0xa6f   : > { %8408 = vst [vmem:[#allocation42_spill] sm:$0xff] %v7808_v13  ;;  %5437 = vmatprep.subr.bf16.mxu0 %v7808_v13  ;;  %5440 = vmatprep.subr.bf16.mxu1 %v7754_v17 }
 0xa70   : > { %v2855_v34 = vpop.xlane.xlu1 %2854  ;;  %5439 = vmatpush3.bf16.msra.mxu0 %v7810_v46 }
 0xa71   : > { %v2875_v5 = vmul.f32 0.0078125, %v2855_v34  ;;  %v2853_v32 = vpop.xlane.xlu0 %2852 }
 0xa72   : > { %v2874_v23 = vmul.f32 0.0078125, %v2853_v32 }
 0xa73   : > { %v2891_v59 = vadd.f32 1e-05, %v2875_v5 }
 0xa74   : > { %v2890_v51 = vadd.f32 1e-05, %v2874_v23  ;;  %v2859_v18 = vpop.xlane.xlu1 %2858 }
 0xa75   : > { %5844 = vrsqrt.f32 %v2891_v59  ;;  %v2877_v1 = vmul.f32 0.0078125, %v2859_v18  ;;  %v2857_v0 = vpop.xlane.xlu0 %2856 }
 0xa76   : > { %5846 = vrsqrt.f32 %v2890_v51  ;;  %v2876_v19 = vmul.f32 0.0078125, %v2857_v0 }
 0xa77   : > { %v5841_v29 = vpop.eup %5840  ;;  %v2893_v36 = vadd.f32 1e-05, %v2877_v1 }
 0xa78   : > { %v5843_v34 = vpop.eup %5842  ;;  %v2892_v41 = vadd.f32 1e-05, %v2876_v19  ;;  %v2863_v8 = vpop.xlane.xlu1 %2862  ;;  %v2921_v22 = vmul.f32 %v5841_v29, %v7677_v15 }
 0xa79   : > { %v2861_v5 = vpop.xlane.xlu0 %2860  ;;  %v2920_v32 = vmul.f32 %v5843_v34, %v7680_v61  ;;  %v2879_v47 = vmul.f32 0.0078125, %v2863_v8 }
 0xa7a   : > { %5848 = vrsqrt.f32 %v2892_v41  ;;  %v2878_v42 = vmul.f32 0.0078125, %v2861_v5  ;;  %v2943_v63 = vmul.f32 %v7719_v30, %v2921_v22 }
 0xa7b   : > { %v2942_v50 = vmul.f32 %v7719_v30, %v2920_v32  ;;  %5850 = vrsqrt.f32 %v2893_v36  ;;  %v2895_v59 = vadd.f32 1e-05, %v2879_v47 }
 0xa7c   : > { %v2894_v23 = vadd.f32 1e-05, %v2878_v42  ;;  %v2965_v15 = vadd.f32 %v7726_v21, %v2943_v63 }
 0xa7d   : > { %v2964_v17 = vadd.f32 %v7726_v21, %v2942_v50 }
 0xa7e   : > { %5852 = vrsqrt.f32 %v2894_v23 }
 0xa7f   : > { %v5845_v9 = vpop.eup %5844  ;;  %3171 = vmatmul.mubr.f32.gmra.mrb[64].mxu1 %v2964_v17  ;;  %3332 = vmatmul.mubr.f32.gmra.mrb[96].mxu0 %v2964_v17  ;;  %5854 = vrsqrt.f32 %v2895_v59 }
 0xa80   : > { %v5847_v57 = vpop.eup %5846  ;;  %3176 = vmatprep.mubr.f32.mxu1 %v8385_v14  ;;  %3337 = vmatprep.mubr.f32.mxu0 %v8385_v14  ;;  %v2923_v51 = vmul.f32 %v5845_v9, %v7687_v54  ;;  %v3036_v9 = vld [vmem:[%s8410_s26] sm:$0xf] }
 0xa81   : > { %v2922_v61 = vmul.f32 %v5847_v57, %v7690_v53 }
 0xa82   : > { %v2945_v19 = vmul.f32 %v7719_v30, %v2923_v51 }
 0xa83   : > { %3177 = vmatmul.mubr.f32.gmra.mrb[66].mxu1 %v2965_v15  ;;  %3338 = vmatmul.mubr.f32.gmra.mrb[98].mxu0 %v2965_v15  ;;  %v2944_v18 = vmul.f32 %v7719_v30, %v2922_v61 }
 0xa84   : > { %v5849_v1 = vpop.eup %5848  ;;  %3182 = vmatprep.mubr.f32.mxu1 %v8385_v14  ;;  %3343 = vmatprep.mubr.f32.mxu0 %v8385_v14  ;;  %v2967_v54 = vadd.f32 %v7726_v21, %v2945_v19 }
 0xa85   : > { %v2966_v0 = vadd.f32 %v7726_v21, %v2944_v18  ;;  %v2924_v29 = vmul.f32 %v5849_v1, %v7700_v26  ;;  %v5851_v34 = vpop.eup %5850 }
 0xa86   : > { %v2925_v36 = vmul.f32 %v5851_v34, %v7697_v11 }
 0xa87   : > { %3183 = vmatmul.mubr.f32.gmra.mrb[68].mxu1 %v2966_v0  ;;  %3344 = vmatmul.mubr.f32.gmra.mrb[100].mxu0 %v2966_v0  ;;  %v2946_v53 = vmul.f32 %v7719_v30, %v2924_v29 }
 0xa88   : > { %3188 = vmatprep.mubr.f32.mxu1 %v8385_v14  ;;  %3349 = vmatprep.mubr.f32.mxu0 %v8385_v14  ;;  %v5853_v41 = vpop.eup %5852  ;;  %v2947_v8 = vmul.f32 %v7719_v30, %v2925_v36 }
 0xa89   : > { %v2968_v26 = vadd.f32 %v7726_v21, %v2946_v53  ;;  %v2926_v5 = vmul.f32 %v5853_v41, %v7710_v62  ;;  %v5855_v32 = vpop.eup %5854 }
 0xa8a   : > { %v2969_v11 = vadd.f32 %v7726_v21, %v2947_v8  ;;  %v2927_v42 = vmul.f32 %v5855_v32, %v7707_v24  ;;  %v3038_v24 = vlaneseq }
 0xa8b   : > { %3189 = vmatmul.mubr.f32.gmra.mrb[70].mxu1 %v2967_v54  ;;  %3350 = vmatmul.mubr.f32.gmra.mrb[102].mxu0 %v2967_v54  ;;  %v2948_v22 = vmul.f32 %v7719_v30, %v2926_v5 }
 0xa8c   : > { %3194 = vmatprep.mubr.f32.mxu1 %v8385_v14  ;;  %3355 = vmatprep.mubr.f32.mxu0 %v8385_v14  ;;  %v2949_v50 = vmul.f32 %v7719_v30, %v2927_v42  ;;  %v3039_v23 = vshrl.u32 %v3038_v24, 7 }
 0xa8d   : > { %v2970_v62 = vadd.f32 %v7726_v21, %v2948_v22 }
 0xa8e   : > { %v2971_v47 = vadd.f32 %v7726_v21, %v2949_v50  ;;  %v3040_v17 = vsub.s32 0, %v3039_v23  ;;  %v3048_v63 = vsub.s32 2, %v3039_v23  ;;  %v3044_v57 = vsub.s32 1, %v3039_v23 }
 0xa8f   : > { %3195 = vmatmul.mubr.f32.gmra.mrb[72].mxu1 %v2968_v26  ;;  %3356 = vmatmul.mubr.f32.gmra.mrb[104].mxu0 %v2968_v26  ;;  %v3052_v30 = vsub.s32 3, %v3039_v23 }
 0xa90   : > { %3200 = vmatprep.mubr.f32.mxu1 %v8385_v14  ;;  %3361 = vmatprep.mubr.f32.mxu0 %v8385_v14  ;;  %v7856_v59 = vrot.slane %v3036_v9, %v3040_v17  ;;  %v7858_v15 = vrot.slane %v3036_v9, %v3048_v63  ;;  %v7860_v61 = vrot.slane %v3036_v9, %v3044_v57 }
 0xa91   : > { %v7862_v51 = vrot.slane %v3036_v9, %v3052_v30 }
 0xa93   : > { %3201 = vmatmul.mubr.f32.gmra.mrb[74].mxu1 %v2969_v11  ;;  %3362 = vmatmul.mubr.f32.gmra.mrb[106].mxu0 %v2969_v11 }
 0xa94   : > { %3206 = vmatprep.mubr.f32.mxu1 %v8385_v14  ;;  %3367 = vmatprep.mubr.f32.mxu0 %v8385_v14 }
 0xa97   : > { %3207 = vmatmul.mubr.f32.gmra.mrb[76].mxu1 %v2970_v62  ;;  %3368 = vmatmul.mubr.f32.gmra.mrb[108].mxu0 %v2970_v62 }
 0xa98   : > { %3212 = vmatprep.mubr.f32.mxu1 %v8385_v14  ;;  %3373 = vmatprep.mubr.f32.mxu0 %v8385_v14 }
 0xa9b   : > { %3213 = vmatmul.mubr.f32.gmra.mrb[78].mxu1 %v2971_v47  ;;  %3374 = vmatmul.mubr.f32.gmra.mrb[110].mxu0 %v2971_v47 }
 0xadc   : > { %v3124_v14 = vpop.f32.mrb[48].mxu1  ;;  %v3285_v21 = vpop.f32.mrb[80].mxu0 }
 0xadd   : > { %v3125_v18 = vadd.f32 %v3124_v14, %v7856_v59  ;;  %v7866_v1 = vadd.f32 %v3285_v21, %v7858_v15  ;;  %v3126_v0 = vpop.f32.mrb[49].mxu1  ;;  %v3287_v19 = vpop.f32.mrb[81].mxu0 }
 0xade   : > { %v7869_v29 = vadd.f32 %v3126_v0, %v7860_v61  ;;  %v7872_v54 = vadd.f32 %v3287_v19, %v7862_v51 }
 0xadf   : > { %v3444_v34 = vmul.f32 0.70710677, %v3125_v18  ;;  %v3446_v53 = vmul.f32 0.70710677, %v7866_v1  ;;  %v3382_v25 = vmul.f32 0.5, %v7866_v1 }
 0xae0   : > { %v3130_v36 = vpop.f32.mrb[50].mxu1  ;;  %v3291_v41 = vpop.f32.mrb[82].mxu0  ;;  %v3445_v26 = vmul.f32 0.70710677, %v7869_v29  ;;  %v3447_v42 = vmul.f32 0.70710677, %v7872_v54 }
 0xae1   : > { %5856 = verf.f32 %v3444_v34  ;;  %v7877_v8 = vadd.f32 %v3130_v36, %v7856_v59  ;;  %v3132_v5 = vpop.f32.mrb[51].mxu1  ;;  %v3293_v32 = vpop.f32.mrb[83].mxu0  ;;  %v7888_v24 = vadd.f32 %v3291_v41, %v7858_v15  ;;  %v3383_v10 = vmul.f32 0.5, %v7872_v54 }
 0xae2   : > { %v7880_v11 = vadd.f32 %v3132_v5, %v7860_v61  ;;  %v7883_v22 = vadd.f32 %v3293_v32, %v7862_v51  ;;  %5858 = verf.f32 %v3446_v53 }
 0xae3   : > { %v3448_v47 = vmul.f32 0.70710677, %v7877_v8  ;;  %5860 = verf.f32 %v3445_v26  ;;  %v3450_v36 = vmul.f32 0.70710677, %v7888_v24 }
 0xae4   : > { %v3136_v62 = vpop.f32.mrb[52].mxu1  ;;  %v3297_v50 = vpop.f32.mrb[84].mxu0  ;;  %v3449_v23 = vmul.f32 0.70710677, %v7880_v11  ;;  %v3451_v9 = vmul.f32 0.70710677, %v7883_v22  ;;  %5862 = verf.f32 %v3447_v42 }
 0xae5   : > { %v3138_v17 = vpop.f32.mrb[53].mxu1  ;;  %v3299_v63 = vpop.f32.mrb[85].mxu0  ;;  %v7893_v57 = vadd.f32 %v3136_v62, %v7856_v59  ;;  %v7902_v21 = vadd.f32 %v3297_v50, %v7858_v15  ;;  %5864 = verf.f32 %v3448_v47  ;;  %v3385_v2 = vmul.f32 0.5, %v7880_v11 }
 0xae6   : > { %v7896_v30 = vadd.f32 %v3138_v17, %v7860_v61  ;;  %v7899_v14 = vadd.f32 %v3299_v63, %v7862_v51  ;;  %5866 = verf.f32 %v3449_v23 }
 0xae7   : > { %5868 = verf.f32 %v3451_v9  ;;  %v3452_v5 = vmul.f32 0.70710677, %v7893_v57  ;;  %v3454_v50 = vmul.f32 0.70710677, %v7902_v21 }
 0xae8   : > { %v3142_v0 = vpop.f32.mrb[54].mxu1  ;;  %v3303_v19 = vpop.f32.mrb[86].mxu0  ;;  %v3453_v34 = vmul.f32 0.70710677, %v7896_v30  ;;  %v3455_v41 = vmul.f32 0.70710677, %v7899_v14 }
 0xae9   : > { %v3144_v53 = vpop.f32.mrb[55].mxu1  ;;  %v3305_v26 = vpop.f32.mrb[87].mxu0  ;;  %v7909_v32 = vadd.f32 %v3142_v0, %v7856_v59  ;;  %v7916_v47 = vadd.f32 %v3303_v19, %v7858_v15  ;;  %v3380_v0 = vmul.f32 0.5, %v3125_v18 }
 0xaea   : > { %v7912_v42 = vadd.f32 %v3144_v53, %v7860_v61  ;;  %5870 = verf.f32 %v3453_v34  ;;  %v7919_v23 = vadd.f32 %v3305_v26, %v7862_v51 }
 0xaeb   : > { %v5857_v62 = vpop.eup %5856  ;;  %5872 = verf.f32 %v3455_v41  ;;  %v3456_v37 = vmul.f32 0.70710677, %v7909_v32  ;;  %v3458_v19 = vmul.f32 0.70710677, %v7916_v47 }
 0xaec   : > { %v3148_v17 = vpop.f32.mrb[56].mxu1  ;;  %v3309_v63 = vpop.f32.mrb[88].mxu0  ;;  %5874 = verf.f32 %v3450_v36  ;;  %v3572_v53 = vadd.f32 1.0, %v5857_v62  ;;  %v3457_v34 = vmul.f32 0.70710677, %v7912_v42 }
 0xaed   : > { %v3150_v9 = vpop.f32.mrb[57].mxu1  ;;  %v3311_v55 = vpop.f32.mrb[89].mxu0  ;;  %5876 = verf.f32 %v3452_v5  ;;  %v3459_v26 = vmul.f32 0.70710677, %v7919_v23  ;;  %v7926_v35 = vadd.f32 %v3148_v17, %v7856_v59  ;;  %v7929_v18 = vadd.f32 %v3309_v63, %v7858_v15 }
 0xaee   : > { %v5859_v60 = vpop.eup %5858  ;;  %5878 = verf.f32 %v3454_v50  ;;  %v7932_v36 = vadd.f32 %v3150_v9, %v7860_v61  ;;  %v7935_v5 = vadd.f32 %v3311_v55, %v7862_v51  ;;  %v3381_v17 = vmul.f32 0.5, %v7869_v29 }
 0xaef   : > { %v5861_v56 = vpop.eup %5860  ;;  %5880 = verf.f32 %v3457_v34  ;;  %v3636_v20 = vmul.f32 %v3572_v53, %v3380_v0  ;;  %v3574_v63 = vadd.f32 1.0, %v5859_v60  ;;  %v3387_v9 = vmul.f32 0.5, %v7883_v22 }
 0xaf0   : > { %v3154_v41 = vpop.f32.mrb[58].mxu1  ;;  %v3315_v38 = vpop.f32.mrb[90].mxu0  ;;  %5882 = verf.f32 %v3459_v26  ;;  %v3573_v55 = vadd.f32 1.0, %v5861_v56  ;;  %v3460_v6 = vmul.f32 0.70710677, %v7926_v35 }
 0xaf1   : > { %v3156_v62 = vpop.f32.mrb[59].mxu1  ;;  %v3317_v50 = vpop.f32.mrb[91].mxu0  ;;  %5884 = verf.f32 %v3456_v37  ;;  %v3461_v4 = vmul.f32 0.70710677, %v7932_v36  ;;  %v3462_v29 = vmul.f32 0.70710677, %v7929_v18  ;;  %v7947_v0 = vadd.f32 %v3154_v41, %v7856_v59 }
 0xaf2   : > { %v5863_v12 = vpop.eup %5862  ;;  %5886 = verf.f32 %v3458_v19  ;;  %v3463_v54 = vmul.f32 0.70710677, %v7935_v5  ;;  %v7950_v22 = vadd.f32 %v3315_v38, %v7858_v15  ;;  %v7953_v37 = vadd.f32 %v3156_v62, %v7860_v61 }
 0xaf3   : > { %v5865_v34 = vpop.eup %5864  ;;  %v3575_v11 = vadd.f32 1.0, %v5863_v12  ;;  %5888 = verf.f32 %v3461_v4  ;;  %v3638_v53 = vmul.f32 %v3574_v63, %v3382_v25  ;;  %v3464_v19 = vmul.f32 0.70710677, %v7947_v0 }
 0xaf4   : > { %v5867_v40 = vpop.eup %5866  ;;  %5890 = verf.f32 %v3463_v54  ;;  %v3576_v52 = vadd.f32 1.0, %v5865_v34  ;;  %v3466_v41 = vmul.f32 0.70710677, %v7950_v22  ;;  %v3465_v38 = vmul.f32 0.70710677, %v7953_v37 }
 0xaf5   : > { %v5869_v1 = vpop.eup %5868  ;;  %v3577_v26 = vadd.f32 1.0, %v5867_v40  ;;  %5892 = verf.f32 %v3460_v6  ;;  %v7959_v62 = vadd.f32 %v3317_v50, %v7862_v51  ;;  %v3637_v40 = vmul.f32 %v3573_v55, %v3381_v17 }
 0xaf6   : > { %v5871_v60 = vpop.eup %5870  ;;  %v3579_v46 = vadd.f32 1.0, %v5869_v1  ;;  %5894 = verf.f32 %v3462_v29  ;;  %v3639_v63 = vmul.f32 %v3575_v11, %v3383_v10  ;;  %v3391_v29 = vmul.f32 0.5, %v7899_v14 }
 0xaf7   : > { %v5873_v56 = vpop.eup %5872  ;;  %v3581_v4 = vadd.f32 1.0, %v5871_v60  ;;  %5896 = verf.f32 %v3464_v19  ;;  %v3467_v6 = vmul.f32 0.70710677, %v7959_v62  ;;  %v3641_v34 = vmul.f32 %v3577_v26, %v3385_v2  ;;  %3835 = vmatprep.mubr.f32.mxu1 %v3637_v40 }
 0xaf8   : > { %v5875_v27 = vpop.eup %5874  ;;  %v3583_v25 = vadd.f32 1.0, %v5873_v56  ;;  %5898 = verf.f32 %v3465_v38  ;;  %v3389_v60 = vmul.f32 0.5, %v7896_v30  ;;  %3980 = vmatprep.mubr.f32.mxu0 %v3639_v63  ;;  %v3643_v50 = vmul.f32 %v3579_v46, %v3387_v9  ;;  %3836 = vmatmul.mubr.f32.vlgmr.msra.gmra.mrb[80].mxu1 %v3636_v20 }
 0xaf9   : > { %v5877_v12 = vpop.eup %5876  ;;  %v3578_v49 = vadd.f32 1.0, %v5875_v27  ;;  %5900 = verf.f32 %v3466_v41  ;;  %v3384_v56 = vmul.f32 0.5, %v7877_v8  ;;  %v3386_v17 = vmul.f32 0.5, %v7888_v24  ;;  %3981 = vmatmul.mubr.f32.vlgmr.msra.gmra.mrb[112].mxu0 %v3638_v53  ;;  %3840 = vmatprep.mubr.f32.mxu1 %v3641_v34 }
 0xafa   : > { %v5879_v13 = vpop.eup %5878  ;;  %5902 = verf.f32 %v3467_v6  ;;  %3985 = vmatprep.mubr.f32.mxu0 %v3643_v50  ;;  %v3645_v2 = vmul.f32 %v3581_v4, %v3389_v60  ;;  %v3647_v30 = vmul.f32 %v3583_v25, %v3391_v29  ;;  %v3580_v14 = vadd.f32 1.0, %v5877_v12  ;;  %5448 = vmatpush3.bf16.msra.mxu1 %v7758_v58 }
 0xafb   : > { %v5881_v54 = vpop.eup %5880  ;;  %v3582_v26 = vadd.f32 1.0, %v5879_v13  ;;  %v3640_v19 = vmul.f32 %v3576_v52, %v3384_v56  ;;  %v3642_v41 = vmul.f32 %v3578_v49, %v3386_v17  ;;  %v3393_v8 = vmul.f32 0.5, %v7912_v42  ;;  %5441 = vmatprep.subr.bf16.mxu1 %v7761_v3 }
 0xafc   : > { %v5883_v1 = vpop.eup %5882  ;;  %v3585_v10 = vadd.f32 1.0, %v5881_v54  ;;  %v3395_v20 = vmul.f32 0.5, %v7919_v23  ;;  %v3388_v9 = vmul.f32 0.5, %v7893_v57  ;;  %v3390_v53 = vmul.f32 0.5, %v7902_v21 }
 0xafd   : > { %v5885_v27 = vpop.eup %5884  ;;  %v3587_v55 = vadd.f32 1.0, %v5883_v1  ;;  %3841 = vmatmul.mubr.f32.gmra.mrb[82].mxu1 %v3640_v19  ;;  %3986 = vmatmul.mubr.f32.gmra.mrb[114].mxu0 %v3642_v41  ;;  %v3397_v57 = vmul.f32 0.5, %v7932_v36  ;;  %v3399_v21 = vmul.f32 0.5, %v7935_v5  ;;  %v3392_v63 = vmul.f32 0.5, %v7909_v32 }
 0xafe   : > { %v5887_v11 = vpop.eup %5886  ;;  %3845 = vmatprep.mubr.f32.mxu1 %v3645_v2  ;;  %3990 = vmatprep.mubr.f32.mxu0 %v3647_v30  ;;  %v3649_v58 = vmul.f32 %v3585_v10, %v3393_v8  ;;  %v3584_v42 = vadd.f32 1.0, %v5885_v27  ;;  %v3644_v23 = vmul.f32 %v3580_v14, %v3388_v9  ;;  %v3646_v25 = vmul.f32 %v3582_v26, %v3390_v53 }
 0xaff   : > { %v5889_v46 = vpop.eup %5888  ;;  %v3651_v49 = vmul.f32 %v3587_v55, %v3395_v20  ;;  %v3586_v38 = vadd.f32 1.0, %v5887_v11  ;;  %5449 = vmatpush3.bf16.msra.mxu1 %v7765_v31  ;;  %v3394_v54 = vmul.f32 0.5, %v7916_v47  ;;  %v3403_v32 = vmul.f32 0.5, %v7959_v62 }
 0xb00   : > { %v5891_v24 = vpop.eup %5890  ;;  %v3589_v13 = vadd.f32 1.0, %v5889_v46  ;;  %5442 = vmatprep.subr.bf16.mxu1 %v7767_v28  ;;  %v3648_v50 = vmul.f32 %v3584_v42, %v3392_v63  ;;  %v3401_v28 = vmul.f32 0.5, %v7953_v37  ;;  %v3396_v56 = vmul.f32 0.5, %v7926_v35  ;;  %v8413_v42 = vld [vmem:[#allocation43_spill] sm:$0xff] }
 0xb01   : > { %v5893_v12 = vpop.eup %5892  ;;  %v3591_v52 = vadd.f32 1.0, %v5891_v24  ;;  %3846 = vmatmul.mubr.f32.gmra.mrb[84].mxu1 %v3644_v23  ;;  %3991 = vmatmul.mubr.f32.gmra.mrb[116].mxu0 %v3646_v25  ;;  %v3650_v5 = vmul.f32 %v3586_v38, %v3394_v54  ;;  %v3398_v17 = vmul.f32 0.5, %v7929_v18  ;;  %v3402_v35 = vmul.f32 0.5, %v7950_v22 }
 0xb02   : > { %v5895_v4 = vpop.eup %5894  ;;  %3850 = vmatprep.mubr.f32.mxu1 %v3649_v58  ;;  %3995 = vmatprep.mubr.f32.mxu0 %v3651_v49  ;;  %v3653_v1 = vmul.f32 %v3589_v13, %v3397_v57  ;;  %v3588_v29 = vadd.f32 1.0, %v5893_v12  ;;  %v8411_v12 = vld [vmem:[#allocation41_spill] sm:$0xff] }
 0xb03   : > { %v5897_v3 = vpop.eup %5896  ;;  %v3655_v31 = vmul.f32 %v3591_v52, %v3399_v21  ;;  %v3590_v36 = vadd.f32 1.0, %v5895_v4  ;;  %5450 = vmatpush3.bf16.msra.mxu1 %v7770_v44 }
 0xb04   : > { %v5899_v40 = vpop.eup %5898  ;;  %5443 = vmatprep.subr.bf16.mxu1 %v7784_v45  ;;  %v3592_v55 = vadd.f32 1.0, %v5897_v3  ;;  %v3652_v44 = vmul.f32 %v3588_v29, %v3396_v56  ;;  %v3400_v45 = vmul.f32 0.5, %v7947_v0 }
 0xb05   : > { %v5901_v6 = vpop.eup %5900  ;;  %v3593_v34 = vadd.f32 1.0, %v5899_v40  ;;  %3851 = vmatmul.mubr.f32.gmra.mrb[86].mxu1 %v3648_v50  ;;  %3996 = vmatmul.mubr.f32.gmra.mrb[118].mxu0 %v3650_v5  ;;  %v3654_v30 = vmul.f32 %v3590_v36, %v3398_v17 }
 0xb06   : > { %v5903_v60 = vpop.eup %5902  ;;  %3855 = vmatprep.mubr.f32.mxu1 %v3653_v1  ;;  %4000 = vmatprep.mubr.f32.mxu0 %v3655_v31  ;;  %v3594_v2 = vadd.f32 1.0, %v5901_v6  ;;  %v3656_v18 = vmul.f32 %v3592_v55, %v3400_v45 }
 0xb07   : > { %v3595_v47 = vadd.f32 1.0, %v5903_v60  ;;  %v3657_v27 = vmul.f32 %v3593_v34, %v3401_v28  ;;  %5451 = vmatpush3.bf16.msra.mxu1 %v7786_v16 }
 0xb08   : > { %5444 = vmatprep.subr.bf16.mxu1 %v7790_v43  ;;  %v3658_v37 = vmul.f32 %v3594_v2, %v3402_v35 }
 0xb09   : > { %v3659_v10 = vmul.f32 %v3595_v47, %v3403_v32  ;;  %3856 = vmatmul.mubr.f32.gmra.mrb[88].mxu1 %v3652_v44  ;;  %4001 = vmatmul.mubr.f32.gmra.mrb[120].mxu0 %v3654_v30 }
 0xb0a   : > { %3860 = vmatprep.mubr.f32.mxu1 %v3657_v27 }
 0xb0b   : > { %4005 = vmatprep.mubr.f32.mxu0 %v3659_v10  ;;  %5452 = vmatpush3.bf16.msra.mxu1 %v7792_v33 }
 0xb0c   : > { %5445 = vmatprep.subr.bf16.mxu1 %v7796_v39 }
 0xb0d   : > { %3861 = vmatmul.mubr.f32.gmra.mrb[90].mxu1 %v3656_v18  ;;  %4006 = vmatmul.mubr.f32.gmra.mrb[122].mxu0 %v3658_v37 }
 0xb0f   : > { %5453 = vmatpush3.bf16.msra.mxu1 %v7798_v48 }
 0xb10   : > { %5446 = vmatprep.subr.bf16.mxu1 %v7802_v7  ;;  %v8412_v7 = vld [vmem:[#allocation42_spill] sm:$0xff] }
 0xb11   : > { %v3160_v62 = vpop.f32.mrb[60].mxu1  ;;  %v3321_v16 = vpop.f32.mrb[92].mxu0 }
 0xb12   : > { %v3161_v43 = vadd.f32 %v3160_v62, %v7856_v59  ;;  %v3322_v0 = vadd.f32 %v3321_v16, %v7858_v15  ;;  %v3162_v11 = vpop.f32.mrb[61].mxu1  ;;  %v3323_v22 = vpop.f32.mrb[93].mxu0 }
 0xb13   : > { %v3163_v14 = vadd.f32 %v3162_v11, %v7860_v61  ;;  %v3324_v26 = vadd.f32 %v3323_v22, %v7862_v51  ;;  %5454 = vmatpush3.bf16.msra.mxu1 %v8411_v12 }
 0xb14   : > { %v3468_v19 = vmul.f32 0.70710677, %v3161_v43  ;;  %v3470_v33 = vmul.f32 0.70710677, %v3322_v0  ;;  %5447 = vmatprep.subr.bf16.mxu1 %v8412_v7  ;;  %v3404_v54 = vmul.f32 0.5, %v3161_v43  ;;  %v3406_v31 = vmul.f32 0.5, %v3322_v0 }
 0xb15   : > { %v3469_v39 = vmul.f32 0.70710677, %v3163_v14  ;;  %v3471_v41 = vmul.f32 0.70710677, %v3324_v26  ;;  %v3166_v46 = vpop.f32.mrb[62].mxu1  ;;  %v3327_v8 = vpop.f32.mrb[94].mxu0 }
 0xb16   : > { %5904 = verf.f32 %v3468_v19  ;;  %v3167_v20 = vadd.f32 %v3166_v46, %v7856_v59  ;;  %v3328_v24 = vadd.f32 %v3327_v8, %v7858_v15  ;;  %v3168_v9 = vpop.f32.mrb[63].mxu1  ;;  %v3329_v53 = vpop.f32.mrb[95].mxu0  ;;  %v3405_v40 = vmul.f32 0.5, %v3163_v14 }
 0xb17   : > { %5906 = verf.f32 %v3470_v33  ;;  %v3169_v48 = vadd.f32 %v3168_v9, %v7860_v61  ;;  %v3330_v13 = vadd.f32 %v3329_v53, %v7862_v51  ;;  %5455 = vmatpush3.bf16.msra.mxu1 %v8413_v42  ;;  %v3407_v6 = vmul.f32 0.5, %v3324_v26 }
 0xb18   : > { %5908 = verf.f32 %v3469_v39  ;;  %v3472_v52 = vmul.f32 0.70710677, %v3167_v20  ;;  %v3474_v58 = vmul.f32 0.70710677, %v3328_v24  ;;  %v3408_v10 = vmul.f32 0.5, %v3167_v20 }
 0xb19   : > { %5910 = verf.f32 %v3471_v41  ;;  %v3473_v49 = vmul.f32 0.70710677, %v3169_v48  ;;  %v3475_v4 = vmul.f32 0.70710677, %v3330_v13  ;;  %v3409_v17 = vmul.f32 0.5, %v3169_v48 }
 0xb1a   : > { %5912 = verf.f32 %v3472_v52  ;;  %v3411_v55 = vmul.f32 0.5, %v3330_v13  ;;  %v3410_v44 = vmul.f32 0.5, %v3328_v24 }
 0xb1b   : > { %5914 = verf.f32 %v3474_v58 }
 0xb1c   : > { %5916 = verf.f32 %v3473_v49 }
 0xb1d   : > { %5918 = verf.f32 %v3475_v4 }
 0xb20   : > { %v5905_v38 = vpop.eup %5904 }
 0xb21   : > { %v5907_v23 = vpop.eup %5906  ;;  %v3596_v3 = vadd.f32 1.0, %v5905_v38 }
 0xb22   : > { %v5909_v25 = vpop.eup %5908  ;;  %v3598_v21 = vadd.f32 1.0, %v5907_v23 }
 0xb23   : > { %v5911_v57 = vpop.eup %5910  ;;  %v3597_v63 = vadd.f32 1.0, %v5909_v25  ;;  %v3660_v50 = vmul.f32 %v3596_v3, %v3404_v54 }
 0xb24   : > { %v3599_v34 = vadd.f32 1.0, %v5911_v57  ;;  %v5913_v1 = vpop.eup %5912  ;;  %v3662_v32 = vmul.f32 %v3598_v21, %v3406_v31 }
 0xb25   : > { %v3661_v60 = vmul.f32 %v3597_v63, %v3405_v40  ;;  %v5915_v29 = vpop.eup %5914  ;;  %v3600_v28 = vadd.f32 1.0, %v5913_v1 }
 0xb26   : > { %v3663_v36 = vmul.f32 %v3599_v34, %v3407_v6  ;;  %v5917_v5 = vpop.eup %5916  ;;  %v3602_v56 = vadd.f32 1.0, %v5915_v29 }
 0xb27   : > { %3865 = vmatprep.mubr.f32.mxu1 %v3661_v60  ;;  %v5919_v47 = vpop.eup %5918  ;;  %v3601_v27 = vadd.f32 1.0, %v5917_v5  ;;  %v3664_v35 = vmul.f32 %v3600_v28, %v3408_v10 }
 0xb28   : > { %4010 = vmatprep.mubr.f32.mxu0 %v3663_v36  ;;  %3866 = vmatmul.mubr.f32.gmra.mrb[92].mxu1 %v3660_v50  ;;  %v3603_v2 = vadd.f32 1.0, %v5919_v47  ;;  %v3666_v18 = vmul.f32 %v3602_v56, %v3410_v44 }
 0xb29   : > { %4011 = vmatmul.mubr.f32.gmra.mrb[124].mxu0 %v3662_v32  ;;  %v3665_v30 = vmul.f32 %v3601_v27, %v3409_v17 }
 0xb2a   : > { %v3667_v45 = vmul.f32 %v3603_v2, %v3411_v55 }
 0xb2b   : > { %3870 = vmatprep.mubr.f32.mxu1 %v3665_v30 }
 0xb2c   : > { %4015 = vmatprep.mubr.f32.mxu0 %v3667_v45  ;;  %3871 = vmatmul.mubr.f32.gmra.mrb[94].mxu1 %v3664_v35 }
 0xb2d   : > { %4016 = vmatmul.mubr.f32.gmra.mrb[126].mxu0 %v3666_v18 }
 0xb52   : > { %v3172_v37 = vpop.f32.mrb[64].mxu1  ;;  %v3333_v62 = vpop.f32.mrb[96].mxu0 }
 0xb53   : > { %v3174_v16 = vpop.f32.mrb[65].mxu1  ;;  %v3335_v43 = vpop.f32.mrb[97].mxu0  ;;  %v8007_v11 = vadd.f32 %v3172_v37, %v7856_v59  ;;  %v8013_v19 = vadd.f32 %v3333_v62, %v7858_v15 }
 0xb54   : > { %v8004_v0 = vadd.f32 %v3174_v16, %v7860_v61  ;;  %v8010_v22 = vadd.f32 %v3335_v43, %v7862_v51 }
 0xb55   : > { %v3476_v46 = vmul.f32 0.70710677, %v8007_v11  ;;  %v3478_v53 = vmul.f32 0.70710677, %v8013_v19 }
 0xb56   : > { %v3178_v14 = vpop.f32.mrb[66].mxu1  ;;  %v3339_v26 = vpop.f32.mrb[98].mxu0  ;;  %v3477_v33 = vmul.f32 0.70710677, %v8004_v0  ;;  %v3479_v9 = vmul.f32 0.70710677, %v8010_v22 }
 0xb57   : > { %v3180_v39 = vpop.f32.mrb[67].mxu1  ;;  %v3341_v41 = vpop.f32.mrb[99].mxu0  ;;  %v8023_v12 = vadd.f32 %v3178_v14, %v7856_v59  ;;  %v8029_v52 = vadd.f32 %v3339_v26, %v7858_v15  ;;  %v3413_v14 = vmul.f32 0.5, %v8004_v0 }
 0xb58   : > { %v8018_v8 = vadd.f32 %v3180_v39, %v7860_v61  ;;  %5920 = verf.f32 %v3477_v33  ;;  %v8026_v7 = vadd.f32 %v3341_v41, %v7862_v51 }
 0xb59   : > { %5922 = verf.f32 %v3476_v46  ;;  %v3480_v38 = vmul.f32 0.70710677, %v8023_v12  ;;  %v3482_v21 = vmul.f32 0.70710677, %v8029_v52 }
 0xb5a   : > { %v3184_v20 = vpop.f32.mrb[68].mxu1  ;;  %v3345_v24 = vpop.f32.mrb[100].mxu0  ;;  %v3481_v58 = vmul.f32 0.70710677, %v8018_v8  ;;  %5924 = verf.f32 %v3479_v9  ;;  %v3483_v3 = vmul.f32 0.70710677, %v8026_v7 }
 0xb5b   : > { %v3186_v48 = vpop.f32.mrb[69].mxu1  ;;  %v3347_v13 = vpop.f32.mrb[101].mxu0  ;;  %5926 = verf.f32 %v3478_v53  ;;  %v8034_v23 = vadd.f32 %v3184_v20, %v7856_v59  ;;  %v8042_v40 = vadd.f32 %v3345_v24, %v7858_v15 }
 0xb5c   : > { %v8038_v57 = vadd.f32 %v3186_v48, %v7860_v61  ;;  %5928 = verf.f32 %v3481_v58  ;;  %v8047_v6 = vadd.f32 %v3347_v13, %v7862_v51  ;;  %v3415_v13 = vmul.f32 0.5, %v8010_v22 }
 0xb5d   : > { %5930 = verf.f32 %v3480_v38  ;;  %v3484_v31 = vmul.f32 0.70710677, %v8034_v23  ;;  %v3486_v5 = vmul.f32 0.70710677, %v8042_v40  ;;  %v3414_v38 = vmul.f32 0.5, %v8013_v19 }
 0xb5e   : > { %v3190_v49 = vpop.f32.mrb[70].mxu1  ;;  %v3351_v4 = vpop.f32.mrb[102].mxu0  ;;  %5932 = verf.f32 %v3483_v3  ;;  %v3485_v29 = vmul.f32 0.70710677, %v8038_v57  ;;  %v3487_v56 = vmul.f32 0.70710677, %v8047_v6 }
 0xb5f   : > { %v3192_v42 = vpop.f32.mrb[71].mxu1  ;;  %v3353_v25 = vpop.f32.mrb[103].mxu0  ;;  %v8053_v60 = vadd.f32 %v3190_v49, %v7856_v59  ;;  %5934 = verf.f32 %v3482_v21  ;;  %v8067_v17 = vadd.f32 %v3351_v4, %v7858_v15 }
 0xb60   : > { %v8057_v36 = vadd.f32 %v3192_v42, %v7860_v61  ;;  %v8061_v28 = vadd.f32 %v3353_v25, %v7862_v51  ;;  %5936 = verf.f32 %v3484_v31  ;;  %v3412_v42 = vmul.f32 0.5, %v8007_v11 }
 0xb61   : > { %v3488_v2 = vmul.f32 0.70710677, %v8053_v60  ;;  %5938 = verf.f32 %v3485_v29  ;;  %v3490_v26 = vmul.f32 0.70710677, %v8067_v17 }
 0xb62   : > { %v3196_v63 = vpop.f32.mrb[72].mxu1  ;;  %v8044_v54 = vpop.f32.mrb[104].mxu0  ;;  %v3489_v35 = vmul.f32 0.70710677, %v8057_v36  ;;  %5940 = verf.f32 %v3486_v5  ;;  %v3491_v37 = vmul.f32 0.70710677, %v8061_v28 }
 0xb63   : > { %v3198_v34 = vpop.f32.mrb[73].mxu1  ;;  %v8049_v1 = vpop.f32.mrb[105].mxu0  ;;  %5942 = verf.f32 %v3487_v56  ;;  %v8088_v53 = vadd.f32 %v3196_v63, %v7856_v59  ;;  %v3417_v63 = vmul.f32 0.5, %v8018_v8 }
 0xb64   : > { %v5921_v50 = vpop.eup %5920  ;;  %v8073_v44 = vadd.f32 %v3198_v34, %v7860_v61  ;;  %5944 = verf.f32 %v3488_v2 }
 0xb65   : > { %v5923_v55 = vpop.eup %5922  ;;  %v3605_v45 = vadd.f32 1.0, %v5921_v50  ;;  %5946 = verf.f32 %v3489_v35  ;;  %v3492_v29 = vmul.f32 0.70710677, %v8088_v53  ;;  %v3416_v35 = vmul.f32 0.5, %v8023_v12 }
 0xb66   : > { %v3202_v32 = vpop.f32.mrb[74].mxu1  ;;  %v8063_v47 = vpop.f32.mrb[106].mxu0  ;;  %v3604_v43 = vadd.f32 1.0, %v5923_v55  ;;  %v3493_v20 = vmul.f32 0.70710677, %v8073_v44  ;;  %5948 = verf.f32 %v3491_v37  ;;  %v3422_v12 = vmul.f32 0.5, %v8042_v40 }
 0xb67   : > { %v3204_v27 = vpop.f32.mrb[75].mxu1  ;;  %v8069_v10 = vpop.f32.mrb[107].mxu0  ;;  %v3669_v0 = vmul.f32 %v3605_v45, %v3413_v14  ;;  %5950 = verf.f32 %v3490_v26  ;;  %v8101_v50 = vadd.f32 %v3202_v32, %v7856_v59  ;;  %v3418_v32 = vmul.f32 0.5, %v8029_v52 }
 0xb68   : > { %v5925_v30 = vpop.eup %5924  ;;  %v8085_v24 = vadd.f32 %v3204_v27, %v7860_v61  ;;  %5952 = verf.f32 %v3493_v20  ;;  %v3668_v11 = vmul.f32 %v3604_v43, %v3412_v42  ;;  %v3425_v42 = vmul.f32 0.5, %v8057_v36 }
 0xb69   : > { %v5927_v18 = vpop.eup %5926  ;;  %v3607_v46 = vadd.f32 1.0, %v5925_v30  ;;  %3875 = vmatprep.mubr.f32.mxu1 %v3669_v0  ;;  %v3496_v43 = vmul.f32 0.70710677, %v8101_v50  ;;  %v3427_v36 = vmul.f32 0.5, %v8061_v28 }
 0xb6a   : > { %v3208_v62 = vpop.f32.mrb[76].mxu1  ;;  %v8077_v16 = vpop.f32.mrb[108].mxu0  ;;  %v3606_v9 = vadd.f32 1.0, %v5927_v18  ;;  %v3497_v34 = vmul.f32 0.70710677, %v8085_v24  ;;  %3876 = vmatmul.mubr.f32.gmra.mrb[96].mxu1 %v3668_v11  ;;  %v3419_v18 = vmul.f32 0.5, %v8026_v7 }
 0xb6b   : > { %v3210_v33 = vpop.f32.mrb[77].mxu1  ;;  %v8081_v39 = vpop.f32.mrb[109].mxu0  ;;  %v3671_v22 = vmul.f32 %v3607_v46, %v3415_v13  ;;  %v8111_v14 = vadd.f32 %v3208_v62, %v7856_v59  ;;  %v3421_v7 = vmul.f32 0.5, %v8038_v57  ;;  %v3423_v13 = vmul.f32 0.5, %v8047_v6 }
 0xb6c   : > { %v5929_v41 = vpop.eup %5928  ;;  %v3670_v19 = vmul.f32 %v3606_v9, %v3414_v38  ;;  %v8104_v8 = vadd.f32 %v3210_v33, %v7860_v61  ;;  %5954 = verf.f32 %v3497_v34  ;;  %v8119_v9 = vadd.f32 %v8049_v1, %v7862_v51 }
 0xb6d   : > { %v5931_v48 = vpop.eup %5930  ;;  %v3609_v25 = vadd.f32 1.0, %v5929_v41  ;;  %4020 = vmatprep.mubr.f32.mxu0 %v3671_v22  ;;  %5956 = verf.f32 %v3492_v29  ;;  %v3420_v41 = vmul.f32 0.5, %v8034_v23  ;;  %v3500_v40 = vmul.f32 0.70710677, %v8111_v14 }
 0xb6e   : > { %v3214_v58 = vpop.f32.mrb[78].mxu1  ;;  %v8091_v49 = vpop.f32.mrb[110].mxu0  ;;  %v3608_v55 = vadd.f32 1.0, %v5931_v48  ;;  %4021 = vmatmul.mubr.f32.gmra.mrb[128].mxu0 %v3670_v19  ;;  %v3501_v26 = vmul.f32 0.70710677, %v8104_v8  ;;  %v8133_v22 = vadd.f32 %v8044_v54, %v7858_v15 }
 0xb6f   : > { %v5933_v4 = vpop.eup %5932  ;;  %v3216_v3 = vpop.f32.mrb[79].mxu1  ;;  %v3673_v30 = vmul.f32 %v3609_v25, %v3417_v63  ;;  %v8125_v57 = vadd.f32 %v3214_v58, %v7856_v59  ;;  %v3495_v29 = vmul.f32 0.70710677, %v8119_v9 }
 0xb70   : > { %v5935_v21 = vpop.eup %5934  ;;  %v8097_v31 = vpop.f32.mrb[111].mxu0  ;;  %v3611_v56 = vadd.f32 1.0, %v5933_v4  ;;  %v3672_v0 = vmul.f32 %v3608_v55, %v3416_v35  ;;  %5958 = verf.f32 %v3501_v26  ;;  %v8128_v1 = vadd.f32 %v3216_v3, %v7860_v61 }
 0xb71   : > { %v5937_v5 = vpop.eup %5936  ;;  %v3610_v2 = vadd.f32 1.0, %v5935_v21  ;;  %3880 = vmatprep.mubr.f32.mxu1 %v3673_v30  ;;  %5960 = verf.f32 %v3496_v43  ;;  %v8138_v61 = vadd.f32 %v8069_v10, %v7862_v51  ;;  %v3504_v28 = vmul.f32 0.70710677, %v8125_v57 }
 0xb72   : > { %v5939_v27 = vpop.eup %5938  ;;  %v3675_v52 = vmul.f32 %v3611_v56, %v3419_v18  ;;  %3881 = vmatmul.mubr.f32.gmra.mrb[98].mxu1 %v3672_v0  ;;  %v3612_v25 = vadd.f32 1.0, %v5937_v5  ;;  %v3505_v58 = vmul.f32 0.70710677, %v8128_v1  ;;  %5962 = verf.f32 %v3500_v40 }
 0xb73   : > { %v5941_v45 = vpop.eup %5940  ;;  %v3613_v46 = vadd.f32 1.0, %v5939_v27  ;;  %v3674_v62 = vmul.f32 %v3610_v2, %v3418_v32  ;;  %v3424_v2 = vmul.f32 0.5, %v8053_v60  ;;  %v3429_v30 = vmul.f32 0.5, %v8073_v44 }
 0xb74   : > { %v5943_v37 = vpop.eup %5942  ;;  %4025 = vmatprep.mubr.f32.mxu0 %v3675_v52  ;;  %v3614_v6 = vadd.f32 1.0, %v5941_v45  ;;  %5964 = verf.f32 %v3505_v58  ;;  %v3676_v54 = vmul.f32 %v3612_v25, %v3420_v41  ;;  %v3426_v45 = vmul.f32 0.5, %v8067_v17 }
 0xb75   : > { %v5945_v33 = vpop.eup %5944  ;;  %v3615_v4 = vadd.f32 1.0, %v5943_v37  ;;  %4026 = vmatmul.mubr.f32.gmra.mrb[130].mxu0 %v3674_v62  ;;  %v3677_v63 = vmul.f32 %v3613_v46, %v3421_v7  ;;  %v3494_v35 = vmul.f32 0.70710677, %v8133_v22  ;;  %5966 = verf.f32 %v3495_v29 }
 0xb76   : > { %v5947_v20 = vpop.eup %5946  ;;  %v3616_v11 = vadd.f32 1.0, %v5945_v33  ;;  %v3678_v56 = vmul.f32 %v3614_v6, %v3422_v12  ;;  %v8148_v32 = vadd.f32 %v8063_v47, %v7858_v15  ;;  %v3499_v37 = vmul.f32 0.70710677, %v8138_v61 }
 0xb77   : > { %v5949_v48 = vpop.eup %5948  ;;  %v3617_v21 = vadd.f32 1.0, %v5947_v20  ;;  %3885 = vmatprep.mubr.f32.mxu1 %v3677_v63  ;;  %v3679_v19 = vmul.f32 %v3615_v4, %v3423_v13  ;;  %5968 = verf.f32 %v3504_v28  ;;  %v8153_v17 = vadd.f32 %v8081_v39, %v7862_v51 }
 0xb78   : > { %v5951_v23 = vpop.eup %5950  ;;  %v3619_v34 = vadd.f32 1.0, %v5949_v48  ;;  %3886 = vmatmul.mubr.f32.gmra.mrb[100].mxu1 %v3676_v54  ;;  %v3680_v26 = vmul.f32 %v3616_v11, %v3424_v2  ;;  %v3433_v47 = vmul.f32 0.5, %v8085_v24  ;;  %v3428_v12 = vmul.f32 0.5, %v8088_v53 }
 0xb79   : > { %v5953_v38 = vpop.eup %5952  ;;  %v3618_v59 = vadd.f32 1.0, %v5951_v23  ;;  %v3681_v27 = vmul.f32 %v3617_v21, %v3425_v42  ;;  %4030 = vmatprep.mubr.f32.mxu0 %v3679_v19  ;;  %5970 = verf.f32 %v3494_v35  ;;  %v3498_v46 = vmul.f32 0.70710677, %v8148_v32 }
 0xb7a   : > { %v3621_v3 = vadd.f32 1.0, %v5953_v38  ;;  %v5955_v5 = vpop.eup %5954  ;;  %v3683_v10 = vmul.f32 %v3619_v34, %v3427_v36  ;;  %4031 = vmatmul.mubr.f32.gmra.mrb[132].mxu0 %v3678_v56  ;;  %5972 = verf.f32 %v3499_v37  ;;  %v8160_v52 = vadd.f32 %v8077_v16, %v7858_v15 }
 0xb7b   : > { %v5957_v55 = vpop.eup %5956  ;;  %v3625_v18 = vadd.f32 1.0, %v5955_v5  ;;  %3890 = vmatprep.mubr.f32.mxu1 %v3681_v27  ;;  %v3682_v33 = vmul.f32 %v3618_v59, %v3426_v45  ;;  %v3503_v0 = vmul.f32 0.70710677, %v8153_v17  ;;  %v8165_v24 = vadd.f32 %v8097_v31, %v7862_v51 }
 0xb7c   : > { %4035 = vmatprep.mubr.f32.mxu0 %v3683_v10  ;;  %v3685_v60 = vmul.f32 %v3621_v3, %v3429_v30  ;;  %v5959_v44 = vpop.eup %5958  ;;  %v3620_v43 = vadd.f32 1.0, %v5957_v55  ;;  %3891 = vmatmul.mubr.f32.gmra.mrb[102].mxu1 %v3680_v26  ;;  %v3437_v48 = vmul.f32 0.5, %v8104_v8  ;;  %v3432_v4 = vmul.f32 0.5, %v8101_v50 }
 0xb7d   : > { %v5961_v41 = vpop.eup %5960  ;;  %v3629_v20 = vadd.f32 1.0, %v5959_v44  ;;  %v3689_v39 = vmul.f32 %v3625_v18, %v3433_v47  ;;  %5974 = verf.f32 %v3498_v46  ;;  %v3502_v16 = vmul.f32 0.70710677, %v8160_v52  ;;  %v8186_v47 = vld [vmem:[%s8414_s27] ss:$0 sm:$0xff] }
 0xb7e   : > { %4036 = vmatmul.mubr.f32.gmra.mrb[134].mxu0 %v3682_v33  ;;  %3895 = vmatprep.mubr.f32.mxu1 %v3685_v60  ;;  %v3624_v7 = vadd.f32 1.0, %v5961_v41  ;;  %v3684_v53 = vmul.f32 %v3620_v43, %v3428_v12  ;;  %v5963_v62 = vpop.eup %5962  ;;  %v3376_v42 = vadd.f32 %v8091_v49, %v7858_v15  ;;  %5976 = verf.f32 %v3503_v0 }
 0xb7f   : > { %v5965_v13 = vpop.eup %5964  ;;  %v3693_v40 = vmul.f32 %v3629_v20, %v3437_v48  ;;  %v3628_v51 = vadd.f32 1.0, %v5963_v62  ;;  %v3507_v31 = vmul.f32 0.70710677, %v8165_v24  ;;  %v3441_v6 = vmul.f32 0.5, %v8128_v1 }
 0xb80   : > { %3896 = vmatmul.mubr.f32.gmra.mrb[104].mxu1 %v3684_v53  ;;  %v3633_v23 = vadd.f32 1.0, %v5965_v13  ;;  %v5967_v38 = vpop.eup %5966  ;;  %v3688_v25 = vmul.f32 %v3624_v7, %v3432_v4  ;;  %v3436_v50 = vmul.f32 0.5, %v8111_v14  ;;  %5978 = verf.f32 %v3502_v16  ;;  %v8415_v4 = vld [vmem:[#allocation26_spill] sm:$0xff] }
 0xb81   : > { %3900 = vmatprep.mubr.f32.mxu1 %v3689_v39  ;;  %v5969_v8 = vpop.eup %5968  ;;  %v3506_v21 = vmul.f32 0.70710677, %v3376_v42  ;;  %5980 = verf.f32 %v3507_v31  ;;  %v3623_v29 = vadd.f32 1.0, %v5967_v38  ;;  %v3440_v11 = vmul.f32 0.5, %v8125_v57 }
 0xb82   : > { %v3697_v63 = vmul.f32 %v3633_v23, %v3441_v6  ;;  %v3632_v49 = vadd.f32 1.0, %v5969_v8  ;;  %v3692_v36 = vmul.f32 %v3628_v51, %v3436_v50  ;;  %v3431_v59 = vmul.f32 0.5, %v8119_v9  ;;  %v8416_v6 = vld [vmem:[#allocation25_spill] sm:$0xff] }
 0xb83   : > { %v5971_v15 = vpop.eup %5970  ;;  %5982 = verf.f32 %v3506_v21  ;;  %v3430_v5 = vmul.f32 0.5, %v8133_v22  ;;  %v3435_v54 = vmul.f32 0.5, %v8138_v61  ;;  %v3434_v30 = vmul.f32 0.5, %v8148_v32 }
 0xb84   : > { %3901 = vmatmul.mubr.f32.gmra.mrb[106].mxu1 %v3688_v25  ;;  %v5973_v34 = vpop.eup %5972  ;;  %v3622_v14 = vadd.f32 1.0, %v5971_v15  ;;  %v3696_v58 = vmul.f32 %v3632_v49, %v3440_v11  ;;  %v3687_v28 = vmul.f32 %v3623_v29, %v3431_v59  ;;  %v3439_v10 = vmul.f32 0.5, %v8153_v17  ;;  %v8417_v59 = vld [vmem:[#allocation27_spill] sm:$0xff] }
 0xb85   : > { %3905 = vmatprep.mubr.f32.mxu1 %v3693_v40  ;;  %v3627_v3 = vadd.f32 1.0, %v5973_v34  ;;  %v3438_v61 = vmul.f32 0.5, %v8160_v52  ;;  %v3443_v60 = vmul.f32 0.5, %v8165_v24  ;;  %v3442_v33 = vmul.f32 0.5, %v3376_v42 }
 0xb86   : > { %v3686_v56 = vmul.f32 %v3622_v14, %v3430_v5 }
 0xb87   : > { %v5975_v1 = vpop.eup %5974  ;;  %v3691_v2 = vmul.f32 %v3627_v3, %v3435_v54 }
 0xb88   : > { %3906 = vmatmul.mubr.f32.gmra.mrb[108].mxu1 %v3692_v36  ;;  %v5977_v19 = vpop.eup %5976  ;;  %v3626_v27 = vadd.f32 1.0, %v5975_v1 }
 0xb89   : > { %3910 = vmatprep.mubr.f32.mxu1 %v3697_v63  ;;  %v3631_v55 = vadd.f32 1.0, %v5977_v19 }
 0xb8a   : > { %v5979_v57 = vpop.eup %5978  ;;  %v3690_v35 = vmul.f32 %v3626_v27, %v3434_v30  ;;  %v8418_v27 = vld [vmem:[#allocation29_spill] sm:$0xff] }
 0xb8b   : > { %v5981_v9 = vpop.eup %5980  ;;  %v3630_v45 = vadd.f32 1.0, %v5979_v57  ;;  %v3695_v37 = vmul.f32 %v3631_v55, %v3439_v10 }
 0xb8c   : > { %3911 = vmatmul.mubr.f32.gmra.mrb[110].mxu1 %v3696_v58  ;;  %v3635_v22 = vadd.f32 1.0, %v5981_v9 }
 0xb8d   : > { %4040 = vmatprep.mubr.f32.mxu1 %v3687_v28  ;;  %v5983_v18 = vpop.eup %5982  ;;  %v3694_v43 = vmul.f32 %v3630_v45, %v3438_v61 }
 0xb8e   : > { %v3634_v44 = vadd.f32 1.0, %v5983_v18  ;;  %v3699_v26 = vmul.f32 %v3635_v22, %v3443_v60  ;;  %v8419_v22 = vld [vmem:[#allocation30_spill] sm:$0xff] }
 0xb90   : > { %4041 = vmatmul.mubr.f32.vlgmr.msra.gmra.mrb[112].mxu1 %v3686_v56  ;;  %v3698_v32 = vmul.f32 %v3634_v44, %v3442_v33  ;;  %v8420_v44 = vld [vmem:[#allocation28_spill] sm:$0xff] }
 0xb91   : > { %4045 = vmatprep.mubr.f32.mxu1 %v3691_v2 }
 0xb94   : > { %4046 = vmatmul.mubr.f32.gmra.mrb[114].mxu1 %v3690_v35 }
 0xb95   : > { %4050 = vmatprep.mubr.f32.mxu1 %v3695_v37 }
 0xb98   : > { %4051 = vmatmul.mubr.f32.gmra.mrb[116].mxu1 %v3694_v43 }
 0xb99   : > { %4055 = vmatprep.mubr.f32.mxu1 %v3699_v26 }
 0xb9c   : > { %4056 = vmatmul.mubr.f32.gmra.mrb[118].mxu1 %v3698_v32 }
 0xbcb   : > { %v4592_v17 = vpop.f32.mrb[80].mxu1 }
 0xbcc   : > { %v4672_v41 = vpop.f32.mrb[112].mxu0  ;;  %v4593_v12 = vpop.f32.mrb[81].mxu1 }
 0xbcd   : > { %v4673_v46 = vpop.f32.mrb[113].mxu0  ;;  %v4594_v52 = vadd.f32 %v4593_v12, %v4592_v17 }
 0xbce   : > { %v4674_v20 = vadd.f32 %v4673_v46, %v4672_v41 }
 0xbcf   : > { %v3838_v39 = vadd.f32 %v4594_v52, %v8186_v47 }
 0xbd0   : > { %v4595_v7 = vpop.f32.mrb[82].mxu1  ;;  %v4675_v0 = vpop.f32.mrb[114].mxu0 }
 0xbd1   : > { %v4596_v24 = vpop.f32.mrb[83].mxu1  ;;  %v4676_v53 = vpop.f32.mrb[115].mxu0  ;;  %v3983_v62 = vadd.f32 %v4674_v20, %v3838_v39 }
 0xbd2   : > { %v4597_v48 = vadd.f32 %v4596_v24, %v4595_v7  ;;  %v4677_v13 = vadd.f32 %v4676_v53, %v4675_v0  ;;  %v8421_v53 = vld [vmem:[#allocation32_spill] sm:$0xff] }
 0xbd3   : > { %v4061_v16 = vadd.f32 %v3983_v62, %v8415_v4 }
 0xbd4   : > { %v3843_v42 = vadd.f32 %v4597_v48, %v8186_v47  ;;  %v4598_v23 = vpop.f32.mrb[84].mxu1  ;;  %v4678_v40 = vpop.f32.mrb[116].mxu0 }
 0xbd5   : > { %v4599_v38 = vpop.f32.mrb[85].mxu1  ;;  %v4679_v51 = vpop.f32.mrb[117].mxu0  ;;  %4077 = vst [vmem:[%s8192_s14] sm:$0xff] %v4061_v16  ;;  %v8422_v16 = vld [vmem:[#allocation31_spill] sm:$0xff] }
 0xbd6   : > { %v3988_v31 = vadd.f32 %v4677_v13, %v3843_v42  ;;  %v4600_v25 = vadd.f32 %v4599_v38, %v4598_v23  ;;  %v4680_v8 = vadd.f32 %v4679_v51, %v4678_v40 }
 0xbd8   : > { %v4062_v50 = vadd.f32 %v3988_v31, %v8416_v6  ;;  %v3848_v21 = vadd.f32 %v4600_v25, %v8186_v47  ;;  %v4601_v63 = vpop.f32.mrb[86].mxu1  ;;  %v4681_v15 = vpop.f32.mrb[118].mxu0 }
 0xbd9   : > { %v4602_v49 = vpop.f32.mrb[87].mxu1  ;;  %v4682_v36 = vpop.f32.mrb[119].mxu0 }
 0xbda   : > { %4078 = vst [vmem:[%s8192_s14 + $0x8] sm:$0xff] %v4062_v50  ;;  %v3993_v34 = vadd.f32 %v4680_v8, %v3848_v21  ;;  %v4603_v29 = vadd.f32 %v4602_v49, %v4601_v63  ;;  %v4683_v11 = vadd.f32 %v4682_v36, %v4681_v15  ;;  %v8423_v49 = vld [vmem:[#allocation34_spill] sm:$0xff] }
 0xbdc   : > { %v4063_v1 = vadd.f32 %v3993_v34, %v8417_v59  ;;  %v3853_v14 = vadd.f32 %v4603_v29, %v8186_v47  ;;  %v4604_v58 = vpop.f32.mrb[88].mxu1  ;;  %v4684_v3 = vpop.f32.mrb[120].mxu0 }
 0xbdd   : > { %v4605_v28 = vpop.f32.mrb[89].mxu1  ;;  %v4685_v19 = vpop.f32.mrb[121].mxu0 }
 0xbde   : > { %4079 = vst [vmem:[%s8192_s14 + $0x10] sm:$0xff] %v4063_v1  ;;  %v3998_v5 = vadd.f32 %v4683_v11, %v3853_v14  ;;  %v4606_v54 = vadd.f32 %v4605_v28, %v4604_v58  ;;  %v4686_v56 = vadd.f32 %v4685_v19, %v4684_v3  ;;  %v8424_v58 = vld [vmem:[#allocation33_spill] sm:$0xff] }
 0xbe0   : > { %v4064_v57 = vadd.f32 %v3998_v5, %v8418_v27  ;;  %v3858_v55 = vadd.f32 %v4606_v54, %v8186_v47  ;;  %v4607_v2 = vpop.f32.mrb[90].mxu1  ;;  %v4687_v9 = vpop.f32.mrb[122].mxu0 }
 0xbe1   : > { %v4608_v30 = vpop.f32.mrb[91].mxu1  ;;  %v4688_v10 = vpop.f32.mrb[123].mxu0 }
 0xbe2   : > { %4080 = vst [vmem:[%s8192_s14 + $0x18] sm:$0xff] %v4064_v57  ;;  %v4003_v45 = vadd.f32 %v4686_v56, %v3858_v55  ;;  %v4609_v35 = vadd.f32 %v4608_v30, %v4607_v2  ;;  %v4689_v18 = vadd.f32 %v4688_v10, %v4687_v9 }
 0xbe4   : > { %v4065_v37 = vadd.f32 %v4003_v45, %v8419_v22  ;;  %v3863_v61 = vadd.f32 %v4609_v35, %v8186_v47  ;;  %v8425_v45 = vld [vmem:[#allocation36_spill] sm:$0xff] }
 0xbe6   : > { %4081 = vst [vmem:[%s8192_s14 + $0x20] sm:$0xff] %v4065_v37  ;;  %v4008_v60 = vadd.f32 %v4689_v18, %v3863_v61 }
 0xbe8   : > { %v4066_v43 = vadd.f32 %v4008_v60, %v8420_v44  ;;  %v8426_v44 = vld [vmem:[#allocation35_spill] sm:$0xff] }
 0xbea   : > { %4082 = vst [vmem:[%s8192_s14 + $0x28] sm:$0xff] %v4066_v43 }
 0xbfb   : > { %v4610_v26 = vpop.f32.mrb[92].mxu1 }
 0xbfc   : > { %v4690_v33 = vpop.f32.mrb[124].mxu0  ;;  %v4611_v32 = vpop.f32.mrb[93].mxu1 }
 0xbfd   : > { %v4612_v17 = vadd.f32 %v4611_v32, %v4610_v26  ;;  %v4691_v41 = vpop.f32.mrb[125].mxu0 }
 0xbfe   : > { %v4692_v12 = vadd.f32 %v4691_v41, %v4690_v33 }
 0xbff   : > { %v3868_v46 = vadd.f32 %v4612_v17, %v8186_v47  ;;  %v4613_v52 = vpop.f32.mrb[94].mxu1 }
 0xc00   : > { %v4693_v39 = vpop.f32.mrb[126].mxu0  ;;  %v4614_v7 = vpop.f32.mrb[95].mxu1 }
 0xc01   : > { %v4013_v20 = vadd.f32 %v4692_v12, %v3868_v46  ;;  %v4615_v0 = vadd.f32 %v4614_v7, %v4613_v52  ;;  %v4694_v24 = vpop.f32.mrb[127].mxu0 }
 0xc02   : > { %v4695_v48 = vadd.f32 %v4694_v24, %v4693_v39 }
 0xc03   : > { %v4067_v62 = vadd.f32 %v4013_v20, %v8421_v53  ;;  %v3873_v13 = vadd.f32 %v4615_v0, %v8186_v47 }
 0xc05   : > { %4083 = vst [vmem:[%s8192_s14 + $0x30] sm:$0xff] %v4067_v62  ;;  %v4018_v4 = vadd.f32 %v4695_v48, %v3873_v13 }
 0xc07   : > { %v4068_v42 = vadd.f32 %v4018_v4, %v8422_v16  ;;  %v8427_v4 = vld [vmem:[#allocation38_spill] sm:$0xff] }
 0xc09   : > { %4084 = vst [vmem:[%s8192_s14 + $0x38] sm:$0xff] %v4068_v42 }
 0xc3d   : > { %v4616_v23 = vpop.f32.mrb[96].mxu1 }
 0xc3e   : > { %v4617_v38 = vpop.f32.mrb[97].mxu1 }
 0xc3f   : > { %v4618_v31 = vadd.f32 %v4617_v38, %v4616_v23 }
 0xc41   : > { %v4696_v40 = vpop.f32.mrb[128].mxu0  ;;  %v3878_v8 = vadd.f32 %v4618_v31, %v8186_v47  ;;  %v8429_v31 = vld [vmem:[#allocation37_spill] sm:$0xff] }
 0xc42   : > { %v4697_v51 = vpop.f32.mrb[129].mxu0 }
 0xc43   : > { %v4698_v25 = vadd.f32 %v4697_v51, %v4696_v40 }
 0xc45   : > { %v4023_v6 = vadd.f32 %v4698_v25, %v3878_v8  ;;  %v4619_v50 = vpop.f32.mrb[98].mxu1 }
 0xc46   : > { %v4620_v63 = vpop.f32.mrb[99].mxu1 }
 0xc47   : > { %v4069_v36 = vadd.f32 %v4023_v6, %v8423_v49  ;;  %v4621_v34 = vadd.f32 %v4620_v63, %v4619_v50 }
 0xc48   : > { %v4699_v21 = vpop.f32.mrb[130].mxu0 }
 0xc49   : > { %v4700_v15 = vpop.f32.mrb[131].mxu0  ;;  %4085 = vst [vmem:[%s8192_s14 + $0x40] sm:$0xff] %v4069_v36  ;;  %v3883_v11 = vadd.f32 %v4621_v34, %v8186_v47 }
 0xc4a   : > { %v4701_v29 = vadd.f32 %v4700_v15, %v4699_v21  ;;  %v8430_v15 = vld [vmem:[#allocation40_spill] sm:$0xff] }
 0xc4b   : > { %v4622_v1 = vpop.f32.mrb[100].mxu1 }
 0xc4c   : > { %v4028_v59 = vadd.f32 %v4701_v29, %v3883_v11  ;;  %v4623_v28 = vpop.f32.mrb[101].mxu1  ;;  %v8432_v29 = vld [vmem:[#allocation39_spill] sm:$0xff] }
 0xc4d   : > { %v4702_v14 = vpop.f32.mrb[132].mxu0  ;;  %v4624_v5 = vadd.f32 %v4623_v28, %v4622_v1 }
 0xc4e   : > { %v4070_v3 = vadd.f32 %v4028_v59, %v8424_v58  ;;  %v4703_v19 = vpop.f32.mrb[133].mxu0 }
 0xc4f   : > { %v4704_v54 = vadd.f32 %v4703_v19, %v4702_v14  ;;  %v3888_v56 = vadd.f32 %v4624_v5, %v8186_v47  ;;  %v4625_v27 = vpop.f32.mrb[102].mxu1 }
 0xc50   : > { %4086 = vst [vmem:[%s8192_s14 + $0x48] sm:$0xff] %v4070_v3  ;;  %v4626_v55 = vpop.f32.mrb[103].mxu1 }
 0xc51   : > { %v4705_v57 = vpop.f32.mrb[134].mxu0  ;;  %v4033_v9 = vadd.f32 %v4704_v54, %v3888_v56  ;;  %v4627_v30 = vadd.f32 %v4626_v55, %v4625_v27 }
 0xc52   : > { %v4706_v2 = vpop.f32.mrb[135].mxu0 }
 0xc53   : > { %v4707_v10 = vadd.f32 %v4706_v2, %v4705_v57  ;;  %v4071_v35 = vadd.f32 %v4033_v9, %v8425_v45  ;;  %v3893_v18 = vadd.f32 %v4627_v30, %v8186_v47  ;;  %v4628_v22 = vpop.f32.mrb[104].mxu1 }
 0xc54   : > { %v4629_v37 = vpop.f32.mrb[105].mxu1 }
 0xc55   : > { %4087 = vst [vmem:[%s8192_s14 + $0x50] sm:$0xff] %v4071_v35  ;;  %v4038_v61 = vadd.f32 %v4707_v10, %v3893_v18  ;;  %v4630_v60 = vadd.f32 %v4629_v37, %v4628_v22 }
 0xc57   : > { %v4072_v43 = vadd.f32 %v4038_v61, %v8426_v44  ;;  %v4631_v26 = vpop.f32.mrb[106].mxu1  ;;  %v3898_v0 = vadd.f32 %v4630_v60, %v8186_v47 }
 0xc58   : > { %v4632_v33 = vpop.f32.mrb[107].mxu1 }
 0xc59   : > { %4088 = vst [vmem:[%s8192_s14 + $0x58] sm:$0xff] %v4072_v43  ;;  %v4633_v32 = vadd.f32 %v4632_v33, %v4631_v26 }
 0xc5b   : > { %v4634_v17 = vpop.f32.mrb[108].mxu1  ;;  %v3903_v13 = vadd.f32 %v4633_v32, %v8186_v47 }
 0xc5c   : > { %v4635_v41 = vpop.f32.mrb[109].mxu1 }
 0xc5d   : > { %v4636_v12 = vadd.f32 %v4635_v41, %v4634_v17 }
 0xc5f   : > { %v4637_v46 = vpop.f32.mrb[110].mxu1  ;;  %v3908_v51 = vadd.f32 %v4636_v12, %v8186_v47 }
 0xc60   : > { %v4638_v52 = vpop.f32.mrb[111].mxu1 }
 0xc61   : > { %v4639_v20 = vadd.f32 %v4638_v52, %v4637_v46 }
 0xc63   : > { %v4708_v39 = vpop.f32.mrb[112].mxu1  ;;  %v3913_v63 = vadd.f32 %v4639_v20, %v8186_v47 }
 0xc64   : > { %v4709_v7 = vpop.f32.mrb[113].mxu1 }
 0xc65   : > { %v4710_v24 = vadd.f32 %v4709_v7, %v4708_v39 }
 0xc67   : > { %v4043_v53 = vadd.f32 %v4710_v24, %v3898_v0  ;;  %v4711_v62 = vpop.f32.mrb[114].mxu1 }
 0xc68   : > { %v4712_v48 = vpop.f32.mrb[115].mxu1 }
 0xc69   : > { %v4073_v16 = vadd.f32 %v4043_v53, %v8427_v4  ;;  %v4713_v42 = vadd.f32 %v4712_v48, %v4711_v62 }
 0xc6b   : > { %4089 = vst [vmem:[%s8192_s14 + $0x60] sm:$0xff] %v4073_v16  ;;  %v4048_v23 = vadd.f32 %v4713_v42, %v3903_v13  ;;  %v4714_v40 = vpop.f32.mrb[116].mxu1 }
 0xc6c   : > { %v4715_v38 = vpop.f32.mrb[117].mxu1 }
 0xc6d   : > { %v4074_v25 = vadd.f32 %v4048_v23, %v8429_v31  ;;  %v4716_v8 = vadd.f32 %v4715_v38, %v4714_v40 }
 0xc6f   : > { %4090 = vst [vmem:[%s8192_s14 + $0x68] sm:$0xff] %v4074_v25  ;;  %v4053_v6 = vadd.f32 %v4716_v8, %v3908_v51  ;;  %v4717_v50 = vpop.f32.mrb[118].mxu1 }
 0xc70   : > { %v4718_v21 = vpop.f32.mrb[119].mxu1 }
 0xc71   : > { %v4075_v49 = vadd.f32 %v4053_v6, %v8430_v15  ;;  %v4719_v36 = vadd.f32 %v4718_v21, %v4717_v50 }
 0xc73   : > { %4091 = vst [vmem:[%s8192_s14 + $0x70] sm:$0xff] %v4075_v49  ;;  %v4058_v34 = vadd.f32 %v4719_v36, %v3913_v63 }
 0xc75   : > { %v4076_v11 = vadd.f32 %v4058_v34, %v8432_v29 }
 0xc77   : > { %4092 = vst [vmem:[%s8192_s14 + $0x78] sm:$0xff] %v4076_v11 }
 0xc78   : > { %6213 = shalt.err (!%p6210_p1)
}
 0xc79   : > { %s6214_s10 = scalar_lea.hbm %s8242_s12, 2048  ;;  %s6218_s19 = scalar_lea.hbm %s8431_s21, 4096 }
 0xc7a   : > { %p6215_p10 = scmp.ne.s32.totalorder %s8242_s12, %s6214_s10  ;;  %p6219_p3 = scmp.lt.u32.totalorder %s8242_s12, %s8431_s21 }
 0xc7b   : > { %p6220_p12 = scmp.lt.u32.totalorder %s6218_s19, %s6214_s10  ;;  %p6222_p6 = scmp.lt.u32.totalorder %s6214_s10, %s8242_s12 }
 0xc7c   : > { %p6216_p11 = pnand %p6215_p10, %p8433_p0 }
 0xc7d   : > { %p6221_p13 = por %p6220_p12, %p6219_p3 }
 0xc7e   : > { %p6217_p8 = pneg %p6216_p11 }
 0xc7f   : > { %p6223_p7 = por %p6222_p6, %p6221_p13 }
 0xc81   : > { %p6224_p5 = pnand %p6223_p7, %p6217_p8 }
 0xc83   : > { %6227 = shalt.err (!%p6224_p5)
}
 0xc84   : > { %s6316_s14 = smov 128   ;;  %s6317_s6 = smov 8  }
 0xc85   : > { %5480 = dma.vmem_to_hbm [thread:$0]  (%p8433_p0), %s8244_s24, 2048, %s8242_s12, %s4094_s8, %s6316_s14, %s6316_s14, %s6317_s6  }
 0xc86 PF: > { %s4124_s3 = sand.u32 1, %s6278_s29   ;;  %p8434_p2 = scmp.ne.s32.totalorder %s8368_s7, 0 }
 0xc87   : > { %p8435_p4 = scmp.ge.s32.totalorder %s6298_s18, 2  ;;  %s4125_s11 = scalar_lea.sflag [#allocation6], %s4124_s3 }
 0xc89   : > { %p5506_p9 = pnand %p8435_p4, %p8434_p2 }
 0xc8b   : > { %6273 = dma.done.wait (!%p5506_p9), %s4125_s11, 2048  }
 0xc8c   : > { %6275 = vsyncadd (!%p5506_p9), %s4125_s11, 4294965248  ;;  %s35_s18 = sadd.s32 1, %s6298_s18   ;;  %s8436_s4 = sld [smem:[#allocation24_spill]] }
 0xc8d   : > { %p32_p1 = scmp.ge.s32.totalorder %s35_s18, 4   ;;  %s8437_s29 = smov %s6282_s30 }
 0xc8e   : > { %s8438_s30 = smov %s6286_s15  ;;  %s8439_s15 = smov %s6590_s13 }
 0xc8f   : > { %s8440_s16 = smov %s6294_s17  ;;  %34 = sbr.rel (!%p32_p1) target bundleno = 23 (0x17), region = 158 }
 0xc92   : > { %s8441_s17 = smov %s8436_s4 }
 0xc96   :  { %4130 = vsyncpa [#allocation5], 1 }
 0xc97   :  { %4132 = vsyncpa [#allocation5 + $0x1], 1 }
 0xc98   :  { %4133 = vsyncpa [#allocation8], 1 }
 0xc99   :  { %4135 = vsyncpa [#allocation8 + $0x1], 1 }
 0xc9a   :  { %4136 = vsyncpa [#allocation11], 1 }
 0xc9b   :  { %4137 = vsyncpa [#allocation14], 1 }
 0xc9c   :  { %4138 = vsyncpa [#allocation6], 1 }
 0xc9d   :  { %4140 = vsyncpa [#allocation6 + $0x1], 1 }

</bundles_post_ra>
